<compile_context>
chip_gen: v5e
topology: v5e:2x2
jax: 0.10.0
libtpu: 0.0.40
codegen_flags: <defaults>
</compile_context>

<pallas_src>
import functools

import jax
import jax.numpy as jnp
from jax.experimental import pallas as pl
from jax.experimental.pallas import tpu as pltpu


# ----------------------------------------------------------------------------
# Fused kernel: one grid step = one image through the whole network.
# ----------------------------------------------------------------------------
def _tinyvgg_kernel(x_ref,
                    band1_ref, band2_ref, band3_ref, band4_ref,
                    b1_ref, b2_ref, b3_ref, b4_ref,
                    selr1_ref, selc1_ref, selr2_ref, selc2_ref,
                    wf_ref, bf_ref,
                    o_ref,
                    pad1, pad2, pad3, pad4,
                    *, H, W, Cin, C, OUT):
    f32 = jnp.float32
    bf16 = jnp.bfloat16
    H2, W2 = H // 2, W // 2
    H4 = H // 4

    def conv_relu(pad_ref, band_ref, b_ref, rows):
        # 3x3 same-conv as 3 matmuls against banded weights; f32 accumulation.
        n = band_ref.shape[-1]
        acc = jnp.zeros((rows, n), f32)
        for ky in range(3):
            lhs = pad_ref[ky:ky + rows, :].astype(bf16)
            acc = acc + jnp.dot(lhs, band_ref[ky],
                                preferred_element_type=f32)
        return jnp.maximum(acc + b_ref[...], 0.0)

    def maxpool(act, selr_ref, selc_ref):
        # 2x2/stride-2 max pool via exact 0/1 selection matmuls + elementwise max.
        a = act.astype(bf16)
        rows = jnp.maximum(
            jnp.dot(selr_ref[0], a, preferred_element_type=f32),
            jnp.dot(selr_ref[1], a, preferred_element_type=f32)).astype(bf16)
        return jnp.maximum(
            jnp.dot(rows, selc_ref[0], preferred_element_type=f32),
            jnp.dot(rows, selc_ref[1], preferred_element_type=f32))

    def write_padded(pad_ref, value, rows, cols):
        # zero top/bottom halo rows, place the image interior at rows [1, rows].
        pad_ref[0:1, :] = jnp.zeros((1, cols), f32)
        pad_ref[rows + 1:rows + 2, :] = jnp.zeros((1, cols), f32)
        pad_ref[1:rows + 1, :] = value

    # ---- conv block 1 (H x W) ----
    write_padded(pad1, x_ref[0], H, W * Cin)
    act1 = conv_relu(pad1, band1_ref, b1_ref, H)             # (H, W*C)
    write_padded(pad2, act1, H, W * C)
    act2 = conv_relu(pad2, band2_ref, b2_ref, H)             # (H, W*C)
    p1 = maxpool(act2, selr1_ref, selc1_ref)                 # (H/2, W/2*C)

    # ---- conv block 2 (H/2 x W/2) ----
    write_padded(pad3, p1, H2, W2 * C)
    act3 = conv_relu(pad3, band3_ref, b3_ref, H2)            # (H/2, W/2*C)
    write_padded(pad4, act3, H2, W2 * C)
    act4 = conv_relu(pad4, band4_ref, b4_ref, H2)            # (H/2, W/2*C)
    p2 = maxpool(act4, selr2_ref, selc2_ref)                 # (H/4, W/4*C)

    # ---- classifier: Flatten (torch C,H,W order folded into wf3) + Linear ----
    p2b = p2.astype(bf16)
    logits = jnp.zeros((1, OUT), f32)
    for y in range(H4):
        logits = logits + jnp.dot(p2b[y:y + 1, :], wf_ref[y],
                                  preferred_element_type=f32)
    o_ref[0] = logits + bf_ref[...]


# ----------------------------------------------------------------------------
# One-time parameter repacking (host side, outside the hot path)
# ----------------------------------------------------------------------------
def pack_params(params, *, H=64, W=64):
    f32, bf16 = jnp.float32, jnp.bfloat16
    hidden = params["b1"].shape[0]
    out_dim = params["bf"].shape[0]

    def band(w, width):
        # w: (3, 3, Cin, Cout) HWIO -> (3, width*Cin, width*Cout) block-banded,
        # band_ky[(x_in*Cin+ci), (x*Cout+co)] = w[ky, x_in-x+1, ci, co]
        # (missing border taps == zero padding in x).
        cin, cout = w.shape[2], w.shape[3]
        mats = []
        for ky in range(3):
            m = jnp.zeros((width * cin, width * cout), f32)
            for kx in range(3):
                shift = jnp.eye(width, width, k=-(kx - 1), dtype=f32)
                m = m + jnp.kron(shift, w[ky, kx])
            mats.append(m)
        return jnp.stack(mats).astype(bf16)

    def row_sel(h):                          # (2, h//2, h): pick even / odd rows
        r = jnp.arange(h // 2)[:, None]
        i = jnp.arange(h)[None, :]
        even = (i == 2 * r).astype(f32)
        odd = (i == 2 * r + 1).astype(f32)
        return jnp.stack([even, odd]).astype(bf16)

    def col_sel(width, c):                   # (2, width*c, (width//2)*c)
        j_out = jnp.arange((width // 2) * c)
        base = 2 * (j_out // c) * c + (j_out % c)
        j_in = jnp.arange(width * c)[:, None]
        even = (j_in == base[None, :]).astype(f32)
        odd = (j_in == (base + c)[None, :]).astype(f32)
        return jnp.stack([even, odd]).astype(bf16)

    def bias_row(b, width):                  # (1, width*Cout), b tiled over x
        return jnp.tile(b, width)[None, :].astype(f32)

    Hq, Wq = H // 4, W // 4
    # torch Flatten order is (c, y, x); permute weight so it matches the
    # kernel's (y, x*C+c) pooled layout.
    wf3 = (params["wf"].reshape(hidden, Hq, Wq, out_dim)
           .transpose(1, 2, 0, 3)
           .reshape(Hq, Wq * hidden, out_dim).astype(bf16))

    return {
        "band1": band(params["w1"], W),
        "band2": band(params["w2"], W),
        "band3": band(params["w3"], W // 2),
        "band4": band(params["w4"], W // 2),
        "b1r": bias_row(params["b1"], W),
        "b2r": bias_row(params["b2"], W),
        "b3r": bias_row(params["b3"], W // 2),
        "b4r": bias_row(params["b4"], W // 2),
        "selr1": row_sel(H),
        "selc1": col_sel(W, hidden),
        "selr2": row_sel(H // 2),
        "selc2": col_sel(W // 2, hidden),
        "wf3": wf3,
        "bfr": params["bf"][None, :].astype(f32),
    }


# ----------------------------------------------------------------------------
# Forward pass: one fused pallas_call over the batch
# ----------------------------------------------------------------------------
@jax.jit
def tiny_vgg_forward(packed, x_nchw):
    B, Cin, H, W = x_nchw.shape
    hidden = packed["band2"].shape[-1] // W
    out_dim = packed["bfr"].shape[-1]

    # NCHW -> lane-dense per-row (width, channel)-interleaved layout (B, H, W*Cin)
    x_rows = jnp.transpose(x_nchw, (0, 2, 3, 1)).reshape(B, H, W * Cin)

    kern = functools.partial(_tinyvgg_kernel,
                             H=H, W=W, Cin=Cin, C=hidden, OUT=out_dim)

    def full_spec(a):
        if a.ndim == 2:
            return pl.BlockSpec(a.shape, lambda b: (0, 0))
        return pl.BlockSpec(a.shape, lambda b: (0, 0, 0))

    param_list = [packed["band1"], packed["band2"], packed["band3"],
                  packed["band4"], packed["b1r"], packed["b2r"],
                  packed["b3r"], packed["b4r"], packed["selr1"],
                  packed["selc1"], packed["selr2"], packed["selc2"],
                  packed["wf3"], packed["bfr"]]

    in_specs = ([pl.BlockSpec((1, H, W * Cin), lambda b: (b, 0, 0))]
                + [full_spec(a) for a in param_list])

    out = pl.pallas_call(
        kern,
        out_shape=jax.ShapeDtypeStruct((B, 1, out_dim), jnp.float32),
        grid_spec=pltpu.PrefetchScalarGridSpec(
            num_scalar_prefetch=0,
            grid=(B,),
            in_specs=in_specs,
            out_specs=pl.BlockSpec((1, 1, out_dim), lambda b: (b, 0, 0)),
            scratch_shapes=[
                pltpu.VMEM((H + 2, W * Cin), jnp.float32),
                pltpu.VMEM((H + 2, W * hidden), jnp.float32),
                pltpu.VMEM((H // 2 + 2, (W // 2) * hidden), jnp.float32),
                pltpu.VMEM((H // 2 + 2, (W // 2) * hidden), jnp.float32),
            ]),
        compiler_params=pltpu.CompilerParams(
            dimension_semantics=("parallel",)),
    )(x_rows, *param_list)
    return out.reshape(B, out_dim)


# ----------------------------------------------------------------------------
# Parameters (deterministic synthetic init; shapes follow the nn.Module)
# ----------------------------------------------------------------------------
def init_params(key, in_channels, hidden, out):
    ks = jax.random.split(key, 10)

    def conv_w(k, cin, cout):
        return jax.random.normal(k, (3, 3, cin, cout), jnp.float32) * (
            1.0 / jnp.sqrt(9.0 * cin))

    return {
        "w1": conv_w(ks[0], in_channels, hidden),
        "b1": jax.random.normal(ks[1], (hidden,), jnp.float32) * 0.01,
        "w2": conv_w(ks[2], hidden, hidden),
        "b2": jax.random.normal(ks[3], (hidden,), jnp.float32) * 0.01,
        "w3": conv_w(ks[4], hidden, hidden),
        "b3": jax.random.normal(ks[5], (hidden,), jnp.float32) * 0.01,
        "w4": conv_w(ks[6], hidden, hidden),
        "b4": jax.random.normal(ks[7], (hidden,), jnp.float32) * 0.01,
        # Linear stored as (in_features, out_features) = (hidden*16*16, out).
        "wf": jax.random.normal(ks[8], (hidden * 16 * 16, out), jnp.float32)
              * (1.0 / jnp.sqrt(hidden * 16.0 * 16.0)),
        "bf": jax.random.normal(ks[9], (out,), jnp.float32) * 0.01,
    }


# ----------------------------------------------------------------------------
# Pure-JAX reference (default precision, raw params) for validation
# ----------------------------------------------------------------------------
def reference_forward(params, x_nchw):
    def conv(x, w, b):
        y = jax.lax.conv_general_dilated(
            x, w, window_strides=(1, 1), padding="SAME",
            dimension_numbers=("NCHW", "HWIO", "NCHW"))
        return jax.nn.relu(y + b[None, :, None, None])

    def pool(x):
        return jax.lax.reduce_window(
            x, -jnp.inf, jax.lax.max, (1, 1, 2, 2), (1, 1, 2, 2), "VALID")

    x = conv(x_nchw, params["w1"], params["b1"])
    x = pool(conv(x, params["w2"], params["b2"]))
    x = conv(x, params["w3"], params["b3"])
    x = pool(conv(x, params["w4"], params["b4"]))
    x = x.reshape(x.shape[0], -1)                            # (C,H,W) flatten
    return jnp.dot(x, params["wf"]) + params["bf"]


if __name__ == "__main__":
    B, C_IN, HW = 2, 3, 64        # 64x64 input -> 16x16 after two 2x2 pools
    HIDDEN, OUT = 8, 3
    key = jax.random.PRNGKey(0)
    k_x, k_p = jax.random.split(key)

    x = jax.random.normal(k_x, (B, C_IN, HW, HW), jnp.float32)
    params = init_params(k_p, C_IN, HIDDEN, OUT)
    packed = pack_params(params, H=HW, W=HW)   # one-time weight repacking

    y = tiny_vgg_forward(packed, x)
    y = jax.block_until_ready(y)
    assert y.shape == (B, OUT), y.shape

    y_ref = reference_forward(params, x)
    err = float(jnp.max(jnp.abs(y - y_ref)))
    # bf16-class MXU products with f32 accumulation -> compare at 2e-2.
    if not bool(jnp.allclose(y, y_ref, rtol=2e-2, atol=2e-2)):
        raise AssertionError(
            f"Pallas output mismatch vs reference, max abs err = {err}")

    print("KERNEL_OK")
</pallas_src>

<mosaic_0001>
module attributes {stable_mosaic.version = 11 : i64} {
  func.func @_tinyvgg_kernel(%arg0: i32, %arg1: memref<1x64x192xf32, #tpu.memory_space<vmem>>, %arg2: memref<3x192x512xbf16, #tpu.memory_space<vmem>>, %arg3: memref<3x512x512xbf16, #tpu.memory_space<vmem>>, %arg4: memref<3x256x256xbf16, #tpu.memory_space<vmem>>, %arg5: memref<3x256x256xbf16, #tpu.memory_space<vmem>>, %arg6: memref<1x512xf32, #tpu.memory_space<vmem>>, %arg7: memref<1x512xf32, #tpu.memory_space<vmem>>, %arg8: memref<1x256xf32, #tpu.memory_space<vmem>>, %arg9: memref<1x256xf32, #tpu.memory_space<vmem>>, %arg10: memref<2x32x64xbf16, #tpu.memory_space<vmem>>, %arg11: memref<2x512x256xbf16, #tpu.memory_space<vmem>>, %arg12: memref<2x16x32xbf16, #tpu.memory_space<vmem>>, %arg13: memref<2x256x128xbf16, #tpu.memory_space<vmem>>, %arg14: memref<16x128x3xbf16, #tpu.memory_space<vmem>>, %arg15: memref<1x3xf32, #tpu.memory_space<vmem>>, %arg16: memref<1x1x3xf32, #tpu.memory_space<vmem>>, %arg17: memref<66x192xf32, #tpu.memory_space<vmem>>, %arg18: memref<66x512xf32, #tpu.memory_space<vmem>>, %arg19: memref<34x256xf32, #tpu.memory_space<vmem>>, %arg20: memref<34x256xf32, #tpu.memory_space<vmem>>) attributes {dimension_semantics = [#tpu.dimension_semantics<parallel>], iteration_bounds = array<i64: 2>, scalar_prefetch = 0 : i64, scratch_operands = 4 : i64, tpu.core_type = #tpu.core_type<tc>, window_params = [{transform_indices = @transform_0, window_bounds = array<i64: 1, 64, 192>}, {pipeline_mode = #tpu.pipeline_mode<synchronous>, transform_indices = @transform_1, window_bounds = array<i64: 3, 192, 512>}, {pipeline_mode = #tpu.pipeline_mode<synchronous>, transform_indices = @transform_2, window_bounds = array<i64: 3, 512, 512>}, {pipeline_mode = #tpu.pipeline_mode<synchronous>, transform_indices = @transform_3, window_bounds = array<i64: 3, 256, 256>}, {pipeline_mode = #tpu.pipeline_mode<synchronous>, transform_indices = @transform_4, window_bounds = array<i64: 3, 256, 256>}, {pipeline_mode = #tpu.pipeline_mode<synchronous>, transform_indices = @transform_5, window_bounds = array<i64: 1, 512>}, {pipeline_mode = #tpu.pipeline_mode<synchronous>, transform_indices = @transform_6, window_bounds = array<i64: 1, 512>}, {pipeline_mode = #tpu.pipeline_mode<synchronous>, transform_indices = @transform_7, window_bounds = array<i64: 1, 256>}, {pipeline_mode = #tpu.pipeline_mode<synchronous>, transform_indices = @transform_8, window_bounds = array<i64: 1, 256>}, {pipeline_mode = #tpu.pipeline_mode<synchronous>, transform_indices = @transform_9, window_bounds = array<i64: 2, 32, 64>}, {pipeline_mode = #tpu.pipeline_mode<synchronous>, transform_indices = @transform_10, window_bounds = array<i64: 2, 512, 256>}, {pipeline_mode = #tpu.pipeline_mode<synchronous>, transform_indices = @transform_11, window_bounds = array<i64: 2, 16, 32>}, {pipeline_mode = #tpu.pipeline_mode<synchronous>, transform_indices = @transform_12, window_bounds = array<i64: 2, 256, 128>}, {pipeline_mode = #tpu.pipeline_mode<synchronous>, transform_indices = @transform_13, window_bounds = array<i64: 16, 128, 3>}, {pipeline_mode = #tpu.pipeline_mode<synchronous>, transform_indices = @transform_14, window_bounds = array<i64: 1, 3>}, {transform_indices = @transform_15, window_bounds = array<i64: 1, 1, 3>}]} {
    %c0 = arith.constant 0 : index
    %c0_0 = arith.constant 0 : index
    %c0_1 = arith.constant 0 : index
    %0 = vector.load %arg1[%c0, %c0_0, %c0_1] : memref<1x64x192xf32, #tpu.memory_space<vmem>>, vector<1x64x192xf32>
    %1 = vector.shape_cast %0 : vector<1x64x192xf32> to vector<64x192xf32>
    %cst = arith.constant 0.000000e+00 : f32
    %2 = vector.broadcast %cst : f32 to vector<1x192xf32>
    %c0_2 = arith.constant 0 : index
    %c0_3 = arith.constant 0 : index
    %3 = vector.load %arg17[%c0_2, %c0_3] : memref<66x192xf32, #tpu.memory_space<vmem>>, vector<1x192xf32>
    tpu.vector_store %arg17[%c0_2, %c0_3], %2 {strides = array<i32>} : memref<66x192xf32, #tpu.memory_space<vmem>>, vector<1x192xf32>,
    %cst_4 = arith.constant 0.000000e+00 : f32
    %4 = vector.broadcast %cst_4 : f32 to vector<1x192xf32>
    %c65 = arith.constant 65 : index
    %c0_5 = arith.constant 0 : index
    %5 = vector.load %arg17[%c65, %c0_5] : memref<66x192xf32, #tpu.memory_space<vmem>>, vector<1x192xf32>
    tpu.vector_store %arg17[%c65, %c0_5], %4 {strides = array<i32>} : memref<66x192xf32, #tpu.memory_space<vmem>>, vector<1x192xf32>,
    %c1 = arith.constant 1 : index
    %c0_6 = arith.constant 0 : index
    %6 = vector.load %arg17[%c1, %c0_6] : memref<66x192xf32, #tpu.memory_space<vmem>>, vector<64x192xf32>
    tpu.vector_store %arg17[%c1, %c0_6], %1 {strides = array<i32>} : memref<66x192xf32, #tpu.memory_space<vmem>>, vector<64x192xf32>,
    %cst_7 = arith.constant 0.000000e+00 : f32
    %7 = vector.broadcast %cst_7 : f32 to vector<64x512xf32>
    %c0_8 = arith.constant 0 : index
    %c0_9 = arith.constant 0 : index
    %8 = vector.load %arg17[%c0_8, %c0_9] : memref<66x192xf32, #tpu.memory_space<vmem>>, vector<64x192xf32>
    %9 = arith.truncf %8 : vector<64x192xf32> to vector<64x192xbf16>
    %c0_10 = arith.constant 0 : index
    %c0_11 = arith.constant 0 : index
    %c0_12 = arith.constant 0 : index
    %10 = vector.load %arg2[%c0_10, %c0_11, %c0_12] : memref<3x192x512xbf16, #tpu.memory_space<vmem>>, vector<1x192x512xbf16>
    %11 = vector.shape_cast %10 : vector<1x192x512xbf16> to vector<192x512xbf16>
    %cst_13 = arith.constant dense<0.000000e+00> : vector<64x512xf32>
    %12 = tpu.matmul %9, %11, %cst_13 {dimension_numbers = #tpu.dot_dimension_numbers<[1], [0], [0], [1], [0, 0, 1, 1], [], []>} : vector<64x192xbf16>, vector<192x512xbf16>, vector<64x512xf32> -> vector<64x512xf32>
    %13 = arith.addf %7, %12 : vector<64x512xf32>
    %c1_14 = arith.constant 1 : index
    %c0_15 = arith.constant 0 : index
    %14 = vector.load %arg17[%c1_14, %c0_15] : memref<66x192xf32, #tpu.memory_space<vmem>>, vector<64x192xf32>
    %15 = arith.truncf %14 : vector<64x192xf32> to vector<64x192xbf16>
    %c1_16 = arith.constant 1 : index
    %c0_17 = arith.constant 0 : index
    %c0_18 = arith.constant 0 : index
    %16 = vector.load %arg2[%c1_16, %c0_17, %c0_18] : memref<3x192x512xbf16, #tpu.memory_space<vmem>>, vector<1x192x512xbf16>
    %17 = vector.shape_cast %16 : vector<1x192x512xbf16> to vector<192x512xbf16>
    %cst_19 = arith.constant dense<0.000000e+00> : vector<64x512xf32>
    %18 = tpu.matmul %15, %17, %cst_19 {dimension_numbers = #tpu.dot_dimension_numbers<[1], [0], [0], [1], [0, 0, 1, 1], [], []>} : vector<64x192xbf16>, vector<192x512xbf16>, vector<64x512xf32> -> vector<64x512xf32>
    %19 = arith.addf %13, %18 : vector<64x512xf32>
    %c2 = arith.constant 2 : index
    %c0_20 = arith.constant 0 : index
    %20 = vector.load %arg17[%c2, %c0_20] : memref<66x192xf32, #tpu.memory_space<vmem>>, vector<64x192xf32>
    %21 = arith.truncf %20 : vector<64x192xf32> to vector<64x192xbf16>
    %c2_21 = arith.constant 2 : index
    %c0_22 = arith.constant 0 : index
    %c0_23 = arith.constant 0 : index
    %22 = vector.load %arg2[%c2_21, %c0_22, %c0_23] : memref<3x192x512xbf16, #tpu.memory_space<vmem>>, vector<1x192x512xbf16>
    %23 = vector.shape_cast %22 : vector<1x192x512xbf16> to vector<192x512xbf16>
    %cst_24 = arith.constant dense<0.000000e+00> : vector<64x512xf32>
    %24 = tpu.matmul %21, %23, %cst_24 {dimension_numbers = #tpu.dot_dimension_numbers<[1], [0], [0], [1], [0, 0, 1, 1], [], []>} : vector<64x192xbf16>, vector<192x512xbf16>, vector<64x512xf32> -> vector<64x512xf32>
    %25 = arith.addf %19, %24 : vector<64x512xf32>
    %c0_25 = arith.constant 0 : index
    %c0_26 = arith.constant 0 : index
    %26 = vector.load %arg6[%c0_25, %c0_26] : memref<1x512xf32, #tpu.memory_space<vmem>>, vector<1x512xf32>
    %27 = vector.broadcast %26 : vector<1x512xf32> to vector<64x512xf32>
    %28 = arith.addf %25, %27 : vector<64x512xf32>
    %cst_27 = arith.constant 0.000000e+00 : f32
    %29 = vector.broadcast %cst_27 : f32 to vector<64x512xf32>
    %30 = arith.maximumf %28, %29 : vector<64x512xf32>
    %cst_28 = arith.constant 0.000000e+00 : f32
    %31 = vector.broadcast %cst_28 : f32 to vector<1x512xf32>
    %c0_29 = arith.constant 0 : index
    %c0_30 = arith.constant 0 : index
    %32 = vector.load %arg18[%c0_29, %c0_30] : memref<66x512xf32, #tpu.memory_space<vmem>>, vector<1x512xf32>
    tpu.vector_store %arg18[%c0_29, %c0_30], %31 {strides = array<i32>} : memref<66x512xf32, #tpu.memory_space<vmem>>, vector<1x512xf32>,
    %cst_31 = arith.constant 0.000000e+00 : f32
    %33 = vector.broadcast %cst_31 : f32 to vector<1x512xf32>
    %c65_32 = arith.constant 65 : index
    %c0_33 = arith.constant 0 : index
    %34 = vector.load %arg18[%c65_32, %c0_33] : memref<66x512xf32, #tpu.memory_space<vmem>>, vector<1x512xf32>
    tpu.vector_store %arg18[%c65_32, %c0_33], %33 {strides = array<i32>} : memref<66x512xf32, #tpu.memory_space<vmem>>, vector<1x512xf32>,
    %c1_34 = arith.constant 1 : index
    %c0_35 = arith.constant 0 : index
    %35 = vector.load %arg18[%c1_34, %c0_35] : memref<66x512xf32, #tpu.memory_space<vmem>>, vector<64x512xf32>
    tpu.vector_store %arg18[%c1_34, %c0_35], %30 {strides = array<i32>} : memref<66x512xf32, #tpu.memory_space<vmem>>, vector<64x512xf32>,
    %cst_36 = arith.constant 0.000000e+00 : f32
    %36 = vector.broadcast %cst_36 : f32 to vector<64x512xf32>
    %c0_37 = arith.constant 0 : index
    %c0_38 = arith.constant 0 : index
    %37 = vector.load %arg18[%c0_37, %c0_38] : memref<66x512xf32, #tpu.memory_space<vmem>>, vector<64x512xf32>
    %38 = arith.truncf %37 : vector<64x512xf32> to vector<64x512xbf16>
    %c0_39 = arith.constant 0 : index
    %c0_40 = arith.constant 0 : index
    %c0_41 = arith.constant 0 : index
    %39 = vector.load %arg3[%c0_39, %c0_40, %c0_41] : memref<3x512x512xbf16, #tpu.memory_space<vmem>>, vector<1x512x512xbf16>
    %40 = vector.shape_cast %39 : vector<1x512x512xbf16> to vector<512x512xbf16>
    %cst_42 = arith.constant dense<0.000000e+00> : vector<64x512xf32>
    %41 = tpu.matmul %38, %40, %cst_42 {dimension_numbers = #tpu.dot_dimension_numbers<[1], [0], [0], [1], [0, 0, 1, 1], [], []>} : vector<64x512xbf16>, vector<512x512xbf16>, vector<64x512xf32> -> vector<64x512xf32>
    %42 = arith.addf %36, %41 : vector<64x512xf32>
    %c1_43 = arith.constant 1 : index
    %c0_44 = arith.constant 0 : index
    %43 = vector.load %arg18[%c1_43, %c0_44] : memref<66x512xf32, #tpu.memory_space<vmem>>, vector<64x512xf32>
    %44 = arith.truncf %43 : vector<64x512xf32> to vector<64x512xbf16>
    %c1_45 = arith.constant 1 : index
    %c0_46 = arith.constant 0 : index
    %c0_47 = arith.constant 0 : index
    %45 = vector.load %arg3[%c1_45, %c0_46, %c0_47] : memref<3x512x512xbf16, #tpu.memory_space<vmem>>, vector<1x512x512xbf16>
    %46 = vector.shape_cast %45 : vector<1x512x512xbf16> to vector<512x512xbf16>
    %cst_48 = arith.constant dense<0.000000e+00> : vector<64x512xf32>
    %47 = tpu.matmul %44, %46, %cst_48 {dimension_numbers = #tpu.dot_dimension_numbers<[1], [0], [0], [1], [0, 0, 1, 1], [], []>} : vector<64x512xbf16>, vector<512x512xbf16>, vector<64x512xf32> -> vector<64x512xf32>
    %48 = arith.addf %42, %47 : vector<64x512xf32>
    %c2_49 = arith.constant 2 : index
    %c0_50 = arith.constant 0 : index
    %49 = vector.load %arg18[%c2_49, %c0_50] : memref<66x512xf32, #tpu.memory_space<vmem>>, vector<64x512xf32>
    %50 = arith.truncf %49 : vector<64x512xf32> to vector<64x512xbf16>
    %c2_51 = arith.constant 2 : index
    %c0_52 = arith.constant 0 : index
    %c0_53 = arith.constant 0 : index
    %51 = vector.load %arg3[%c2_51, %c0_52, %c0_53] : memref<3x512x512xbf16, #tpu.memory_space<vmem>>, vector<1x512x512xbf16>
    %52 = vector.shape_cast %51 : vector<1x512x512xbf16> to vector<512x512xbf16>
    %cst_54 = arith.constant dense<0.000000e+00> : vector<64x512xf32>
    %53 = tpu.matmul %50, %52, %cst_54 {dimension_numbers = #tpu.dot_dimension_numbers<[1], [0], [0], [1], [0, 0, 1, 1], [], []>} : vector<64x512xbf16>, vector<512x512xbf16>, vector<64x512xf32> -> vector<64x512xf32>
    %54 = arith.addf %48, %53 : vector<64x512xf32>
    %c0_55 = arith.constant 0 : index
    %c0_56 = arith.constant 0 : index
    %55 = vector.load %arg7[%c0_55, %c0_56] : memref<1x512xf32, #tpu.memory_space<vmem>>, vector<1x512xf32>
    %56 = vector.broadcast %55 : vector<1x512xf32> to vector<64x512xf32>
    %57 = arith.addf %54, %56 : vector<64x512xf32>
    %cst_57 = arith.constant 0.000000e+00 : f32
    %58 = vector.broadcast %cst_57 : f32 to vector<64x512xf32>
    %59 = arith.maximumf %57, %58 : vector<64x512xf32>
    %60 = arith.truncf %59 : vector<64x512xf32> to vector<64x512xbf16>
    %c0_58 = arith.constant 0 : index
    %c0_59 = arith.constant 0 : index
    %c0_60 = arith.constant 0 : index
    %61 = vector.load %arg10[%c0_58, %c0_59, %c0_60] : memref<2x32x64xbf16, #tpu.memory_space<vmem>>, vector<1x32x64xbf16>
    %62 = vector.shape_cast %61 : vector<1x32x64xbf16> to vector<32x64xbf16>
    %cst_61 = arith.constant dense<0.000000e+00> : vector<32x512xf32>
    %63 = tpu.matmul %62, %60, %cst_61 {dimension_numbers = #tpu.dot_dimension_numbers<[1], [0], [0], [1], [0, 0, 1, 1], [], []>} : vector<32x64xbf16>, vector<64x512xbf16>, vector<32x512xf32> -> vector<32x512xf32>
    %c1_62 = arith.constant 1 : index
    %c0_63 = arith.constant 0 : index
    %c0_64 = arith.constant 0 : index
    %64 = vector.load %arg10[%c1_62, %c0_63, %c0_64] : memref<2x32x64xbf16, #tpu.memory_space<vmem>>, vector<1x32x64xbf16>
    %65 = vector.shape_cast %64 : vector<1x32x64xbf16> to vector<32x64xbf16>
    %cst_65 = arith.constant dense<0.000000e+00> : vector<32x512xf32>
    %66 = tpu.matmul %65, %60, %cst_65 {dimension_numbers = #tpu.dot_dimension_numbers<[1], [0], [0], [1], [0, 0, 1, 1], [], []>} : vector<32x64xbf16>, vector<64x512xbf16>, vector<32x512xf32> -> vector<32x512xf32>
    %67 = arith.maximumf %63, %66 : vector<32x512xf32>
    %68 = arith.truncf %67 : vector<32x512xf32> to vector<32x512xbf16>
    %c0_66 = arith.constant 0 : index
    %c0_67 = arith.constant 0 : index
    %c0_68 = arith.constant 0 : index
    %69 = vector.load %arg11[%c0_66, %c0_67, %c0_68] : memref<2x512x256xbf16, #tpu.memory_space<vmem>>, vector<1x512x256xbf16>
    %70 = vector.shape_cast %69 : vector<1x512x256xbf16> to vector<512x256xbf16>
    %cst_69 = arith.constant dense<0.000000e+00> : vector<32x256xf32>
    %71 = tpu.matmul %68, %70, %cst_69 {dimension_numbers = #tpu.dot_dimension_numbers<[1], [0], [0], [1], [0, 0, 1, 1], [], []>} : vector<32x512xbf16>, vector<512x256xbf16>, vector<32x256xf32> -> vector<32x256xf32>
    %c1_70 = arith.constant 1 : index
    %c0_71 = arith.constant 0 : index
    %c0_72 = arith.constant 0 : index
    %72 = vector.load %arg11[%c1_70, %c0_71, %c0_72] : memref<2x512x256xbf16, #tpu.memory_space<vmem>>, vector<1x512x256xbf16>
    %73 = vector.shape_cast %72 : vector<1x512x256xbf16> to vector<512x256xbf16>
    %cst_73 = arith.constant dense<0.000000e+00> : vector<32x256xf32>
    %74 = tpu.matmul %68, %73, %cst_73 {dimension_numbers = #tpu.dot_dimension_numbers<[1], [0], [0], [1], [0, 0, 1, 1], [], []>} : vector<32x512xbf16>, vector<512x256xbf16>, vector<32x256xf32> -> vector<32x256xf32>
    %75 = arith.maximumf %71, %74 : vector<32x256xf32>
    %cst_74 = arith.constant 0.000000e+00 : f32
    %76 = vector.broadcast %cst_74 : f32 to vector<1x256xf32>
    %c0_75 = arith.constant 0 : index
    %c0_76 = arith.constant 0 : index
    %77 = vector.load %arg19[%c0_75, %c0_76] : memref<34x256xf32, #tpu.memory_space<vmem>>, vector<1x256xf32>
    tpu.vector_store %arg19[%c0_75, %c0_76], %76 {strides = array<i32>} : memref<34x256xf32, #tpu.memory_space<vmem>>, vector<1x256xf32>,
    %cst_77 = arith.constant 0.000000e+00 : f32
    %78 = vector.broadcast %cst_77 : f32 to vector<1x256xf32>
    %c33 = arith.constant 33 : index
    %c0_78 = arith.constant 0 : index
    %79 = vector.load %arg19[%c33, %c0_78] : memref<34x256xf32, #tpu.memory_space<vmem>>, vector<1x256xf32>
    tpu.vector_store %arg19[%c33, %c0_78], %78 {strides = array<i32>} : memref<34x256xf32, #tpu.memory_space<vmem>>, vector<1x256xf32>,
    %c1_79 = arith.constant 1 : index
    %c0_80 = arith.constant 0 : index
    %80 = vector.load %arg19[%c1_79, %c0_80] : memref<34x256xf32, #tpu.memory_space<vmem>>, vector<32x256xf32>
    tpu.vector_store %arg19[%c1_79, %c0_80], %75 {strides = array<i32>} : memref<34x256xf32, #tpu.memory_space<vmem>>, vector<32x256xf32>,
    %cst_81 = arith.constant 0.000000e+00 : f32
    %81 = vector.broadcast %cst_81 : f32 to vector<32x256xf32>
    %c0_82 = arith.constant 0 : index
    %c0_83 = arith.constant 0 : index
    %82 = vector.load %arg19[%c0_82, %c0_83] : memref<34x256xf32, #tpu.memory_space<vmem>>, vector<32x256xf32>
    %83 = arith.truncf %82 : vector<32x256xf32> to vector<32x256xbf16>
    %c0_84 = arith.constant 0 : index
    %c0_85 = arith.constant 0 : index
    %c0_86 = arith.constant 0 : index
    %84 = vector.load %arg4[%c0_84, %c0_85, %c0_86] : memref<3x256x256xbf16, #tpu.memory_space<vmem>>, vector<1x256x256xbf16>
    %85 = vector.shape_cast %84 : vector<1x256x256xbf16> to vector<256x256xbf16>
    %cst_87 = arith.constant dense<0.000000e+00> : vector<32x256xf32>
    %86 = tpu.matmul %83, %85, %cst_87 {dimension_numbers = #tpu.dot_dimension_numbers<[1], [0], [0], [1], [0, 0, 1, 1], [], []>} : vector<32x256xbf16>, vector<256x256xbf16>, vector<32x256xf32> -> vector<32x256xf32>
    %87 = arith.addf %81, %86 : vector<32x256xf32>
    %c1_88 = arith.constant 1 : index
    %c0_89 = arith.constant 0 : index
    %88 = vector.load %arg19[%c1_88, %c0_89] : memref<34x256xf32, #tpu.memory_space<vmem>>, vector<32x256xf32>
    %89 = arith.truncf %88 : vector<32x256xf32> to vector<32x256xbf16>
    %c1_90 = arith.constant 1 : index
    %c0_91 = arith.constant 0 : index
    %c0_92 = arith.constant 0 : index
    %90 = vector.load %arg4[%c1_90, %c0_91, %c0_92] : memref<3x256x256xbf16, #tpu.memory_space<vmem>>, vector<1x256x256xbf16>
    %91 = vector.shape_cast %90 : vector<1x256x256xbf16> to vector<256x256xbf16>
    %cst_93 = arith.constant dense<0.000000e+00> : vector<32x256xf32>
    %92 = tpu.matmul %89, %91, %cst_93 {dimension_numbers = #tpu.dot_dimension_numbers<[1], [0], [0], [1], [0, 0, 1, 1], [], []>} : vector<32x256xbf16>, vector<256x256xbf16>, vector<32x256xf32> -> vector<32x256xf32>
    %93 = arith.addf %87, %92 : vector<32x256xf32>
    %c2_94 = arith.constant 2 : index
    %c0_95 = arith.constant 0 : index
    %94 = vector.load %arg19[%c2_94, %c0_95] : memref<34x256xf32, #tpu.memory_space<vmem>>, vector<32x256xf32>
    %95 = arith.truncf %94 : vector<32x256xf32> to vector<32x256xbf16>
    %c2_96 = arith.constant 2 : index
    %c0_97 = arith.constant 0 : index
    %c0_98 = arith.constant 0 : index
    %96 = vector.load %arg4[%c2_96, %c0_97, %c0_98] : memref<3x256x256xbf16, #tpu.memory_space<vmem>>, vector<1x256x256xbf16>
    %97 = vector.shape_cast %96 : vector<1x256x256xbf16> to vector<256x256xbf16>
    %cst_99 = arith.constant dense<0.000000e+00> : vector<32x256xf32>
    %98 = tpu.matmul %95, %97, %cst_99 {dimension_numbers = #tpu.dot_dimension_numbers<[1], [0], [0], [1], [0, 0, 1, 1], [], []>} : vector<32x256xbf16>, vector<256x256xbf16>, vector<32x256xf32> -> vector<32x256xf32>
    %99 = arith.addf %93, %98 : vector<32x256xf32>
    %c0_100 = arith.constant 0 : index
    %c0_101 = arith.constant 0 : index
    %100 = vector.load %arg8[%c0_100, %c0_101] : memref<1x256xf32, #tpu.memory_space<vmem>>, vector<1x256xf32>
    %101 = vector.broadcast %100 : vector<1x256xf32> to vector<32x256xf32>
    %102 = arith.addf %99, %101 : vector<32x256xf32>
    %cst_102 = arith.constant 0.000000e+00 : f32
    %103 = vector.broadcast %cst_102 : f32 to vector<32x256xf32>
    %104 = arith.maximumf %102, %103 : vector<32x256xf32>
    %cst_103 = arith.constant 0.000000e+00 : f32
    %105 = vector.broadcast %cst_103 : f32 to vector<1x256xf32>
    %c0_104 = arith.constant 0 : index
    %c0_105 = arith.constant 0 : index
    %106 = vector.load %arg20[%c0_104, %c0_105] : memref<34x256xf32, #tpu.memory_space<vmem>>, vector<1x256xf32>
    tpu.vector_store %arg20[%c0_104, %c0_105], %105 {strides = array<i32>} : memref<34x256xf32, #tpu.memory_space<vmem>>, vector<1x256xf32>,
    %cst_106 = arith.constant 0.000000e+00 : f32
    %107 = vector.broadcast %cst_106 : f32 to vector<1x256xf32>
    %c33_107 = arith.constant 33 : index
    %c0_108 = arith.constant 0 : index
    %108 = vector.load %arg20[%c33_107, %c0_108] : memref<34x256xf32, #tpu.memory_space<vmem>>, vector<1x256xf32>
    tpu.vector_store %arg20[%c33_107, %c0_108], %107 {strides = array<i32>} : memref<34x256xf32, #tpu.memory_space<vmem>>, vector<1x256xf32>,
    %c1_109 = arith.constant 1 : index
    %c0_110 = arith.constant 0 : index
    %109 = vector.load %arg20[%c1_109, %c0_110] : memref<34x256xf32, #tpu.memory_space<vmem>>, vector<32x256xf32>
    tpu.vector_store %arg20[%c1_109, %c0_110], %104 {strides = array<i32>} : memref<34x256xf32, #tpu.memory_space<vmem>>, vector<32x256xf32>,
    %cst_111 = arith.constant 0.000000e+00 : f32
    %110 = vector.broadcast %cst_111 : f32 to vector<32x256xf32>
    %c0_112 = arith.constant 0 : index
    %c0_113 = arith.constant 0 : index
    %111 = vector.load %arg20[%c0_112, %c0_113] : memref<34x256xf32, #tpu.memory_space<vmem>>, vector<32x256xf32>
    %112 = arith.truncf %111 : vector<32x256xf32> to vector<32x256xbf16>
    %c0_114 = arith.constant 0 : index
    %c0_115 = arith.constant 0 : index
    %c0_116 = arith.constant 0 : index
    %113 = vector.load %arg5[%c0_114, %c0_115, %c0_116] : memref<3x256x256xbf16, #tpu.memory_space<vmem>>, vector<1x256x256xbf16>
    %114 = vector.shape_cast %113 : vector<1x256x256xbf16> to vector<256x256xbf16>
    %cst_117 = arith.constant dense<0.000000e+00> : vector<32x256xf32>
    %115 = tpu.matmul %112, %114, %cst_117 {dimension_numbers = #tpu.dot_dimension_numbers<[1], [0], [0], [1], [0, 0, 1, 1], [], []>} : vector<32x256xbf16>, vector<256x256xbf16>, vector<32x256xf32> -> vector<32x256xf32>
    %116 = arith.addf %110, %115 : vector<32x256xf32>
    %c1_118 = arith.constant 1 : index
    %c0_119 = arith.constant 0 : index
    %117 = vector.load %arg20[%c1_118, %c0_119] : memref<34x256xf32, #tpu.memory_space<vmem>>, vector<32x256xf32>
    %118 = arith.truncf %117 : vector<32x256xf32> to vector<32x256xbf16>
    %c1_120 = arith.constant 1 : index
    %c0_121 = arith.constant 0 : index
    %c0_122 = arith.constant 0 : index
    %119 = vector.load %arg5[%c1_120, %c0_121, %c0_122] : memref<3x256x256xbf16, #tpu.memory_space<vmem>>, vector<1x256x256xbf16>
    %120 = vector.shape_cast %119 : vector<1x256x256xbf16> to vector<256x256xbf16>
    %cst_123 = arith.constant dense<0.000000e+00> : vector<32x256xf32>
    %121 = tpu.matmul %118, %120, %cst_123 {dimension_numbers = #tpu.dot_dimension_numbers<[1], [0], [0], [1], [0, 0, 1, 1], [], []>} : vector<32x256xbf16>, vector<256x256xbf16>, vector<32x256xf32> -> vector<32x256xf32>
    %122 = arith.addf %116, %121 : vector<32x256xf32>
    %c2_124 = arith.constant 2 : index
    %c0_125 = arith.constant 0 : index
    %123 = vector.load %arg20[%c2_124, %c0_125] : memref<34x256xf32, #tpu.memory_space<vmem>>, vector<32x256xf32>
    %124 = arith.truncf %123 : vector<32x256xf32> to vector<32x256xbf16>
    %c2_126 = arith.constant 2 : index
    %c0_127 = arith.constant 0 : index
    %c0_128 = arith.constant 0 : index
    %125 = vector.load %arg5[%c2_126, %c0_127, %c0_128] : memref<3x256x256xbf16, #tpu.memory_space<vmem>>, vector<1x256x256xbf16>
    %126 = vector.shape_cast %125 : vector<1x256x256xbf16> to vector<256x256xbf16>
    %cst_129 = arith.constant dense<0.000000e+00> : vector<32x256xf32>
    %127 = tpu.matmul %124, %126, %cst_129 {dimension_numbers = #tpu.dot_dimension_numbers<[1], [0], [0], [1], [0, 0, 1, 1], [], []>} : vector<32x256xbf16>, vector<256x256xbf16>, vector<32x256xf32> -> vector<32x256xf32>
    %128 = arith.addf %122, %127 : vector<32x256xf32>
    %c0_130 = arith.constant 0 : index
    %c0_131 = arith.constant 0 : index
    %129 = vector.load %arg9[%c0_130, %c0_131] : memref<1x256xf32, #tpu.memory_space<vmem>>, vector<1x256xf32>
    %130 = vector.broadcast %129 : vector<1x256xf32> to vector<32x256xf32>
    %131 = arith.addf %128, %130 : vector<32x256xf32>
    %cst_132 = arith.constant 0.000000e+00 : f32
    %132 = vector.broadcast %cst_132 : f32 to vector<32x256xf32>
    %133 = arith.maximumf %131, %132 : vector<32x256xf32>
    %134 = arith.truncf %133 : vector<32x256xf32> to vector<32x256xbf16>
    %c0_133 = arith.constant 0 : index
    %c0_134 = arith.constant 0 : index
    %c0_135 = arith.constant 0 : index
    %135 = vector.load %arg12[%c0_133, %c0_134, %c0_135] : memref<2x16x32xbf16, #tpu.memory_space<vmem>>, vector<1x16x32xbf16>
    %136 = vector.shape_cast %135 : vector<1x16x32xbf16> to vector<16x32xbf16>
    %cst_136 = arith.constant dense<0.000000e+00> : vector<16x256xf32>
    %137 = tpu.matmul %136, %134, %cst_136 {dimension_numbers = #tpu.dot_dimension_numbers<[1], [0], [0], [1], [0, 0, 1, 1], [], []>} : vector<16x32xbf16>, vector<32x256xbf16>, vector<16x256xf32> -> vector<16x256xf32>
    %c1_137 = arith.constant 1 : index
    %c0_138 = arith.constant 0 : index
    %c0_139 = arith.constant 0 : index
    %138 = vector.load %arg12[%c1_137, %c0_138, %c0_139] : memref<2x16x32xbf16, #tpu.memory_space<vmem>>, vector<1x16x32xbf16>
    %139 = vector.shape_cast %138 : vector<1x16x32xbf16> to vector<16x32xbf16>
    %cst_140 = arith.constant dense<0.000000e+00> : vector<16x256xf32>
    %140 = tpu.matmul %139, %134, %cst_140 {dimension_numbers = #tpu.dot_dimension_numbers<[1], [0], [0], [1], [0, 0, 1, 1], [], []>} : vector<16x32xbf16>, vector<32x256xbf16>, vector<16x256xf32> -> vector<16x256xf32>
    %141 = arith.maximumf %137, %140 : vector<16x256xf32>
    %142 = arith.truncf %141 : vector<16x256xf32> to vector<16x256xbf16>
    %c0_141 = arith.constant 0 : index
    %c0_142 = arith.constant 0 : index
    %c0_143 = arith.constant 0 : index
    %143 = vector.load %arg13[%c0_141, %c0_142, %c0_143] : memref<2x256x128xbf16, #tpu.memory_space<vmem>>, vector<1x256x128xbf16>
    %144 = vector.shape_cast %143 : vector<1x256x128xbf16> to vector<256x128xbf16>
    %cst_144 = arith.constant dense<0.000000e+00> : vector<16x128xf32>
    %145 = tpu.matmul %142, %144, %cst_144 {dimension_numbers = #tpu.dot_dimension_numbers<[1], [0], [0], [1], [0, 0, 1, 1], [], []>} : vector<16x256xbf16>, vector<256x128xbf16>, vector<16x128xf32> -> vector<16x128xf32>
    %c1_145 = arith.constant 1 : index
    %c0_146 = arith.constant 0 : index
    %c0_147 = arith.constant 0 : index
    %146 = vector.load %arg13[%c1_145, %c0_146, %c0_147] : memref<2x256x128xbf16, #tpu.memory_space<vmem>>, vector<1x256x128xbf16>
    %147 = vector.shape_cast %146 : vector<1x256x128xbf16> to vector<256x128xbf16>
    %cst_148 = arith.constant dense<0.000000e+00> : vector<16x128xf32>
    %148 = tpu.matmul %142, %147, %cst_148 {dimension_numbers = #tpu.dot_dimension_numbers<[1], [0], [0], [1], [0, 0, 1, 1], [], []>} : vector<16x256xbf16>, vector<256x128xbf16>, vector<16x128xf32> -> vector<16x128xf32>
    %149 = arith.maximumf %145, %148 : vector<16x128xf32>
    %150 = arith.truncf %149 : vector<16x128xf32> to vector<16x128xbf16>
    %cst_149 = arith.constant 0.000000e+00 : f32
    %151 = vector.broadcast %cst_149 : f32 to vector<1x3xf32>
    %152 = vector.extract_strided_slice %150 {offsets = [0, 0], sizes = [1, 128], strides = [1, 1]} : vector<16x128xbf16> to vector<1x128xbf16>
    %c0_150 = arith.constant 0 : index
    %c0_151 = arith.constant 0 : index
    %c0_152 = arith.constant 0 : index
    %153 = vector.load %arg14[%c0_150, %c0_151, %c0_152] : memref<16x128x3xbf16, #tpu.memory_space<vmem>>, vector<1x128x3xbf16>
    %154 = vector.shape_cast %153 : vector<1x128x3xbf16> to vector<128x3xbf16>
    %cst_153 = arith.constant dense<0.000000e+00> : vector<1x3xf32>
    %155 = tpu.matmul %152, %154, %cst_153 {dimension_numbers = #tpu.dot_dimension_numbers<[1], [0], [0], [1], [0, 0, 1, 1], [], []>} : vector<1x128xbf16>, vector<128x3xbf16>, vector<1x3xf32> -> vector<1x3xf32>
    %156 = arith.addf %151, %155 : vector<1x3xf32>
    %157 = vector.extract_strided_slice %150 {offsets = [1, 0], sizes = [1, 128], strides = [1, 1]} : vector<16x128xbf16> to vector<1x128xbf16>
    %c1_154 = arith.constant 1 : index
    %c0_155 = arith.constant 0 : index
    %c0_156 = arith.constant 0 : index
    %158 = vector.load %arg14[%c1_154, %c0_155, %c0_156] : memref<16x128x3xbf16, #tpu.memory_space<vmem>>, vector<1x128x3xbf16>
    %159 = vector.shape_cast %158 : vector<1x128x3xbf16> to vector<128x3xbf16>
    %cst_157 = arith.constant dense<0.000000e+00> : vector<1x3xf32>
    %160 = tpu.matmul %157, %159, %cst_157 {dimension_numbers = #tpu.dot_dimension_numbers<[1], [0], [0], [1], [0, 0, 1, 1], [], []>} : vector<1x128xbf16>, vector<128x3xbf16>, vector<1x3xf32> -> vector<1x3xf32>
    %161 = arith.addf %156, %160 : vector<1x3xf32>
    %162 = vector.extract_strided_slice %150 {offsets = [2, 0], sizes = [1, 128], strides = [1, 1]} : vector<16x128xbf16> to vector<1x128xbf16>
    %c2_158 = arith.constant 2 : index
    %c0_159 = arith.constant 0 : index
    %c0_160 = arith.constant 0 : index
    %163 = vector.load %arg14[%c2_158, %c0_159, %c0_160] : memref<16x128x3xbf16, #tpu.memory_space<vmem>>, vector<1x128x3xbf16>
    %164 = vector.shape_cast %163 : vector<1x128x3xbf16> to vector<128x3xbf16>
    %cst_161 = arith.constant dense<0.000000e+00> : vector<1x3xf32>
    %165 = tpu.matmul %162, %164, %cst_161 {dimension_numbers = #tpu.dot_dimension_numbers<[1], [0], [0], [1], [0, 0, 1, 1], [], []>} : vector<1x128xbf16>, vector<128x3xbf16>, vector<1x3xf32> -> vector<1x3xf32>
    %166 = arith.addf %161, %165 : vector<1x3xf32>
    %167 = vector.extract_strided_slice %150 {offsets = [3, 0], sizes = [1, 128], strides = [1, 1]} : vector<16x128xbf16> to vector<1x128xbf16>
    %c3 = arith.constant 3 : index
    %c0_162 = arith.constant 0 : index
    %c0_163 = arith.constant 0 : index
    %168 = vector.load %arg14[%c3, %c0_162, %c0_163] : memref<16x128x3xbf16, #tpu.memory_space<vmem>>, vector<1x128x3xbf16>
    %169 = vector.shape_cast %168 : vector<1x128x3xbf16> to vector<128x3xbf16>
    %cst_164 = arith.constant dense<0.000000e+00> : vector<1x3xf32>
    %170 = tpu.matmul %167, %169, %cst_164 {dimension_numbers = #tpu.dot_dimension_numbers<[1], [0], [0], [1], [0, 0, 1, 1], [], []>} : vector<1x128xbf16>, vector<128x3xbf16>, vector<1x3xf32> -> vector<1x3xf32>
    %171 = arith.addf %166, %170 : vector<1x3xf32>
    %172 = vector.extract_strided_slice %150 {offsets = [4, 0], sizes = [1, 128], strides = [1, 1]} : vector<16x128xbf16> to vector<1x128xbf16>
    %c4 = arith.constant 4 : index
    %c0_165 = arith.constant 0 : index
    %c0_166 = arith.constant 0 : index
    %173 = vector.load %arg14[%c4, %c0_165, %c0_166] : memref<16x128x3xbf16, #tpu.memory_space<vmem>>, vector<1x128x3xbf16>
    %174 = vector.shape_cast %173 : vector<1x128x3xbf16> to vector<128x3xbf16>
    %cst_167 = arith.constant dense<0.000000e+00> : vector<1x3xf32>
    %175 = tpu.matmul %172, %174, %cst_167 {dimension_numbers = #tpu.dot_dimension_numbers<[1], [0], [0], [1], [0, 0, 1, 1], [], []>} : vector<1x128xbf16>, vector<128x3xbf16>, vector<1x3xf32> -> vector<1x3xf32>
    %176 = arith.addf %171, %175 : vector<1x3xf32>
    %177 = vector.extract_strided_slice %150 {offsets = [5, 0], sizes = [1, 128], strides = [1, 1]} : vector<16x128xbf16> to vector<1x128xbf16>
    %c5 = arith.constant 5 : index
    %c0_168 = arith.constant 0 : index
    %c0_169 = arith.constant 0 : index
    %178 = vector.load %arg14[%c5, %c0_168, %c0_169] : memref<16x128x3xbf16, #tpu.memory_space<vmem>>, vector<1x128x3xbf16>
    %179 = vector.shape_cast %178 : vector<1x128x3xbf16> to vector<128x3xbf16>
    %cst_170 = arith.constant dense<0.000000e+00> : vector<1x3xf32>
    %180 = tpu.matmul %177, %179, %cst_170 {dimension_numbers = #tpu.dot_dimension_numbers<[1], [0], [0], [1], [0, 0, 1, 1], [], []>} : vector<1x128xbf16>, vector<128x3xbf16>, vector<1x3xf32> -> vector<1x3xf32>
    %181 = arith.addf %176, %180 : vector<1x3xf32>
    %182 = vector.extract_strided_slice %150 {offsets = [6, 0], sizes = [1, 128], strides = [1, 1]} : vector<16x128xbf16> to vector<1x128xbf16>
    %c6 = arith.constant 6 : index
    %c0_171 = arith.constant 0 : index
    %c0_172 = arith.constant 0 : index
    %183 = vector.load %arg14[%c6, %c0_171, %c0_172] : memref<16x128x3xbf16, #tpu.memory_space<vmem>>, vector<1x128x3xbf16>
    %184 = vector.shape_cast %183 : vector<1x128x3xbf16> to vector<128x3xbf16>
    %cst_173 = arith.constant dense<0.000000e+00> : vector<1x3xf32>
    %185 = tpu.matmul %182, %184, %cst_173 {dimension_numbers = #tpu.dot_dimension_numbers<[1], [0], [0], [1], [0, 0, 1, 1], [], []>} : vector<1x128xbf16>, vector<128x3xbf16>, vector<1x3xf32> -> vector<1x3xf32>
    %186 = arith.addf %181, %185 : vector<1x3xf32>
    %187 = vector.extract_strided_slice %150 {offsets = [7, 0], sizes = [1, 128], strides = [1, 1]} : vector<16x128xbf16> to vector<1x128xbf16>
    %c7 = arith.constant 7 : index
    %c0_174 = arith.constant 0 : index
    %c0_175 = arith.constant 0 : index
    %188 = vector.load %arg14[%c7, %c0_174, %c0_175] : memref<16x128x3xbf16, #tpu.memory_space<vmem>>, vector<1x128x3xbf16>
    %189 = vector.shape_cast %188 : vector<1x128x3xbf16> to vector<128x3xbf16>
    %cst_176 = arith.constant dense<0.000000e+00> : vector<1x3xf32>
    %190 = tpu.matmul %187, %189, %cst_176 {dimension_numbers = #tpu.dot_dimension_numbers<[1], [0], [0], [1], [0, 0, 1, 1], [], []>} : vector<1x128xbf16>, vector<128x3xbf16>, vector<1x3xf32> -> vector<1x3xf32>
    %191 = arith.addf %186, %190 : vector<1x3xf32>
    %192 = vector.extract_strided_slice %150 {offsets = [8, 0], sizes = [1, 128], strides = [1, 1]} : vector<16x128xbf16> to vector<1x128xbf16>
    %c8 = arith.constant 8 : index
    %c0_177 = arith.constant 0 : index
    %c0_178 = arith.constant 0 : index
    %193 = vector.load %arg14[%c8, %c0_177, %c0_178] : memref<16x128x3xbf16, #tpu.memory_space<vmem>>, vector<1x128x3xbf16>
    %194 = vector.shape_cast %193 : vector<1x128x3xbf16> to vector<128x3xbf16>
    %cst_179 = arith.constant dense<0.000000e+00> : vector<1x3xf32>
    %195 = tpu.matmul %192, %194, %cst_179 {dimension_numbers = #tpu.dot_dimension_numbers<[1], [0], [0], [1], [0, 0, 1, 1], [], []>} : vector<1x128xbf16>, vector<128x3xbf16>, vector<1x3xf32> -> vector<1x3xf32>
    %196 = arith.addf %191, %195 : vector<1x3xf32>
    %197 = vector.extract_strided_slice %150 {offsets = [9, 0], sizes = [1, 128], strides = [1, 1]} : vector<16x128xbf16> to vector<1x128xbf16>
    %c9 = arith.constant 9 : index
    %c0_180 = arith.constant 0 : index
    %c0_181 = arith.constant 0 : index
    %198 = vector.load %arg14[%c9, %c0_180, %c0_181] : memref<16x128x3xbf16, #tpu.memory_space<vmem>>, vector<1x128x3xbf16>
    %199 = vector.shape_cast %198 : vector<1x128x3xbf16> to vector<128x3xbf16>
    %cst_182 = arith.constant dense<0.000000e+00> : vector<1x3xf32>
    %200 = tpu.matmul %197, %199, %cst_182 {dimension_numbers = #tpu.dot_dimension_numbers<[1], [0], [0], [1], [0, 0, 1, 1], [], []>} : vector<1x128xbf16>, vector<128x3xbf16>, vector<1x3xf32> -> vector<1x3xf32>
    %201 = arith.addf %196, %200 : vector<1x3xf32>
    %202 = vector.extract_strided_slice %150 {offsets = [10, 0], sizes = [1, 128], strides = [1, 1]} : vector<16x128xbf16> to vector<1x128xbf16>
    %c10 = arith.constant 10 : index
    %c0_183 = arith.constant 0 : index
    %c0_184 = arith.constant 0 : index
    %203 = vector.load %arg14[%c10, %c0_183, %c0_184] : memref<16x128x3xbf16, #tpu.memory_space<vmem>>, vector<1x128x3xbf16>
    %204 = vector.shape_cast %203 : vector<1x128x3xbf16> to vector<128x3xbf16>
    %cst_185 = arith.constant dense<0.000000e+00> : vector<1x3xf32>
    %205 = tpu.matmul %202, %204, %cst_185 {dimension_numbers = #tpu.dot_dimension_numbers<[1], [0], [0], [1], [0, 0, 1, 1], [], []>} : vector<1x128xbf16>, vector<128x3xbf16>, vector<1x3xf32> -> vector<1x3xf32>
    %206 = arith.addf %201, %205 : vector<1x3xf32>
    %207 = vector.extract_strided_slice %150 {offsets = [11, 0], sizes = [1, 128], strides = [1, 1]} : vector<16x128xbf16> to vector<1x128xbf16>
    %c11 = arith.constant 11 : index
    %c0_186 = arith.constant 0 : index
    %c0_187 = arith.constant 0 : index
    %208 = vector.load %arg14[%c11, %c0_186, %c0_187] : memref<16x128x3xbf16, #tpu.memory_space<vmem>>, vector<1x128x3xbf16>
    %209 = vector.shape_cast %208 : vector<1x128x3xbf16> to vector<128x3xbf16>
    %cst_188 = arith.constant dense<0.000000e+00> : vector<1x3xf32>
    %210 = tpu.matmul %207, %209, %cst_188 {dimension_numbers = #tpu.dot_dimension_numbers<[1], [0], [0], [1], [0, 0, 1, 1], [], []>} : vector<1x128xbf16>, vector<128x3xbf16>, vector<1x3xf32> -> vector<1x3xf32>
    %211 = arith.addf %206, %210 : vector<1x3xf32>
    %212 = vector.extract_strided_slice %150 {offsets = [12, 0], sizes = [1, 128], strides = [1, 1]} : vector<16x128xbf16> to vector<1x128xbf16>
    %c12 = arith.constant 12 : index
    %c0_189 = arith.constant 0 : index
    %c0_190 = arith.constant 0 : index
    %213 = vector.load %arg14[%c12, %c0_189, %c0_190] : memref<16x128x3xbf16, #tpu.memory_space<vmem>>, vector<1x128x3xbf16>
    %214 = vector.shape_cast %213 : vector<1x128x3xbf16> to vector<128x3xbf16>
    %cst_191 = arith.constant dense<0.000000e+00> : vector<1x3xf32>
    %215 = tpu.matmul %212, %214, %cst_191 {dimension_numbers = #tpu.dot_dimension_numbers<[1], [0], [0], [1], [0, 0, 1, 1], [], []>} : vector<1x128xbf16>, vector<128x3xbf16>, vector<1x3xf32> -> vector<1x3xf32>
    %216 = arith.addf %211, %215 : vector<1x3xf32>
    %217 = vector.extract_strided_slice %150 {offsets = [13, 0], sizes = [1, 128], strides = [1, 1]} : vector<16x128xbf16> to vector<1x128xbf16>
    %c13 = arith.constant 13 : index
    %c0_192 = arith.constant 0 : index
    %c0_193 = arith.constant 0 : index
    %218 = vector.load %arg14[%c13, %c0_192, %c0_193] : memref<16x128x3xbf16, #tpu.memory_space<vmem>>, vector<1x128x3xbf16>
    %219 = vector.shape_cast %218 : vector<1x128x3xbf16> to vector<128x3xbf16>
    %cst_194 = arith.constant dense<0.000000e+00> : vector<1x3xf32>
    %220 = tpu.matmul %217, %219, %cst_194 {dimension_numbers = #tpu.dot_dimension_numbers<[1], [0], [0], [1], [0, 0, 1, 1], [], []>} : vector<1x128xbf16>, vector<128x3xbf16>, vector<1x3xf32> -> vector<1x3xf32>
    %221 = arith.addf %216, %220 : vector<1x3xf32>
    %222 = vector.extract_strided_slice %150 {offsets = [14, 0], sizes = [1, 128], strides = [1, 1]} : vector<16x128xbf16> to vector<1x128xbf16>
    %c14 = arith.constant 14 : index
    %c0_195 = arith.constant 0 : index
    %c0_196 = arith.constant 0 : index
    %223 = vector.load %arg14[%c14, %c0_195, %c0_196] : memref<16x128x3xbf16, #tpu.memory_space<vmem>>, vector<1x128x3xbf16>
    %224 = vector.shape_cast %223 : vector<1x128x3xbf16> to vector<128x3xbf16>
    %cst_197 = arith.constant dense<0.000000e+00> : vector<1x3xf32>
    %225 = tpu.matmul %222, %224, %cst_197 {dimension_numbers = #tpu.dot_dimension_numbers<[1], [0], [0], [1], [0, 0, 1, 1], [], []>} : vector<1x128xbf16>, vector<128x3xbf16>, vector<1x3xf32> -> vector<1x3xf32>
    %226 = arith.addf %221, %225 : vector<1x3xf32>
    %227 = vector.extract_strided_slice %150 {offsets = [15, 0], sizes = [1, 128], strides = [1, 1]} : vector<16x128xbf16> to vector<1x128xbf16>
    %c15 = arith.constant 15 : index
    %c0_198 = arith.constant 0 : index
    %c0_199 = arith.constant 0 : index
    %228 = vector.load %arg14[%c15, %c0_198, %c0_199] : memref<16x128x3xbf16, #tpu.memory_space<vmem>>, vector<1x128x3xbf16>
    %229 = vector.shape_cast %228 : vector<1x128x3xbf16> to vector<128x3xbf16>
    %cst_200 = arith.constant dense<0.000000e+00> : vector<1x3xf32>
    %230 = tpu.matmul %227, %229, %cst_200 {dimension_numbers = #tpu.dot_dimension_numbers<[1], [0], [0], [1], [0, 0, 1, 1], [], []>} : vector<1x128xbf16>, vector<128x3xbf16>, vector<1x3xf32> -> vector<1x3xf32>
    %231 = arith.addf %226, %230 : vector<1x3xf32>
    %c0_201 = arith.constant 0 : index
    %c0_202 = arith.constant 0 : index
    %232 = vector.load %arg15[%c0_201, %c0_202] : memref<1x3xf32, #tpu.memory_space<vmem>>, vector<1x3xf32>
    %233 = arith.addf %231, %232 : vector<1x3xf32>
    %c0_203 = arith.constant 0 : index
    %c0_204 = arith.constant 0 : index
    %c0_205 = arith.constant 0 : index
    %234 = vector.load %arg16[%c0_203, %c0_204, %c0_205] : memref<1x1x3xf32, #tpu.memory_space<vmem>>, vector<1x1x3xf32>
    %235 = vector.shape_cast %234 : vector<1x1x3xf32> to vector<1x3xf32>
    %236 = vector.shape_cast %233 : vector<1x3xf32> to vector<1x1x3xf32>
    tpu.vector_store %arg16[%c0_203, %c0_204, %c0_205], %236 {strides = array<i32>} : memref<1x1x3xf32, #tpu.memory_space<vmem>>, vector<1x1x3xf32>,
    return
  }
  func.func @transform_0(%arg0: i32) -> (i32, i32, i32) {
    %c0_i32 = arith.constant 0 : i32
    %c0_i32_0 = arith.constant 0 : i32
    %c0_i32_1 = arith.constant 0 : i32
    return %arg0, %c0_i32, %c0_i32_0 : i32, i32, i32
  }
  func.func @transform_1(%arg0: i32) -> (i32, i32, i32) {
    %c0_i32 = arith.constant 0 : i32
    %c0_i32_0 = arith.constant 0 : i32
    %c0_i32_1 = arith.constant 0 : i32
    %c0_i32_2 = arith.constant 0 : i32
    return %c0_i32, %c0_i32_0, %c0_i32_1 : i32, i32, i32
  }
  func.func @transform_2(%arg0: i32) -> (i32, i32, i32) {
    %c0_i32 = arith.constant 0 : i32
    %c0_i32_0 = arith.constant 0 : i32
    %c0_i32_1 = arith.constant 0 : i32
    %c0_i32_2 = arith.constant 0 : i32
    return %c0_i32, %c0_i32_0, %c0_i32_1 : i32, i32, i32
  }
  func.func @transform_3(%arg0: i32) -> (i32, i32, i32) {
    %c0_i32 = arith.constant 0 : i32
    %c0_i32_0 = arith.constant 0 : i32
    %c0_i32_1 = arith.constant 0 : i32
    %c0_i32_2 = arith.constant 0 : i32
    return %c0_i32, %c0_i32_0, %c0_i32_1 : i32, i32, i32
  }
  func.func @transform_4(%arg0: i32) -> (i32, i32, i32) {
    %c0_i32 = arith.constant 0 : i32
    %c0_i32_0 = arith.constant 0 : i32
    %c0_i32_1 = arith.constant 0 : i32
    %c0_i32_2 = arith.constant 0 : i32
    return %c0_i32, %c0_i32_0, %c0_i32_1 : i32, i32, i32
  }
  func.func @transform_5(%arg0: i32) -> (i32, i32) {
    %c0_i32 = arith.constant 0 : i32
    %c0_i32_0 = arith.constant 0 : i32
    %c0_i32_1 = arith.constant 0 : i32
    return %c0_i32, %c0_i32_0 : i32, i32
  }
  func.func @transform_6(%arg0: i32) -> (i32, i32) {
    %c0_i32 = arith.constant 0 : i32
    %c0_i32_0 = arith.constant 0 : i32
    %c0_i32_1 = arith.constant 0 : i32
    return %c0_i32, %c0_i32_0 : i32, i32
  }
  func.func @transform_7(%arg0: i32) -> (i32, i32) {
    %c0_i32 = arith.constant 0 : i32
    %c0_i32_0 = arith.constant 0 : i32
    %c0_i32_1 = arith.constant 0 : i32
    return %c0_i32, %c0_i32_0 : i32, i32
  }
  func.func @transform_8(%arg0: i32) -> (i32, i32) {
    %c0_i32 = arith.constant 0 : i32
    %c0_i32_0 = arith.constant 0 : i32
    %c0_i32_1 = arith.constant 0 : i32
    return %c0_i32, %c0_i32_0 : i32, i32
  }
  func.func @transform_9(%arg0: i32) -> (i32, i32, i32) {
    %c0_i32 = arith.constant 0 : i32
    %c0_i32_0 = arith.constant 0 : i32
    %c0_i32_1 = arith.constant 0 : i32
    %c0_i32_2 = arith.constant 0 : i32
    return %c0_i32, %c0_i32_0, %c0_i32_1 : i32, i32, i32
  }
  func.func @transform_10(%arg0: i32) -> (i32, i32, i32) {
    %c0_i32 = arith.constant 0 : i32
    %c0_i32_0 = arith.constant 0 : i32
    %c0_i32_1 = arith.constant 0 : i32
    %c0_i32_2 = arith.constant 0 : i32
    return %c0_i32, %c0_i32_0, %c0_i32_1 : i32, i32, i32
  }
  func.func @transform_11(%arg0: i32) -> (i32, i32, i32) {
    %c0_i32 = arith.constant 0 : i32
    %c0_i32_0 = arith.constant 0 : i32
    %c0_i32_1 = arith.constant 0 : i32
    %c0_i32_2 = arith.constant 0 : i32
    return %c0_i32, %c0_i32_0, %c0_i32_1 : i32, i32, i32
  }
  func.func @transform_12(%arg0: i32) -> (i32, i32, i32) {
    %c0_i32 = arith.constant 0 : i32
    %c0_i32_0 = arith.constant 0 : i32
    %c0_i32_1 = arith.constant 0 : i32
    %c0_i32_2 = arith.constant 0 : i32
    return %c0_i32, %c0_i32_0, %c0_i32_1 : i32, i32, i32
  }
  func.func @transform_13(%arg0: i32) -> (i32, i32, i32) {
    %c0_i32 = arith.constant 0 : i32
    %c0_i32_0 = arith.constant 0 : i32
    %c0_i32_1 = arith.constant 0 : i32
    %c0_i32_2 = arith.constant 0 : i32
    return %c0_i32, %c0_i32_0, %c0_i32_1 : i32, i32, i32
  }
  func.func @transform_14(%arg0: i32) -> (i32, i32) {
    %c0_i32 = arith.constant 0 : i32
    %c0_i32_0 = arith.constant 0 : i32
    %c0_i32_1 = arith.constant 0 : i32
    return %c0_i32, %c0_i32_0 : i32, i32
  }
  func.func @transform_15(%arg0: i32) -> (i32, i32, i32) {
    %c0_i32 = arith.constant 0 : i32
    %c0_i32_0 = arith.constant 0 : i32
    %c0_i32_1 = arith.constant 0 : i32
    return %arg0, %c0_i32, %c0_i32_0 : i32, i32, i32
  }
}

</mosaic_0001>

<bundles_post_ra>
// kernel: tiny_vgg_forward.1
= control target key start
LH: loop header
LB: loop body
LE: loop exit
PB: predicated region body
PF: predicated region fallthrough
CT: control target
= control target key end

     0   :  { %s21081_s0 = inlined_call_operand.vmem [shape: f32[2,64,192], index: 0, kind: input, shape index: {}]   ;;  %s21082_s1 = inlined_call_operand.hbm [shape: bf16[3,192,512], index: 1, kind: input, shape index: {}]   ;;  %s21083_s2 = inlined_call_operand.hbm [shape: bf16[3,512,512], index: 2, kind: input, shape index: {}]   ;;  %s21084_s3 = inlined_call_operand.hbm [shape: bf16[3,256,256], index: 3, kind: input, shape index: {}]   ;;  %s21085_s4 = inlined_call_operand.hbm [shape: bf16[3,256,256], index: 4, kind: input, shape index: {}]   ;;  %s21086_s5 = inlined_call_operand.hbm [shape: f32[1,512], index: 5, kind: input, shape index: {}]   ;;  %s21087_s6 = inlined_call_operand.hbm [shape: f32[1,512], index: 6, kind: input, shape index: {}]   ;;  %s21088_s7 = inlined_call_operand.hbm [shape: f32[1,256], index: 7, kind: input, shape index: {}]   ;;  %s21089_s8 = inlined_call_operand.hbm [shape: f32[1,256], index: 8, kind: input, shape index: {}]   ;;  %s21090_s9 = inlined_call_operand.hbm [shape: bf16[2,32,64], index: 9, kind: input, shape index: {}]   ;;  %s21091_s10 = inlined_call_operand.hbm [shape: bf16[2,512,256], index: 10, kind: input, shape index: {}]   ;;  %s21092_s11 = inlined_call_operand.hbm [shape: bf16[2,16,32], index: 11, kind: input, shape index: {}]   ;;  %s21093_s12 = inlined_call_operand.hbm [shape: bf16[2,256,128], index: 12, kind: input, shape index: {}]   ;;  %s21094_s13 = inlined_call_operand.vmem [shape: bf16[16,128,3], index: 13, kind: input, shape index: {}]   ;;  %s21095_s14 = inlined_call_operand.hbm [shape: f32[1,3], index: 14, kind: input, shape index: {}]   ;;  %s21096_s15 = inlined_call_operand.hbm [shape: f32[2,1,3], index: 15, kind: output, shape index: {}]  }
   0x1   :  { %21131 = sst [smem:[#allocation63_spill]] %s21082_s1 }
   0x2   :  { %21132 = sst [smem:[#allocation64_spill]] %s21083_s2 }
   0x3   :  { %21133 = sst [smem:[#allocation65_spill]] %s21085_s4 }
   0x4   :  { %21134 = sst [smem:[#allocation66_spill]] %s21087_s6 }
   0x5   :  { %21135 = sst [smem:[#allocation67_spill]] %s21096_s15 }
   0x6   :  { %20 = vsyncpa [#allocation7], 0 }
   0x7   :  { %21 = vsyncpa [#allocation10], 0 }
   0x8   :  { %22 = vsyncpa [#allocation13], 0 }
   0x9   :  { %23 = vsyncpa [#allocation16], 0 }
   0xa   :  { %24 = vsyncpa [#allocation19], 0 }
   0xb   :  { %25 = vsyncpa [#allocation22], 0 }
   0xc   :  { %26 = vsyncpa [#allocation25], 0 }
   0xd   :  { %27 = vsyncpa [#allocation8], 0 }
   0xe   :  { %29 = vsyncpa [#allocation8 + $0x1], 0  ;;  %s18301_s18 = smov 0   ;;  %s18303_s19 = smov 0  }
   0xf   :  { %s18305_s20 = smov 0   ;;  %s18307_s21 = smov 0  }
  0x10 LB: > { %21136 = sst [smem:[#allocation36_spill]] %s18187_s18  ;;  %s18322_s22 = sadd.s32 4294967295, %s18199_s21   ;;  %s18199_s21 = sphi %s18307_s21, %s21252_s21   ;;  %s18195_s20 = sphi %s18305_s20, %s21254_s20   ;;  %s18191_s19 = sphi %s18303_s19, %s21256_s19   ;;  %s18187_s18 = sphi %s18301_s18, %s21255_s18  }
  0x11   : > { %21137 = sst [smem:[#allocation37_spill]] %s18195_s20  ;;  %s12115_s23 = sadd.s32 4294967294, %s18199_s21  }
  0x12   : > { %21138 = sst [smem:[#allocation38_spill]] %s18199_s21  ;;  %s18326_s24 = sadd.s32 1, %s18199_s21  }
  0x13   : > { %21139 = sst [smem:[#allocation39_spill]] %s18326_s24  ;;  %s362_s25 = sadd.s32 1, %s18195_s20 }
  0x14   : > { %s359_s26 = ssub.s32 %s18199_s21, %s18326_s24  ;;  %p372_p0 = scmp.ne.s32.totalorder %s18195_s20, %s18191_s19 }
  0x15   : > { %p360_p1 = scmp.eq.s32.totalorder %s359_s26, 0  ;;  %p373_p2 = scmp.eq.s32.totalorder %s18322_s22, 1 }
  0x16   : > { %p378_p3 = scmp.ne.s32.totalorder %s18191_s19, %s18187_s18  ;;  %p379_p4 = scmp.eq.s32.totalorder %s12115_s23, 1 }
  0x17   : > { %s18337_s27 = scalar_select %p360_p1, %s18195_s20, %s362_s25  }
  0x18   : > { %p18339_p5 = por %p373_p2, %p372_p0  ;;  %p18343_p6 = por %p379_p4, %p378_p3 }
  0x19   : > { %21140 = sst [smem:[#allocation40_spill]] %s18337_s27  ;;  %p12116_p7 = scmp.ge.s32.totalorder %s18199_s21, 1 }
  0x1a   : > { %s21141_s28 = scalar_select %p18339_p5, 1, 0 }
  0x1b   : > { %s21143_s29 = scalar_select %p18343_p6, 1, 0 }
  0x1c   : > { %21142 = sst [smem:[#allocation41_spill]] %s21141_s28  ;;  %p386_p8 = scmp.lt.s32.totalorder %s18199_s21, 3 }
  0x1d   : > { %21144 = sst [smem:[#allocation42_spill]] %s21143_s29  ;;  %p17630_p9 = scmp.eq.s32.totalorder %s18322_s22, 0 }
  0x1e   : > { %p18350_p10 = pnand %p12116_p7, %p386_p8  ;;  %s21146_s2 = sld [smem:[#allocation64_spill]] }
  0x1f   : > { %s18201_s26 = smov [#allocation9]   ;;  %s21148_s4 = sld [smem:[#allocation65_spill]] }
  0x20   : > { %p17586_p11 = pneg %p18350_p10  ;;  %s413_s27 = sshll.u32 %s18201_s26, 4  ;;  %s414_s27 = int_to_ptr.vmem [resolvable:$true] %s413_s27 }
  0x21   : > { %s21106_s16 = smov 256   ;;  %s21107_s17 = smov 16  }
  0x22   : > { %p18361_p12 = pnand %p17630_p9, %p17586_p11  ;;  %s21149_s6 = sld [smem:[#allocation66_spill]] }
  0x23   : > { %s21108_s20 = smov 128   ;;  %s21109_s24 = smov 8  }
  0x24   : > { %s411_s23 = sshll.u32 %s21146_s2, 4  ;;  %s18204_s2 = smov [#allocation12]   ;;  %s412_s23 = int_to_ptr.hbm [resolvable:$true] %s411_s23 }
  0x25   : > { %s439_s29 = sshll.u32 %s21148_s4, 4  ;;  %s441_s18 = sshll.u32 %s18204_s2, 4  ;;  %s440_s29 = int_to_ptr.hbm [resolvable:$true] %s439_s29  ;;  %s442_s18 = int_to_ptr.vmem [resolvable:$true] %s441_s18 }
  0x26   : > { %17592 = dma.hbm_to_vmem [thread:$0]  (!%p18361_p12), %s412_s23, 49152, %s414_s27, [#allocation10], %s21106_s16, %s21106_s16, %s21107_s17  }
  0x27   : > { %17598 = dma.hbm_to_vmem [thread:$0]  (!%p18361_p12), %s440_s29, 12288, %s442_s18, [#allocation13], %s21108_s20, %s21108_s20, %s21109_s24  }
  0x28   : > { %s466_s26 = sshll.u32 %s21149_s6, 4  ;;  %s490_s27 = sshll.u32 %s21089_s8, 4  ;;  %s467_s26 = int_to_ptr.hbm [resolvable:$true] %s466_s26  ;;  %s491_s27 = int_to_ptr.hbm [resolvable:$true] %s490_s27 }
  0x29   : > { %s18207_s2 = smov [#allocation15]   ;;  %s18208_s21 = smov [#allocation18]  }
  0x2a   : > { %s468_s23 = sshll.u32 %s18207_s2, 4  ;;  %s492_s28 = sshll.u32 %s18208_s21, 4  ;;  %s469_s23 = int_to_ptr.vmem [resolvable:$true] %s468_s23  ;;  %s493_s28 = int_to_ptr.vmem [resolvable:$true] %s492_s28 }
  0x2b   : > { %17604 = dma.hbm_to_vmem [thread:$0]  (!%p18361_p12), %s467_s26, 64, %s469_s23, [#allocation16]  }
  0x2c   : > { %s515_s6 = sshll.u32 %s21091_s10, 4  ;;  %s18209_s4 = smov [#allocation21]   ;;  %s516_s6 = int_to_ptr.hbm [resolvable:$true] %s515_s6 }
  0x2d   : > { %17610 = dma.hbm_to_vmem [thread:$0]  (!%p18361_p12), %s491_s27, 32, %s493_s28, [#allocation19]  }
  0x2e   : > { %s517_s15 = sshll.u32 %s18209_s4, 4  ;;  %s543_s2 = sshll.u32 %s21093_s12, 4  ;;  %s518_s15 = int_to_ptr.vmem [resolvable:$true] %s517_s15  ;;  %s544_s2 = int_to_ptr.hbm [resolvable:$true] %s543_s2 }
  0x2f   : > { %17616 = dma.hbm_to_vmem [thread:$0]  (!%p18361_p12), %s516_s6, 16384, %s518_s15, [#allocation22], %s21108_s20, %s21108_s20, %s21109_s24  }
  0x30   : > { %s18210_s16 = smov [#allocation24]   ;;  %s21150_s1 = sld [smem:[#allocation63_spill]] }
  0x31   : > { %s545_s17 = sshll.u32 %s18210_s16, 4  ;;  %s21110_s21 = smov 64   ;;  %s546_s17 = int_to_ptr.vmem [resolvable:$true] %s545_s17 }
  0x32   : > { %s21112_s28 = smov 4   ;;  %s425_s6 = sshll.u32 %s21084_s3, 4  ;;  %s426_s6 = int_to_ptr.hbm [resolvable:$true] %s425_s6 }
  0x33   : > { %17622 = dma.hbm_to_vmem [thread:$0]  (!%p18361_p12), %s544_s2, 4096, %s546_s17, [#allocation25], %s21110_s21, %s21110_s21, %s21112_s28  }
  0x34   : > { %s18213_s15 = smov [#allocation6]   ;;  %s21151_s16 = smov 16  }
  0x35   : > { %s399_s29 = sshll.u32 %s18213_s15, 4  ;;  %s21152_s26 = smov 256   ;;  %s400_s29 = int_to_ptr.vmem [resolvable:$true] %s399_s29 }
  0x36   : > { %s397_s27 = sshll.u32 %s21150_s1, 4  ;;  %s18214_s23 = smov [#allocation11]   ;;  %s398_s27 = int_to_ptr.hbm [resolvable:$true] %s397_s27 }
  0x37   : > { %17589 = dma.hbm_to_vmem [thread:$0]  (!%p18361_p12), %s398_s27, 18432, %s400_s29, [#allocation7], %s21152_s26, %s21152_s26, %s21151_s16  }
  0x38   : > { %s427_s20 = sshll.u32 %s18214_s23, 4  ;;  %s454_s2 = sshll.u32 %s21086_s5, 4  ;;  %s428_s20 = int_to_ptr.vmem [resolvable:$true] %s427_s20  ;;  %s455_s2 = int_to_ptr.hbm [resolvable:$true] %s454_s2 }
  0x39   : > { %s21153_s17 = smov 8   ;;  %s21154_s4 = smov 128  }
  0x3a   : > { %17595 = dma.hbm_to_vmem [thread:$0]  (!%p18361_p12), %s426_s6, 12288, %s428_s20, [#allocation10], %s21154_s4, %s21154_s4, %s21153_s17  }
  0x3b   : > { %s478_s21 = sshll.u32 %s21088_s7, 4  ;;  %s18215_s28 = smov [#allocation14]   ;;  %s479_s21 = int_to_ptr.hbm [resolvable:$true] %s478_s21 }
  0x3c   : > { %s456_s27 = sshll.u32 %s18215_s28, 4  ;;  %s18216_s1 = smov [#allocation17]   ;;  %s457_s27 = int_to_ptr.vmem [resolvable:$true] %s456_s27 }
  0x3d   : > { %17601 = dma.hbm_to_vmem [thread:$0]  (!%p18361_p12), %s455_s2, 64, %s457_s27, [#allocation13]  }
  0x3e   : > { %s480_s24 = sshll.u32 %s18216_s1, 4  ;;  %s501_s26 = sshll.u32 %s21090_s9, 4  ;;  %s481_s24 = int_to_ptr.vmem [resolvable:$true] %s480_s24  ;;  %s502_s26 = int_to_ptr.hbm [resolvable:$true] %s501_s26 }
  0x3f   : > { %17607 = dma.hbm_to_vmem [thread:$0]  (!%p18361_p12), %s479_s21, 32, %s481_s24, [#allocation16]  }
  0x40   : > { %s529_s28 = sshll.u32 %s21092_s11, 4  ;;  %s18217_s23 = smov [#allocation20]   ;;  %s530_s28 = int_to_ptr.hbm [resolvable:$true] %s529_s28 }
  0x41   : > { %s503_s17 = sshll.u32 %s18217_s23, 4  ;;  %s21155_s2 = smov 4   ;;  %s504_s17 = int_to_ptr.vmem [resolvable:$true] %s503_s17 }
  0x42   : > { %s21156_s4 = smov 64   ;;  %s18218_s18 = smov [#allocation23]  }
  0x43   : > { %17613 = dma.hbm_to_vmem [thread:$0]  (!%p18361_p12), %s502_s26, 512, %s504_s17, [#allocation19], %s21156_s4, %s21156_s4, %s21155_s2  }
  0x44   : > { %s531_s15 = sshll.u32 %s18218_s18, 4  ;;  %s561_s21 = sshll.u32 %s21095_s14, 4  ;;  %s532_s15 = int_to_ptr.vmem [resolvable:$true] %s531_s15  ;;  %s562_s21 = int_to_ptr.hbm [resolvable:$true] %s561_s21 }
  0x45   : > { %17619 = dma.hbm_to_vmem [thread:$0]  (!%p18361_p12), %s530_s28, 256, %s532_s15, [#allocation22], %s21156_s4, %s21156_s4, %s21155_s2  }
  0x46   : > { %s18219_s24 = smov [#allocation26]   ;;  %584 = sbr.rel (%p18350_p10) target bundleno = 2960 (0xb90), region = 80 }
  0x47   : > { %s563_s29 = sshll.u32 %s18219_s24, 4  ;;  %s564_s29 = int_to_ptr.vmem [resolvable:$true] %s563_s29 }
  0x48   : > { %17625 = dma.hbm_to_vmem [thread:$0]  (!%p18361_p12), %s562_s21, 16, %s564_s29, [#allocation25]  }
  0x4b   : > { %18154 = dma.done.wait (%p17630_p9), [#allocation7], 18432  }
  0x4c   : > { %18156 = vsyncadd (%p17630_p9), [#allocation7], 4294948864 }
  0x4d   : > { %18158 = dma.done.wait (%p17630_p9), [#allocation10], 61440  }
  0x4e   : > { %18160 = vsyncadd (%p17630_p9), [#allocation10], 4294905856 }
  0x4f   : > { %18162 = dma.done.wait (%p17630_p9), [#allocation13], 12352  }
  0x50   : > { %18164 = vsyncadd (%p17630_p9), [#allocation13], 4294954944 }
  0x51   : > { %18166 = dma.done.wait (%p17630_p9), [#allocation16], 96  }
  0x52   : > { %18168 = vsyncadd (%p17630_p9), [#allocation16], 4294967200 }
  0x53   : > { %18170 = dma.done.wait (%p17630_p9), [#allocation19], 544  }
  0x54   : > { %18172 = vsyncadd (%p17630_p9), [#allocation19], 4294966752 }
  0x55   : > { %18174 = dma.done.wait (%p17630_p9), [#allocation22], 16640  }
  0x56   : > { %18176 = vsyncadd (%p17630_p9), [#allocation22], 4294950656 }
  0x57   : > { %18178 = dma.done.wait (%p17630_p9), [#allocation25], 4112  }
  0x58   : > { %18180 = vsyncadd (%p17630_p9), [#allocation25], 4294963184  ;;  %p692_p13 = scmp.lt.s32.totalorder %s18322_s22, 1  ;;  %v12261_v0 = vld [vmem:[#allocation6 + $0x260] sm:$0xf]  ;;  %vm739_vm0 = vcmask 1040384  }
  0x59   : > { %v16592_v1 = vld [vmem:[#allocation6 + $0x26c] sm:$0xf0]  ;;  %v16590_v2 = vld [vmem:[#allocation6 + $0x264] sm:$0xf]  ;;  %v12263_v4 = vld [vmem:[#allocation6 + $0x270] sm:$0xf0] }
  0x5a   : > { %s18483_s30 = scalar_select %p692_p13, %s18322_s22, 1  ;;  %v12262_v3 = vor.u32 %v16592_v1, %v12261_v0  ;;  %v12325_v5 = vld [vmem:[#allocation6 + $0x2e0] sm:$0xf]  ;;  %v16608_v6 = vld [vmem:[#allocation6 + $0x2ec] sm:$0xf0]  ;;  %v12266_v7 = vor.u32 %v16590_v2, %v12263_v4  ;;  %vm789_vm1 = vcmask 523265  }
  0x5b   : > { %v12326_v8 = vor.u32 %v16608_v6, %v12325_v5  ;;  %v16606_v9 = vld [vmem:[#allocation6 + $0x2e4] sm:$0xf]  ;;  %v12327_v10 = vld [vmem:[#allocation6 + $0x2f0] sm:$0xf0]  ;;  %v12245_v11 = vld [vmem:[#allocation6 + $0x240] sm:$0xf] }
  0x5c   : > { %s16513_s25 = sshll.u32 %s18483_s30, 7  ;;  %1267 = vmatpush.bf16.msra.mxu0 %v12262_v3  ;;  %v12330_v12 = vor.u32 %v16606_v9, %v12327_v10  ;;  %v16588_v13 = vld [vmem:[#allocation6 + $0x24c] sm:$0xf0]  ;;  %v16586_v14 = vld [vmem:[#allocation6 + $0x244] sm:$0xf]  ;;  %1325 = vmatpush.bf16.msra.mxu2 %v12266_v7  ;;  %vm792_vm2 = vcmask 523264  }
  0x5d   : > { %v12247_v15 = vld [vmem:[#allocation6 + $0x250] sm:$0xf0]  ;;  %1300 = vmatpush.bf16.msra.mxu1 %v12326_v8  ;;  %v12246_v16 = vor.u32 %v16588_v13, %v12245_v11  ;;  %v12309_v18 = vld [vmem:[#allocation6 + $0x2c0] sm:$0xf]  ;;  %v16604_v19 = vld [vmem:[#allocation6 + $0x2cc] sm:$0xf0]  ;;  %s18491_s20 = scalar_lea.vmem %s21081_s0, %s16513_s25 }
  0x5e   : > { %v12250_v17 = vor.u32 %v16586_v14, %v12247_v15  ;;  %v16602_v20 = vld [vmem:[#allocation6 + $0x2c4] sm:$0xf]  ;;  %1358 = vmatpush.bf16.msra.mxu3 %v12330_v12  ;;  %v12310_v21 = vor.u32 %v16604_v19, %v12309_v18  ;;  %v12311_v22 = vld [vmem:[#allocation6 + $0x2d0] sm:$0xf0]  ;;  %v12229_v23 = vld [vmem:[#allocation6 + $0x220] sm:$0xf] }
  0x5f   : > { %v16584_v24 = vld [vmem:[#allocation6 + $0x22c] sm:$0xf0]  ;;  %v12314_v25 = vor.u32 %v16602_v20, %v12311_v22  ;;  %v16582_v26 = vld [vmem:[#allocation6 + $0x224] sm:$0xf]  ;;  %v12231_v27 = vld [vmem:[#allocation6 + $0x230] sm:$0xf0] }
  0x60   : > { %v12293_v28 = vld [vmem:[#allocation6 + $0x2a0] sm:$0xf]  ;;  %1268 = vmatpush.bf16.msra.mxu0 %v12246_v16  ;;  %v12230_v29 = vor.u32 %v16584_v24, %v12229_v23  ;;  %v16600_v30 = vld [vmem:[#allocation6 + $0x2ac] sm:$0xf0]  ;;  %v16598_v31 = vld [vmem:[#allocation6 + $0x2a4] sm:$0xf]  ;;  %1326 = vmatpush.bf16.msra.mxu2 %v12250_v17  ;;  %v12234_v33 = vor.u32 %v16582_v26, %v12231_v27 }
  0x61   : > { %v12295_v32 = vld [vmem:[#allocation6 + $0x2b0] sm:$0xf0]  ;;  %1301 = vmatpush.bf16.msra.mxu1 %v12310_v21  ;;  %v12294_v34 = vor.u32 %v16600_v30, %v12293_v28  ;;  %v12213_v35 = vld [vmem:[#allocation6 + $0x200] sm:$0xf]  ;;  %v16580_v36 = vld [vmem:[#allocation6 + $0x20c] sm:$0xf0] }
  0x62   : > { %v16578_v37 = vld [vmem:[#allocation6 + $0x204] sm:$0xf]  ;;  %1359 = vmatpush.bf16.msra.mxu3 %v12314_v25  ;;  %v12298_v38 = vor.u32 %v16598_v31, %v12295_v32  ;;  %v12215_v39 = vld [vmem:[#allocation6 + $0x210] sm:$0xf0]  ;;  %v12277_v40 = vld [vmem:[#allocation6 + $0x280] sm:$0xf]  ;;  %v12214_v44 = vor.u32 %v16580_v36, %v12213_v35 }
  0x63   : > { %v16596_v41 = vld [vmem:[#allocation6 + $0x28c] sm:$0xf0]  ;;  %v16594_v42 = vld [vmem:[#allocation6 + $0x284] sm:$0xf]  ;;  %v12279_v43 = vld [vmem:[#allocation6 + $0x290] sm:$0xf0]  ;;  %v12218_v48 = vor.u32 %v16578_v37, %v12215_v39 }
  0x64   : > { %1269 = vmatpush.bf16.msra.mxu0 %v12230_v29  ;;  %v12197_v45 = vld [vmem:[#allocation6 + $0x1e0] sm:$0xf]  ;;  %v16576_v46 = vld [vmem:[#allocation6 + $0x1ec] sm:$0xf0]  ;;  %v16574_v47 = vld [vmem:[#allocation6 + $0x1e4] sm:$0xf]  ;;  %1327 = vmatpush.bf16.msra.mxu2 %v12234_v33  ;;  %v12278_v49 = vor.u32 %v16596_v41, %v12277_v40  ;;  %v12282_v53 = vor.u32 %v16594_v42, %v12279_v43 }
  0x65   : > { %1302 = vmatpush.bf16.msra.mxu1 %v12294_v34  ;;  %v699_v50 = vld [vmem:[%s18491_s20 + $0x8] sm:$0xff]  ;;  %v701_v51 = vld [vmem:[%s18491_s20 + $0x18] sm:$0xff]  ;;  %v12199_v54 = vld [vmem:[#allocation6 + $0x1f0] sm:$0xf0]  ;;  %v12198_v60 = vor.u32 %v16576_v46, %v12197_v45  ;;  %vm938_vm3 = vsmask.f32 7424 }
  0x66   : > { %v703_v52 = vld [vmem:[%s18491_s20 + $0x28] sm:$0xff]  ;;  %1360 = vmatpush.bf16.msra.mxu3 %v12298_v38  ;;  %v705_v55 = vld [vmem:[%s18491_s20 + $0x38] sm:$0xff]  ;;  %v741_v56 = vrot.slane %v699_v50, 7  ;;  %v744_v57 = vrot.slane %v701_v51, 7  ;;  %v12181_v63 = vld [vmem:[#allocation6 + $0x1c0] sm:$0xf]  ;;  %v12202_v0 = vor.u32 %v16574_v47, %v12199_v54 }
  0x67   : > { %v748_v58 = vrot.slane %v703_v52, 7  ;;  %v752_v59 = vrot.slane %v705_v55, 7  ;;  %v16572_v2 = vld [vmem:[#allocation6 + $0x1cc] sm:$0xf0]  ;;  %v700_v4 = vld [vmem:[%s18491_s20 + $0x10] sm:$0xff]  ;;  %v707_v17 = vld [vmem:[%s18491_s20 + $0x48] sm:$0xff] }
  0x68   : > { %1270 = vmatpush.bf16.msra.mxu0 %v12214_v44  ;;  %v745_v61 = vsel %vm739_vm0, %v741_v56, %v744_v57  ;;  %790 = vst.msk [vmem:[#allocation2 + $0x8] sm:$0xfe] %vm789_vm1, %v741_v56  ;;  %1328 = vmatpush.bf16.msra.mxu2 %v12218_v48  ;;  %v698_v3 = vld [vmem:[%s18491_s20] sm:$0xff]  ;;  %v16570_v5 = vld [vmem:[#allocation6 + $0x1c4] sm:$0xf]  ;;  %v12182_v11 = vor.u32 %v16572_v2, %v12181_v63  ;;  %v742_v15 = vrot.slane %v700_v4, 7 }
  0x69   : > { %v749_v62 = vsel %vm739_vm0, %v744_v57, %v748_v58  ;;  %1303 = vmatpush.bf16.msra.mxu1 %v12278_v49  ;;  %v753_v1 = vsel %vm739_vm0, %v748_v58, %v752_v59  ;;  %793 = vst.msk [vmem:[#allocation2 + $0x18] sm:$0xff] %vm792_vm2, %v745_v61  ;;  %v12183_v6 = vld [vmem:[#allocation6 + $0x1d0] sm:$0xf0]  ;;  %v12165_v8 = vld [vmem:[#allocation6 + $0x1a0] sm:$0xf]  ;;  %v740_v14 = vrot.slane %v698_v3, 7 }
  0x6a   : > { %1361 = vmatpush.bf16.msra.mxu3 %v12282_v53  ;;  %795 = vst.msk [vmem:[#allocation2 + $0x28] sm:$0xff] %vm792_vm2, %v749_v62  ;;  %v702_v7 = vld [vmem:[%s18491_s20 + $0x20] sm:$0xff]  ;;  %v704_v10 = vld [vmem:[%s18491_s20 + $0x30] sm:$0xff]  ;;  %v12186_v18 = vor.u32 %v16570_v5, %v12183_v6  ;;  %v709_v20 = vld [vmem:[%s18491_s20 + $0x58] sm:$0xff]  ;;  %v756_v21 = vrot.slane %v707_v17, 7  ;;  %vm807_vm4 = vcmask 516096  }
  0x6b   : > { %797 = vst.msk [vmem:[#allocation2 + $0x38] sm:$0xff] %vm792_vm2, %v753_v1  ;;  %v16568_v9 = vld [vmem:[#allocation6 + $0x1ac] sm:$0xf0]  ;;  %v16566_v12 = vld [vmem:[#allocation6 + $0x1a4] sm:$0xf]  ;;  %v746_v16 = vrot.slane %v702_v7, 7  ;;  %v18514_v24 = vsel %vm739_vm0, %v740_v14, %v742_v15 }
  0x6c   : > { %1271 = vmatpush.bf16.msra.mxu0 %v12198_v60  ;;  %v12167_v13 = vld [vmem:[#allocation6 + $0x1b0] sm:$0xf0]  ;;  %1329 = vmatpush.bf16.msra.mxu2 %v12202_v0  ;;  %v750_v19 = vrot.slane %v704_v10, 7  ;;  %v18511_v23 = vld [vmem:[%s18491_s20 + $0x50] sm:$0xff]  ;;  %788 = vst [vmem:[#allocation2] sm:$0xfe] %v740_v14  ;;  %v757_v32 = vsel %vm739_vm0, %v752_v59, %v756_v21  ;;  %v12166_v35 = vor.u32 %v16568_v9, %v12165_v8 }
  0x6d   : > { %v706_v22 = vld [vmem:[%s18491_s20 + $0x40] sm:$0xff]  ;;  %v747_v25 = vsel %vm739_vm0, %v742_v15, %v746_v16  ;;  %v760_v26 = vrot.slane %v709_v20, 7  ;;  %v711_v28 = vld [vmem:[%s18491_s20 + $0x68] sm:$0xff]  ;;  %v18519_v29 = vld [vmem:[%s18491_s20 + $0x78] sm:$0xff]  ;;  %791 = vst [vmem:[#allocation2 + $0x10] sm:$0xff] %v18514_v24  ;;  %v758_v37 = vrot.slane %v18511_v23, 7  ;;  %v12170_v41 = vor.u32 %v16566_v12, %v12167_v13 }
  0x6e   : > { %v754_v27 = vrot.slane %v706_v22, 7  ;;  %v751_v31 = vsel %vm739_vm0, %v746_v16, %v750_v19  ;;  %v764_v33 = vrot.slane %v711_v28, 7  ;;  %v768_v38 = vrot.slane %v18519_v29, 7  ;;  %v12149_v42 = vld [vmem:[#allocation6 + $0x180] sm:$0xf]  ;;  %799 = vst.msk [vmem:[#allocation2 + $0x48] sm:$0xff] %vm792_vm2, %v757_v32 }
  0x6f   : > { %v882_v30 = vld [vmem:[#allocation2 + $0x8] sm:$0xfe]  ;;  %v761_v36 = vsel %vm739_vm0, %v756_v21, %v760_v26  ;;  %v16564_v43 = vld [vmem:[#allocation6 + $0x18c] sm:$0xf0]  ;;  %v18530_v44 = vpack.c.bf16 %v751_v31, %v747_v25  ;;  %v16562_v46 = vld [vmem:[#allocation6 + $0x184] sm:$0xf] }
  0x70   : > { %v18524_v34 = vld [vmem:[#allocation2 + $0x18] sm:$0xff]  ;;  %1272 = vmatpush.bf16.msra.mxu0 %v12182_v11  ;;  %1330 = vmatpush.bf16.msra.mxu2 %v12186_v18  ;;  %v12151_v47 = vld [vmem:[#allocation6 + $0x190] sm:$0xf0]  ;;  %v18534_v48 = vsel %vm739_vm0, %v750_v19, %v754_v27  ;;  %801 = vst.msk [vmem:[#allocation2 + $0x58] sm:$0xff] %vm792_vm2, %v761_v36  ;;  %v765_v52 = vsel %vm739_vm0, %v760_v26, %v764_v33  ;;  %v16593_v3 = vld [vmem:[#allocation6 + $0x274] sm:$0xf0] }
  0x71   : > { %v814_v39 = vld [vmem:[#allocation2 + $0x28] sm:$0xff]  ;;  %v886_v40 = vpack.c.bf16 %v18524_v34, %v882_v30  ;;  %v12150_v53 = vor.u32 %v16564_v43, %v12149_v42  ;;  %v759_v54 = vsel %vm739_vm0, %v754_v27, %v758_v37  ;;  %v769_v55 = vsel %vm739_vm0, %v764_v33, %v768_v38  ;;  %803 = vst.msk [vmem:[#allocation2 + $0x68] sm:$0xff] %vm792_vm2, %v765_v52  ;;  %v12269_v2 = vld [vmem:[#allocation6 + $0x268] sm:$0xf]  ;;  %v16607_v13 = vld [vmem:[#allocation6 + $0x2ec] sm:$0xf] }
  0x72   : > { %v816_v45 = vld [vmem:[#allocation2 + $0x38] sm:$0xff]  ;;  %v12154_v58 = vor.u32 %v16562_v46, %v12151_v47  ;;  %v947_v60 = vshll.u32 %v18530_v44, 16  ;;  %805 = vst.msk [vmem:[#allocation2 + $0x78] sm:$0xff] %vm792_vm2, %v769_v55  ;;  %v12270_v7 = vor.u32 %v16593_v3, %v12269_v2  ;;  %v16589_v11 = vld [vmem:[#allocation6 + $0x254] sm:$0xf0]  ;;  %v710_v26 = vld [vmem:[%s18491_s20 + $0x60] sm:$0xff] }
  0x73   : > { %v18536_v49 = vpack.c.bf16 %v816_v45, %v814_v39  ;;  %v952_v50 = vshrl.u32 %v886_v40, 16  ;;  %v954_v51 = vshll.u32 %v886_v40, 16  ;;  %v881_v59 = vld [vmem:[#allocation2] sm:$0xfe]  ;;  %v12253_v10 = vld [vmem:[#allocation6 + $0x248] sm:$0xf]  ;;  %v18570_v39 = vpack.c.bf16 %v759_v54, %v18534_v48 }
  0x74   : > { %1273 = vmatpush.bf16.msra.mxu0 %v12166_v35  ;;  %1331 = vmatpush.bf16.msra.mxu2 %v12170_v41  ;;  %v885_v61 = vpack.c.bf16 %v18514_v24, %v881_v59  ;;  %v949_v5 = vrot.slane %v947_v60, 1  ;;  %v12335_v14 = vld [vmem:[#allocation6 + $0x2f8] sm:$0xf0]  ;;  %v12254_v16 = vor.u32 %v16589_v11, %v12253_v10  ;;  %v12237_v18 = vld [vmem:[#allocation6 + $0x228] sm:$0xf]  ;;  %v712_v30 = vld [vmem:[%s18491_s20 + $0x70] sm:$0xff] }
  0x75   : > { %v956_v56 = vrot.slane %v954_v51, 1  ;;  %v959_v57 = vshll.u32 %v18536_v49, 16  ;;  %v818_v6 = vld [vmem:[#allocation2 + $0x48] sm:$0xff]  ;;  %1383 = vmatpush.bf16.msrb.mxu1 %v12270_v7  ;;  %v12338_v17 = vor.u32 %v16607_v13, %v12335_v14  ;;  %v12333_v19 = vld [vmem:[#allocation6 + $0x2e8] sm:$0xf]  ;;  %v762_v31 = vrot.slane %v710_v26, 7 }
  0x76   : > { %v940_v0 = vshrl.u32 %v885_v61, 16  ;;  %v942_v1 = vshll.u32 %v885_v61, 16  ;;  %v16609_v20 = vld [vmem:[#allocation6 + $0x2f4] sm:$0xf0]  ;;  %v16591_v25 = vld [vmem:[#allocation6 + $0x26c] sm:$0xf] }
  0x77   : > { %v957_v62 = vor.u32 %v956_v56, %v952_v50  ;;  %v961_v63 = vrot.slane %v959_v57, 1  ;;  %v820_v9 = vld [vmem:[#allocation2 + $0x58] sm:$0xff]  ;;  %v16585_v21 = vld [vmem:[#allocation6 + $0x234] sm:$0xf0]  ;;  %v12334_v22 = vor.u32 %v16609_v20, %v12333_v19  ;;  %v12271_v28 = vld [vmem:[#allocation6 + $0x278] sm:$0xf0]  ;;  %v763_v41 = vsel %vm739_vm0, %v758_v37, %v762_v31 }
  0x78   : > { %1274 = vmatpush.bf16.msra.mxu0 %v12150_v53  ;;  %1332 = vmatpush.bf16.msra.mxu2 %v12154_v58  ;;  %v944_v8 = vrot.slane %v942_v1, 1  ;;  %v18558_v12 = vpack.c.bf16 %v820_v9, %v818_v6  ;;  %v971_v32 = vshrl.u32 %v18536_v49, 16  ;;  %v12274_v35 = vor.u32 %v16591_v25, %v12271_v28  ;;  %v12221_v43 = vld [vmem:[#allocation6 + $0x208] sm:$0xf]  ;;  %v16581_v45 = vld [vmem:[#allocation6 + $0x214] sm:$0xf0] }
  0x79   : > { %v18552_v4 = vsel %vm938_vm3, %v957_v62, %v961_v63  ;;  %v766_v36 = vrot.slane %v712_v30, 7  ;;  %1384 = vmatpush.bf16.msrb.mxu1 %v12254_v16  ;;  %v12238_v40 = vor.u32 %v16585_v21, %v12237_v18  ;;  %1416 = vmatpush.bf16.msrb.mxu3 %v12334_v22  ;;  %v963_v48 = vshrl.u32 %v18530_v44, 16  ;;  %808 = vst.msk [vmem:[#allocation2 + $0x88] sm:$0x1] %vm807_vm4, %v768_v38  ;;  %v822_v37 = vld [vmem:[#allocation2 + $0x68] sm:$0xff]  ;;  %v824_v54 = vld [vmem:[#allocation2 + $0x78] sm:$0xff] }
  0x7a   : > { %12339 = vmatmul.msk.bf16.vlgmr.msra.gmra.mxu1 %vm792_vm2, %v18552_v4  ;;  %12343 = vmatmul.msk.bf16.vlgmr.msra.gmra.mxu3 %vm792_vm2, %v18552_v4  ;;  %v945_v15 = vor.u32 %v944_v8, %v940_v0  ;;  %v975_v33 = vshll.u32 %v18558_v12, 16  ;;  %v973_v46 = vor.u32 %v971_v32, %v961_v63  ;;  %v967_v50 = vshll.u32 %v18570_v39, 16  ;;  %v12205_v55 = vld [vmem:[#allocation6 + $0x1e8] sm:$0xf]  ;;  %v16577_v56 = vld [vmem:[#allocation6 + $0x1f4] sm:$0xf0] }
  0x7b   : > { %v767_v42 = vsel %vm739_vm0, %v762_v31, %v766_v36  ;;  %806 = vst [vmem:[#allocation2 + $0x80] sm:$0x1] %v766_v36  ;;  %v12222_v51 = vor.u32 %v16581_v45, %v12221_v43  ;;  %v965_v52 = vor.u32 %v963_v48, %v949_v5  ;;  %v12206_v57 = vor.u32 %v16577_v56, %v12205_v55  ;;  %v16587_v58 = vld [vmem:[#allocation6 + $0x24c] sm:$0xf]  ;;  %v12255_v59 = vld [vmem:[#allocation6 + $0x258] sm:$0xf0] }
  0x7c   : > { %v18562_v27 = vsel %vm938_vm3, %v945_v15, %v949_v5  ;;  %1474 = vmatpush.bf16.msrb.mxu2 %v12338_v17  ;;  %1441 = vmatpush.bf16.msrb.mxu0 %v12274_v35  ;;  %v18576_v47 = vrot.slane %v975_v33, 1  ;;  %v18586_v53 = vrot.slane %v967_v50, 1  ;;  %v12258_v29 = vor.u32 %v16587_v58, %v12255_v59  ;;  %v12189_v38 = vld [vmem:[#allocation6 + $0x1c8] sm:$0xf]  ;;  %v16573_v60 = vld [vmem:[#allocation6 + $0x1d4] sm:$0xf0] }
  0x7d   : > { %1275 = vmatmul.bf16.vlgmr.msra.gmra.mxu0 %v18562_v27  ;;  %1333 = vmatmul.bf16.vlgmr.msra.gmra.mxu2 %v18562_v27  ;;  %v12317_v61 = vld [vmem:[#allocation6 + $0x2c8] sm:$0xf]  ;;  %v18592_v62 = vpack.c.bf16 %v824_v54, %v822_v37  ;;  %v16605_v63 = vld [vmem:[#allocation6 + $0x2d4] sm:$0xf0]  ;;  %v16583_v0 = vld [vmem:[#allocation6 + $0x22c] sm:$0xf]  ;;  %v12190_v2 = vor.u32 %v16573_v60, %v12189_v38  ;;  %v18602_v20 = vpack.c.bf16 %v767_v42, %v763_v41 }
  0x7e   : > { %1385 = vmatpush.bf16.msrb.mxu1 %v12238_v40  ;;  %v18584_v23 = vsel %vm938_vm3, %v973_v46, %v18576_v47  ;;  %v18596_v1 = vsel %vm938_vm3, %v965_v52, %v18586_v53  ;;  %v12318_v3 = vor.u32 %v16605_v63, %v12317_v61  ;;  %v12239_v5 = vld [vmem:[#allocation6 + $0x238] sm:$0xf0]  ;;  %v16603_v6 = vld [vmem:[#allocation6 + $0x2cc] sm:$0xf]  ;;  %v12173_v10 = vld [vmem:[#allocation6 + $0x1a8] sm:$0xf] }
  0x7f   : > { %v12319_v7 = vld [vmem:[#allocation6 + $0x2d8] sm:$0xf0]  ;;  %v12242_v8 = vor.u32 %v16583_v0, %v12239_v5  ;;  %v16569_v11 = vld [vmem:[#allocation6 + $0x1b4] sm:$0xf0]  ;;  %v12301_v13 = vld [vmem:[#allocation6 + $0x2a8] sm:$0xf] }
  0x80   : > { %1442 = vmatpush.bf16.msrb.mxu0 %v12258_v29  ;;  %v12322_v9 = vor.u32 %v16603_v6, %v12319_v7  ;;  %1417 = vmatpush.bf16.msrb.mxu3 %v12318_v3  ;;  %v16601_v14 = vld [vmem:[#allocation6 + $0x2b4] sm:$0xf0]  ;;  %v16579_v15 = vld [vmem:[#allocation6 + $0x20c] sm:$0xf]  ;;  %v987_v16 = vshrl.u32 %v18558_v12, 16  ;;  %v991_v17 = vshll.u32 %v18592_v62, 16  ;;  %v12174_v21 = vor.u32 %v16569_v11, %v12173_v10 }
  0x81   : > { %v12302_v18 = vor.u32 %v16601_v14, %v12301_v13  ;;  %v12223_v19 = vld [vmem:[#allocation6 + $0x218] sm:$0xf0]  ;;  %v12157_v25 = vld [vmem:[#allocation6 + $0x188] sm:$0xf]  ;;  %v16565_v26 = vld [vmem:[#allocation6 + $0x194] sm:$0xf0] }
  0x82   : > { %1386 = vmatpush.bf16.msrb.mxu1 %v12222_v51  ;;  %v12226_v22 = vor.u32 %v16579_v15, %v12223_v19  ;;  %v12285_v28 = vld [vmem:[#allocation6 + $0x288] sm:$0xf]  ;;  %1475 = vmatpush.bf16.msrb.mxu2 %v12322_v9  ;;  %v16597_v30 = vld [vmem:[#allocation6 + $0x294] sm:$0xf0]  ;;  %v16575_v31 = vld [vmem:[#allocation6 + $0x1ec] sm:$0xf]  ;;  %v989_v35 = vor.u32 %v987_v16, %v18576_v47  ;;  %v12158_v42 = vor.u32 %v16565_v26, %v12157_v25 }
  0x83   : > { %v12207_v32 = vld [vmem:[#allocation6 + $0x1f8] sm:$0xf0]  ;;  %v12286_v33 = vor.u32 %v16597_v30, %v12285_v28  ;;  %v993_v36 = vrot.slane %v991_v17, 1  ;;  %v979_v40 = vshrl.u32 %v18570_v39, 16  ;;  %v983_v41 = vshll.u32 %v18602_v20, 16  ;;  %s690_s2 = sand.u32 1, %s18191_s19  }
  0x84   : > { %1443 = vmatpush.bf16.msrb.mxu0 %v12242_v8  ;;  %1418 = vmatpush.bf16.msrb.mxu3 %v12302_v18  ;;  %v12210_v43 = vor.u32 %v16575_v31, %v12207_v32  ;;  %v884_v50 = vld [vmem:[#allocation2 + $0x88] sm:$0x1]  ;;  %v16571_v47 = vld [vmem:[#allocation6 + $0x1cc] sm:$0xf]  ;;  %v12191_v51 = vld [vmem:[#allocation6 + $0x1d8] sm:$0xf0] }
  0x85   : > { %v18608_v45 = vsel %vm938_vm3, %v989_v35, %v993_v36  ;;  %v981_v46 = vor.u32 %v979_v40, %v18586_v53  ;;  %v985_v48 = vrot.slane %v983_v41, 1  ;;  %v12194_v37 = vor.u32 %v16571_v47, %v12191_v51  ;;  %v16567_v52 = vld [vmem:[#allocation6 + $0x1ac] sm:$0xf]  ;;  %v12175_v54 = vld [vmem:[#allocation6 + $0x1b8] sm:$0xf0]  ;;  %s21247_s15 = sld [smem:[#allocation67_spill]] }
  0x86   : > { %1387 = vmatpush.bf16.msrb.mxu1 %v12206_v57  ;;  %v16599_v55 = vld [vmem:[#allocation6 + $0x2ac] sm:$0xf]  ;;  %v888_v56 = vpack.c.bf16 %v884_v50, %v884_v50  ;;  %v12303_v57 = vld [vmem:[#allocation6 + $0x2b8] sm:$0xf0]  ;;  %v12178_v58 = vor.u32 %v16567_v52, %v12175_v54  ;;  %v883_v60 = vld [vmem:[#allocation2 + $0x80] sm:$0x1] }
  0x87   : > { %v18616_v53 = vsel %vm938_vm3, %v981_v46, %v985_v48  ;;  %v12306_v59 = vor.u32 %v16599_v55, %v12303_v57  ;;  %v16595_v29 = vld [vmem:[#allocation6 + $0x28c] sm:$0xf]  ;;  %v12287_v38 = vld [vmem:[#allocation6 + $0x298] sm:$0xf0]  ;;  %v887_v5 = vpack.c.bf16 %v883_v60, %v883_v60  ;;  %v995_v9 = vshrl.u32 %v18602_v20, 16  ;;  %s691_s21 = scalar_lea.vmem [#allocation27], %s690_s2 }
  0x88   : > { %1444 = vmatpush.bf16.msrb.mxu0 %v12226_v22  ;;  %1419 = vmatpush.bf16.msrb.mxu3 %v12286_v33  ;;  %v16563_v61 = vld [vmem:[#allocation6 + $0x18c] sm:$0xf]  ;;  %v12159_v63 = vld [vmem:[#allocation6 + $0x198] sm:$0xf0]  ;;  %v12290_v0 = vor.u32 %v16595_v29, %v12287_v38  ;;  %v1007_v3 = vshll.u32 %v888_v56, 16  ;;  %vm2047_vm6 = vcmask 1046528  }
  0x89   : > { %1476 = vmatpush.bf16.msrb.mxu2 %v12306_v59  ;;  %v12162_v6 = vor.u32 %v16563_v61, %v12159_v63  ;;  %v999_v10 = vshll.u32 %v887_v5, 16  ;;  %v997_v13 = vor.u32 %v995_v9, %v985_v48  ;;  %v12469_v16 = vld [vmem:[#allocation6 + $0xe0] sm:$0xf]  ;;  %v16544_v17 = vld [vmem:[#allocation6 + $0xec] sm:$0xf0]  ;;  %vm10224_vm9 = vcmask 261120  }
  0x8a   : > { %12340 = vmatmul.msk.bf16.gmra.mxu1 %vm792_vm2, %v18584_v23  ;;  %12344 = vmatmul.msk.bf16.gmra.mxu3 %vm792_vm2, %v18584_v23  ;;  %v1009_v8 = vrot.slane %v1007_v3, 1  ;;  %v12470_v18 = vor.u32 %v16544_v17, %v12469_v16  ;;  %v12453_v19 = vld [vmem:[#allocation6 + $0xc0] sm:$0xf]  ;;  %v16558_v22 = vld [vmem:[#allocation6 + $0x164] sm:$0xf]  ;;  %s11932_s24 = sshll.u32 %s691_s21, 4  ;;  %s11933_s24 = int_to_ptr.vmem [resolvable:$true] %s11932_s24 }
  0x8b   : > { %1388 = vmatpush.bf16.msrb.mxu1 %v12190_v2  ;;  %v1003_v2 = vshrl.u32 %v18592_v62, 16  ;;  %v1001_v14 = vrot.slane %v999_v10, 1  ;;  %v12535_v25 = vld [vmem:[#allocation6 + $0x170] sm:$0xf0]  ;;  %v12533_v30 = vld [vmem:[#allocation6 + $0x160] sm:$0xf]  ;;  %s11930_s27 = scalar_lea.hbm %s21247_s15, %s18322_s22 }
  0x8c   : > { %1445 = vmatpush.bf16.msrb.mxu0 %v12210_v43  ;;  %v12538_v28 = vor.u32 %v16558_v22, %v12535_v25  ;;  %v16560_v31 = vld [vmem:[#allocation6 + $0x16c] sm:$0xf0]  ;;  %v16542_v32 = vld [vmem:[#allocation6 + $0xe4] sm:$0xf]  ;;  %v12437_v33 = vld [vmem:[#allocation6 + $0xa0] sm:$0xf] }
  0x8d   : > { %1280 = vmatmul.bf16.gmra.mxu0 %v18596_v1  ;;  %1338 = vmatmul.bf16.gmra.mxu2 %v18596_v1  ;;  %v1005_v7 = vor.u32 %v1003_v2, %v993_v36  ;;  %v18630_v15 = vsel %vm938_vm3, %v997_v13, %v1001_v14  ;;  %v16536_v35 = vld [vmem:[#allocation6 + $0xac] sm:$0xf0]  ;;  %v12534_v36 = vor.u32 %v16560_v31, %v12533_v30  ;;  %v12471_v40 = vld [vmem:[#allocation6 + $0xf0] sm:$0xf0]  ;;  %v12421_v43 = vld [vmem:[#allocation6 + $0x80] sm:$0xf] }
  0x8e   : > { %1477 = vmatpush.bf16.msrb.mxu2 %v12290_v0  ;;  %v12474_v41 = vor.u32 %v16542_v32, %v12471_v40  ;;  %v16532_v46 = vld [vmem:[#allocation6 + $0x8c] sm:$0xf0]  ;;  %v12405_v50 = vld [vmem:[#allocation6 + $0x60] sm:$0xf]  ;;  %v12455_v52 = vld [vmem:[#allocation6 + $0xd0] sm:$0xf0] }
  0x8f   : > { %1389 = vmatpush.bf16.msrb.mxu1 %v12174_v21  ;;  %v18623_v11 = vsel %vm938_vm3, %v1005_v7, %v1009_v8  ;;  %v16540_v21 = vld [vmem:[#allocation6 + $0xcc] sm:$0xf0]  ;;  %1781 = vmatpush.bf16.msra.mxu3 %v12534_v36  ;;  %v12422_v48 = vor.u32 %v16532_v46, %v12421_v43  ;;  %v12517_v55 = vld [vmem:[#allocation6 + $0x140] sm:$0xf]  ;;  %v16534_v57 = vld [vmem:[#allocation6 + $0xa4] sm:$0xf] }
  0x90   : > { %1446 = vmatpush.bf16.msrb.mxu0 %v12194_v37  ;;  %v12454_v26 = vor.u32 %v16540_v21, %v12453_v19  ;;  %v16528_v47 = vld [vmem:[#allocation6 + $0x6c] sm:$0xf0]  ;;  %v16538_v37 = vld [vmem:[#allocation6 + $0xc4] sm:$0xf]  ;;  %v12519_v61 = vld [vmem:[#allocation6 + $0x150] sm:$0xf0] }
  0x91   : > { %v12406_v51 = vor.u32 %v16528_v47, %v12405_v50  ;;  %v16524_v54 = vld [vmem:[#allocation6 + $0x4c] sm:$0xf0]  ;;  %v16554_v60 = vld [vmem:[#allocation6 + $0x144] sm:$0xf]  ;;  %v12373_v63 = vld [vmem:[#allocation6 + $0x20] sm:$0xf] }
  0x92   : > { %1839 = vmatpush.bf16.msra.mxu2 %v12538_v28  ;;  %v16556_v56 = vld [vmem:[#allocation6 + $0x14c] sm:$0xf0]  ;;  %v12522_v0 = vor.u32 %v16554_v60, %v12519_v61  ;;  %v12501_v3 = vld [vmem:[#allocation6 + $0x120] sm:$0xf]  ;;  %v16530_v8 = vld [vmem:[#allocation6 + $0x84] sm:$0xf] }
  0x93   : > { %1390 = vmatpush.bf16.msrb.mxu1 %v12158_v42  ;;  %v12438_v42 = vor.u32 %v16536_v35, %v12437_v33  ;;  %v12518_v29 = vor.u32 %v16556_v56, %v12517_v55  ;;  %v16520_v2 = vld [vmem:[#allocation6 + $0x2c] sm:$0xf0]  ;;  %v12423_v9 = vld [vmem:[#allocation6 + $0x90] sm:$0xf0]  ;;  %v21114_v14 = vmov 0.0   ;;  %s11934_s29 = sshll.u32 %s11930_s27, 4  ;;  %s11935_s29 = int_to_ptr.hbm [resolvable:$true] %s11934_s29 }
  0x94   : > { %1447 = vmatpush.bf16.msrb.mxu0 %v12178_v58  ;;  %v12439_v58 = vld [vmem:[#allocation6 + $0xb0] sm:$0xf0]  ;;  %v16552_v5 = vld [vmem:[#allocation6 + $0x12c] sm:$0xf0]  ;;  %v12374_v10 = vor.u32 %v16520_v2, %v12373_v63  ;;  %v12426_v13 = vor.u32 %v16530_v8, %v12423_v9  ;;  %v12357_v16 = vld [vmem:[#allocation6] sm:$0xf] }
  0x95   : > { %v12442_v38 = vor.u32 %v16534_v57, %v12439_v58  ;;  %1782 = vmatpush.bf16.msra.mxu3 %v12518_v29  ;;  %v12502_v7 = vor.u32 %v16552_v5, %v12501_v3  ;;  %v12485_v17 = vld [vmem:[#allocation6 + $0x100] sm:$0xf]  ;;  %v16526_v19 = vld [vmem:[#allocation6 + $0x64] sm:$0xf]  ;;  %v12407_v21 = vld [vmem:[#allocation6 + $0x70] sm:$0xf0] }
  0x96   : > { %1840 = vmatpush.bf16.msra.mxu2 %v12522_v0  ;;  %v12410_v25 = vor.u32 %v16526_v19, %v12407_v21  ;;  %v12391_v28 = vld [vmem:[#allocation6 + $0x50] sm:$0xf0]  ;;  %v16518_v31 = vld [vmem:[#allocation6 + $0x24] sm:$0xf]  ;;  %v12543_v58 = vld [vmem:[#allocation6 + $0x178] sm:$0xf0] }
  0x97   : > { %1748 = vmatpush.bf16.msra.mxu1 %v12470_v18  ;;  %v12375_v32 = vld [vmem:[#allocation6 + $0x30] sm:$0xf0]  ;;  %v16550_v33 = vld [vmem:[#allocation6 + $0x124] sm:$0xf]  ;;  %v12541_v60 = vld [vmem:[#allocation6 + $0x168] sm:$0xf] }
  0x98   : > { %1448 = vmatpush.bf16.msrb.mxu0 %v12162_v6  ;;  %v21116_v6 = vlaneseq  ;;  %v12378_v35 = vor.u32 %v16518_v31, %v12375_v32  ;;  %v12503_v36 = vld [vmem:[#allocation6 + $0x130] sm:$0xf0]  ;;  %v16546_v43 = vld [vmem:[#allocation6 + $0x104] sm:$0xf]  ;;  %v16561_v61 = vld [vmem:[#allocation6 + $0x174] sm:$0xf0] }
  0x99   : > { %1783 = vmatpush.bf16.msra.mxu3 %v12502_v7  ;;  %v12506_v40 = vor.u32 %v16550_v33, %v12503_v36  ;;  %v12487_v46 = vld [vmem:[#allocation6 + $0x110] sm:$0xf0]  ;;  %v12542_v0 = vor.u32 %v16561_v61, %v12541_v60  ;;  %v12429_v7 = vld [vmem:[#allocation6 + $0x88] sm:$0xf]  ;;  %v16533_v8 = vld [vmem:[#allocation6 + $0x94] sm:$0xf0] }
  0x9a   : > { %12341 = vmatmul.msk.bf16.gmra.mxu1 %vm792_vm2, %v18608_v45  ;;  %12345 = vmatmul.msk.bf16.gmra.mxu3 %vm792_vm2, %v18608_v45  ;;  %vm716_vm5 = vcmp.lt.s32.totalorder %v21116_v6, 192  ;;  %v12490_v50 = vor.u32 %v16546_v43, %v12487_v46  ;;  %v16529_v19 = vld [vmem:[#allocation6 + $0x74] sm:$0xf0]  ;;  %v12397_v32 = vld [vmem:[#allocation6 + $0x48] sm:$0xf]  ;;  %vm2660_vm7 = vcmp.lt.s32.totalorder %v21116_v6, 512 }
  0x9b   : > { %1749 = vmatpush.bf16.msra.mxu1 %v12454_v26  ;;  %718 = vst.msk [vmem:[#allocation2] ss:$8 sm:$0x3] %vm716_vm5, %v21114_v14  ;;  %v16522_v26 = vld [vmem:[#allocation6 + $0x44] sm:$0xf]  ;;  %1841 = vmatpush.bf16.msra.mxu2 %v12506_v40  ;;  %vm11919_vm10 = vcmask 16384  }
  0x9c   : > { %1806 = vmatpush.bf16.msra.mxu0 %v12474_v41  ;;  %721 = vst.msk [vmem:[#allocation2 + $0x81] ss:$8 sm:$0x3] %vm716_vm5, %v21114_v14  ;;  %v12394_v30 = vor.u32 %v16522_v26, %v12391_v28  ;;  %v16514_v41 = vld [vmem:[#allocation6 + $0x4] sm:$0xf]  ;;  %s11922_s30 = scalar_lea.sflag [#allocation8], %s690_s2 }
  0x9d   : > { %1285 = vmatmul.bf16.gmra.mxu0 %v18616_v53  ;;  %1343 = vmatmul.bf16.gmra.mxu2 %v18616_v53  ;;  %v16525_v33 = vld [vmem:[#allocation6 + $0x54] sm:$0xf0]  ;;  %v16535_v43 = vld [vmem:[#allocation6 + $0xac] sm:$0xf]  ;;  %v12447_v46 = vld [vmem:[#allocation6 + $0xb8] sm:$0xf0] }
  0x9e   : > { %v16517_v60 = vld [vmem:[#allocation6 + $0x14] sm:$0xf0]  ;;  %v12493_v61 = vld [vmem:[#allocation6 + $0x108] sm:$0xf]  ;;  %v16840_v6 = vld [vmem:[#allocation9 + $0x5ac] sm:$0xf0] }
  0x9f   : > { %1750 = vmatpush.bf16.msra.mxu1 %v12438_v42  ;;  %v12359_v42 = vld [vmem:[#allocation6 + $0x10] sm:$0xf0]  ;;  %1842 = vmatpush.bf16.msra.mxu2 %v12490_v50  ;;  %v12450_v50 = vor.u32 %v16535_v43, %v12447_v46  ;;  %v16547_v43 = vld [vmem:[#allocation6 + $0x10c] sm:$0xf]  ;;  %v12495_v46 = vld [vmem:[#allocation6 + $0x118] sm:$0xf0] }
  0xa0   : > { %s18123_s25 = sshra.s32 %s11935_s29, 4  ;;  %s18129_s20 = scalar_lea.hbm %s21247_s15, 2  ;;  %s18124_s25 = int_to_ptr.hbm [resolvable:$true] %s18123_s25 }
  0xa1   : > { %s18125_s16 = scalar_lea.hbm %s18124_s25, 1  ;;  %p18130_p3 = scmp.lt.s32.totalorder %s18124_s25, %s21247_s15 }
  0xa2   : > { %p18126_p0 = scmp.ne.s32.totalorder %s18124_s25, %s18125_s16  ;;  %p18131_p4 = scmp.lt.s32.totalorder %s18129_s20, %s18125_s16 }
  0xa3   : > { %1751 = vmatpush.bf16.msra.mxu1 %v12422_v48  ;;  %v12362_v48 = vor.u32 %v16514_v41, %v12359_v42  ;;  %v12398_v41 = vor.u32 %v16525_v33, %v12397_v32  ;;  %v16557_v42 = vld [vmem:[#allocation6 + $0x154] sm:$0xf0]  ;;  %v12511_v33 = vld [vmem:[#allocation6 + $0x138] sm:$0xf0] }
  0xa4   : > { %p18127_p1 = pnand %p18126_p0, %p18339_p5  ;;  %p18132_p7 = por %p18131_p4, %p18130_p3 }
  0xa6   : > { %p18128_p2 = pneg %p18127_p1 }
  0xa7   : > { %1752 = vmatpush.bf16.msra.mxu1 %v12406_v51 }
  0xa8   : > { %p18133_p8 = pnand %p18132_p7, %p18128_p2 }
  0xaa   : > { %12342 = vmatmul.msk.bf16.gmra.mxu1 %vm792_vm2, %v18623_v11  ;;  %12346 = vmatmul.msk.bf16.gmra.mxu3 %vm792_vm2, %v18623_v11 }
  0xad   : > { %1290 = vmatmul.bf16.gmra.mxu0 %v18630_v15  ;;  %1348 = vmatmul.bf16.gmra.mxu2 %v18630_v15 }
  0xba   : > { %1391 = vmatmul.bf16.vlgmr.msrb.gmra.mxu1 %v18562_v27  ;;  %12347 = vmatmul.msk.bf16.vlgmr.msrb.gmra.mxu3 %vm792_vm2, %v18552_v4 }
  0xbd   : > { %1449 = vmatmul.bf16.vlgmr.msrb.gmra.mxu0 %v18562_v27  ;;  %12351 = vmatmul.msk.bf16.vlgmr.msrb.gmra.mxu2 %vm792_vm2, %v18552_v4  ;;  %v12458_v4 = vor.u32 %v16538_v37, %v12455_v52  ;;  %v12389_v27 = vld [vmem:[#allocation6 + $0x40] sm:$0xf]  ;;  %v12477_v52 = vld [vmem:[#allocation6 + $0xe8] sm:$0xf] }
  0xbe   : > { %v12390_v59 = vor.u32 %v16524_v54, %v12389_v27  ;;  %v16541_v54 = vld [vmem:[#allocation6 + $0xd4] sm:$0xf0] }
  0xbf   : > { %1807 = vmatpush.bf16.msra.mxu0 %v12458_v4  ;;  %v16545_v4 = vld [vmem:[#allocation6 + $0xf4] sm:$0xf0] }
  0xc0   : > { %1753 = vmatpush.bf16.msra.mxu1 %v12390_v59  ;;  %v12478_v27 = vor.u32 %v16545_v4, %v12477_v52  ;;  %v12445_v59 = vld [vmem:[#allocation6 + $0xa8] sm:$0xf] }
  0xc1   : > { %v12381_v52 = vld [vmem:[#allocation6 + $0x28] sm:$0xf] }
  0xc3   : > { %1808 = vmatpush.bf16.msra.mxu0 %v12442_v38  ;;  %v16537_v38 = vld [vmem:[#allocation6 + $0xb4] sm:$0xf0] }
  0xc4   : > { %1754 = vmatpush.bf16.msra.mxu1 %v12374_v10  ;;  %v12446_v63 = vor.u32 %v16537_v38, %v12445_v59  ;;  %v12365_v38 = vld [vmem:[#allocation6 + $0x8] sm:$0xf] }
  0xc7   : > { %1809 = vmatpush.bf16.msra.mxu0 %v12426_v13  ;;  %v16543_v13 = vld [vmem:[#allocation6 + $0xec] sm:$0xf] }
  0xca   : > { %1396 = vmatmul.bf16.gmra.mxu1 %v18596_v1  ;;  %12348 = vmatmul.msk.bf16.gmra.mxu3 %vm792_vm2, %v18584_v23 }
  0xcb   : > { %1810 = vmatpush.bf16.msra.mxu0 %v12410_v25  ;;  %v12463_v25 = vld [vmem:[#allocation6 + $0xd8] sm:$0xf0] }
  0xcd   : > { %1454 = vmatmul.bf16.gmra.mxu0 %v18596_v1  ;;  %12352 = vmatmul.msk.bf16.gmra.mxu2 %vm792_vm2, %v18584_v23  ;;  %v16516_v1 = vld [vmem:[#allocation6 + $0xc] sm:$0xf0] }
  0xce   : > { %v12358_v18 = vor.u32 %v16516_v1, %v12357_v16  ;;  %v16548_v23 = vld [vmem:[#allocation6 + $0x10c] sm:$0xf0]  ;;  %v12479_v16 = vld [vmem:[#allocation6 + $0xf8] sm:$0xf0]  ;;  %v12430_v1 = vor.u32 %v16533_v8, %v12429_v7  ;;  %v16527_v7 = vld [vmem:[#allocation6 + $0x6c] sm:$0xf] }
  0xcf   : > { %v12486_v22 = vor.u32 %v16548_v23, %v12485_v17  ;;  %1811 = vmatpush.bf16.msra.mxu0 %v12394_v30  ;;  %v12482_v17 = vor.u32 %v16543_v13, %v12479_v16  ;;  %v12413_v23 = vld [vmem:[#allocation6 + $0x68] sm:$0xf]  ;;  %v12415_v8 = vld [vmem:[#allocation6 + $0x78] sm:$0xf0] }
  0xd0   : > { %1755 = vmatpush.bf16.msra.mxu1 %v12358_v18  ;;  %v12414_v21 = vor.u32 %v16529_v19, %v12413_v23  ;;  %v12418_v13 = vor.u32 %v16527_v7, %v12415_v8 }
  0xd1   : > { %1784 = vmatpush.bf16.msra.mxu3 %v12486_v22  ;;  %v16539_v22 = vld [vmem:[#allocation6 + $0xcc] sm:$0xf] }
  0xd2   : > { %v12466_v28 = vor.u32 %v16539_v22, %v12463_v25 }
  0xd3   : > { %1812 = vmatpush.bf16.msra.mxu0 %v12378_v35  ;;  %v12525_v35 = vld [vmem:[#allocation6 + $0x148] sm:$0xf] }
  0xd4   : > { %1864 = vmatpush.bf16.msrb.mxu1 %v12478_v27  ;;  %v16521_v27 = vld [vmem:[#allocation6 + $0x34] sm:$0xf0] }
  0xd5   : > { %1897 = vmatpush.bf16.msrb.mxu3 %v12542_v0 }
  0xd7   : > { %1813 = vmatpush.bf16.msra.mxu0 %v12362_v48  ;;  %v12526_v48 = vor.u32 %v16557_v42, %v12525_v35  ;;  %v12367_v42 = vld [vmem:[#allocation6 + $0x18] sm:$0xf0] }
  0xd9   : > { %1898 = vmatpush.bf16.msrb.mxu3 %v12526_v48 }
  0xda   : > { %1401 = vmatmul.bf16.gmra.mxu1 %v18616_v53  ;;  %12349 = vmatmul.msk.bf16.gmra.mxu3 %vm792_vm2, %v18608_v45 }
  0xdb   : > { %1922 = vmatpush.bf16.msrb.mxu0 %v12482_v17  ;;  %v12399_v17 = vld [vmem:[#allocation6 + $0x58] sm:$0xf0] }
  0xdd   : > { %1459 = vmatmul.bf16.gmra.mxu0 %v18616_v53  ;;  %12353 = vmatmul.msk.bf16.gmra.mxu2 %vm792_vm2, %v18608_v45  ;;  %v809_v45 = vld [vmem:[#allocation2] sm:$0xff]  ;;  %v810_v53 = vld [vmem:[#allocation2 + $0x8] sm:$0xff] }
  0xde   : > { %v18662_v47 = vpack.c.bf16 %v18514_v24, %v809_v45  ;;  %v18665_v51 = vpack.c.bf16 %v18524_v34, %v810_v53  ;;  %v16559_v34 = vld [vmem:[#allocation6 + $0x16c] sm:$0xf] }
  0xdf   : > { %v12546_v29 = vor.u32 %v16559_v34, %v12543_v58  ;;  %1923 = vmatpush.bf16.msrb.mxu0 %v12466_v28  ;;  %v16555_v53 = vld [vmem:[#allocation6 + $0x14c] sm:$0xf]  ;;  %v12383_v28 = vld [vmem:[#allocation6 + $0x38] sm:$0xf0] }
  0xe1   : > { %1955 = vmatpush.bf16.msrb.mxu2 %v12546_v29 }
  0xe3   : > { %1924 = vmatpush.bf16.msrb.mxu0 %v12450_v50  ;;  %v12498_v50 = vor.u32 %v16547_v43, %v12495_v46  ;;  %v12645_v46 = vld [vmem:[#allocation6 + $0x3a0] sm:$0xf] }
  0xea   : > { %1406 = vmatmul.bf16.gmra.mxu1 %v18630_v15  ;;  %12350 = vmatmul.msk.bf16.gmra.mxu3 %vm792_vm2, %v18623_v11 }
  0xed   : > { %1464 = vmatmul.bf16.gmra.mxu0 %v18630_v15  ;;  %12354 = vmatmul.msk.bf16.gmra.mxu2 %vm792_vm2, %v18623_v11  ;;  %v12461_v11 = vld [vmem:[#allocation6 + $0xc8] sm:$0xf] }
  0xee   : > { %v12462_v24 = vor.u32 %v16541_v54, %v12461_v11  ;;  %v16553_v11 = vld [vmem:[#allocation6 + $0x134] sm:$0xf0]  ;;  %v12382_v54 = vor.u32 %v16521_v27, %v12381_v52 }
  0xf0   : > { %1865 = vmatpush.bf16.msrb.mxu1 %v12462_v24  ;;  %v16531_v24 = vld [vmem:[#allocation6 + $0x8c] sm:$0xf] }
  0xf4   : > { %1866 = vmatpush.bf16.msrb.mxu1 %v12446_v63 }
  0xf7   : > { %v1305_v37 = vpop.f32.mrf.mxu1 }
  0xf8   : > { %1867 = vmatpush.bf16.msrb.mxu1 %v12430_v1  ;;  %v16523_v1 = vld [vmem:[#allocation6 + $0x4c] sm:$0xf] }
  0xf9   : > { %v12402_v23 = vor.u32 %v16523_v1, %v12399_v17  ;;  %v16654_v1 = vld [vmem:[#allocation6 + $0x464] sm:$0xf]  ;;  %v12743_v17 = vld [vmem:[#allocation6 + $0x470] sm:$0xf0] }
  0xfa   : > { %1756 = vmatmul.bf16.vlgmr.msra.gmra.mxu1 %v18662_v47  ;;  %12547 = vmatmul.msk.bf16.vlgmr.msra.gmra.mxu3 %vm792_vm2, %v18665_v51  ;;  %v1276_v15 = vpop.f32.mrf.mxu0 }
  0xfb   : > { %v18670_v56 = vadd.f32 %v1305_v37, %v1276_v15  ;;  %v12527_v37 = vld [vmem:[#allocation6 + $0x158] sm:$0xf0]  ;;  %v12509_v15 = vld [vmem:[#allocation6 + $0x128] sm:$0xf] }
  0xfc   : > { %1868 = vmatpush.bf16.msrb.mxu1 %v12414_v21  ;;  %v12530_v4 = vor.u32 %v16555_v53, %v12527_v37 }
  0xfd   : > { %v1363_v55 = vpop.f32.mrf.mxu3  ;;  %1814 = vmatmul.bf16.vlgmr.msra.gmra.mxu0 %v18662_v47  ;;  %12551 = vmatmul.msk.bf16.vlgmr.msra.gmra.mxu2 %vm792_vm2, %v18665_v51 }
  0xfe   : > { %1956 = vmatpush.bf16.msrb.mxu2 %v12530_v4 }
  0xff   : > { %v1307_v57 = vpop.f32.mrf.mxu1 }
 0x100   : > { %v1334_v2 = vpop.f32.mrf.mxu2  ;;  %1869 = vmatpush.bf16.msrb.mxu1 %v12398_v41  ;;  %v16515_v41 = vld [vmem:[#allocation6 + $0xc] sm:$0xf] }
 0x101   : > { %v18675_v3 = vadd.f32 %v1363_v55, %v1334_v2  ;;  %v12510_v55 = vor.u32 %v16553_v11, %v12509_v15  ;;  %v12366_v2 = vor.u32 %v16517_v60, %v12365_v38  ;;  %v12370_v48 = vor.u32 %v16515_v41, %v12367_v42  ;;  %v12679_v41 = vld [vmem:[#allocation6 + $0x3f0] sm:$0xf0] }
 0x102   : > { %v1278_v5 = vpop.f32.mrf.mxu0 }
 0x103   : > { %v18677_v10 = vadd.f32 %v1307_v57, %v1278_v5  ;;  %v12431_v57 = vld [vmem:[#allocation6 + $0x98] sm:$0xf0]  ;;  %1899 = vmatpush.bf16.msrb.mxu3 %v12510_v55  ;;  %v16549_v5 = vld [vmem:[#allocation6 + $0x114] sm:$0xf0] }
 0x104   : > { %v12434_v58 = vor.u32 %v16531_v24, %v12431_v57  ;;  %1870 = vmatpush.bf16.msrb.mxu1 %v12382_v54 }
 0x105   : > { %v1365_v9 = vpop.f32.mrf.mxu3 }
 0x106   : > { %1925 = vmatpush.bf16.msrb.mxu0 %v12434_v58 }
 0x107   : > { %v1310_v18 = vpop.f32.mrf.mxu1 }
 0x108   : > { %v1336_v26 = vpop.f32.mrf.mxu2  ;;  %1871 = vmatpush.bf16.msrb.mxu1 %v12366_v2 }
 0x109   : > { %v18682_v30 = vadd.f32 %v1365_v9, %v1336_v26  ;;  %v12494_v9 = vor.u32 %v16549_v5, %v12493_v61  ;;  %v16519_v26 = vld [vmem:[#allocation6 + $0x2c] sm:$0xf] }
 0x10a   : > { %1761 = vmatmul.bf16.gmra.mxu1 %v18530_v44  ;;  %12548 = vmatmul.msk.bf16.gmra.mxu3 %vm792_vm2, %v18536_v49  ;;  %v1281_v31 = vpop.f32.mrf.mxu0  ;;  %v12386_v32 = vor.u32 %v16519_v26, %v12383_v28 }
 0x10b   : > { %v18684_v40 = vadd.f32 %v1310_v18, %v1281_v31  ;;  %1900 = vmatpush.bf16.msrb.mxu3 %v12494_v9  ;;  %1926 = vmatpush.bf16.msrb.mxu0 %v12418_v13  ;;  %v16551_v31 = vld [vmem:[#allocation6 + $0x12c] sm:$0xf]  ;;  %v12677_v9 = vld [vmem:[#allocation6 + $0x3e0] sm:$0xf]  ;;  %v16640_v13 = vld [vmem:[#allocation6 + $0x3ec] sm:$0xf0] }
 0x10d   : > { %v1368_v36 = vpop.f32.mrf.mxu3  ;;  %1819 = vmatmul.bf16.gmra.mxu0 %v18530_v44  ;;  %12552 = vmatmul.msk.bf16.gmra.mxu2 %vm792_vm2, %v18536_v49 }
 0x10f   : > { %v1312_v45 = vpop.f32.mrf.mxu1  ;;  %1927 = vmatpush.bf16.msrb.mxu0 %v12402_v23  ;;  %v12741_v23 = vld [vmem:[#allocation6 + $0x460] sm:$0xf] }
 0x110   : > { %v1339_v34 = vpop.f32.mrf.mxu2 }
 0x111   : > { %v18689_v59 = vadd.f32 %v1368_v36, %v1339_v34  ;;  %v12514_v36 = vor.u32 %v16551_v31, %v12511_v33  ;;  %v12661_v31 = vld [vmem:[#allocation6 + $0x3c0] sm:$0xf] }
 0x112   : > { %v1283_v29 = vpop.f32.mrf.mxu0 }
 0x113   : > { %v18691_v0 = vadd.f32 %v1312_v45, %v1283_v29  ;;  %1928 = vmatpush.bf16.msrb.mxu0 %v12386_v32  ;;  %1957 = vmatpush.bf16.msrb.mxu2 %v12514_v36  ;;  %v16636_v32 = vld [vmem:[#allocation6 + $0x3cc] sm:$0xf0] }
 0x115   : > { %v1370_v63 = vpop.f32.mrf.mxu3 }
 0x117   : > { %v1315_v16 = vpop.f32.mrf.mxu1  ;;  %1929 = vmatpush.bf16.msrb.mxu0 %v12370_v48  ;;  %1958 = vmatpush.bf16.msrb.mxu2 %v12498_v50  ;;  %v16632_v48 = vld [vmem:[#allocation6 + $0x3ac] sm:$0xf0] }
 0x118   : > { %v1341_v18 = vpop.f32.mrf.mxu2 }
 0x119   : > { %v18696_v19 = vadd.f32 %v1370_v63, %v1341_v18  ;;  %v12678_v18 = vor.u32 %v16640_v13, %v12677_v9  ;;  %v12647_v9 = vld [vmem:[#allocation6 + $0x3b0] sm:$0xf0] }
 0x11a   : > { %1766 = vmatmul.bf16.gmra.mxu1 %v18570_v39  ;;  %12549 = vmatmul.msk.bf16.gmra.mxu3 %vm792_vm2, %v18558_v12  ;;  %v1286_v21 = vpop.f32.mrf.mxu0 }
 0x11b   : > { %v18698_v25 = vadd.f32 %v1315_v16, %v1286_v21  ;;  %v12746_v21 = vor.u32 %v16654_v1, %v12743_v17  ;;  %2322 = vmatpush.bf16.msra.mxu1 %v12678_v18  ;;  %v12613_v1 = vld [vmem:[#allocation6 + $0x360] sm:$0xf]  ;;  %v16624_v17 = vld [vmem:[#allocation6 + $0x36c] sm:$0xf0] }
 0x11d   : > { %v1373_v22 = vpop.f32.mrf.mxu3  ;;  %1824 = vmatmul.bf16.gmra.mxu0 %v18570_v39  ;;  %12553 = vmatmul.msk.bf16.gmra.mxu2 %vm792_vm2, %v18558_v12 }
 0x11e   : > { %2413 = vmatpush.bf16.msra.mxu2 %v12746_v21  ;;  %v12727_v21 = vld [vmem:[#allocation6 + $0x450] sm:$0xf0] }
 0x11f   : > { %v1317_v35 = vpop.f32.mrf.mxu1 }
 0x120   : > { %v1344_v45 = vpop.f32.mrf.mxu2 }
 0x121   : > { %v18703_v53 = vadd.f32 %v1373_v22, %v1344_v45  ;;  %v16656_v22 = vld [vmem:[#allocation6 + $0x46c] sm:$0xf0]  ;;  %v12646_v45 = vor.u32 %v16632_v48, %v12645_v46 }
 0x122   : > { %v1288_v37 = vpop.f32.mrf.mxu0  ;;  %v12742_v26 = vor.u32 %v16656_v22, %v12741_v23  ;;  %v16650_v23 = vld [vmem:[#allocation6 + $0x444] sm:$0xf]  ;;  %v12614_v22 = vor.u32 %v16624_v17, %v12613_v1  ;;  %v12565_v1 = vld [vmem:[#allocation6 + $0x300] sm:$0xf]  ;;  %v16612_v17 = vld [vmem:[#allocation6 + $0x30c] sm:$0xf0] }
 0x123   : > { %v18705_v4 = vadd.f32 %v1317_v35, %v1288_v37  ;;  %v12662_v35 = vor.u32 %v16636_v32, %v12661_v31  ;;  %v16634_v37 = vld [vmem:[#allocation6 + $0x3c4] sm:$0xf]  ;;  %v16648_v31 = vld [vmem:[#allocation6 + $0x42c] sm:$0xf0] }
 0x124   : > { %2355 = vmatpush.bf16.msra.mxu3 %v12742_v26  ;;  %v12709_v26 = vld [vmem:[#allocation6 + $0x420] sm:$0xf]  ;;  %v16626_v32 = vld [vmem:[#allocation6 + $0x384] sm:$0xf] }
 0x125   : > { %v1375_v52 = vpop.f32.mrf.mxu3  ;;  %2323 = vmatpush.bf16.msra.mxu1 %v12662_v35  ;;  %v12631_v35 = vld [vmem:[#allocation6 + $0x390] sm:$0xf0] }
 0x127   : > { %v1320_v27 = vpop.f32.mrf.mxu1 }
 0x128   : > { %v1346_v15 = vpop.f32.mrf.mxu2 }
 0x129   : > { %v18710_v11 = vadd.f32 %v1375_v52, %v1346_v15  ;;  %2324 = vmatpush.bf16.msra.mxu1 %v12646_v45  ;;  %v12663_v52 = vld [vmem:[#allocation6 + $0x3d0] sm:$0xf0]  ;;  %v12693_v45 = vld [vmem:[#allocation6 + $0x400] sm:$0xf] }
 0x12a   : > { %1771 = vmatmul.bf16.gmra.mxu1 %v18602_v20  ;;  %12550 = vmatmul.msk.bf16.gmra.mxu3 %vm792_vm2, %v18592_v62  ;;  %v1291_v54 = vpop.f32.mrf.mxu0  ;;  %v12666_v15 = vor.u32 %v16634_v37, %v12663_v52  ;;  %v16644_v37 = vld [vmem:[#allocation6 + $0x40c] sm:$0xf0] }
 0x12b   : > { %v18712_v24 = vadd.f32 %v1320_v27, %v1291_v54  ;;  %v12629_v54 = vld [vmem:[#allocation6 + $0x380] sm:$0xf] }
 0x12d   : > { %v1378_v55 = vpop.f32.mrf.mxu3  ;;  %1829 = vmatmul.bf16.gmra.mxu0 %v18602_v20  ;;  %12554 = vmatmul.msk.bf16.gmra.mxu2 %vm792_vm2, %v18592_v62 }
 0x12f   : > { %v1322_v57 = vpop.f32.mrf.mxu1 }
 0x130   : > { %v1349_v34 = vpop.f32.mrf.mxu2 }
 0x131   : > { %v18717_v58 = vadd.f32 %v1378_v55, %v1349_v34  ;;  %v16628_v55 = vld [vmem:[#allocation6 + $0x38c] sm:$0xf0] }
 0x132   : > { %v1293_v29 = vpop.f32.mrf.mxu0  ;;  %v12630_v34 = vor.u32 %v16628_v55, %v12629_v54  ;;  %v12615_v54 = vld [vmem:[#allocation6 + $0x370] sm:$0xf0] }
 0x133   : > { %v18719_v60 = vadd.f32 %v1322_v57, %v1293_v29 }
 0x134   : > { %2325 = vmatpush.bf16.msra.mxu1 %v12630_v34 }
 0x135   : > { %v1380_v38 = vpop.f32.mrf.mxu3 }
 0x137   : > { %v1392_v61 = vpop.f32.mrf.mxu1 }
 0x138   : > { %v1351_v63 = vpop.f32.mrf.mxu2  ;;  %2326 = vmatpush.bf16.msra.mxu1 %v12614_v22 }
 0x139   : > { %v18724_v2 = vadd.f32 %v1380_v38, %v1351_v63  ;;  %v12725_v38 = vld [vmem:[#allocation6 + $0x440] sm:$0xf] }
 0x13a   : > { %1872 = vmatmul.bf16.vlgmr.msrb.gmra.mxu1 %v18662_v47  ;;  %12555 = vmatmul.msk.bf16.vlgmr.msrb.gmra.mxu3 %vm792_vm2, %v18665_v51  ;;  %v1450_v5 = vpop.f32.mrf.mxu0 }
 0x13d   : > { %v1421_v7 = vpop.f32.mrf.mxu3  ;;  %1930 = vmatmul.bf16.vlgmr.msrb.gmra.mxu0 %v18662_v47  ;;  %12559 = vmatmul.msk.bf16.vlgmr.msrb.gmra.mxu2 %vm792_vm2, %v18665_v51  ;;  %v16638_v51 = vld [vmem:[#allocation6 + $0x3e4] sm:$0xf] }
 0x13e   : > { %v18726_v8 = vadd.f32 %v1421_v7, %v1392_v61  ;;  %v12682_v43 = vor.u32 %v16638_v51, %v12679_v41  ;;  %v16652_v61 = vld [vmem:[#allocation6 + $0x44c] sm:$0xf0]  ;;  %v16630_v7 = vld [vmem:[#allocation6 + $0x3a4] sm:$0xf]  ;;  %v12597_v41 = vld [vmem:[#allocation6 + $0x340] sm:$0xf] }
 0x13f   : > { %v1394_v16 = vpop.f32.mrf.mxu1 }
 0x140   : > { %v1479_v28 = vpop.f32.mrf.mxu2  ;;  %2380 = vmatpush.bf16.msra.mxu0 %v12682_v43  ;;  %v16620_v43 = vld [vmem:[#allocation6 + $0x34c] sm:$0xf0] }
 0x141   : > { %v18731_v33 = vadd.f32 %v1479_v28, %v1450_v5  ;;  %v12726_v5 = vor.u32 %v16652_v61, %v12725_v38  ;;  %v12730_v28 = vor.u32 %v16650_v23, %v12727_v21  ;;  %v12598_v48 = vor.u32 %v16620_v43, %v12597_v41  ;;  %v12581_v38 = vld [vmem:[#allocation6 + $0x320] sm:$0xf]  ;;  %v16616_v61 = vld [vmem:[#allocation6 + $0x32c] sm:$0xf0]  ;;  %v16610_v41 = vld [vmem:[#allocation6 + $0x304] sm:$0xf] }
 0x142   : > { %v1452_v47 = vpop.f32.mrf.mxu0  ;;  %v12566_v23 = vor.u32 %v16612_v17, %v12565_v1  ;;  %v12567_v43 = vld [vmem:[#allocation6 + $0x310] sm:$0xf0]  ;;  %v17709_v1 = vld [vmem:[#allocation2 + $0x18] sm:$0xff] }
 0x143   : > { %2356 = vmatpush.bf16.msra.mxu3 %v12726_v5  ;;  %2414 = vmatpush.bf16.msra.mxu2 %v12730_v28  ;;  %v12582_v5 = vor.u32 %v16616_v61, %v12581_v38  ;;  %v12583_v28 = vld [vmem:[#allocation6 + $0x330] sm:$0xf0] }
 0x144   : > { %2381 = vmatpush.bf16.msra.mxu0 %v12666_v15  ;;  %2327 = vmatpush.bf16.msra.mxu1 %v12598_v48  ;;  %v16622_v15 = vld [vmem:[#allocation6 + $0x364] sm:$0xf] }
 0x145   : > { %v1423_v36 = vpop.f32.mrf.mxu3  ;;  %v12618_v34 = vor.u32 %v16622_v15, %v12615_v54  ;;  %v16642_v48 = vld [vmem:[#allocation6 + $0x404] sm:$0xf] }
 0x146   : > { %v18733_v42 = vadd.f32 %v1423_v36, %v1394_v16  ;;  %v12650_v16 = vor.u32 %v16630_v7, %v12647_v9  ;;  %v12634_v36 = vor.u32 %v16626_v32, %v12631_v35  ;;  %v12599_v7 = vld [vmem:[#allocation6 + $0x350] sm:$0xf0]  ;;  %v16646_v35 = vld [vmem:[#allocation6 + $0x424] sm:$0xf] }
 0x147   : > { %v1397_v50 = vpop.f32.mrf.mxu1 }
 0x148   : > { %v1481_v27 = vpop.f32.mrf.mxu2  ;;  %2382 = vmatpush.bf16.msra.mxu0 %v12650_v16  ;;  %2328 = vmatpush.bf16.msra.mxu1 %v12582_v5  ;;  %v1981_v5 = vld [vmem:[#allocation2 + $0x8] sm:$0xfc] }
 0x149   : > { %v18738_v57 = vadd.f32 %v1481_v27, %v1452_v47  ;;  %v12710_v47 = vor.u32 %v16648_v31, %v12709_v26  ;;  %v12694_v27 = vor.u32 %v16644_v37, %v12693_v45  ;;  %v16614_v26 = vld [vmem:[#allocation6 + $0x324] sm:$0xf]  ;;  %v12695_v45 = vld [vmem:[#allocation6 + $0x410] sm:$0xf0]  ;;  %v1985_v17 = vpack.c.bf16 %v17709_v1, %v1981_v5  ;;  %v16641_v5 = vld [vmem:[#allocation6 + $0x3f4] sm:$0xf0] }
 0x14a   : > { %1877 = vmatmul.bf16.gmra.mxu1 %v18530_v44  ;;  %12556 = vmatmul.msk.bf16.gmra.mxu3 %vm792_vm2, %v18536_v49  ;;  %v1455_v29 = vpop.f32.mrf.mxu0  ;;  %v12586_v32 = vor.u32 %v16614_v26, %v12583_v28  ;;  %v12751_v1 = vld [vmem:[#allocation6 + $0x478] sm:$0xf0] }
 0x14b   : > { %2357 = vmatpush.bf16.msra.mxu3 %v12710_v47  ;;  %v12711_v47 = vld [vmem:[#allocation6 + $0x430] sm:$0xf0]  ;;  %v2051_v28 = vrot.slane %v1985_v17, 1  ;;  %v12749_v17 = vld [vmem:[#allocation6 + $0x468] sm:$0xf] }
 0x14c   : > { %2383 = vmatpush.bf16.msra.mxu0 %v12634_v36  ;;  %2329 = vmatpush.bf16.msra.mxu1 %v12566_v23 }
 0x14d   : > { %v1426_v63 = vpop.f32.mrf.mxu3  ;;  %1935 = vmatmul.bf16.gmra.mxu0 %v18530_v44  ;;  %12560 = vmatmul.msk.bf16.gmra.mxu2 %vm792_vm2, %v18536_v49 }
 0x14e   : > { %v18740_v13 = vadd.f32 %v1426_v63, %v1397_v50 }
 0x14f   : > { %v1399_v18 = vpop.f32.mrf.mxu1  ;;  %2358 = vmatpush.bf16.msra.mxu3 %v12694_v27 }
 0x150   : > { %v1484_v51 = vpop.f32.mrf.mxu2  ;;  %2384 = vmatpush.bf16.msra.mxu0 %v12618_v34 }
 0x151   : > { %v18745_v46 = vadd.f32 %v1484_v51, %v1455_v29  ;;  %v16618_v29 = vld [vmem:[#allocation6 + $0x344] sm:$0xf]  ;;  %v12714_v51 = vor.u32 %v16646_v35, %v12711_v47  ;;  %v2052_v35 = vrot.slane %v18536_v49, 1 }
 0x152   : > { %v1457_v50 = vpop.f32.mrf.mxu0  ;;  %v12602_v16 = vor.u32 %v16618_v29, %v12599_v7  ;;  %v1980_v7 = vld [vmem:[#allocation2] sm:$0xfc] }
 0x153   : > { %2415 = vmatpush.bf16.msra.mxu2 %v12714_v51 }
 0x154   : > { %2385 = vmatpush.bf16.msra.mxu0 %v12602_v16 }
 0x155   : > { %v1428_v52 = vpop.f32.mrf.mxu3 }
 0x156   : > { %v18747_v55 = vadd.f32 %v1428_v52, %v1399_v18  ;;  %v12698_v52 = vor.u32 %v16642_v48, %v12695_v45 }
 0x157   : > { %v1402_v63 = vpop.f32.mrf.mxu1 }
 0x158   : > { %v1486_v9 = vpop.f32.mrf.mxu2  ;;  %2386 = vmatpush.bf16.msra.mxu0 %v12586_v32  ;;  %2416 = vmatpush.bf16.msra.mxu2 %v12698_v52 }
 0x159   : > { %v18752_v18 = vadd.f32 %v1486_v9, %v1457_v50  ;;  %v12570_v50 = vor.u32 %v16610_v41, %v12567_v43 }
 0x15a   : > { %1882 = vmatmul.bf16.gmra.mxu1 %v18570_v39  ;;  %12557 = vmatmul.msk.bf16.gmra.mxu3 %vm792_vm2, %v18558_v12  ;;  %v1460_v21 = vpop.f32.mrf.mxu0 }
 0x15c   : > { %2387 = vmatpush.bf16.msra.mxu0 %v12570_v50  ;;  %v18780_v50 = vsel %vm2047_vm6, %v2051_v28, %v2052_v35  ;;  %v16637_v28 = vld [vmem:[#allocation6 + $0x3d4] sm:$0xf0] }
 0x15d   : > { %v1431_v22 = vpop.f32.mrf.mxu3  ;;  %1940 = vmatmul.bf16.gmra.mxu0 %v18570_v39  ;;  %12561 = vmatmul.msk.bf16.gmra.mxu2 %vm792_vm2, %v18558_v12 }
 0x15e   : > { %v18754_v31 = vadd.f32 %v1431_v22, %v1402_v63 }
 0x15f   : > { %v1404_v36 = vpop.f32.mrf.mxu1 }
 0x160   : > { %v1489_v37 = vpop.f32.mrf.mxu2 }
 0x161   : > { %v18759_v27 = vadd.f32 %v1489_v37, %v1460_v21  ;;  %v17710_v21 = vld [vmem:[#allocation2 + $0x10] sm:$0xff] }
 0x162   : > { %v1462_v15 = vpop.f32.mrf.mxu0  ;;  %v1984_v22 = vpack.c.bf16 %v17710_v21, %v1980_v7  ;;  %v16657_v21 = vld [vmem:[#allocation6 + $0x474] sm:$0xf0] }
 0x164   : > { %v2048_v47 = vrot.slane %v1984_v22, 1  ;;  %v12750_v22 = vor.u32 %v16657_v21, %v12749_v17 }
 0x165   : > { %v1433_v54 = vpop.f32.mrf.mxu3 }
 0x166   : > { %v18761_v34 = vadd.f32 %v1433_v54, %v1404_v36  ;;  %v2049_v36 = vrot.slane %v18530_v44, 1  ;;  %2471 = vmatpush.bf16.msrb.mxu3 %v12750_v22  ;;  %v16629_v22 = vld [vmem:[#allocation6 + $0x394] sm:$0xf0] }
 0x167   : > { %v1407_v38 = vpop.f32.mrf.mxu1 }
 0x168   : > { %v1491_v61 = vpop.f32.mrf.mxu2  ;;  %v18783_v45 = vsel %vm2047_vm6, %v2048_v47, %v2049_v36 }
 0x169   : > { %v18766_v63 = vadd.f32 %v1491_v61, %v1462_v15  ;;  %v12685_v61 = vld [vmem:[#allocation6 + $0x3e8] sm:$0xf] }
 0x16a   : > { %1887 = vmatmul.bf16.gmra.mxu1 %v18602_v20  ;;  %12558 = vmatmul.msk.bf16.gmra.mxu3 %vm792_vm2, %v18592_v62  ;;  %v1465_v29 = vpop.f32.mrf.mxu0 }
 0x16d   : > { %v1436_v9 = vpop.f32.mrf.mxu3  ;;  %1945 = vmatmul.bf16.gmra.mxu0 %v18602_v20  ;;  %12562 = vmatmul.msk.bf16.gmra.mxu2 %vm792_vm2, %v18592_v62 }
 0x16e   : > { %v18768_v16 = vadd.f32 %v1436_v9, %v1407_v38  ;;  %v16655_v9 = vld [vmem:[#allocation6 + $0x46c] sm:$0xf] }
 0x16f   : > { %v1409_v23 = vpop.f32.mrf.mxu1 }
 0x170   : > { %v1494_v26 = vpop.f32.mrf.mxu2 }
 0x171   : > { %v18773_v32 = vadd.f32 %v1494_v26, %v1465_v29  ;;  %v12669_v26 = vld [vmem:[#allocation6 + $0x3c8] sm:$0xf] }
 0x172   : > { %v1467_v51 = vpop.f32.mrf.mxu0 }
 0x175   : > { %v1438_v41 = vpop.f32.mrf.mxu3 }
 0x176   : > { %v18777_v43 = vadd.f32 %v1438_v41, %v1409_v23  ;;  %v12754_v23 = vor.u32 %v16655_v9, %v12751_v1  ;;  %v2054_v41 = vrot.slane %v18570_v39, 1  ;;  %v16613_v39 = vld [vmem:[#allocation6 + $0x314] sm:$0xf0] }
 0x177   : > { %v1757_v48 = vpop.f32.mrf.mxu1 }
 0x178   : > { %21157 = vst [vmem:[#allocation43_spill] sm:$0xff] %v18777_v43  ;;  %v1758_v37 = vadd.f32 %v1757_v48, %v18670_v56  ;;  %v1496_v44 = vpop.f32.mrf.mxu2  ;;  %v12686_v56 = vor.u32 %v16641_v5, %v12685_v61  ;;  %2529 = vmatpush.bf16.msrb.mxu2 %v12754_v23  ;;  %v12670_v48 = vor.u32 %v16637_v28, %v12669_v26  ;;  %v12671_v23 = vld [vmem:[#allocation6 + $0x3d8] sm:$0xf0] }
 0x179   : > { %v18789_v49 = vadd.f32 %v1496_v44, %v1467_v51  ;;  %v2056_v51 = vrot.slane %v18558_v12, 1  ;;  %v18813_v1 = vsel %vm2047_vm6, %v2049_v36, %v2054_v41 }
 0x17a   : > { %12755 = vmatmul.msk.bf16.vlgmr.msra.gmra.mxu3 %vm792_vm2, %v18780_v50  ;;  %2330 = vmatmul.bf16.vlgmr.msra.gmra.mxu1 %v18783_v45  ;;  %v1815_v52 = vpop.f32.mrf.mxu0 }
 0x17b   : > { %21158 = vst [vmem:[#allocation44_spill] sm:$0xff] %v18789_v49  ;;  %v1816_v54 = vadd.f32 %v1815_v52, %v18675_v3  ;;  %2438 = vmatpush.bf16.msrb.mxu1 %v12686_v56  ;;  %v16639_v52 = vld [vmem:[#allocation6 + $0x3ec] sm:$0xf]  ;;  %v18808_v9 = vsel %vm2047_vm6, %v2052_v35, %v2056_v51 }
 0x17d   : > { %v1786_v15 = vpop.f32.mrf.mxu3  ;;  %2388 = vmatmul.bf16.vlgmr.msra.gmra.mxu0 %v18783_v45  ;;  %12759 = vmatmul.msk.bf16.vlgmr.msra.gmra.mxu2 %vm792_vm2, %v18780_v50 }
 0x17e   : > { %v18792_v38 = vadd.f32 %v1786_v15, %v1758_v37  ;;  %v12687_v15 = vld [vmem:[#allocation6 + $0x3f8] sm:$0xf0] }
 0x17f   : > { %v1759_v29 = vpop.f32.mrf.mxu1  ;;  %2439 = vmatpush.bf16.msrb.mxu1 %v12670_v48  ;;  %v12690_v5 = vor.u32 %v16639_v52, %v12687_v15  ;;  %v12733_v48 = vld [vmem:[#allocation6 + $0x448] sm:$0xf]  ;;  %v16631_v15 = vld [vmem:[#allocation6 + $0x3ac] sm:$0xf] }
 0x180   : > { %v1760_v7 = vadd.f32 %v1759_v29, %v18677_v10  ;;  %v1844_v3 = vpop.f32.mrf.mxu2  ;;  %v12653_v29 = vld [vmem:[#allocation6 + $0x3a8] sm:$0xf] }
 0x181   : > { %v18798_v47 = vadd.f32 %v1844_v3, %v1816_v54  ;;  %v16633_v54 = vld [vmem:[#allocation6 + $0x3b4] sm:$0xf0]  ;;  %2496 = vmatpush.bf16.msrb.mxu0 %v12690_v5  ;;  %v12637_v3 = vld [vmem:[#allocation6 + $0x388] sm:$0xf]  ;;  %v12655_v5 = vld [vmem:[#allocation6 + $0x3b8] sm:$0xf0] }
 0x182   : > { %v1817_v37 = vpop.f32.mrf.mxu0  ;;  %v12638_v36 = vor.u32 %v16629_v22, %v12637_v3  ;;  %v16627_v22 = vld [vmem:[#allocation6 + $0x38c] sm:$0xf] }
 0x183   : > { %v1818_v44 = vadd.f32 %v1817_v37, %v18682_v30  ;;  %v12654_v30 = vor.u32 %v16633_v54, %v12653_v29  ;;  %v12658_v54 = vor.u32 %v16631_v15, %v12655_v5  ;;  %v16621_v15 = vld [vmem:[#allocation6 + $0x354] sm:$0xf0] }
 0x185   : > { %v1788_v10 = vpop.f32.mrf.mxu3  ;;  %2440 = vmatpush.bf16.msrb.mxu1 %v12654_v30  ;;  %v16625_v30 = vld [vmem:[#allocation6 + $0x374] sm:$0xf0] }
 0x186   : > { %v18803_v61 = vadd.f32 %v1788_v10, %v1760_v7  ;;  %v16635_v7 = vld [vmem:[#allocation6 + $0x3cc] sm:$0xf] }
 0x187   : > { %v1762_v56 = vpop.f32.mrf.mxu1  ;;  %v12674_v35 = vor.u32 %v16635_v7, %v12671_v23 }
 0x188   : > { %v1763_v17 = vadd.f32 %v1762_v56, %v18684_v40  ;;  %v1846_v21 = vpop.f32.mrf.mxu2  ;;  %v16653_v40 = vld [vmem:[#allocation6 + $0x454] sm:$0xf0]  ;;  %v12621_v56 = vld [vmem:[#allocation6 + $0x368] sm:$0xf] }
 0x189   : > { %v18819_v26 = vadd.f32 %v1846_v21, %v1818_v44  ;;  %2497 = vmatpush.bf16.msrb.mxu0 %v12674_v35  ;;  %2441 = vmatpush.bf16.msrb.mxu1 %v12638_v36  ;;  %v12734_v52 = vor.u32 %v16653_v40, %v12733_v48  ;;  %v12622_v44 = vor.u32 %v16625_v30, %v12621_v56  ;;  %v12735_v21 = vld [vmem:[#allocation6 + $0x458] sm:$0xf0]  ;;  %v12717_v35 = vld [vmem:[#allocation6 + $0x428] sm:$0xf]  ;;  %v2060_v56 = vrot.slane %v18592_v62, 1 }
 0x18a   : > { %12756 = vmatmul.msk.bf16.gmra.mxu3 %vm792_vm2, %v18808_v9  ;;  %2335 = vmatmul.bf16.gmra.mxu1 %v18813_v1  ;;  %v1820_v28 = vpop.f32.mrf.mxu0  ;;  %v12639_v36 = vld [vmem:[#allocation6 + $0x398] sm:$0xf0]  ;;  %v12701_v30 = vld [vmem:[#allocation6 + $0x408] sm:$0xf] }
 0x18b   : > { %v1821_v10 = vadd.f32 %v1820_v28, %v18689_v59  ;;  %2472 = vmatpush.bf16.msrb.mxu3 %v12734_v52  ;;  %v16651_v59 = vld [vmem:[#allocation6 + $0x44c] sm:$0xf]  ;;  %v12642_v40 = vor.u32 %v16627_v22, %v12639_v36  ;;  %v12589_v36 = vld [vmem:[#allocation6 + $0x328] sm:$0xf] }
 0x18c   : > { %v12738_v3 = vor.u32 %v16651_v59, %v12735_v21 }
 0x18d   : > { %v1791_v37 = vpop.f32.mrf.mxu3  ;;  %2393 = vmatmul.bf16.gmra.mxu0 %v18813_v1  ;;  %12760 = vmatmul.msk.bf16.gmra.mxu2 %vm792_vm2, %v18808_v9 }
 0x18e   : > { %v18822_v29 = vadd.f32 %v1791_v37, %v1763_v17  ;;  %2498 = vmatpush.bf16.msrb.mxu0 %v12658_v54  ;;  %2442 = vmatpush.bf16.msrb.mxu1 %v12622_v44  ;;  %v16649_v17 = vld [vmem:[#allocation6 + $0x434] sm:$0xf0]  ;;  %v12605_v37 = vld [vmem:[#allocation6 + $0x348] sm:$0xf] }
 0x18f   : > { %v1764_v7 = vpop.f32.mrf.mxu1  ;;  %v12718_v48 = vor.u32 %v16649_v17, %v12717_v35  ;;  %2530 = vmatpush.bf16.msrb.mxu2 %v12738_v3  ;;  %v12606_v52 = vor.u32 %v16621_v15, %v12605_v37  ;;  %v16623_v35 = vld [vmem:[#allocation6 + $0x36c] sm:$0xf]  ;;  %v12623_v17 = vld [vmem:[#allocation6 + $0x378] sm:$0xf0]  ;;  %v18840_v3 = vsel %vm2047_vm6, %v2056_v51, %v2060_v56  ;;  %v12573_v15 = vld [vmem:[#allocation6 + $0x308] sm:$0xf] }
 0x190   : > { %v1765_v23 = vadd.f32 %v1764_v7, %v18691_v0  ;;  %v1849_v28 = vpop.f32.mrf.mxu2  ;;  %v2058_v0 = vrot.slane %v18602_v20, 1  ;;  %v16645_v7 = vld [vmem:[#allocation6 + $0x414] sm:$0xf0]  ;;  %v12626_v22 = vor.u32 %v16623_v35, %v12623_v17  ;;  %v12607_v37 = vld [vmem:[#allocation6 + $0x358] sm:$0xf0] }
 0x191   : > { %v18828_v5 = vadd.f32 %v1849_v28, %v1821_v10  ;;  %2473 = vmatpush.bf16.msrb.mxu3 %v12718_v48  ;;  %v12702_v21 = vor.u32 %v16645_v7, %v12701_v30  ;;  %v16617_v28 = vld [vmem:[#allocation6 + $0x334] sm:$0xf0]  ;;  %v16647_v35 = vld [vmem:[#allocation6 + $0x42c] sm:$0xf] }
 0x192   : > { %v1822_v54 = vpop.f32.mrf.mxu0  ;;  %2499 = vmatpush.bf16.msrb.mxu0 %v12642_v40  ;;  %2443 = vmatpush.bf16.msrb.mxu1 %v12606_v52  ;;  %v16619_v40 = vld [vmem:[#allocation6 + $0x34c] sm:$0xf]  ;;  %v1983_v30 = vld [vmem:[#allocation2 + $0x88] sm:$0x3] }
 0x193   : > { %v1823_v59 = vadd.f32 %v1822_v54, %v18696_v19  ;;  %v18847_v19 = vsel %vm2047_vm6, %v2054_v41, %v2058_v0  ;;  %v12610_v51 = vor.u32 %v16619_v40, %v12607_v37  ;;  %v12574_v41 = vor.u32 %v16613_v39, %v12573_v15  ;;  %v12703_v15 = vld [vmem:[#allocation6 + $0x418] sm:$0xf0] }
 0x195   : > { %v1793_v44 = vpop.f32.mrf.mxu3  ;;  %2474 = vmatpush.bf16.msrb.mxu3 %v12702_v21  ;;  %v12591_v21 = vld [vmem:[#allocation6 + $0x338] sm:$0xf0] }
 0x196   : > { %v18833_v10 = vadd.f32 %v1793_v44, %v1765_v23  ;;  %v12590_v23 = vor.u32 %v16617_v28, %v12589_v36  ;;  %2500 = vmatpush.bf16.msrb.mxu0 %v12626_v22  ;;  %v16615_v44 = vld [vmem:[#allocation6 + $0x32c] sm:$0xf]  ;;  %v12719_v36 = vld [vmem:[#allocation6 + $0x438] sm:$0xf0] }
 0x197   : > { %v1767_v14 = vpop.f32.mrf.mxu1  ;;  %v12594_v22 = vor.u32 %v16615_v44, %v12591_v21  ;;  %v12722_v40 = vor.u32 %v16647_v35, %v12719_v36 }
 0x198   : > { %v1768_v48 = vadd.f32 %v1767_v14, %v18698_v25  ;;  %2444 = vmatpush.bf16.msrb.mxu1 %v12590_v23  ;;  %v1851_v12 = vpop.f32.mrf.mxu2  ;;  %v1982_v14 = vld [vmem:[#allocation2 + $0x80] sm:$0x3] }
 0x199   : > { %v18853_v52 = vadd.f32 %v1851_v12, %v1823_v59  ;;  %v1987_v59 = vpack.c.bf16 %v1983_v30, %v1983_v30  ;;  %v1986_v23 = vpack.c.bf16 %v1982_v14, %v1982_v14  ;;  %v12575_v12 = vld [vmem:[#allocation6 + $0x318] sm:$0xf0]  ;;  %2531 = vmatpush.bf16.msrb.mxu2 %v12722_v40 }
 0x19a   : > { %12757 = vmatmul.msk.bf16.gmra.mxu3 %vm792_vm2, %v18840_v3  ;;  %2340 = vmatmul.bf16.gmra.mxu1 %v18847_v19  ;;  %v1825_v54 = vpop.f32.mrf.mxu0 }
 0x19b   : > { %2501 = vmatpush.bf16.msrb.mxu0 %v12610_v51  ;;  %v1826_v7 = vadd.f32 %v1825_v54, %v18703_v53  ;;  %v16611_v53 = vld [vmem:[#allocation6 + $0x30c] sm:$0xf]  ;;  %v2062_v44 = vrot.slane %v1986_v23, 1 }
 0x19c   : > { %2445 = vmatpush.bf16.msrb.mxu1 %v12574_v41  ;;  %v16643_v51 = vld [vmem:[#allocation6 + $0x40c] sm:$0xf] }
 0x19d   : > { %v1796_v25 = vpop.f32.mrf.mxu3  ;;  %2398 = vmatmul.bf16.gmra.mxu0 %v18847_v19  ;;  %12761 = vmatmul.msk.bf16.gmra.mxu2 %vm792_vm2, %v18840_v3  ;;  %v12706_v41 = vor.u32 %v16643_v51, %v12703_v15 }
 0x19e   : > { %v18856_v17 = vadd.f32 %v1796_v25, %v1768_v48  ;;  %v12578_v48 = vor.u32 %v16611_v53, %v12575_v12  ;;  %v2064_v25 = vrot.slane %v1987_v59, 1 }
 0x19f   : > { %v1769_v28 = vpop.f32.mrf.mxu1  ;;  %2502 = vmatpush.bf16.msrb.mxu0 %v12594_v22  ;;  %2532 = vmatpush.bf16.msrb.mxu2 %v12706_v41 }
 0x1a0   : > { %v1770_v37 = vadd.f32 %v1769_v28, %v18705_v4  ;;  %v1854_v39 = vpop.f32.mrf.mxu2  ;;  %v18870_v22 = vsel %vm2047_vm6, %v2060_v56, %v2064_v25 }
 0x1a1   : > { %v18862_v54 = vadd.f32 %v1854_v39, %v1826_v7  ;;  %v18875_v7 = vsel %vm2047_vm6, %v2058_v0, %v2062_v44 }
 0x1a2   : > { %v1827_v21 = vpop.f32.mrf.mxu0 }
 0x1a3   : > { %2503 = vmatpush.bf16.msrb.mxu0 %v12578_v48  ;;  %v1828_v14 = vadd.f32 %v1827_v21, %v18710_v11 }
 0x1a5   : > { %v1798_v30 = vpop.f32.mrf.mxu3 }
 0x1a6   : > { %v18865_v4 = vadd.f32 %v1798_v30, %v1770_v37 }
 0x1a7   : > { %v1772_v35 = vpop.f32.mrf.mxu1 }
 0x1a8   : > { %v1773_v36 = vadd.f32 %v1772_v35, %v18712_v24  ;;  %v1856_v11 = vpop.f32.mrf.mxu2 }
 0x1a9   : > { %v18881_v28 = vadd.f32 %v1856_v11, %v1828_v14 }
 0x1aa   : > { %12758 = vmatmul.msk.bf16.gmra.mxu3 %vm792_vm2, %v18870_v22  ;;  %2345 = vmatmul.bf16.gmra.mxu1 %v18875_v7  ;;  %v1830_v59 = vpop.f32.mrf.mxu0 }
 0x1ab   : > { %v1831_v56 = vadd.f32 %v1830_v59, %v18717_v58 }
 0x1ad   : > { %v1801_v62 = vpop.f32.mrf.mxu3  ;;  %2403 = vmatmul.bf16.gmra.mxu0 %v18875_v7  ;;  %12762 = vmatmul.msk.bf16.gmra.mxu2 %vm792_vm2, %v18870_v22 }
 0x1ae   : > { %v18884_v23 = vadd.f32 %v1801_v62, %v1773_v36 }
 0x1af   : > { %v1774_v20 = vpop.f32.mrf.mxu1 }
 0x1b0   : > { %v1775_v24 = vadd.f32 %v1774_v20, %v18719_v60  ;;  %v1859_v0 = vpop.f32.mrf.mxu2 }
 0x1b1   : > { %v18890_v40 = vadd.f32 %v1859_v0, %v1831_v56 }
 0x1b2   : > { %v1832_v37 = vpop.f32.mrf.mxu0 }
 0x1b3   : > { %v1833_v12 = vadd.f32 %v1832_v37, %v18724_v2 }
 0x1b5   : > { %v1803_v53 = vpop.f32.mrf.mxu3 }
 0x1b6   : > { %v18893_v51 = vadd.f32 %v1803_v53, %v1775_v24 }
 0x1b7   : > { %v1873_v58 = vpop.f32.mrf.mxu1 }
 0x1b8   : > { %v1874_v48 = vadd.f32 %v1873_v58, %v18726_v8  ;;  %v1861_v15 = vpop.f32.mrf.mxu2 }
 0x1b9   : > { %v18899_v39 = vadd.f32 %v1861_v15, %v1833_v12 }
 0x1ba   : > { %12763 = vmatmul.msk.bf16.vlgmr.msrb.gmra.mxu3 %vm792_vm2, %v18780_v50  ;;  %2446 = vmatmul.bf16.vlgmr.msrb.gmra.mxu1 %v18783_v45  ;;  %v1931_v60 = vpop.f32.mrf.mxu0 }
 0x1bb   : > { %v1932_v25 = vadd.f32 %v1931_v60, %v18731_v33 }
 0x1bd   : > { %v1902_v41 = vpop.f32.mrf.mxu3  ;;  %2504 = vmatmul.bf16.vlgmr.msrb.gmra.mxu0 %v18783_v45  ;;  %12767 = vmatmul.msk.bf16.vlgmr.msrb.gmra.mxu2 %vm792_vm2, %v18780_v50 }
 0x1be   : > { %v18902_v44 = vadd.f32 %v1902_v41, %v1874_v48  ;;  %v12885_v41 = vld [vmem:[#allocation9 + $0x4e0] sm:$0xf] }
 0x1bf   : > { %v18904_v2 = vpop.f32.mrf.mxu1 }
 0x1c0   : > { %v1960_v8 = vpop.f32.mrf.mxu2 }
 0x1c1   : > { %v18909_v21 = vadd.f32 %v1960_v8, %v1932_v25  ;;  %v16816_v25 = vld [vmem:[#allocation9 + $0x4ec] sm:$0xf0] }
 0x1c2   : > { %v18911_v30 = vpop.f32.mrf.mxu0 }
 0x1c5   : > { %v18913_v14 = vpop.f32.mrf.mxu3 }
 0x1c7   : > { %v1878_v35 = vpop.f32.mrf.mxu1 }
 0x1c8   : > { %v1879_v36 = vadd.f32 %v1878_v35, %v18740_v13  ;;  %v18919_v33 = vpop.f32.mrf.mxu2 }
 0x1ca   : > { %12764 = vmatmul.msk.bf16.gmra.mxu3 %vm792_vm2, %v18808_v9  ;;  %2451 = vmatmul.bf16.gmra.mxu1 %v18813_v1  ;;  %v1936_v45 = vpop.f32.mrf.mxu0 }
 0x1cb   : > { %v1937_v50 = vadd.f32 %v1936_v45, %v18745_v46  ;;  %v16812_v45 = vld [vmem:[#allocation9 + $0x4cc] sm:$0xf0] }
 0x1cd   : > { %v1907_v11 = vpop.f32.mrf.mxu3  ;;  %2509 = vmatmul.bf16.gmra.mxu0 %v18813_v1  ;;  %12768 = vmatmul.msk.bf16.gmra.mxu2 %vm792_vm2, %v18808_v9 }
 0x1ce   : > { %v18922_v59 = vadd.f32 %v1907_v11, %v1879_v36  ;;  %v12869_v36 = vld [vmem:[#allocation9 + $0x4c0] sm:$0xf] }
 0x1cf   : > { %v18924_v62 = vpop.f32.mrf.mxu1  ;;  %v12870_v11 = vor.u32 %v16812_v45, %v12869_v36 }
 0x1d0   : > { %v1965_v13 = vpop.f32.mrf.mxu2 }
 0x1d1   : > { %v18929_v56 = vadd.f32 %v1965_v13, %v1937_v50 }
 0x1d2   : > { %v18931_v20 = vpop.f32.mrf.mxu0 }
 0x1d5   : > { %v18933_v24 = vpop.f32.mrf.mxu3 }
 0x1d7   : > { %v1883_v0 = vpop.f32.mrf.mxu1 }
 0x1d8   : > { %v1884_v37 = vadd.f32 %v1883_v0, %v18754_v31  ;;  %v18939_v46 = vpop.f32.mrf.mxu2 }
 0x1da   : > { %12765 = vmatmul.msk.bf16.gmra.mxu3 %vm792_vm2, %v18840_v3  ;;  %2456 = vmatmul.bf16.gmra.mxu1 %v18847_v19  ;;  %v1941_v1 = vpop.f32.mrf.mxu0 }
 0x1db   : > { %v1942_v9 = vadd.f32 %v1941_v1, %v18759_v27  ;;  %v12886_v27 = vor.u32 %v16816_v25, %v12885_v41  ;;  %v16808_v1 = vld [vmem:[#allocation9 + $0x4ac] sm:$0xf0]  ;;  %v12837_v41 = vld [vmem:[#allocation9 + $0x480] sm:$0xf] }
 0x1dc   : > { %v16804_v25 = vld [vmem:[#allocation9 + $0x48c] sm:$0xf0] }
 0x1dd   : > { %v1912_v53 = vpop.f32.mrf.mxu3  ;;  %2514 = vmatmul.bf16.gmra.mxu0 %v18847_v19  ;;  %12769 = vmatmul.msk.bf16.gmra.mxu2 %vm792_vm2, %v18840_v3  ;;  %v21159_v19 = vmov 0.0  }
 0x1de   : > { %v18942_v12 = vadd.f32 %v1912_v53, %v1884_v37  ;;  %3952 = vmatpush.bf16.msra.mxu1 %v12886_v27  ;;  %2662 = vst.msk [vmem:[#allocation3] ss:$8 sm:$0xf] %vm2660_vm7, %v21159_v19  ;;  %v12853_v37 = vld [vmem:[#allocation9 + $0x4a0] sm:$0xf] }
 0x1df   : > { %v18944_v58 = vpop.f32.mrf.mxu1  ;;  %2665 = vst.msk [vmem:[#allocation3 + $0x101] ss:$8 sm:$0xf] %vm2660_vm7, %v21159_v19  ;;  %v13013_v27 = vld [vmem:[#allocation9 + $0x5e0] sm:$0xf] }
 0x1e0   : > { %v1970_v31 = vpop.f32.mrf.mxu2 }
 0x1e1   : > { %v18949_v48 = vadd.f32 %v1970_v31, %v1942_v9  ;;  %v12854_v9 = vor.u32 %v16808_v1, %v12853_v37  ;;  %v12997_v37 = vld [vmem:[#allocation9 + $0x5c0] sm:$0xf]  ;;  %v16844_v1 = vld [vmem:[#allocation9 + $0x5cc] sm:$0xf0] }
 0x1e2   : > { %v18951_v15 = vpop.f32.mrf.mxu0  ;;  %3953 = vmatpush.bf16.msra.mxu1 %v12870_v11 }
 0x1e5   : > { %v18953_v60 = vpop.f32.mrf.mxu3 }
 0x1e6   : > { %3954 = vmatpush.bf16.msra.mxu1 %v12854_v9  ;;  %v12998_v9 = vor.u32 %v16844_v1, %v12997_v37 }
 0x1e7   : > { %v1888_v8 = vpop.f32.mrf.mxu1 }
 0x1e8   : > { %v1889_v35 = vadd.f32 %v1888_v8, %v18768_v16  ;;  %v18961_v3 = vpop.f32.mrf.mxu2 }
 0x1ea   : > { %12766 = vmatmul.msk.bf16.gmra.mxu3 %vm792_vm2, %v18870_v22  ;;  %2461 = vmatmul.bf16.gmra.mxu1 %v18875_v7  ;;  %v1946_v50 = vpop.f32.mrf.mxu0 }
 0x1eb   : > { %v1947_v16 = vadd.f32 %v1946_v50, %v18773_v32  ;;  %v12838_v32 = vor.u32 %v16804_v25, %v12837_v41  ;;  %v16800_v50 = vld [vmem:[#allocation9 + $0x46c] sm:$0xf0]  ;;  %v18980_v25 = vld [vmem:[#allocation14] sm:$0xf] }
 0x1ec   : > { %v16796_v41 = vld [vmem:[#allocation9 + $0x44c] sm:$0xf0] }
 0x1ed   : > { %v1917_v13 = vpop.f32.mrf.mxu3  ;;  %2519 = vmatmul.bf16.gmra.mxu0 %v18875_v7  ;;  %12770 = vmatmul.msk.bf16.gmra.mxu2 %vm792_vm2, %v18870_v22  ;;  %v12821_v7 = vld [vmem:[#allocation9 + $0x460] sm:$0xf] }
 0x1ee   : > { %v18965_v0 = vadd.f32 %v1917_v13, %v1889_v35  ;;  %v16848_v35 = vld [vmem:[#allocation9 + $0x5ec] sm:$0xf0]  ;;  %3955 = vmatpush.bf16.msra.mxu1 %v12838_v32  ;;  %v12822_v13 = vor.u32 %v16800_v50, %v12821_v7  ;;  %v18983_v7 = vperm.slane %v18980_v25, 0  ;;  %v12789_v50 = vld [vmem:[#allocation9 + $0x420] sm:$0xf] }
 0x1ef   : > { %v18967_v53 = vpop.f32.mrf.mxu1  ;;  %v13014_v45 = vor.u32 %v16848_v35, %v13013_v27  ;;  %v12981_v35 = vld [vmem:[#allocation9 + $0x5a0] sm:$0xf] }
 0x1f0   : > { %21160 = vst [vmem:[#allocation45_spill] sm:$0xff] %v18965_v0  ;;  %v1975_v31 = vpop.f32.mrf.mxu2 }
 0x1f1   : > { %21161 = vst [vmem:[#allocation46_spill] sm:$0xff] %v18967_v53  ;;  %v18972_v8 = vadd.f32 %v1975_v31, %v1947_v16  ;;  %3981 = vmatpush.bf16.msra.mxu3 %v13014_v45  ;;  %v12805_v31 = vld [vmem:[#allocation9 + $0x440] sm:$0xf]  ;;  %v12982_v45 = vor.u32 %v16840_v6, %v12981_v35  ;;  %v18988_v35 = vperm.slane %v18980_v25, 1 }
 0x1f2   : > { %v18974_v36 = vpop.f32.mrf.mxu0  ;;  %3956 = vmatpush.bf16.msra.mxu1 %v12822_v13  ;;  %v12806_v27 = vor.u32 %v16796_v41, %v12805_v31  ;;  %v16792_v13 = vld [vmem:[#allocation9 + $0x42c] sm:$0xf0] }
 0x1f3   : > { %21162 = vst [vmem:[#allocation47_spill] sm:$0xff] %v18972_v8  ;;  %v12790_v1 = vor.u32 %v16792_v13, %v12789_v50  ;;  %v16832_v8 = vld [vmem:[#allocation9 + $0x56c] sm:$0xf0] }
 0x1f4   : > { %21163 = vst [vmem:[#allocation48_spill] sm:$0xff] %v18974_v36 }
 0x1f5   : > { %v18976_v11 = vpop.f32.mrf.mxu3  ;;  %3982 = vmatpush.bf16.msra.mxu3 %v12998_v9  ;;  %v12965_v9 = vld [vmem:[#allocation9 + $0x580] sm:$0xf] }
 0x1f6   : > { %21164 = vst [vmem:[#allocation49_spill] sm:$0xff] %v18976_v11  ;;  %3957 = vmatpush.bf16.msra.mxu1 %v12806_v27  ;;  %v12773_v27 = vld [vmem:[#allocation9 + $0x400] sm:$0xf] }
 0x1f7   : > { %v2331_v22 = vpop.f32.mrf.mxu1  ;;  %v12949_v11 = vld [vmem:[#allocation9 + $0x560] sm:$0xf] }
 0x1f8   : > { %v18978_v16 = vpop.f32.mrf.mxu2  ;;  %v12950_v53 = vor.u32 %v16832_v8, %v12949_v11 }
 0x1f9   : > { %21165 = vst [vmem:[#allocation50_spill] sm:$0xff] %v18978_v16  ;;  %3983 = vmatpush.bf16.msra.mxu3 %v12982_v45  ;;  %v16836_v16 = vld [vmem:[#allocation9 + $0x58c] sm:$0xf0] }
 0x1fa   : > { %v2389_v32 = vpop.f32.mrf.mxu0  ;;  %v12966_v31 = vor.u32 %v16836_v16, %v12965_v9  ;;  %3958 = vmatpush.bf16.msra.mxu1 %v12790_v1  ;;  %v16828_v9 = vld [vmem:[#allocation9 + $0x54c] sm:$0xf0] }
 0x1fd   : > { %v2360_v19 = vpop.f32.mrf.mxu3  ;;  %3984 = vmatpush.bf16.msra.mxu3 %v12966_v31 }
 0x1fe   : > { %v2361_v36 = vadd.f32 %v2360_v19, %v2331_v22  ;;  %v16788_v19 = vld [vmem:[#allocation9 + $0x40c] sm:$0xf0] }
 0x1ff   : > { %v2333_v37 = vpop.f32.mrf.mxu1  ;;  %v12774_v45 = vor.u32 %v16788_v19, %v12773_v27  ;;  %v12917_v19 = vld [vmem:[#allocation9 + $0x520] sm:$0xf] }
 0x200   : > { %v2554_v49 = vadd.f32 %v2361_v36, %v18792_v38  ;;  %v2418_v6 = vpop.f32.mrf.mxu2 }
 0x201   : > { %v2419_v22 = vadd.f32 %v2418_v6, %v2389_v32  ;;  %3959 = vmatpush.bf16.msra.mxu1 %v12774_v45  ;;  %3985 = vmatpush.bf16.msra.mxu3 %v12950_v53  ;;  %v12933_v32 = vld [vmem:[#allocation9 + $0x540] sm:$0xf] }
 0x202   : > { %v2596_v41 = vadd.f32 %v18983_v7, %v2554_v49  ;;  %v2391_v13 = vpop.f32.mrf.mxu0  ;;  %v12934_v6 = vor.u32 %v16828_v9, %v12933_v32  ;;  %v16820_v32 = vld [vmem:[#allocation9 + $0x50c] sm:$0xf0] }
 0x203   : > { %v2555_v38 = vadd.f32 %v2419_v22, %v18798_v47  ;;  %v16824_v22 = vld [vmem:[#allocation9 + $0x52c] sm:$0xf0] }
 0x204   : > { %v2628_v50 = vmax.f32 %v2596_v41, 0.0 }
 0x205   : > { %v2362_v43 = vpop.f32.mrf.mxu3  ;;  %v2597_v16 = vadd.f32 %v18988_v35, %v2555_v38  ;;  %3986 = vmatpush.bf16.msra.mxu3 %v12934_v6 }
 0x206   : > { %v2699_v36 = vrot.slane %v2628_v50, 7  ;;  %v2363_v49 = vadd.f32 %v2362_v43, %v2333_v37  ;;  %v12918_v37 = vor.u32 %v16824_v22, %v12917_v19 }
 0x207   : > { %v2336_v1 = vpop.f32.mrf.mxu1  ;;  %v2629_v27 = vmax.f32 %v2597_v16, 0.0  ;;  %v12901_v16 = vld [vmem:[#allocation9 + $0x500] sm:$0xf] }
 0x208   : > { %2795 = vst [vmem:[#allocation3] sm:$0xfe] %v2699_v36  ;;  %v2558_v31 = vadd.f32 %v2363_v49, %v18803_v61  ;;  %v2420_v8 = vpop.f32.mrf.mxu2 }
 0x209   : > { %v2700_v11 = vrot.slane %v2629_v27, 7  ;;  %v2421_v47 = vadd.f32 %v2420_v8, %v2391_v13  ;;  %3987 = vmatpush.bf16.msra.mxu3 %v12918_v37 }
 0x20a   : > { %v2600_v41 = vadd.f32 %v18983_v7, %v2558_v31  ;;  %v2394_v53 = vpop.f32.mrf.mxu0  ;;  %v12902_v31 = vor.u32 %v16820_v32, %v12901_v16 }
 0x20b   : > { %2796 = vst [vmem:[#allocation3 + $0x8] sm:$0xfe] %v2700_v11  ;;  %v2559_v50 = vadd.f32 %v2421_v47, %v18819_v26 }
 0x20c   : > { %v2632_v43 = vmax.f32 %v2600_v41, 0.0 }
 0x20d   : > { %v2365_v45 = vpop.f32.mrf.mxu3  ;;  %v2601_v61 = vadd.f32 %v18988_v35, %v2559_v50  ;;  %3988 = vmatpush.bf16.msra.mxu3 %v12902_v31 }
 0x20e   : > { %v2703_v38 = vrot.slane %v2632_v43, 7  ;;  %v2366_v0 = vadd.f32 %v2365_v45, %v2336_v1 }
 0x20f   : > { %v2338_v49 = vpop.f32.mrf.mxu1  ;;  %v2633_v6 = vmax.f32 %v2601_v61, 0.0  ;;  %v3007_v37 = vld [vmem:[#allocation3] sm:$0xfe] }
 0x210   : > { %v2704_v9 = vsel %vm739_vm0, %v2699_v36, %v2703_v38  ;;  %v2562_v13 = vadd.f32 %v2366_v0, %v18822_v29  ;;  %v2423_v41 = vpop.f32.mrf.mxu2 }
 0x211   : > { %2799 = vst [vmem:[#allocation3 + $0x20] sm:$0xff] %v2704_v9  ;;  %v2705_v26 = vrot.slane %v2633_v6, 7  ;;  %v2424_v8 = vadd.f32 %v2423_v41, %v2394_v53  ;;  %v3015_v16 = vpack.c.bf16 %v2704_v9, %v3007_v37 }
 0x212   : > { %v2604_v27 = vadd.f32 %v18983_v7, %v2562_v13  ;;  %v2396_v47 = vpop.f32.mrf.mxu0 }
 0x213   : > { %v2706_v19 = vsel %vm739_vm0, %v2700_v11, %v2705_v26  ;;  %v2563_v43 = vadd.f32 %v2424_v8, %v18828_v5  ;;  %v3008_v11 = vld [vmem:[#allocation3 + $0x8] sm:$0xfe]  ;;  %v3155_v41 = vshll.u32 %v3015_v16, 16 }
 0x214   : > { %v2636_v1 = vmax.f32 %v2604_v27, 0.0  ;;  %2800 = vst [vmem:[#allocation3 + $0x28] sm:$0xff] %v2706_v19 }
 0x215   : > { %v2367_v22 = vpop.f32.mrf.mxu3  ;;  %v2605_v0 = vadd.f32 %v18988_v35, %v2563_v43 }
 0x216   : > { %v2711_v36 = vrot.slane %v2636_v1, 7  ;;  %v2368_v29 = vadd.f32 %v2367_v22, %v2338_v49  ;;  %v3016_v22 = vpack.c.bf16 %v2706_v19, %v3008_v11 }
 0x217   : > { %v2341_v45 = vpop.f32.mrf.mxu1  ;;  %v2637_v53 = vmax.f32 %v2605_v0, 0.0  ;;  %v3157_v0 = vrot.slane %v3155_v41, 1 }
 0x218   : > { %v2712_v50 = vsel %vm739_vm0, %v2703_v38, %v2711_v36  ;;  %v2566_v61 = vadd.f32 %v2368_v29, %v18833_v10  ;;  %v2425_v13 = vpop.f32.mrf.mxu2 }
 0x219   : > { %v2713_v31 = vrot.slane %v2637_v53, 7  ;;  %v2426_v6 = vadd.f32 %v2425_v13, %v2396_v47  ;;  %v3167_v53 = vshll.u32 %v3016_v22, 16  ;;  %v3153_v13 = vshrl.u32 %v3015_v16, 16  ;;  %v13141_v16 = vld [vmem:[#allocation9 + $0x6e0] sm:$0xf] }
 0x21a   : > { %v2608_v32 = vadd.f32 %v18983_v7, %v2566_v61  ;;  %v2399_v27 = vpop.f32.mrf.mxu0 }
 0x21b   : > { %v2714_v49 = vsel %vm739_vm0, %v2705_v26, %v2713_v31  ;;  %v2567_v1 = vadd.f32 %v2426_v6, %v18853_v52 }
 0x21c   : > { %v2640_v5 = vmax.f32 %v2608_v32, 0.0 }
 0x21d   : > { %v2370_v8 = vpop.f32.mrf.mxu3  ;;  %v2609_v10 = vadd.f32 %v18988_v35, %v2567_v1 }
 0x21e   : > { %v2719_v38 = vrot.slane %v2640_v5, 7  ;;  %v2371_v43 = vadd.f32 %v2370_v8, %v2341_v45  ;;  %v3158_v5 = vor.u32 %v3157_v0, %v3153_v13 }
 0x21f   : > { %v2343_v9 = vpop.f32.mrf.mxu1  ;;  %v2641_v47 = vmax.f32 %v2609_v10, 0.0 }
 0x220   : > { %v2720_v37 = vsel %vm739_vm0, %v2711_v36, %v2719_v38  ;;  %v2570_v29 = vadd.f32 %v2371_v43, %v18856_v17  ;;  %v2428_v32 = vpop.f32.mrf.mxu2 }
 0x221   : > { %v19010_v61 = vpack.c.bf16 %v2720_v37, %v2712_v50  ;;  %v2721_v52 = vrot.slane %v2641_v47, 7  ;;  %v2429_v19 = vadd.f32 %v2428_v32, %v2399_v27  ;;  %v3169_v50 = vrot.slane %v3167_v53, 1  ;;  %v16880_v37 = vld [vmem:[#allocation9 + $0x6ec] sm:$0xf0]  ;;  %v16814_v47 = vld [vmem:[#allocation9 + $0x4e4] sm:$0xf] }
 0x222   : > { %v2612_v26 = vadd.f32 %v18983_v7, %v2570_v29  ;;  %v2401_v6 = vpop.f32.mrf.mxu0 }
 0x223   : > { %21166 = vst [vmem:[#allocation51_spill] sm:$0xff] %v19010_v61  ;;  %v3160_v45 = vshll.u32 %v19010_v61, 16  ;;  %v2722_v36 = vsel %vm739_vm0, %v2713_v31, %v2721_v52  ;;  %v2571_v17 = vadd.f32 %v2429_v19, %v18862_v54  ;;  %v13142_v31 = vor.u32 %v16880_v37, %v13141_v16  ;;  %v12871_v16 = vld [vmem:[#allocation9 + $0x4d0] sm:$0xf0] }
 0x224   : > { %v2644_v11 = vmax.f32 %v2612_v26, 0.0  ;;  %v19018_v10 = vpack.c.bf16 %v2722_v36, %v2714_v49  ;;  %v12887_v26 = vld [vmem:[#allocation9 + $0x4f0] sm:$0xf0]  ;;  %v3165_v49 = vshrl.u32 %v3016_v22, 16  ;;  %v13125_v36 = vld [vmem:[#allocation9 + $0x6c0] sm:$0xf] }
 0x225   : > { %v2372_v8 = vpop.f32.mrf.mxu3  ;;  %v19016_v41 = vrot.slane %v3160_v45, 1  ;;  %v2613_v27 = vadd.f32 %v18988_v35, %v2571_v17  ;;  %4010 = vmatpush.bf16.msra.mxu0 %v13142_v31  ;;  %v12890_v13 = vor.u32 %v16814_v47, %v12887_v26 }
 0x226   : > { %v2727_v1 = vrot.slane %v2644_v11, 7  ;;  %v2373_v43 = vadd.f32 %v2372_v8, %v2343_v9  ;;  %21167 = vst [vmem:[#allocation52_spill] sm:$0xff] %v19018_v10  ;;  %v3172_v9 = vshll.u32 %v19018_v10, 16  ;;  %v3170_v11 = vor.u32 %v3169_v50, %v3165_v49  ;;  %v16876_v8 = vld [vmem:[#allocation9 + $0x6cc] sm:$0xf0] }
 0x227   : > { %v2346_v29 = vpop.f32.mrf.mxu1  ;;  %v19023_v0 = vsel %vm938_vm3, %v3158_v5, %v19016_v41  ;;  %v2645_v32 = vmax.f32 %v2613_v27, 0.0  ;;  %4068 = vmatpush.bf16.msrb.mxu1 %v12890_v13  ;;  %v13109_v49 = vld [vmem:[#allocation9 + $0x6a0] sm:$0xf] }
 0x228   : > { %v2728_v54 = vsel %vm739_vm0, %v2719_v38, %v2727_v1  ;;  %v2574_v53 = vadd.f32 %v2373_v43, %v18865_v4  ;;  %3960 = vmatmul.bf16.vlgmr.msra.gmra.mxu1 %v19023_v0  ;;  %v2430_v45 = vpop.f32.mrf.mxu2  ;;  %v19030_v5 = vrot.slane %v3172_v9, 1  ;;  %v13126_v4 = vor.u32 %v16876_v8, %v13125_v36  ;;  %v16810_v43 = vld [vmem:[#allocation9 + $0x4c4] sm:$0xf]  ;;  %v16872_v9 = vld [vmem:[#allocation9 + $0x6ac] sm:$0xf0] }
 0x229   : > { %v2729_v17 = vrot.slane %v2645_v32, 7  ;;  %v2431_v38 = vadd.f32 %v2430_v45, %v2401_v6  ;;  %v12874_v31 = vor.u32 %v16810_v43, %v12871_v16  ;;  %v16806_v45 = vld [vmem:[#allocation9 + $0x4a4] sm:$0xf]  ;;  %v3200_v43 = vshrl.u32 %v19010_v61, 16  ;;  %v13093_v16 = vld [vmem:[#allocation9 + $0x680] sm:$0xf] }
 0x22a   : > { %v2616_v19 = vadd.f32 %v18983_v7, %v2574_v53  ;;  %v2404_v37 = vpop.f32.mrf.mxu0  ;;  %v19034_v27 = vsel %vm938_vm3, %v3170_v11, %v19030_v5  ;;  %4011 = vmatpush.bf16.msra.mxu0 %v13126_v4  ;;  %v12855_v11 = vld [vmem:[#allocation9 + $0x4b0] sm:$0xf0] }
 0x22b   : > { %v2730_v47 = vsel %vm739_vm0, %v2721_v52, %v2729_v17  ;;  %v2575_v26 = vadd.f32 %v2431_v38, %v18881_v28  ;;  %3989 = vmatmul.bf16.vlgmr.msra.gmra.mxu3 %v19034_v27  ;;  %4069 = vmatpush.bf16.msrb.mxu1 %v12874_v31  ;;  %v12858_v8 = vor.u32 %v16806_v45, %v12855_v11  ;;  %v12839_v45 = vld [vmem:[#allocation9 + $0x490] sm:$0xf0] }
 0x22c   : > { %v2648_v22 = vmax.f32 %v2616_v19, 0.0  ;;  %v13110_v19 = vor.u32 %v16872_v9, %v13109_v49  ;;  %v3208_v9 = vshrl.u32 %v19018_v10, 16 }
 0x22d   : > { %v2375_v50 = vpop.f32.mrf.mxu3  ;;  %v2617_v32 = vadd.f32 %v18988_v35, %v2575_v26 }
 0x22e   : > { %v2735_v6 = vrot.slane %v2648_v22, 7  ;;  %v2376_v53 = vadd.f32 %v2375_v50, %v2346_v29  ;;  %4012 = vmatpush.bf16.msra.mxu0 %v13110_v19  ;;  %v16868_v22 = vld [vmem:[#allocation9 + $0x68c] sm:$0xf0] }
 0x22f   : > { %v2348_v13 = vpop.f32.mrf.mxu1  ;;  %v2649_v28 = vmax.f32 %v2617_v32, 0.0  ;;  %4070 = vmatpush.bf16.msrb.mxu1 %v12858_v8  ;;  %v16912_v32 = vld [vmem:[#allocation9 + $0x7ec] sm:$0xf0]  ;;  %v13094_v19 = vor.u32 %v16868_v22, %v13093_v16  ;;  %v16846_v8 = vld [vmem:[#allocation9 + $0x5e4] sm:$0xf] }
 0x230   : > { %v2736_v36 = vsel %vm739_vm0, %v2727_v1, %v2735_v6  ;;  %v2578_v52 = vadd.f32 %v2376_v53, %v18884_v23  ;;  %v2433_v4 = vpop.f32.mrf.mxu2  ;;  %v13269_v1 = vld [vmem:[#allocation9 + $0x7e0] sm:$0xf]  ;;  %v16802_v23 = vld [vmem:[#allocation9 + $0x484] sm:$0xf]  ;;  %v16864_v22 = vld [vmem:[#allocation9 + $0x66c] sm:$0xf0] }
 0x231   : > { %v19042_v38 = vpack.c.bf16 %v2736_v36, %v2728_v54  ;;  %v19046_v31 = vrot.slane %v2649_v28, 7  ;;  %v2434_v50 = vadd.f32 %v2433_v4, %v2404_v37  ;;  %v3202_v54 = vor.u32 %v3200_v43, %v19016_v41  ;;  %v13015_v4 = vld [vmem:[#allocation9 + $0x5f0] sm:$0xf0]  ;;  %v13077_v16 = vld [vmem:[#allocation9 + $0x660] sm:$0xf] }
 0x232   : > { %v2620_v29 = vadd.f32 %v18983_v7, %v2578_v52  ;;  %v2406_v49 = vpop.f32.mrf.mxu0  ;;  %v13270_v28 = vor.u32 %v16912_v32, %v13269_v1  ;;  %4013 = vmatpush.bf16.msra.mxu0 %v13094_v19  ;;  %v12842_v43 = vor.u32 %v16802_v23, %v12839_v45  ;;  %v13018_v1 = vor.u32 %v16846_v8, %v13015_v4  ;;  %v12823_v19 = vld [vmem:[#allocation9 + $0x470] sm:$0xf0]  ;;  %v13061_v4 = vld [vmem:[#allocation9 + $0x640] sm:$0xf] }
 0x233   : > { %v3204_v26 = vshll.u32 %v19042_v38, 16  ;;  %v2738_v11 = vsel %vm739_vm0, %v2729_v17, %v19046_v31  ;;  %v2579_v37 = vadd.f32 %v2434_v50, %v18890_v40  ;;  %v13253_v50 = vld [vmem:[#allocation9 + $0x7c0] sm:$0xf]  ;;  %v3210_v23 = vor.u32 %v3208_v9, %v19030_v5 }
 0x234   : > { %v2652_v53 = vmax.f32 %v2620_v29, 0.0  ;;  %v19058_v41 = vpack.c.bf16 %v2738_v11, %v2730_v47  ;;  %4039 = vmatpush.bf16.msra.mxu2 %v13270_v28  ;;  %4071 = vmatpush.bf16.msrb.mxu1 %v12842_v43  ;;  %v16794_v43 = vld [vmem:[#allocation9 + $0x444] sm:$0xf] }
 0x235   : > { %v2377_v36 = vpop.f32.mrf.mxu3  ;;  %v19054_v52 = vrot.slane %v3204_v26, 1  ;;  %v2621_v10 = vadd.f32 %v18988_v35, %v2579_v37  ;;  %v16908_v26 = vld [vmem:[#allocation9 + $0x7cc] sm:$0xf0]  ;;  %4097 = vmatpush.bf16.msrb.mxu3 %v13018_v1  ;;  %v12999_v37 = vld [vmem:[#allocation9 + $0x5d0] sm:$0xf0] }
 0x236   : > { %v19056_v29 = vrot.slane %v2652_v53, 7  ;;  %v2378_v61 = vadd.f32 %v2377_v36, %v2348_v13  ;;  %v16798_v53 = vld [vmem:[#allocation9 + $0x464] sm:$0xf]  ;;  %v3212_v32 = vshll.u32 %v19058_v41, 16  ;;  %v13254_v11 = vor.u32 %v16908_v26, %v13253_v50  ;;  %v12807_v50 = vld [vmem:[#allocation9 + $0x450] sm:$0xf0] }
 0x237   : > { %v2447_v17 = vpop.f32.mrf.mxu1  ;;  %v19063_v40 = vsel %vm938_vm3, %v3202_v54, %v19054_v52  ;;  %v16842_v54 = vld [vmem:[#allocation9 + $0x5c4] sm:$0xf]  ;;  %v2653_v45 = vmax.f32 %v2621_v10, 0.0  ;;  %v13078_v36 = vor.u32 %v16864_v22, %v13077_v16  ;;  %v19079_v16 = vperm.slane %v18980_v25, 2 }
 0x238   : > { %21168 = vst [vmem:[#allocation53_spill] sm:$0xff] %v19063_v40  ;;  %v19067_v47 = vsel %vm739_vm0, %v2735_v6, %v19056_v29  ;;  %v2582_v13 = vadd.f32 %v2378_v61, %v18893_v51  ;;  %3965 = vmatmul.bf16.gmra.mxu1 %v19063_v40  ;;  %v2435_v6 = vpop.f32.mrf.mxu2  ;;  %v19074_v8 = vrot.slane %v3212_v32, 1  ;;  %v12826_v51 = vor.u32 %v16798_v53, %v12823_v19  ;;  %v16860_v40 = vld [vmem:[#allocation9 + $0x64c] sm:$0xf0]  ;;  %v13237_v53 = vld [vmem:[#allocation9 + $0x7a0] sm:$0xf] }
 0x239   : > { %v13002_v61 = vor.u32 %v16842_v54, %v12999_v37  ;;  %v19076_v5 = vrot.slane %v2653_v45, 7  ;;  %v2436_v9 = vadd.f32 %v2435_v6, %v2406_v49  ;;  %4040 = vmatpush.bf16.msra.mxu2 %v13254_v11  ;;  %4014 = vmatpush.bf16.msra.mxu0 %v13078_v36  ;;  %v13062_v10 = vor.u32 %v16860_v40, %v13061_v4  ;;  %v16838_v45 = vld [vmem:[#allocation9 + $0x5a4] sm:$0xf]  ;;  %v16856_v6 = vld [vmem:[#allocation9 + $0x62c] sm:$0xf0] }
 0x23a   : > { %v2624_v28 = vadd.f32 %v18983_v7, %v2582_v13  ;;  %v2505_v7 = vpop.f32.mrf.mxu0  ;;  %v19083_v22 = vsel %vm938_vm3, %v3210_v23, %v19074_v8  ;;  %v12810_v1 = vor.u32 %v16794_v43, %v12807_v50  ;;  %v16904_v13 = vld [vmem:[#allocation9 + $0x7ac] sm:$0xf0]  ;;  %v3232_v19 = vshrl.u32 %v19042_v38, 16  ;;  %4072 = vmatpush.bf16.msrb.mxu1 %v12826_v51  ;;  %v12983_v23 = vld [vmem:[#allocation9 + $0x5b0] sm:$0xf0] }
 0x23b   : > { %v19088_v49 = vsel %vm739_vm0, %v19046_v31, %v19076_v5  ;;  %v2583_v32 = vadd.f32 %v2436_v9, %v18899_v39  ;;  %3994 = vmatmul.bf16.gmra.mxu3 %v19083_v22  ;;  %v13238_v54 = vor.u32 %v16904_v13, %v13237_v53  ;;  %v12986_v37 = vor.u32 %v16838_v45, %v12983_v23  ;;  %v16790_v9 = vld [vmem:[#allocation9 + $0x424] sm:$0xf]  ;;  %v12791_v43 = vld [vmem:[#allocation9 + $0x430] sm:$0xf0]  ;;  %v13221_v50 = vld [vmem:[#allocation9 + $0x780] sm:$0xf] }
 0x23c   : > { %v2656_v26 = vmax.f32 %v2624_v28, 0.0  ;;  %4098 = vmatpush.bf16.msrb.mxu3 %v13002_v61  ;;  %v13045_v28 = vld [vmem:[#allocation9 + $0x620] sm:$0xf]  ;;  %v16834_v61 = vld [vmem:[#allocation9 + $0x584] sm:$0xf] }
 0x23d   : > { %v2476_v40 = vpop.f32.mrf.mxu3  ;;  %v2625_v31 = vadd.f32 %v18988_v35, %v2583_v32  ;;  %4015 = vmatpush.bf16.msra.mxu0 %v13062_v10  ;;  %4041 = vmatpush.bf16.msra.mxu2 %v13238_v54  ;;  %v13046_v39 = vor.u32 %v16856_v6, %v13045_v28  ;;  %v12794_v35 = vor.u32 %v16790_v9, %v12791_v43  ;;  %v13029_v23 = vld [vmem:[#allocation9 + $0x600] sm:$0xf]  ;;  %v12775_v6 = vld [vmem:[#allocation9 + $0x410] sm:$0xf0] }
 0x23e   : > { %v2751_v11 = vrot.slane %v2656_v26, 7  ;;  %v2477_v36 = vadd.f32 %v2476_v40, %v2447_v17  ;;  %v16900_v17 = vld [vmem:[#allocation9 + $0x78c] sm:$0xf0]  ;;  %4073 = vmatpush.bf16.msrb.mxu1 %v12810_v1  ;;  %v12967_v40 = vld [vmem:[#allocation9 + $0x590] sm:$0xf0]  ;;  %v1876_v32 = vadd.f32 %v18904_v2, %v18733_v42  ;;  %v3234_v2 = vor.u32 %v3232_v19, %v19054_v52 }
 0x23f   : > { %v2449_v4 = vpop.f32.mrf.mxu1  ;;  %v2657_v53 = vmax.f32 %v2625_v31, 0.0  ;;  %v13222_v10 = vor.u32 %v16900_v17, %v13221_v50  ;;  %v13205_v43 = vld [vmem:[#allocation9 + $0x760] sm:$0xf]  ;;  %v16896_v50 = vld [vmem:[#allocation9 + $0x76c] sm:$0xf0] }
 0x240   : > { %v2752_v51 = vsel %vm739_vm0, %v19056_v29, %v2751_v11  ;;  %2827 = vst [vmem:[#allocation3 + $0x100] sm:$0x1] %v2751_v11  ;;  %v2556_v26 = vadd.f32 %v2477_v36, %v18902_v44  ;;  %v2534_v45 = vpop.f32.mrf.mxu2  ;;  %4099 = vmatpush.bf16.msrb.mxu3 %v12986_v37  ;;  %v12970_v29 = vor.u32 %v16834_v61, %v12967_v40  ;;  %v16852_v44 = vld [vmem:[#allocation9 + $0x60c] sm:$0xf0]  ;;  %v16786_v11 = vld [vmem:[#allocation9 + $0x404] sm:$0xf] }
 0x241   : > { %v19098_v13 = vpack.c.bf16 %v2752_v51, %v19067_v47  ;;  %v2753_v36 = vrot.slane %v2657_v53, 7  ;;  %v2535_v28 = vadd.f32 %v2534_v45, %v2505_v7  ;;  %v19104_v47 = vperm.slane %v18980_v25, 3  ;;  %4016 = vmatpush.bf16.msra.mxu0 %v13046_v39  ;;  %4042 = vmatpush.bf16.msra.mxu2 %v13222_v10  ;;  %v16830_v19 = vld [vmem:[#allocation9 + $0x564] sm:$0xf]  ;;  %v12951_v10 = vld [vmem:[#allocation9 + $0x570] sm:$0xf0] }
 0x242   : > { %v2598_v54 = vadd.f32 %v19079_v16, %v2556_v26  ;;  %v2507_v42 = vpop.f32.mrf.mxu0  ;;  %v13030_v9 = vor.u32 %v16852_v44, %v13029_v23  ;;  %v12778_v37 = vor.u32 %v16786_v11, %v12775_v6  ;;  %4074 = vmatpush.bf16.msrb.mxu1 %v12794_v35  ;;  %v13206_v39 = vor.u32 %v16896_v50, %v13205_v43  ;;  %v16826_v23 = vld [vmem:[#allocation9 + $0x544] sm:$0xf]  ;;  %v12935_v6 = vld [vmem:[#allocation9 + $0x550] sm:$0xf0] }
 0x243   : > { %v3236_v1 = vshll.u32 %v19098_v13, 16  ;;  %v2754_v51 = vsel %vm739_vm0, %v19076_v5, %v2753_v36  ;;  %2828 = vst [vmem:[#allocation3 + $0x108] sm:$0x1] %v2753_v36  ;;  %v2557_v25 = vadd.f32 %v2535_v28, %v18909_v21  ;;  %v1905_v17 = vadd.f32 %v18913_v14, %v1876_v32  ;;  %v13189_v32 = vld [vmem:[#allocation9 + $0x740] sm:$0xf] }
 0x244   : > { %v2630_v31 = vmax.f32 %v2598_v54, 0.0  ;;  %v19115_v52 = vpack.c.bf16 %v2754_v51, %v19088_v49  ;;  %4100 = vmatpush.bf16.msrb.mxu3 %v12970_v29  ;;  %v1934_v5 = vadd.f32 %v18911_v30, %v18738_v57  ;;  %v3240_v49 = vshrl.u32 %v19058_v41, 16  ;;  %v16892_v29 = vld [vmem:[#allocation9 + $0x74c] sm:$0xf0] }
 0x245   : > { %v2478_v7 = vpop.f32.mrf.mxu3  ;;  %v19111_v26 = vrot.slane %v3236_v1, 1  ;;  %v2599_v40 = vadd.f32 %v19104_v47, %v2557_v25  ;;  %4017 = vmatpush.bf16.msra.mxu0 %v13030_v9  ;;  %4043 = vmatpush.bf16.msra.mxu2 %v13206_v39  ;;  %v12954_v45 = vor.u32 %v16830_v19, %v12951_v10  ;;  %v13190_v1 = vor.u32 %v16892_v29, %v13189_v32  ;;  %v16888_v39 = vld [vmem:[#allocation9 + $0x72c] sm:$0xf0]  ;;  %v12919_v10 = vld [vmem:[#allocation9 + $0x530] sm:$0xf0] }
 0x246   : > { %v2701_v61 = vrot.slane %v2630_v31, 7  ;;  %v2479_v53 = vadd.f32 %v2478_v7, %v2449_v4  ;;  %v3244_v4 = vshll.u32 %v19115_v52, 16  ;;  %v1963_v57 = vadd.f32 %v18919_v33, %v1934_v5  ;;  %4075 = vmatpush.bf16.msrb.mxu1 %v12778_v37  ;;  %v13173_v7 = vld [vmem:[#allocation9 + $0x720] sm:$0xf] }
 0x247   : > { %v2452_v21 = vpop.f32.mrf.mxu1  ;;  %v19122_v35 = vsel %vm938_vm3, %v3234_v2, %v19111_v26  ;;  %v3011_v54 = vld [vmem:[#allocation3 + $0x100] sm:$0x1]  ;;  %v2631_v30 = vmax.f32 %v2599_v40, 0.0  ;;  %v3242_v36 = vor.u32 %v3240_v49, %v19074_v8  ;;  %v12938_v43 = vor.u32 %v16826_v23, %v12935_v6  ;;  %v12903_v23 = vld [vmem:[#allocation9 + $0x510] sm:$0xf0] }
 0x248   : > { %2797 = vst [vmem:[#allocation3 + $0x10] sm:$0xfe] %v2701_v61  ;;  %v2560_v14 = vadd.f32 %v2479_v53, %v1905_v17  ;;  %3970 = vmatmul.bf16.gmra.mxu1 %v19122_v35  ;;  %v2536_v11 = vpop.f32.mrf.mxu2  ;;  %v19130_v28 = vrot.slane %v3244_v4, 1  ;;  %v3019_v9 = vpack.c.bf16 %v3011_v54, %v3011_v54  ;;  %4101 = vmatpush.bf16.msrb.mxu3 %v12954_v45  ;;  %v16822_v17 = vld [vmem:[#allocation9 + $0x524] sm:$0xf] }
 0x249   : > { %v2702_v31 = vrot.slane %v2631_v30, 7  ;;  %v2537_v2 = vadd.f32 %v2536_v11, %v2507_v42  ;;  %4044 = vmatpush.bf16.msra.mxu2 %v13190_v1  ;;  %v13174_v19 = vor.u32 %v16888_v39, %v13173_v7  ;;  %v16884_v30 = vld [vmem:[#allocation9 + $0x70c] sm:$0xf0]  ;;  %v16818_v45 = vld [vmem:[#allocation9 + $0x504] sm:$0xf] }
 0x24a   : > { %v2602_v44 = vadd.f32 %v19079_v16, %v2560_v14  ;;  %v2510_v50 = vpop.f32.mrf.mxu0  ;;  %v19134_v37 = vsel %vm938_vm3, %v3242_v36, %v19130_v28  ;;  %v3012_v51 = vld [vmem:[#allocation3 + $0x108] sm:$0x1]  ;;  %v3268_v54 = vshll.u32 %v3019_v9, 16  ;;  %v12922_v14 = vor.u32 %v16822_v17, %v12919_v10 }
 0x24b   : > { %2798 = vst [vmem:[#allocation3 + $0x18] sm:$0xfe] %v2702_v31  ;;  %v2561_v25 = vadd.f32 %v2537_v2, %v1963_v57  ;;  %3999 = vmatmul.bf16.gmra.mxu3 %v19134_v37  ;;  %v3020_v32 = vpack.c.bf16 %v3012_v51, %v3012_v51  ;;  %v13157_v57 = vld [vmem:[#allocation9 + $0x700] sm:$0xf]  ;;  %v3264_v36 = vshrl.u32 %v19098_v13, 16 }
 0x24c   : > { %v2634_v33 = vmax.f32 %v2602_v44, 0.0  ;;  %4102 = vmatpush.bf16.msrb.mxu3 %v12938_v43  ;;  %v3270_v2 = vrot.slane %v3268_v54, 1 }
 0x24d   : > { %v2481_v8 = vpop.f32.mrf.mxu3  ;;  %v2603_v5 = vadd.f32 %v19104_v47, %v2561_v25  ;;  %4045 = vmatpush.bf16.msra.mxu2 %v13174_v19  ;;  %v3266_v25 = vor.u32 %v3264_v36, %v19111_v26 }
 0x24e   : > { %v2707_v42 = vrot.slane %v2634_v33, 7  ;;  %v2482_v53 = vadd.f32 %v2481_v8, %v2452_v21  ;;  %v13158_v21 = vor.u32 %v16884_v30, %v13157_v57  ;;  %v3276_v33 = vshll.u32 %v3020_v32, 16 }
 0x24f   : > { %v2454_v40 = vpop.f32.mrf.mxu1  ;;  %v2635_v29 = vmax.f32 %v2603_v5, 0.0 }
 0x250   : > { %v2708_v49 = vsel %vm739_vm0, %v2701_v61, %v2707_v42  ;;  %v2564_v4 = vadd.f32 %v2482_v53, %v18922_v59  ;;  %v2539_v11 = vpop.f32.mrf.mxu2  ;;  %4103 = vmatpush.bf16.msrb.mxu3 %v12922_v14  ;;  %v12906_v61 = vor.u32 %v16818_v45, %v12903_v23  ;;  %v1881_v59 = vadd.f32 %v18924_v62, %v18747_v55  ;;  %v3009_v53 = vld [vmem:[#allocation3 + $0x10] sm:$0xfe] }
 0x251   : > { %2801 = vst [vmem:[#allocation3 + $0x30] sm:$0xff] %v2708_v49  ;;  %v2709_v1 = vrot.slane %v2635_v29, 7  ;;  %v2540_v6 = vadd.f32 %v2539_v11, %v2510_v50  ;;  %4046 = vmatpush.bf16.msra.mxu2 %v13158_v21  ;;  %v19150_v62 = vsel %vm938_vm3, %v3266_v25, %v3270_v2  ;;  %v3278_v26 = vrot.slane %v3276_v33, 1 }
 0x252   : > { %v2606_v44 = vadd.f32 %v19079_v16, %v2564_v4  ;;  %v2512_v43 = vpop.f32.mrf.mxu0  ;;  %v1910_v39 = vadd.f32 %v18933_v24, %v1881_v59  ;;  %v1939_v24 = vadd.f32 %v18931_v20, %v18752_v18  ;;  %v3010_v30 = vld [vmem:[#allocation3 + $0x18] sm:$0xfe] }
 0x253   : > { %v2710_v51 = vsel %vm739_vm0, %v2702_v31, %v2709_v1  ;;  %v2565_v8 = vadd.f32 %v2540_v6, %v18929_v56  ;;  %v3272_v56 = vshrl.u32 %v19115_v52, 16 }
 0x254   : > { %v2638_v9 = vmax.f32 %v2606_v44, 0.0  ;;  %2802 = vst [vmem:[#allocation3 + $0x38] sm:$0xff] %v2710_v51  ;;  %4104 = vmatpush.bf16.msrb.mxu3 %v12906_v61  ;;  %v1968_v32 = vadd.f32 %v18939_v46, %v1939_v24  ;;  %v1944_v24 = vadd.f32 %v18951_v15, %v18766_v63  ;;  %v16817_v15 = vld [vmem:[#allocation9 + $0x4f4] sm:$0xf0] }
 0x255   : > { %v2483_v7 = vpop.f32.mrf.mxu3  ;;  %v2607_v19 = vadd.f32 %v19104_v47, %v2565_v8  ;;  %v3274_v4 = vor.u32 %v3272_v56, %v19130_v28  ;;  %v3018_v28 = vpack.c.bf16 %v2710_v51, %v3010_v30 }
 0x256   : > { %v2715_v50 = vrot.slane %v2638_v9, 7  ;;  %v2484_v17 = vadd.f32 %v2483_v7, %v2454_v40  ;;  %v3017_v40 = vpack.c.bf16 %v2708_v49, %v3009_v53 }
 0x257   : > { %v2457_v55 = vpop.f32.mrf.mxu1  ;;  %v2639_v5 = vmax.f32 %v2607_v19, 0.0  ;;  %v19161_v21 = vsel %vm938_vm3, %v3274_v4, %v3278_v26  ;;  %v3191_v7 = vshll.u32 %v3018_v28, 16 }
 0x258   : > { %v2716_v31 = vsel %vm739_vm0, %v2707_v42, %v2715_v50  ;;  %v2568_v10 = vadd.f32 %v2484_v17, %v1910_v39  ;;  %3975 = vmatmul.bf16.gmra.mxu1 %v19150_v62  ;;  %v2541_v14 = vpop.f32.mrf.mxu2  ;;  %v3179_v49 = vshll.u32 %v3017_v40, 16  ;;  %v3177_v25 = vshrl.u32 %v3017_v40, 16  ;;  %v13143_v40 = vld [vmem:[#allocation9 + $0x6f0] sm:$0xf0] }
 0x259   : > { %v2717_v57 = vrot.slane %v2639_v5, 7  ;;  %v2542_v42 = vadd.f32 %v2541_v14, %v2512_v43  ;;  %v3193_v26 = vrot.slane %v3191_v7, 1 }
 0x25a   : > { %v2610_v54 = vadd.f32 %v19079_v16, %v2568_v10  ;;  %v2515_v29 = vpop.f32.mrf.mxu0  ;;  %v3181_v9 = vrot.slane %v3179_v49, 1 }
 0x25b   : > { %v2718_v23 = vsel %vm739_vm0, %v2709_v1, %v2717_v57  ;;  %v2569_v20 = vadd.f32 %v2542_v42, %v1968_v32  ;;  %4004 = vmatmul.bf16.gmra.mxu3 %v19161_v21  ;;  %v1886_v1 = vadd.f32 %v18944_v58, %v18761_v34  ;;  %v3189_v32 = vshrl.u32 %v3018_v28, 16  ;;  %v16910_v28 = vld [vmem:[#allocation9 + $0x7e4] sm:$0xf] }
 0x25c   : > { %v2642_v45 = vmax.f32 %v2610_v54, 0.0  ;;  %v12893_v54 = vld [vmem:[#allocation9 + $0x4e8] sm:$0xf] }
 0x25d   : > { %v2486_v18 = vpop.f32.mrf.mxu3  ;;  %v2611_v46 = vadd.f32 %v19104_v47, %v2569_v20  ;;  %v1973_v20 = vadd.f32 %v18961_v3, %v1944_v24 }
 0x25e   : > { %v2723_v44 = vrot.slane %v2642_v45, 7  ;;  %v2487_v11 = vadd.f32 %v2486_v18, %v2457_v55  ;;  %v3182_v55 = vor.u32 %v3181_v9, %v3177_v25  ;;  %v12877_v18 = vld [vmem:[#allocation9 + $0x4c8] sm:$0xf] }
 0x25f   : > { %v2459_v36 = vpop.f32.mrf.mxu1  ;;  %v2643_v61 = vmax.f32 %v2611_v46, 0.0  ;;  %v12861_v25 = vld [vmem:[#allocation9 + $0x4a8] sm:$0xf] }
 0x260   : > { %v2724_v6 = vsel %vm739_vm0, %v2715_v50, %v2723_v44  ;;  %v2572_v2 = vadd.f32 %v2487_v11, %v18942_v12  ;;  %v2544_v33 = vpop.f32.mrf.mxu2  ;;  %v1915_v50 = vadd.f32 %v18953_v60, %v1886_v1  ;;  %v3194_v11 = vor.u32 %v3193_v26, %v3189_v32  ;;  %v13271_v1 = vld [vmem:[#allocation9 + $0x7f0] sm:$0xf0] }
 0x261   : > { %v19168_v59 = vpack.c.bf16 %v2724_v6, %v2716_v31  ;;  %v2725_v8 = vrot.slane %v2643_v61, 7  ;;  %v2545_v51 = vadd.f32 %v2544_v33, %v2515_v29  ;;  %v12894_v29 = vor.u32 %v16817_v15, %v12893_v54  ;;  %v21169_v54 = vld [vmem:[#allocation45_spill] sm:$0xff]  ;;  %v16805_v15 = vld [vmem:[#allocation9 + $0x494] sm:$0xf0] }
 0x262   : > { %v2614_v43 = vadd.f32 %v19079_v16, %v2572_v2  ;;  %v2517_v10 = vpop.f32.mrf.mxu0  ;;  %v13274_v7 = vor.u32 %v16910_v28, %v13271_v1 }
 0x263   : > { %v3184_v39 = vshll.u32 %v19168_v59, 16  ;;  %v2726_v12 = vsel %vm739_vm0, %v2717_v57, %v2725_v8  ;;  %v2573_v19 = vadd.f32 %v2545_v51, %v18949_v48  ;;  %v16878_v48 = vld [vmem:[#allocation9 + $0x6e4] sm:$0xf]  ;;  %4184 = vmatpush.bf16.msra.mxu1 %v12894_v29  ;;  %v13111_v51 = vld [vmem:[#allocation9 + $0x6b0] sm:$0xf0] }
 0x264   : > { %v2646_v17 = vmax.f32 %v2614_v43, 0.0  ;;  %v19181_v56 = vpack.c.bf16 %v2726_v12, %v2718_v23  ;;  %v16874_v57 = vld [vmem:[#allocation9 + $0x6c4] sm:$0xf]  ;;  %v13146_v45 = vor.u32 %v16878_v48, %v13143_v40  ;;  %v13127_v23 = vld [vmem:[#allocation9 + $0x6d0] sm:$0xf0]  ;;  %4155 = vmatpush.bf16.msrb.mxu2 %v13274_v7 }
 0x265   : > { %v2488_v53 = vpop.f32.mrf.mxu3  ;;  %v19177_v31 = vrot.slane %v3184_v39, 1  ;;  %v2615_v60 = vadd.f32 %v19104_v47, %v2573_v19  ;;  %v13130_v61 = vor.u32 %v16874_v57, %v13127_v23  ;;  %v16870_v43 = vld [vmem:[#allocation9 + $0x6a4] sm:$0xf]  ;;  %v16809_v12 = vld [vmem:[#allocation9 + $0x4b4] sm:$0xf0] }
 0x266   : > { %v19179_v34 = vrot.slane %v2646_v17, 7  ;;  %v2489_v58 = vadd.f32 %v2488_v53, %v2459_v36  ;;  %v3196_v63 = vshll.u32 %v19181_v56, 16  ;;  %v16813_v36 = vld [vmem:[#allocation9 + $0x4d4] sm:$0xf0]  ;;  %4126 = vmatpush.bf16.msrb.mxu0 %v13146_v45  ;;  %v13114_v26 = vor.u32 %v16870_v43, %v13111_v51  ;;  %v13021_v48 = vld [vmem:[#allocation9 + $0x5e8] sm:$0xf] }
 0x267   : > { %v19188_v5 = vsel %vm938_vm3, %v3182_v55, %v19177_v31  ;;  %v2647_v42 = vmax.f32 %v2615_v60, 0.0  ;;  %v2462_v30 = vpop.f32.mrf.mxu1  ;;  %v12878_v9 = vor.u32 %v16813_v36, %v12877_v18  ;;  %v16866_v55 = vld [vmem:[#allocation9 + $0x684] sm:$0xf]  ;;  %v12862_v24 = vor.u32 %v16809_v12, %v12861_v25 }
 0x268   : > { %v2732_v14 = vsel %vm739_vm0, %v2723_v44, %v19179_v34  ;;  %v2576_v4 = vadd.f32 %v2489_v58, %v1915_v50  ;;  %4018 = vmatmul.bf16.vlgmr.msra.gmra.mxu0 %v19188_v5  ;;  %4076 = vmatmul.bf16.vlgmr.msrb.gmra.mxu1 %v19023_v0  ;;  %v2546_v44 = vpop.f32.mrf.mxu2  ;;  %v19197_v46 = vrot.slane %v3196_v63, 1  ;;  %v13095_v58 = vld [vmem:[#allocation9 + $0x690] sm:$0xf0]  ;;  %v16906_v60 = vld [vmem:[#allocation9 + $0x7c4] sm:$0xf] }
 0x269   : > { %v2733_v6 = vrot.slane %v2647_v42, 7  ;;  %v2547_v2 = vadd.f32 %v2546_v44, %v2517_v10  ;;  %4185 = vmatpush.bf16.msra.mxu1 %v12878_v9  ;;  %v12845_v63 = vld [vmem:[#allocation9 + $0x488] sm:$0xf]  ;;  %v16849_v42 = vld [vmem:[#allocation9 + $0x5f4] sm:$0xf0] }
 0x26a   : > { %v2618_v49 = vadd.f32 %v19079_v16, %v2576_v4  ;;  %v19201_v3 = vsel %vm938_vm3, %v3194_v11, %v19197_v46  ;;  %4127 = vmatpush.bf16.msrb.mxu0 %v13130_v61  ;;  %v2520_v32 = vpop.f32.mrf.mxu0  ;;  %v13022_v29 = vor.u32 %v16849_v42, %v13021_v48  ;;  %v12846_v28 = vor.u32 %v16805_v15, %v12845_v63 }
 0x26b   : > { %v2734_v39 = vsel %vm739_vm0, %v2725_v8, %v2733_v6  ;;  %v2577_v17 = vadd.f32 %v2547_v2, %v1973_v20  ;;  %4047 = vmatmul.bf16.vlgmr.msra.gmra.mxu2 %v19201_v3  ;;  %4105 = vmatmul.bf16.vlgmr.msrb.gmra.mxu3 %v19034_v27  ;;  %v13255_v8 = vld [vmem:[#allocation9 + $0x7d0] sm:$0xf0]  ;;  %v3216_v20 = vshrl.u32 %v19168_v59, 16  ;;  %v21170_v2 = vld [vmem:[#allocation43_spill] sm:$0xff] }
 0x26c   : > { %v2650_v33 = vmax.f32 %v2618_v49, 0.0  ;;  %v13258_v57 = vor.u32 %v16906_v60, %v13255_v8  ;;  %v13098_v49 = vor.u32 %v16866_v55, %v13095_v58  ;;  %4213 = vmatpush.bf16.msra.mxu3 %v13022_v29  ;;  %v3224_v8 = vshrl.u32 %v19181_v56, 16 }
 0x26d   : > { %v2491_v50 = vpop.f32.mrf.mxu3  ;;  %v2619_v10 = vadd.f32 %v19104_v47, %v2577_v17  ;;  %4186 = vmatpush.bf16.msra.mxu1 %v12862_v24  ;;  %v3218_v51 = vor.u32 %v3216_v20, %v19177_v31  ;;  %v12829_v31 = vld [vmem:[#allocation9 + $0x468] sm:$0xf] }
 0x26e   : > { %v2739_v53 = vrot.slane %v2650_v33, 7  ;;  %v2492_v19 = vadd.f32 %v2491_v50, %v2462_v30  ;;  %4156 = vmatpush.bf16.msrb.mxu2 %v13258_v57  ;;  %4128 = vmatpush.bf16.msrb.mxu0 %v13114_v26  ;;  %v21172_v33 = vld [vmem:[#allocation47_spill] sm:$0xff]  ;;  %v21173_v50 = vld [vmem:[#allocation49_spill] sm:$0xff]  ;;  %v3226_v20 = vor.u32 %v3224_v8, %v19197_v46  ;;  %v12797_v8 = vld [vmem:[#allocation9 + $0x428] sm:$0xf] }
 0x26f   : > { %v2651_v30 = vmax.f32 %v2619_v10, 0.0  ;;  %v13079_v26 = vld [vmem:[#allocation9 + $0x670] sm:$0xf0] }
 0x270   : > { %v2740_v40 = vsel %vm739_vm0, %v19179_v34, %v2739_v53  ;;  %v2580_v4 = vadd.f32 %v2492_v19, %v21169_v54  ;;  %v2549_v18 = vpop.f32.mrf.mxu2  ;;  %v2464_v34 = vpop.f32.mrf.mxu1  ;;  %v13005_v54 = vld [vmem:[#allocation9 + $0x5c8] sm:$0xf] }
 0x271   : > { %v19210_v45 = vpack.c.bf16 %v2740_v40, %v2732_v14  ;;  %v19214_v44 = vrot.slane %v2651_v30, 7  ;;  %v2550_v11 = vadd.f32 %v2549_v18, %v2520_v32  ;;  %v21171_v14 = vld [vmem:[#allocation46_spill] sm:$0xff]  ;;  %4187 = vmatpush.bf16.msra.mxu1 %v12846_v28  ;;  %v21176_v32 = vld [vmem:[#allocation48_spill] sm:$0xff] }
 0x272   : > { %v2622_v23 = vadd.f32 %v19079_v16, %v2580_v4  ;;  %v1891_v61 = vadd.f32 %v21171_v14, %v21170_v2  ;;  %4129 = vmatpush.bf16.msrb.mxu0 %v13098_v49  ;;  %v16801_v40 = vld [vmem:[#allocation9 + $0x474] sm:$0xf0]  ;;  %v21175_v4 = vld [vmem:[#allocation44_spill] sm:$0xff] }
 0x273   : > { %v3220_v36 = vshll.u32 %v19210_v45, 16  ;;  %v2742_v1 = vsel %vm739_vm0, %v2733_v6, %v19214_v44  ;;  %v2581_v7 = vadd.f32 %v2550_v11, %v21172_v33  ;;  %v16862_v6 = vld [vmem:[#allocation9 + $0x664] sm:$0xf]  ;;  %v1949_v63 = vadd.f32 %v21176_v32, %v21175_v4  ;;  %v16845_v30 = vld [vmem:[#allocation9 + $0x5d4] sm:$0xf0] }
 0x274   : > { %v2654_v9 = vmax.f32 %v2622_v23, 0.0  ;;  %v1920_v17 = vadd.f32 %v21173_v50, %v1891_v61  ;;  %v19228_v55 = vpack.c.bf16 %v2742_v1, %v2734_v39  ;;  %v21174_v39 = vld [vmem:[#allocation53_spill] sm:$0xff]  ;;  %v13082_v57 = vor.u32 %v16862_v6, %v13079_v26  ;;  %v2522_v23 = vpop.f32.mrf.mxu0  ;;  %v21177_v28 = vld [vmem:[#allocation50_spill] sm:$0xff]  ;;  %v16854_v6 = vld [vmem:[#allocation9 + $0x624] sm:$0xf] }
 0x275   : > { %v2493_v43 = vpop.f32.mrf.mxu3  ;;  %v19223_v25 = vrot.slane %v3220_v36, 1  ;;  %v2623_v58 = vadd.f32 %v19104_v47, %v2581_v7  ;;  %v12830_v42 = vor.u32 %v16801_v40, %v12829_v31  ;;  %v13063_v11 = vld [vmem:[#allocation9 + $0x650] sm:$0xf0]  ;;  %v12813_v36 = vld [vmem:[#allocation9 + $0x448] sm:$0xf]  ;;  %v1978_v2 = vadd.f32 %v21177_v28, %v1949_v63 }
 0x276   : > { %v19226_v12 = vrot.slane %v2654_v9, 7  ;;  %v2494_v19 = vadd.f32 %v2493_v43, %v2464_v34  ;;  %v3228_v48 = vshll.u32 %v19228_v55, 16  ;;  %v13006_v34 = vor.u32 %v16845_v30, %v13005_v54  ;;  %4130 = vmatpush.bf16.msrb.mxu0 %v13082_v57  ;;  %v16797_v1 = vld [vmem:[#allocation9 + $0x454] sm:$0xf0]  ;;  %v16902_v43 = vld [vmem:[#allocation9 + $0x7a4] sm:$0xf] }
 0x277   : > { %v19233_v10 = vsel %vm938_vm3, %v3218_v51, %v19223_v25  ;;  %v2655_v15 = vmax.f32 %v2623_v58, 0.0  ;;  %4188 = vmatpush.bf16.msra.mxu1 %v12830_v42  ;;  %v12814_v46 = vor.u32 %v16797_v1, %v12813_v36  ;;  %v13239_v7 = vld [vmem:[#allocation9 + $0x7b0] sm:$0xf0]  ;;  %v12989_v51 = vld [vmem:[#allocation9 + $0x5a8] sm:$0xf] }
 0x278   : > { %v19237_v24 = vsel %vm739_vm0, %v2739_v53, %v19226_v12  ;;  %v2584_v60 = vadd.f32 %v2494_v19, %v1920_v17  ;;  %4023 = vmatmul.bf16.gmra.mxu0 %v19233_v10  ;;  %4081 = vmatmul.bf16.gmra.mxu1 %v21174_v39  ;;  %v16858_v53 = vld [vmem:[#allocation9 + $0x644] sm:$0xf]  ;;  %v2551_v18 = vpop.f32.mrf.mxu2  ;;  %v19247_v49 = vrot.slane %v3228_v48, 1  ;;  %v13242_v19 = vor.u32 %v16902_v43, %v13239_v7  ;;  %v16841_v58 = vld [vmem:[#allocation9 + $0x5b4] sm:$0xf0] }
 0x279   : > { %v2749_v14 = vrot.slane %v2655_v15, 7  ;;  %v2552_v61 = vadd.f32 %v2551_v18, %v2522_v23  ;;  %v13066_v9 = vor.u32 %v16858_v53, %v13063_v11  ;;  %4214 = vmatpush.bf16.msra.mxu3 %v13006_v34  ;;  %v13047_v26 = vld [vmem:[#allocation9 + $0x630] sm:$0xf0]  ;;  %v16793_v48 = vld [vmem:[#allocation9 + $0x434] sm:$0xf0] }
 0x27a   : > { %v2626_v29 = vadd.f32 %v19079_v16, %v2584_v60  ;;  %v19252_v16 = vsel %vm938_vm3, %v3226_v20, %v19247_v49  ;;  %v12990_v60 = vor.u32 %v16841_v58, %v12989_v51  ;;  %v13050_v54 = vor.u32 %v16854_v6, %v13047_v26  ;;  %v13223_v32 = vld [vmem:[#allocation9 + $0x790] sm:$0xf0]  ;;  %v12973_v63 = vld [vmem:[#allocation9 + $0x588] sm:$0xf]  ;;  %4157 = vmatpush.bf16.msrb.mxu2 %v13242_v19  ;;  %v16837_v42 = vld [vmem:[#allocation9 + $0x594] sm:$0xf0] }
 0x27b   : > { %v2750_v50 = vsel %vm739_vm0, %v19214_v44, %v2749_v14  ;;  %v2585_v17 = vadd.f32 %v2552_v61, %v1978_v2  ;;  %4052 = vmatmul.bf16.gmra.mxu2 %v19252_v16  ;;  %4110 = vmatmul.bf16.gmra.mxu3 %v19083_v22  ;;  %v12798_v4 = vor.u32 %v16793_v48, %v12797_v8  ;;  %v16898_v44 = vld [vmem:[#allocation9 + $0x784] sm:$0xf]  ;;  %v13031_v34 = vld [vmem:[#allocation9 + $0x610] sm:$0xf0]  ;;  %v12781_v11 = vld [vmem:[#allocation9 + $0x408] sm:$0xf] }
 0x27c   : > { %v2658_v33 = vmax.f32 %v2626_v29, 0.0  ;;  %4131 = vmatpush.bf16.msrb.mxu0 %v13066_v9  ;;  %4189 = vmatpush.bf16.msra.mxu1 %v12814_v46  ;;  %v13226_v57 = vor.u32 %v16898_v44, %v13223_v32  ;;  %v3248_v29 = vshrl.u32 %v19210_v45, 16  ;;  %v16850_v20 = vld [vmem:[#allocation9 + $0x604] sm:$0xf]  ;;  %v16789_v36 = vld [vmem:[#allocation9 + $0x414] sm:$0xf0] }
 0x27d   : > { %v2627_v40 = vadd.f32 %v19104_v47, %v2585_v17  ;;  %4215 = vmatpush.bf16.msra.mxu3 %v12990_v60  ;;  %v12974_v47 = vor.u32 %v16837_v42, %v12973_v63  ;;  %v13034_v2 = vor.u32 %v16850_v20, %v13031_v34  ;;  %v12782_v61 = vor.u32 %v16789_v36, %v12781_v11  ;;  %v16894_v9 = vld [vmem:[#allocation9 + $0x764] sm:$0xf]  ;;  %v13207_v43 = vld [vmem:[#allocation9 + $0x770] sm:$0xf0]  ;;  %v16833_v17 = vld [vmem:[#allocation9 + $0x574] sm:$0xf0] }
 0x27e   : > { %v2755_v31 = vrot.slane %v2658_v33, 7  ;;  %4158 = vmatpush.bf16.msrb.mxu2 %v13226_v57  ;;  %v12957_v33 = vld [vmem:[#allocation9 + $0x568] sm:$0xf]  ;;  %v13210_v51 = vor.u32 %v16894_v9, %v13207_v43  ;;  %v16890_v19 = vld [vmem:[#allocation9 + $0x744] sm:$0xf] }
 0x27f   : > { %v2659_v30 = vmax.f32 %v2627_v40, 0.0  ;;  %v13191_v58 = vld [vmem:[#allocation9 + $0x750] sm:$0xf0]  ;;  %v12941_v26 = vld [vmem:[#allocation9 + $0x548] sm:$0xf] }
 0x280   : > { %v2756_v15 = vsel %vm739_vm0, %v19226_v12, %v2755_v31  ;;  %2829 = vst [vmem:[#allocation3 + $0x110] sm:$0x1] %v2755_v31  ;;  %4132 = vmatpush.bf16.msrb.mxu0 %v13050_v54  ;;  %4190 = vmatpush.bf16.msra.mxu1 %v12798_v4  ;;  %v3250_v12 = vor.u32 %v3248_v29, %v19223_v25  ;;  %v3256_v25 = vshrl.u32 %v19228_v55, 16  ;;  %v16829_v31 = vld [vmem:[#allocation9 + $0x554] sm:$0xf0] }
 0x281   : > { %v19262_v53 = vpack.c.bf16 %v2756_v15, %v19237_v24  ;;  %v2757_v23 = vrot.slane %v2659_v30, 7  ;;  %4216 = vmatpush.bf16.msra.mxu3 %v12974_v47  ;;  %v13194_v48 = vor.u32 %v16890_v19, %v13191_v58  ;;  %v12942_v40 = vor.u32 %v16829_v31, %v12941_v26  ;;  %v16886_v44 = vld [vmem:[#allocation9 + $0x724] sm:$0xf]  ;;  %v13175_v32 = vld [vmem:[#allocation9 + $0x730] sm:$0xf0] }
 0x282   : > { %v3258_v6 = vor.u32 %v3256_v25, %v19247_v49  ;;  %4159 = vmatpush.bf16.msrb.mxu2 %v13210_v51  ;;  %v12925_v63 = vld [vmem:[#allocation9 + $0x528] sm:$0xf]  ;;  %v16825_v49 = vld [vmem:[#allocation9 + $0x534] sm:$0xf0]  ;;  %v13178_v57 = vor.u32 %v16886_v44, %v13175_v32  ;;  %v16882_v30 = vld [vmem:[#allocation9 + $0x704] sm:$0xf] }
 0x283   : > { %v3252_v18 = vshll.u32 %v19262_v53, 16  ;;  %v2758_v28 = vsel %vm739_vm0, %v2749_v14, %v2757_v23  ;;  %2830 = vst [vmem:[#allocation3 + $0x118] sm:$0x1] %v2757_v23  ;;  %v12926_v42 = vor.u32 %v16825_v49, %v12925_v63  ;;  %v13159_v47 = vld [vmem:[#allocation9 + $0x710] sm:$0xf0]  ;;  %v3280_v34 = vshrl.u32 %v19262_v53, 16 }
 0x284   : > { %v19268_v1 = vpack.c.bf16 %v2758_v28, %v2750_v50  ;;  %4133 = vmatpush.bf16.msrb.mxu0 %v13034_v2  ;;  %4191 = vmatpush.bf16.msra.mxu1 %v12782_v61  ;;  %v12958_v50 = vor.u32 %v16833_v17, %v12957_v33  ;;  %v12909_v29 = vld [vmem:[#allocation9 + $0x508] sm:$0xf]  ;;  %v16821_v23 = vld [vmem:[#allocation9 + $0x514] sm:$0xf0]  ;;  %v13162_v20 = vor.u32 %v16882_v30, %v13159_v47  ;;  %v16815_v51 = vld [vmem:[#allocation9 + $0x4ec] sm:$0xf] }
 0x285   : > { %v3254_v24 = vrot.slane %v3252_v18, 1  ;;  %v13149_v25 = vld [vmem:[#allocation9 + $0x6e8] sm:$0xf]  ;;  %v16877_v58 = vld [vmem:[#allocation9 + $0x6d4] sm:$0xf0] }
 0x286   : > { %v3260_v14 = vshll.u32 %v19268_v1, 16  ;;  %4217 = vmatpush.bf16.msra.mxu3 %v12958_v50  ;;  %4160 = vmatpush.bf16.msrb.mxu2 %v13194_v48  ;;  %v3288_v61 = vshrl.u32 %v19268_v1, 16  ;;  %v13133_v19 = vld [vmem:[#allocation9 + $0x6c8] sm:$0xf]  ;;  %v12879_v31 = vld [vmem:[#allocation9 + $0x4d8] sm:$0xf0] }
 0x287   : > { %v19271_v46 = vsel %vm938_vm3, %v3250_v12, %v3254_v24  ;;  %v3013_v7 = vld [vmem:[#allocation3 + $0x110] sm:$0x1]  ;;  %v12910_v12 = vor.u32 %v16821_v23, %v12909_v29  ;;  %v3282_v28 = vor.u32 %v3280_v34, %v3254_v24  ;;  %v13134_v26 = vor.u32 %v16877_v58, %v13133_v19  ;;  %v13277_v48 = vld [vmem:[#allocation9 + $0x7e8] sm:$0xf]  ;;  %v16873_v32 = vld [vmem:[#allocation9 + $0x6b4] sm:$0xf0] }
 0x288   : > { %4028 = vmatmul.bf16.gmra.mxu0 %v19271_v46  ;;  %4086 = vmatmul.bf16.gmra.mxu1 %v19122_v35  ;;  %v3262_v60 = vrot.slane %v3260_v14, 1  ;;  %v3021_v8 = vpack.c.bf16 %v3013_v7, %v3013_v7  ;;  %v16881_v7 = vld [vmem:[#allocation9 + $0x6f4] sm:$0xf0]  ;;  %v12895_v14 = vld [vmem:[#allocation9 + $0x4f8] sm:$0xf0] }
 0x289   : > { %v13150_v17 = vor.u32 %v16881_v7, %v13149_v25  ;;  %v12898_v50 = vor.u32 %v16815_v51, %v12895_v14  ;;  %v16807_v63 = vld [vmem:[#allocation9 + $0x4ac] sm:$0xf]  ;;  %v12863_v49 = vld [vmem:[#allocation9 + $0x4b8] sm:$0xf0]  ;;  %v13101_v47 = vld [vmem:[#allocation9 + $0x688] sm:$0xf] }
 0x28a   : > { %v19279_v54 = vsel %vm938_vm3, %v3258_v6, %v3262_v60  ;;  %v3014_v4 = vld [vmem:[#allocation3 + $0x118] sm:$0x1]  ;;  %v3284_v15 = vshll.u32 %v3021_v8, 16  ;;  %4218 = vmatpush.bf16.msra.mxu3 %v12942_v40  ;;  %4161 = vmatpush.bf16.msrb.mxu2 %v13178_v57  ;;  %v3290_v43 = vor.u32 %v3288_v61, %v3262_v60  ;;  %v16811_v6 = vld [vmem:[#allocation9 + $0x4cc] sm:$0xf]  ;;  %v12866_v57 = vor.u32 %v16807_v63, %v12863_v49 }
 0x28b   : > { %4057 = vmatmul.bf16.gmra.mxu2 %v19279_v54  ;;  %4115 = vmatmul.bf16.gmra.mxu3 %v19134_v37  ;;  %v3022_v18 = vpack.c.bf16 %v3014_v4, %v3014_v4  ;;  %v12882_v8 = vor.u32 %v16811_v6, %v12879_v31  ;;  %v16913_v40 = vld [vmem:[#allocation9 + $0x7f4] sm:$0xf0]  ;;  %v13117_v4 = vld [vmem:[#allocation9 + $0x6a8] sm:$0xf]  ;;  %v16803_v23 = vld [vmem:[#allocation9 + $0x48c] sm:$0xf] }
 0x28c   : > { %v3286_v11 = vrot.slane %v3284_v15, 1  ;;  %4242 = vmatpush.bf16.msra.mxu0 %v13150_v17  ;;  %4300 = vmatpush.bf16.msrb.mxu1 %v12898_v50  ;;  %v13278_v44 = vor.u32 %v16913_v40, %v13277_v48  ;;  %v13118_v15 = vor.u32 %v16873_v32, %v13117_v4  ;;  %v16869_v29 = vld [vmem:[#allocation9 + $0x694] sm:$0xf0]  ;;  %v13023_v34 = vld [vmem:[#allocation9 + $0x5f8] sm:$0xf0] }
 0x28d   : > { %v3292_v36 = vshll.u32 %v3022_v18, 16  ;;  %v13102_v18 = vor.u32 %v16869_v29, %v13101_v47  ;;  %v16909_v61 = vld [vmem:[#allocation9 + $0x7d4] sm:$0xf0]  ;;  %v16799_v7 = vld [vmem:[#allocation9 + $0x46c] sm:$0xf] }
 0x28e   : > { %4219 = vmatpush.bf16.msra.mxu3 %v12926_v42  ;;  %4162 = vmatpush.bf16.msrb.mxu2 %v13162_v20  ;;  %v19285_v2 = vsel %vm938_vm3, %v3282_v28, %v3286_v11  ;;  %v12847_v20 = vld [vmem:[#allocation9 + $0x498] sm:$0xf0]  ;;  %v13261_v28 = vld [vmem:[#allocation9 + $0x7c8] sm:$0xf]  ;;  %v16865_v25 = vld [vmem:[#allocation9 + $0x674] sm:$0xf0] }
 0x28f   : > { %v3294_v9 = vrot.slane %v3292_v36, 1  ;;  %v12850_v36 = vor.u32 %v16803_v23, %v12847_v20  ;;  %v12831_v14 = vld [vmem:[#allocation9 + $0x478] sm:$0xf0]  ;;  %v16843_v50 = vld [vmem:[#allocation9 + $0x5cc] sm:$0xf] }
 0x290   : > { %4243 = vmatpush.bf16.msra.mxu0 %v13134_v26  ;;  %4301 = vmatpush.bf16.msrb.mxu1 %v12882_v8  ;;  %v13007_v19 = vld [vmem:[#allocation9 + $0x5d8] sm:$0xf0]  ;;  %v12834_v6 = vor.u32 %v16799_v7, %v12831_v14  ;;  %v13069_v31 = vld [vmem:[#allocation9 + $0x648] sm:$0xf]  ;;  %v16861_v8 = vld [vmem:[#allocation9 + $0x654] sm:$0xf0] }
 0x291   : > { %v19291_v33 = vsel %vm938_vm3, %v3290_v43, %v3294_v9  ;;  %v13262_v43 = vor.u32 %v16909_v61, %v13261_v28  ;;  %v13010_v26 = vor.u32 %v16843_v50, %v13007_v19  ;;  %v16795_v48 = vld [vmem:[#allocation9 + $0x44c] sm:$0xf]  ;;  %v13070_v40 = vor.u32 %v16861_v8, %v13069_v31  ;;  %v12815_v4 = vld [vmem:[#allocation9 + $0x458] sm:$0xf0]  ;;  %v16905_v32 = vld [vmem:[#allocation9 + $0x7b4] sm:$0xf0] }
 0x292   : > { %4220 = vmatpush.bf16.msra.mxu3 %v12910_v12  ;;  %4271 = vmatpush.bf16.msra.mxu2 %v13278_v44  ;;  %v16847_v12 = vld [vmem:[#allocation9 + $0x5ec] sm:$0xf]  ;;  %v13245_v44 = vld [vmem:[#allocation9 + $0x7a8] sm:$0xf]  ;;  %v16857_v29 = vld [vmem:[#allocation9 + $0x634] sm:$0xf0] }
 0x293   : > { %v13026_v9 = vor.u32 %v16847_v12, %v13023_v34  ;;  %v13246_v49 = vor.u32 %v16905_v32, %v13245_v44  ;;  %v16791_v23 = vld [vmem:[#allocation9 + $0x42c] sm:$0xf]  ;;  %v13229_v34 = vld [vmem:[#allocation9 + $0x788] sm:$0xf]  ;;  %v12783_v50 = vld [vmem:[#allocation9 + $0x418] sm:$0xf0] }
 0x294   : > { %4244 = vmatpush.bf16.msra.mxu0 %v13118_v15  ;;  %4302 = vmatpush.bf16.msrb.mxu1 %v12866_v57  ;;  %v16839_v15 = vld [vmem:[#allocation9 + $0x5ac] sm:$0xf]  ;;  %v12991_v57 = vld [vmem:[#allocation9 + $0x5b8] sm:$0xf0]  ;;  %v13037_v7 = vld [vmem:[#allocation9 + $0x608] sm:$0xf] }
 0x295   : > { %v12994_v47 = vor.u32 %v16839_v15, %v12991_v57  ;;  %v16835_v28 = vld [vmem:[#allocation9 + $0x58c] sm:$0xf]  ;;  %v13213_v19 = vld [vmem:[#allocation9 + $0x768] sm:$0xf]  ;;  %v16893_v32 = vld [vmem:[#allocation9 + $0x754] sm:$0xf0] }
 0x296   : > { %4329 = vmatpush.bf16.msrb.mxu3 %v13026_v9  ;;  %4272 = vmatpush.bf16.msra.mxu2 %v13262_v43  ;;  %v12975_v43 = vld [vmem:[#allocation9 + $0x598] sm:$0xf0]  ;;  %v13197_v44 = vld [vmem:[#allocation9 + $0x748] sm:$0xf] }
 0x297   : > { %v13198_v15 = vor.u32 %v16893_v32, %v13197_v44  ;;  %v12943_v57 = vld [vmem:[#allocation9 + $0x558] sm:$0xf0]  ;;  %v16688_v32 = vld [vmem:[#allocation9 + $0xec] sm:$0xf0] }
 0x298   : > { %4033 = vmatmul.bf16.gmra.mxu0 %v19285_v2  ;;  %4091 = vmatmul.bf16.gmra.mxu1 %v19150_v62 }
 0x299   : > { %4245 = vmatpush.bf16.msra.mxu0 %v13102_v18  ;;  %4303 = vmatpush.bf16.msrb.mxu1 %v12850_v36  ;;  %v12799_v18 = vld [vmem:[#allocation9 + $0x438] sm:$0xf0]  ;;  %v16901_v36 = vld [vmem:[#allocation9 + $0x794] sm:$0xf0] }
 0x29a   : > { %4330 = vmatpush.bf16.msrb.mxu3 %v13010_v26  ;;  %4273 = vmatpush.bf16.msra.mxu2 %v13246_v49  ;;  %v12802_v12 = vor.u32 %v16791_v23, %v12799_v18  ;;  %v13230_v9 = vor.u32 %v16901_v36, %v13229_v34  ;;  %v16823_v23 = vld [vmem:[#allocation9 + $0x52c] sm:$0xf]  ;;  %v13165_v36 = vld [vmem:[#allocation9 + $0x708] sm:$0xf] }
 0x29b   : > { %4062 = vmatmul.bf16.gmra.mxu2 %v19291_v33  ;;  %4120 = vmatmul.bf16.gmra.mxu3 %v19161_v21 }
 0x29d   : > { %4304 = vmatpush.bf16.msrb.mxu1 %v12834_v6  ;;  %v16897_v6 = vld [vmem:[#allocation9 + $0x774] sm:$0xf0] }
 0x29e   : > { %4331 = vmatpush.bf16.msrb.mxu3 %v12994_v47  ;;  %4274 = vmatpush.bf16.msra.mxu2 %v13230_v9  ;;  %v13214_v8 = vor.u32 %v16897_v6, %v13213_v19  ;;  %v13181_v47 = vld [vmem:[#allocation9 + $0x728] sm:$0xf]  ;;  %v12911_v9 = vld [vmem:[#allocation9 + $0x518] sm:$0xf0] }
 0x2a2   : > { %4275 = vmatpush.bf16.msra.mxu2 %v13214_v8 }
 0x2a5   : > { %v3961_v24 = vpop.f32.mrf.mxu1 }
 0x2a6   : > { %4276 = vmatpush.bf16.msra.mxu2 %v13198_v15 }
 0x2a8   : > { %4134 = vmatmul.bf16.vlgmr.msrb.gmra.mxu0 %v19188_v5  ;;  %4192 = vmatmul.bf16.vlgmr.msra.gmra.mxu1 %v19023_v0 }
 0x2ab   : > { %4163 = vmatmul.bf16.vlgmr.msrb.gmra.mxu2 %v19201_v3  ;;  %4221 = vmatmul.bf16.vlgmr.msra.gmra.mxu3 %v19034_v27 }
 0x2ad   : > { %v3963_v60 = vpop.f32.mrf.mxu1 }
 0x2ae   : > { %v3990_v42 = vpop.f32.mrf.mxu3 }
 0x2af   : > { %v19299_v30 = vadd.f32 %v3990_v42, %v3961_v24  ;;  %v13085_v24 = vld [vmem:[#allocation9 + $0x668] sm:$0xf] }
 0x2b0   : > { %v13086_v17 = vor.u32 %v16865_v25, %v13085_v24  ;;  %v13053_v42 = vld [vmem:[#allocation9 + $0x628] sm:$0xf]  ;;  %v12978_v25 = vor.u32 %v16835_v28, %v12975_v43 }
 0x2b1   : > { %v13054_v20 = vor.u32 %v16857_v29, %v13053_v42  ;;  %v16889_v29 = vld [vmem:[#allocation9 + $0x734] sm:$0xf0] }
 0x2b2   : > { %4246 = vmatpush.bf16.msra.mxu0 %v13086_v17  ;;  %v16787_v17 = vld [vmem:[#allocation9 + $0x40c] sm:$0xf]  ;;  %4332 = vmatpush.bf16.msrb.mxu3 %v12978_v25 }
 0x2b3   : > { %v12786_v31 = vor.u32 %v16787_v17, %v12783_v50 }
 0x2b5   : > { %v3966_v11 = vpop.f32.mrf.mxu1 }
 0x2b6   : > { %v3992_v51 = vpop.f32.mrf.mxu3  ;;  %4247 = vmatpush.bf16.msra.mxu0 %v13070_v40  ;;  %v12959_v40 = vld [vmem:[#allocation9 + $0x578] sm:$0xf0] }
 0x2b7   : > { %v19303_v58 = vadd.f32 %v3992_v51, %v3963_v60  ;;  %v12818_v60 = vor.u32 %v16795_v48, %v12815_v4  ;;  %v16853_v51 = vld [vmem:[#allocation9 + $0x614] sm:$0xf0]  ;;  %v16831_v48 = vld [vmem:[#allocation9 + $0x56c] sm:$0xf] }
 0x2b8   : > { %4139 = vmatmul.bf16.gmra.mxu0 %v19233_v10  ;;  %4197 = vmatmul.bf16.gmra.mxu1 %v21174_v39  ;;  %v13038_v14 = vor.u32 %v16853_v51, %v13037_v7 }
 0x2b9   : > { %4305 = vmatpush.bf16.msrb.mxu1 %v12818_v60  ;;  %v16827_v60 = vld [vmem:[#allocation9 + $0x54c] sm:$0xf] }
 0x2ba   : > { %4248 = vmatpush.bf16.msra.mxu0 %v13054_v20  ;;  %v12946_v42 = vor.u32 %v16827_v60, %v12943_v57  ;;  %v13182_v20 = vor.u32 %v16889_v29, %v13181_v47  ;;  %v16875_v57 = vld [vmem:[#allocation9 + $0x6cc] sm:$0xf]  ;;  %v13381_v47 = vld [vmem:[#allocation9 + $0xc0] sm:$0xf] }
 0x2bb   : > { %4168 = vmatmul.bf16.gmra.mxu2 %v19252_v16  ;;  %4226 = vmatmul.bf16.gmra.mxu3 %v19083_v22 }
 0x2bc   : > { %4277 = vmatpush.bf16.msra.mxu2 %v13182_v20 }
 0x2bd   : > { %v3968_v63 = vpop.f32.mrf.mxu1  ;;  %4306 = vmatpush.bf16.msrb.mxu1 %v12802_v12  ;;  %v12927_v12 = vld [vmem:[#allocation9 + $0x538] sm:$0xf0] }
 0x2be   : > { %v3995_v61 = vpop.f32.mrf.mxu3  ;;  %4249 = vmatpush.bf16.msra.mxu0 %v13038_v14  ;;  %v12930_v34 = vor.u32 %v16823_v23, %v12927_v12  ;;  %v16911_v12 = vld [vmem:[#allocation9 + $0x7ec] sm:$0xf] }
 0x2bf   : > { %v19307_v24 = vadd.f32 %v3995_v61, %v3966_v11  ;;  %v12962_v11 = vor.u32 %v16831_v48, %v12959_v40  ;;  %v16819_v61 = vld [vmem:[#allocation9 + $0x50c] sm:$0xf]  ;;  %v13151_v40 = vld [vmem:[#allocation9 + $0x6f8] sm:$0xf0] }
 0x2c0   : > { %v12914_v7 = vor.u32 %v16819_v61, %v12911_v9  ;;  %v16879_v48 = vld [vmem:[#allocation9 + $0x6ec] sm:$0xf]  ;;  %v13365_v61 = vld [vmem:[#allocation9 + $0xa0] sm:$0xf]  ;;  %v16680_v9 = vld [vmem:[#allocation9 + $0xac] sm:$0xf0] }
 0x2c1   : > { %4307 = vmatpush.bf16.msrb.mxu1 %v12786_v31  ;;  %4333 = vmatpush.bf16.msrb.mxu3 %v12962_v11  ;;  %v13397_v11 = vld [vmem:[#allocation9 + $0xe0] sm:$0xf]  ;;  %v13154_v44 = vor.u32 %v16879_v48, %v13151_v40  ;;  %v16676_v40 = vld [vmem:[#allocation9 + $0x8c] sm:$0xf0] }
 0x2c2   : > { %v13398_v15 = vor.u32 %v16688_v32, %v13397_v11  ;;  %v13525_v11 = vld [vmem:[#allocation9 + $0x1e0] sm:$0xf] }
 0x2c3   : > { %4358 = vmatpush.bf16.msrb.mxu0 %v13154_v44 }
 0x2c5   : > { %v3971_v26 = vpop.f32.mrf.mxu1  ;;  %4334 = vmatpush.bf16.msrb.mxu3 %v12946_v42  ;;  %5056 = vmatpush.bf16.msra.mxu1 %v13398_v15  ;;  %v13135_v42 = vld [vmem:[#allocation9 + $0x6d8] sm:$0xf0] }
 0x2c6   : > { %v3997_v4 = vpop.f32.mrf.mxu3  ;;  %v13138_v29 = vor.u32 %v16875_v57, %v13135_v42  ;;  %v13263_v42 = vld [vmem:[#allocation9 + $0x7d8] sm:$0xf0] }
 0x2c7   : > { %v19311_v49 = vadd.f32 %v3997_v4, %v3968_v63  ;;  %v16885_v63 = vld [vmem:[#allocation9 + $0x714] sm:$0xf0] }
 0x2c8   : > { %4144 = vmatmul.bf16.gmra.mxu0 %v19271_v46  ;;  %4202 = vmatmul.bf16.gmra.mxu1 %v19122_v35  ;;  %v13166_v28 = vor.u32 %v16885_v63, %v13165_v36  ;;  %v16871_v36 = vld [vmem:[#allocation9 + $0x6ac] sm:$0xf] }
 0x2c9   : > { %4335 = vmatpush.bf16.msrb.mxu3 %v12930_v34  ;;  %4359 = vmatpush.bf16.msrb.mxu0 %v13138_v29  ;;  %v13279_v34 = vld [vmem:[#allocation9 + $0x7f8] sm:$0xf0]  ;;  %v16863_v29 = vld [vmem:[#allocation9 + $0x66c] sm:$0xf] }
 0x2ca   : > { %4278 = vmatpush.bf16.msra.mxu2 %v13166_v28  ;;  %v13282_v63 = vor.u32 %v16911_v12, %v13279_v34  ;;  %v13119_v28 = vld [vmem:[#allocation9 + $0x6b8] sm:$0xf0] }
 0x2cb   : > { %4173 = vmatmul.bf16.gmra.mxu2 %v19279_v54  ;;  %4231 = vmatmul.bf16.gmra.mxu3 %v19134_v37 }
 0x2cd   : > { %v3973_v18 = vpop.f32.mrf.mxu1  ;;  %4336 = vmatpush.bf16.msrb.mxu3 %v12914_v7 }
 0x2ce   : > { %v4000_v43 = vpop.f32.mrf.mxu3  ;;  %4387 = vmatpush.bf16.msrb.mxu2 %v13282_v63  ;;  %v13509_v63 = vld [vmem:[#allocation9 + $0x1c0] sm:$0xf] }
 0x2cf   : > { %v19315_v25 = vadd.f32 %v4000_v43, %v3971_v26 }
 0x2d5   : > { %v3976_v51 = vpop.f32.mrf.mxu1 }
 0x2d6   : > { %v4002_v17 = vpop.f32.mrf.mxu3 }
 0x2d7   : > { %v19319_v14 = vadd.f32 %v4002_v17, %v3973_v18  ;;  %v13366_v17 = vor.u32 %v16680_v9, %v13365_v61 }
 0x2d8   : > { %4149 = vmatmul.bf16.gmra.mxu0 %v19285_v2  ;;  %4207 = vmatmul.bf16.gmra.mxu1 %v19150_v62 }
 0x2db   : > { %4178 = vmatmul.bf16.gmra.mxu2 %v19291_v33  ;;  %4236 = vmatmul.bf16.gmra.mxu3 %v19161_v21 }
 0x2dd   : > { %v3978_v50 = vpop.f32.mrf.mxu1 }
 0x2de   : > { %v4005_v19 = vpop.f32.mrf.mxu3 }
 0x2df   : > { %v19323_v6 = vadd.f32 %v4005_v19, %v3976_v51  ;;  %v13122_v51 = vor.u32 %v16871_v36, %v13119_v28  ;;  %v16672_v36 = vld [vmem:[#allocation9 + $0x6c] sm:$0xf0] }
 0x2e0   : > { %v16716_v28 = vld [vmem:[#allocation9 + $0x1cc] sm:$0xf0] }
 0x2e1   : > { %4360 = vmatpush.bf16.msrb.mxu0 %v13122_v51  ;;  %v13071_v51 = vld [vmem:[#allocation9 + $0x658] sm:$0xf0] }
 0x2e5   : > { %v4019_v26 = vpop.f32.mrf.mxu0  ;;  %v4077_v31 = vpop.f32.mrf.mxu1 }
 0x2e6   : > { %v4020_v8 = vadd.f32 %v4019_v26, %v19299_v30  ;;  %v4007_v4 = vpop.f32.mrf.mxu3  ;;  %v16684_v30 = vld [vmem:[#allocation9 + $0xcc] sm:$0xf0]  ;;  %v13349_v26 = vld [vmem:[#allocation9 + $0x80] sm:$0xf] }
 0x2e7   : > { %v19328_v60 = vadd.f32 %v4007_v4, %v3978_v50  ;;  %v16720_v4 = vld [vmem:[#allocation9 + $0x1ec] sm:$0xf0]  ;;  %v13350_v15 = vor.u32 %v16676_v40, %v13349_v26  ;;  %v13247_v26 = vld [vmem:[#allocation9 + $0x7b8] sm:$0xf0] }
 0x2e8   : > { %4250 = vmatmul.bf16.vlgmr.msra.gmra.mxu0 %v19188_v5  ;;  %4308 = vmatmul.bf16.vlgmr.msrb.gmra.mxu1 %v19023_v0  ;;  %v13382_v0 = vor.u32 %v16684_v30, %v13381_v47  ;;  %v13526_v57 = vor.u32 %v16720_v4, %v13525_v11  ;;  %v13087_v30 = vld [vmem:[#allocation9 + $0x678] sm:$0xf0]  ;;  %v13493_v11 = vld [vmem:[#allocation9 + $0x1a0] sm:$0xf]  ;;  %v16712_v4 = vld [vmem:[#allocation9 + $0x1ac] sm:$0xf0] }
 0x2e9   : > { %v13090_v34 = vor.u32 %v16863_v29, %v13087_v30  ;;  %v16664_v29 = vld [vmem:[#allocation9 + $0x2c] sm:$0xf0]  ;;  %v16899_v30 = vld [vmem:[#allocation9 + $0x78c] sm:$0xf] }
 0x2ea   : > { %5057 = vmatpush.bf16.msra.mxu1 %v13382_v0  ;;  %5085 = vmatpush.bf16.msra.mxu3 %v13526_v57  ;;  %v16855_v57 = vld [vmem:[#allocation9 + $0x62c] sm:$0xf] }
 0x2eb   : > { %4279 = vmatmul.bf16.vlgmr.msra.gmra.mxu2 %v19201_v3  ;;  %4337 = vmatmul.bf16.vlgmr.msrb.gmra.mxu3 %v19034_v27  ;;  %v16867_v27 = vld [vmem:[#allocation9 + $0x68c] sm:$0xf] }
 0x2ed   : > { %v4021_v23 = vpop.f32.mrf.mxu0  ;;  %v4079_v18 = vpop.f32.mrf.mxu1 }
 0x2ee   : > { %v4022_v20 = vadd.f32 %v4021_v23, %v19303_v58  ;;  %v4048_v43 = vpop.f32.mrf.mxu2  ;;  %v4106_v7 = vpop.f32.mrf.mxu3  ;;  %5058 = vmatpush.bf16.msra.mxu1 %v13366_v17  ;;  %v13103_v58 = vld [vmem:[#allocation9 + $0x698] sm:$0xf0]  ;;  %v13333_v23 = vld [vmem:[#allocation9 + $0x60] sm:$0xf] }
 0x2ef   : > { %v19333_v50 = vadd.f32 %v4048_v43, %v4020_v8  ;;  %v19335_v19 = vadd.f32 %v4106_v7, %v4077_v31  ;;  %v13106_v48 = vor.u32 %v16867_v27, %v13103_v58  ;;  %v16907_v31 = vld [vmem:[#allocation9 + $0x7cc] sm:$0xf]  ;;  %v13334_v9 = vor.u32 %v16672_v36, %v13333_v23  ;;  %v13317_v17 = vld [vmem:[#allocation9 + $0x40] sm:$0xf]  ;;  %v16668_v27 = vld [vmem:[#allocation9 + $0x4c] sm:$0xf0] }
 0x2f0   : > { %v13266_v47 = vor.u32 %v16907_v31, %v13263_v42  ;;  %v13510_v43 = vor.u32 %v16716_v28, %v13509_v63  ;;  %v16859_v7 = vld [vmem:[#allocation9 + $0x64c] sm:$0xf]  ;;  %v13055_v31 = vld [vmem:[#allocation9 + $0x638] sm:$0xf0]  ;;  %v13301_v42 = vld [vmem:[#allocation9 + $0x20] sm:$0xf] }
 0x2f1   : > { %4361 = vmatpush.bf16.msrb.mxu0 %v13106_v48  ;;  %v16903_v58 = vld [vmem:[#allocation9 + $0x7ac] sm:$0xf]  ;;  %v13231_v23 = vld [vmem:[#allocation9 + $0x798] sm:$0xf0]  ;;  %v13477_v36 = vld [vmem:[#allocation9 + $0x180] sm:$0xf] }
 0x2f2   : > { %5059 = vmatpush.bf16.msra.mxu1 %v13350_v15  ;;  %4388 = vmatpush.bf16.msrb.mxu2 %v13266_v47  ;;  %v13494_v15 = vor.u32 %v16712_v4, %v13493_v11  ;;  %v13058_v47 = vor.u32 %v16855_v57, %v13055_v31  ;;  %v16708_v63 = vld [vmem:[#allocation9 + $0x18c] sm:$0xf0]  ;;  %v16891_v31 = vld [vmem:[#allocation9 + $0x74c] sm:$0xf] }
 0x2f3   : > { %5086 = vmatpush.bf16.msra.mxu3 %v13510_v43  ;;  %v16851_v43 = vld [vmem:[#allocation9 + $0x60c] sm:$0xf]  ;;  %v16704_v11 = vld [vmem:[#allocation9 + $0x16c] sm:$0xf0] }
 0x2f5   : > { %v4024_v44 = vpop.f32.mrf.mxu0  ;;  %v19337_v32 = vpop.f32.mrf.mxu1  ;;  %4362 = vmatpush.bf16.msrb.mxu0 %v13090_v34  ;;  %v13234_v34 = vor.u32 %v16899_v30, %v13231_v23 }
 0x2f6   : > { %v4025_v8 = vadd.f32 %v4024_v44, %v19307_v24  ;;  %v4050_v0 = vpop.f32.mrf.mxu2  ;;  %v4108_v12 = vpop.f32.mrf.mxu3  ;;  %5060 = vmatpush.bf16.msra.mxu1 %v13334_v9  ;;  %v13478_v9 = vor.u32 %v16708_v63, %v13477_v36 }
 0x2f7   : > { %v19342_v24 = vadd.f32 %v4050_v0, %v4022_v20  ;;  %v19344_v61 = vadd.f32 %v4108_v12, %v4079_v18  ;;  %v13318_v18 = vor.u32 %v16668_v27, %v13317_v17  ;;  %v13250_v20 = vor.u32 %v16903_v58, %v13247_v26  ;;  %5087 = vmatpush.bf16.msra.mxu3 %v13494_v15  ;;  %v16895_v27 = vld [vmem:[#allocation9 + $0x76c] sm:$0xf]  ;;  %v13215_v58 = vld [vmem:[#allocation9 + $0x778] sm:$0xf0] }
 0x2f8   : > { %4255 = vmatmul.bf16.gmra.mxu0 %v19233_v10  ;;  %4313 = vmatmul.bf16.gmra.mxu1 %v21174_v39  ;;  %v13074_v39 = vor.u32 %v16859_v7, %v13071_v51  ;;  %v13039_v7 = vld [vmem:[#allocation9 + $0x618] sm:$0xf0]  ;;  %v13285_v51 = vld [vmem:[#allocation9] sm:$0xf] }
 0x2f9   : > { %4389 = vmatpush.bf16.msrb.mxu2 %v13250_v20  ;;  %v13042_v17 = vor.u32 %v16851_v43, %v13039_v7  ;;  %v13461_v20 = vld [vmem:[#allocation9 + $0x160] sm:$0xf]  ;;  %v16883_v43 = vld [vmem:[#allocation9 + $0x70c] sm:$0xf]  ;;  %v13167_v7 = vld [vmem:[#allocation9 + $0x718] sm:$0xf0] }
 0x2fa   : > { %4363 = vmatpush.bf16.msrb.mxu0 %v13074_v39  ;;  %5061 = vmatpush.bf16.msra.mxu1 %v13318_v18  ;;  %v16660_v39 = vld [vmem:[#allocation9 + $0xc] sm:$0xf0]  ;;  %v13462_v4 = vor.u32 %v16704_v11, %v13461_v20 }
 0x2fb   : > { %4284 = vmatmul.bf16.gmra.mxu2 %v19252_v16  ;;  %4342 = vmatmul.bf16.gmra.mxu3 %v19083_v22  ;;  %v13302_v22 = vor.u32 %v16664_v29, %v13301_v42  ;;  %v13286_v18 = vor.u32 %v16660_v39, %v13285_v51  ;;  %v13199_v42 = vld [vmem:[#allocation9 + $0x758] sm:$0xf0]  ;;  %v13170_v51 = vor.u32 %v16883_v43, %v13167_v7  ;;  %v16692_v39 = vld [vmem:[#allocation9 + $0x10c] sm:$0xf0] }
 0x2fc   : > { %5088 = vmatpush.bf16.msra.mxu3 %v13478_v9  ;;  %v13202_v23 = vor.u32 %v16891_v31, %v13199_v42  ;;  %v16696_v9 = vld [vmem:[#allocation9 + $0x12c] sm:$0xf0] }
 0x2fd   : > { %v4026_v48 = vpop.f32.mrf.mxu0  ;;  %v4084_v40 = vpop.f32.mrf.mxu1  ;;  %4390 = vmatpush.bf16.msrb.mxu2 %v13234_v34  ;;  %v13429_v34 = vld [vmem:[#allocation9 + $0x120] sm:$0xf] }
 0x2fe   : > { %v4027_v44 = vadd.f32 %v4026_v48, %v19311_v49  ;;  %v4053_v0 = vpop.f32.mrf.mxu2  ;;  %v4111_v12 = vpop.f32.mrf.mxu3  ;;  %4364 = vmatpush.bf16.msrb.mxu0 %v13058_v47  ;;  %5062 = vmatpush.bf16.msra.mxu1 %v13302_v22  ;;  %v13445_v47 = vld [vmem:[#allocation9 + $0x140] sm:$0xf]  ;;  %v13183_v22 = vld [vmem:[#allocation9 + $0x738] sm:$0xf0] }
 0x2ff   : > { %v19349_v28 = vadd.f32 %v4053_v0, %v4025_v8  ;;  %v19352_v49 = vadd.f32 %v4111_v12, %v19337_v32  ;;  %v13218_v8 = vor.u32 %v16895_v27, %v13215_v58  ;;  %v16887_v12 = vld [vmem:[#allocation9 + $0x72c] sm:$0xf] }
 0x300   : > { %5089 = vmatpush.bf16.msra.mxu3 %v13462_v4 }
 0x301   : > { %4391 = vmatpush.bf16.msrb.mxu2 %v13218_v8 }
 0x302   : > { %4365 = vmatpush.bf16.msrb.mxu0 %v13042_v17  ;;  %5063 = vmatpush.bf16.msra.mxu1 %v13286_v18  ;;  %v13413_v17 = vld [vmem:[#allocation9 + $0x100] sm:$0xf] }
 0x305   : > { %v4029_v26 = vpop.f32.mrf.mxu0  ;;  %v4087_v48 = vpop.f32.mrf.mxu1  ;;  %4392 = vmatpush.bf16.msrb.mxu2 %v13202_v23 }
 0x306   : > { %v4030_v32 = vadd.f32 %v4029_v26, %v19315_v25  ;;  %v4055_v15 = vpop.f32.mrf.mxu2  ;;  %v4113_v57 = vpop.f32.mrf.mxu3  ;;  %v16700_v25 = vld [vmem:[#allocation9 + $0x14c] sm:$0xf0] }
 0x307   : > { %v19357_v29 = vadd.f32 %v4055_v15, %v4027_v44  ;;  %v19359_v30 = vadd.f32 %v4113_v57, %v4084_v40  ;;  %v13446_v0 = vor.u32 %v16700_v25, %v13445_v47  ;;  %v13430_v40 = vor.u32 %v16696_v9, %v13429_v34  ;;  %v2832_v9 = vld [vmem:[#allocation3 + $0x8] sm:$0xff] }
 0x308   : > { %4260 = vmatmul.bf16.gmra.mxu0 %v19271_v46  ;;  %4318 = vmatmul.bf16.gmra.mxu1 %v19122_v35  ;;  %v13186_v35 = vor.u32 %v16887_v12, %v13183_v22  ;;  %v17711_v22 = vld [vmem:[#allocation3 + $0x20] sm:$0xff] }
 0x309   : > { %5090 = vmatpush.bf16.msra.mxu3 %v13446_v0 }
 0x30a   : > { %4393 = vmatpush.bf16.msrb.mxu2 %v13186_v35  ;;  %v16686_v35 = vld [vmem:[#allocation9 + $0xe4] sm:$0xf] }
 0x30b   : > { %4289 = vmatmul.bf16.gmra.mxu2 %v19279_v54  ;;  %4347 = vmatmul.bf16.gmra.mxu3 %v19134_v37  ;;  %v13414_v37 = vor.u32 %v16692_v39, %v13413_v17  ;;  %v13637_v39 = vld [vmem:[#allocation9 + $0x2c0] sm:$0xf] }
 0x30d   : > { %v4031_v36 = vpop.f32.mrf.mxu0  ;;  %v4089_v63 = vpop.f32.mrf.mxu1  ;;  %5091 = vmatpush.bf16.msra.mxu3 %v13430_v40  ;;  %v13399_v40 = vld [vmem:[#allocation9 + $0xf0] sm:$0xf0] }
 0x30e   : > { %v4032_v44 = vadd.f32 %v4031_v36, %v19319_v14  ;;  %v4058_v27 = vpop.f32.mrf.mxu2  ;;  %v4116_v58 = vpop.f32.mrf.mxu3  ;;  %4394 = vmatpush.bf16.msrb.mxu2 %v13170_v51  ;;  %v13653_v36 = vld [vmem:[#allocation9 + $0x2e0] sm:$0xf]  ;;  %v17712_v51 = vld [vmem:[#allocation3 + $0x28] sm:$0xff] }
 0x30f   : > { %v19364_v26 = vadd.f32 %v4058_v27, %v4030_v32  ;;  %v19366_v18 = vadd.f32 %v4116_v58, %v4087_v48  ;;  %v19391_v17 = vpack.c.bf16 %v17712_v51, %v2832_v9  ;;  %v16748_v27 = vld [vmem:[#allocation9 + $0x2cc] sm:$0xf0] }
 0x310   : > { %v13638_v58 = vor.u32 %v16748_v27, %v13637_v39 }
 0x311   : > { %5092 = vmatpush.bf16.msra.mxu3 %v13414_v37  ;;  %v13383_v37 = vld [vmem:[#allocation9 + $0xd0] sm:$0xf0] }
 0x315   : > { %v4034_v8 = vpop.f32.mrf.mxu0  ;;  %v4092_v20 = vpop.f32.mrf.mxu1 }
 0x316   : > { %v4035_v14 = vadd.f32 %v4034_v8, %v19323_v6  ;;  %v4060_v11 = vpop.f32.mrf.mxu2  ;;  %v4118_v4 = vpop.f32.mrf.mxu3 }
 0x317   : > { %v19371_v15 = vadd.f32 %v4060_v11, %v4032_v44  ;;  %v19373_v32 = vadd.f32 %v4118_v4, %v4089_v63  ;;  %v16752_v63 = vld [vmem:[#allocation9 + $0x2ec] sm:$0xf0]  ;;  %v13781_v4 = vld [vmem:[#allocation9 + $0x3e0] sm:$0xf] }
 0x318   : > { %4265 = vmatmul.bf16.gmra.mxu0 %v19285_v2  ;;  %4323 = vmatmul.bf16.gmra.mxu1 %v19150_v62  ;;  %v2831_v62 = vld [vmem:[#allocation3] sm:$0xff]  ;;  %v13654_v44 = vor.u32 %v16752_v63, %v13653_v36 }
 0x319   : > { %v19383_v34 = vpack.c.bf16 %v17711_v22, %v2831_v62  ;;  %v13367_v62 = vld [vmem:[#allocation9 + $0xb0] sm:$0xf0] }
 0x31a   : > { %5114 = vmatpush.bf16.msra.mxu0 %v13654_v44  ;;  %v13351_v44 = vld [vmem:[#allocation9 + $0x90] sm:$0xf0] }
 0x31b   : > { %4294 = vmatmul.bf16.gmra.mxu2 %v19291_v33  ;;  %4352 = vmatmul.bf16.gmra.mxu3 %v19161_v21 }
 0x31d   : > { %v4036_v48 = vpop.f32.mrf.mxu0  ;;  %v4094_v57 = vpop.f32.mrf.mxu1 }
 0x31e   : > { %v4037_v31 = vadd.f32 %v4036_v48, %v19328_v60  ;;  %v4063_v6 = vpop.f32.mrf.mxu2  ;;  %v4121_v42 = vpop.f32.mrf.mxu3  ;;  %5115 = vmatpush.bf16.msra.mxu0 %v13638_v58  ;;  %v16784_v48 = vld [vmem:[#allocation9 + $0x3ec] sm:$0xf0] }
 0x31f   : > { %v19378_v47 = vadd.f32 %v4063_v6, %v4035_v14  ;;  %v19380_v23 = vadd.f32 %v4121_v42, %v4092_v20  ;;  %v16744_v6 = vld [vmem:[#allocation9 + $0x2ac] sm:$0xf0]  ;;  %v16678_v42 = vld [vmem:[#allocation9 + $0xa4] sm:$0xf] }
 0x320   : > { %v13370_v63 = vor.u32 %v16678_v42, %v13367_v62  ;;  %v16780_v58 = vld [vmem:[#allocation9 + $0x3cc] sm:$0xf0]  ;;  %v13335_v42 = vld [vmem:[#allocation9 + $0x70] sm:$0xf0]  ;;  %v16714_v62 = vld [vmem:[#allocation9 + $0x1c4] sm:$0xf] }
 0x325   : > { %v4135_v25 = vpop.f32.mrf.mxu0  ;;  %v4193_v0 = vpop.f32.mrf.mxu1 }
 0x326   : > { %v4136_v12 = vadd.f32 %v4135_v25, %v19335_v19  ;;  %v4065_v21 = vpop.f32.mrf.mxu2  ;;  %v4123_v60 = vpop.f32.mrf.mxu3  ;;  %v13402_v19 = vor.u32 %v16686_v35, %v13399_v40  ;;  %v16718_v40 = vld [vmem:[#allocation9 + $0x1e4] sm:$0xf] }
 0x327   : > { %v19387_v43 = vadd.f32 %v4065_v21, %v4037_v31  ;;  %v19389_v7 = vadd.f32 %v4123_v60, %v4094_v57  ;;  %v13621_v57 = vld [vmem:[#allocation9 + $0x2a0] sm:$0xf]  ;;  %v13782_v31 = vor.u32 %v16784_v48, %v13781_v4  ;;  %v16740_v21 = vld [vmem:[#allocation9 + $0x28c] sm:$0xf0]  ;;  %v16674_v60 = vld [vmem:[#allocation9 + $0x84] sm:$0xf] }
 0x328   : > { %4366 = vmatmul.bf16.vlgmr.msrb.gmra.mxu0 %v19188_v5  ;;  %5064 = vmatmul.bf16.vlgmr.msra.gmra.mxu1 %v19383_v34  ;;  %v16682_v5 = vld [vmem:[#allocation9 + $0xc4] sm:$0xf]  ;;  %v13622_v36 = vor.u32 %v16744_v6, %v13621_v57  ;;  %v13354_v27 = vor.u32 %v16674_v60, %v13351_v44  ;;  %v13749_v44 = vld [vmem:[#allocation9 + $0x3a0] sm:$0xf] }
 0x329   : > { %5172 = vmatpush.bf16.msrb.mxu1 %v13402_v19  ;;  %v13386_v14 = vor.u32 %v16682_v5, %v13383_v37  ;;  %5143 = vmatpush.bf16.msra.mxu2 %v13782_v31  ;;  %v13527_v19 = vld [vmem:[#allocation9 + $0x1f0] sm:$0xf0]  ;;  %v16670_v4 = vld [vmem:[#allocation9 + $0x64] sm:$0xf] }
 0x32a   : > { %5116 = vmatpush.bf16.msra.mxu0 %v13622_v36  ;;  %v13530_v5 = vor.u32 %v16718_v40, %v13527_v19  ;;  %v21178_v48 = vld [vmem:[#allocation51_spill] sm:$0xff]  ;;  %v13338_v36 = vor.u32 %v16670_v4, %v13335_v42  ;;  %v16776_v40 = vld [vmem:[#allocation9 + $0x3ac] sm:$0xf0] }
 0x32b   : > { %4395 = vmatmul.bf16.vlgmr.msrb.gmra.mxu2 %v19201_v3  ;;  %5093 = vmatmul.bf16.vlgmr.msra.gmra.mxu3 %v19391_v17  ;;  %v16662_v4 = vld [vmem:[#allocation9 + $0x24] sm:$0xf]  ;;  %v16772_v42 = vld [vmem:[#allocation9 + $0x38c] sm:$0xf0] }
 0x32c   : > { %5201 = vmatpush.bf16.msrb.mxu3 %v13530_v5  ;;  %v16710_v5 = vld [vmem:[#allocation9 + $0x1a4] sm:$0xf] }
 0x32d   : > { %v4137_v8 = vpop.f32.mrf.mxu0  ;;  %v4195_v20 = vpop.f32.mrf.mxu1  ;;  %5173 = vmatpush.bf16.msrb.mxu1 %v13386_v14  ;;  %v16736_v14 = vld [vmem:[#allocation9 + $0x26c] sm:$0xf0] }
 0x32e   : > { %v4138_v11 = vadd.f32 %v4137_v8, %v19344_v61  ;;  %v4164_v25 = vpop.f32.mrf.mxu2  ;;  %v4222_v22 = vpop.f32.mrf.mxu3  ;;  %v13605_v61 = vld [vmem:[#allocation9 + $0x280] sm:$0xf] }
 0x32f   : > { %v19396_v35 = vadd.f32 %v4164_v25, %v4136_v12  ;;  %v19398_v3 = vadd.f32 %v4222_v22, %v4193_v0  ;;  %v13606_v9 = vor.u32 %v16740_v21, %v13605_v61  ;;  %v13765_v0 = vld [vmem:[#allocation9 + $0x3c0] sm:$0xf]  ;;  %v13511_v25 = vld [vmem:[#allocation9 + $0x1d0] sm:$0xf0]  ;;  %v16666_v21 = vld [vmem:[#allocation9 + $0x44] sm:$0xf] }
 0x330   : > { %v13766_v37 = vor.u32 %v16780_v58, %v13765_v0  ;;  %v13589_v8 = vld [vmem:[#allocation9 + $0x260] sm:$0xf]  ;;  %v13495_v0 = vld [vmem:[#allocation9 + $0x1b0] sm:$0xf0] }
 0x331   : > { %5174 = vmatpush.bf16.msrb.mxu1 %v13370_v63  ;;  %5117 = vmatpush.bf16.msra.mxu0 %v13606_v9  ;;  %v13590_v6 = vor.u32 %v16736_v14, %v13589_v8  ;;  %v13514_v63 = vor.u32 %v16714_v62, %v13511_v25  ;;  %v13573_v61 = vld [vmem:[#allocation9 + $0x240] sm:$0xf]  ;;  %v13319_v9 = vld [vmem:[#allocation9 + $0x50] sm:$0xf0]  ;;  %v16728_v14 = vld [vmem:[#allocation9 + $0x22c] sm:$0xf0] }
 0x332   : > { %5144 = vmatpush.bf16.msra.mxu2 %v13766_v37  ;;  %v13498_v37 = vor.u32 %v16710_v5, %v13495_v0  ;;  %v13557_v8 = vld [vmem:[#allocation9 + $0x220] sm:$0xf] }
 0x333   : > { %5202 = vmatpush.bf16.msrb.mxu3 %v13514_v63  ;;  %v16706_v63 = vld [vmem:[#allocation9 + $0x184] sm:$0xf] }
 0x335   : > { %v4140_v51 = vpop.f32.mrf.mxu0  ;;  %v19400_v39 = vpop.f32.mrf.mxu1  ;;  %5175 = vmatpush.bf16.msrb.mxu1 %v13354_v27  ;;  %5118 = vmatpush.bf16.msra.mxu0 %v13590_v6  ;;  %v13750_v27 = vor.u32 %v16776_v40, %v13749_v44  ;;  %v13733_v6 = vld [vmem:[#allocation9 + $0x380] sm:$0xf]  ;;  %v16658_v44 = vld [vmem:[#allocation9 + $0x4] sm:$0xf] }
 0x336   : > { %v4141_v12 = vadd.f32 %v4140_v51, %v19352_v49  ;;  %v4166_v57 = vpop.f32.mrf.mxu2  ;;  %v4224_v31 = vpop.f32.mrf.mxu3 }
 0x337   : > { %v19405_v49 = vadd.f32 %v4166_v57, %v4138_v11  ;;  %v19407_v22 = vadd.f32 %v4224_v31, %v4195_v20  ;;  %v21179_v11 = vld [vmem:[#allocation52_spill] sm:$0xff]  ;;  %v13322_v20 = vor.u32 %v16666_v21, %v13319_v9  ;;  %5145 = vmatpush.bf16.msra.mxu2 %v13750_v27  ;;  %v13558_v57 = vor.u32 %v16728_v14, %v13557_v8  ;;  %v13303_v31 = vld [vmem:[#allocation9 + $0x30] sm:$0xf0]  ;;  %v16724_v9 = vld [vmem:[#allocation9 + $0x20c] sm:$0xf0] }
 0x338   : > { %4371 = vmatmul.bf16.gmra.mxu0 %v19233_v10  ;;  %5069 = vmatmul.bf16.gmra.mxu1 %v21178_v48  ;;  %v16732_v10 = vld [vmem:[#allocation9 + $0x24c] sm:$0xf0]  ;;  %v13306_v25 = vor.u32 %v16662_v4, %v13303_v31  ;;  %v16702_v8 = vld [vmem:[#allocation9 + $0x164] sm:$0xf]  ;;  %v13463_v14 = vld [vmem:[#allocation9 + $0x170] sm:$0xf0] }
 0x339   : > { %5176 = vmatpush.bf16.msrb.mxu1 %v13338_v36  ;;  %v13574_v60 = vor.u32 %v16732_v10, %v13573_v61  ;;  %5203 = vmatpush.bf16.msrb.mxu3 %v13498_v37  ;;  %v13734_v36 = vor.u32 %v16772_v42, %v13733_v6  ;;  %v13479_v61 = vld [vmem:[#allocation9 + $0x190] sm:$0xf0]  ;;  %v16768_v27 = vld [vmem:[#allocation9 + $0x36c] sm:$0xf0]  ;;  %v13466_v4 = vor.u32 %v16702_v8, %v13463_v14  ;;  %v13701_v6 = vld [vmem:[#allocation9 + $0x340] sm:$0xf] }
 0x33a   : > { %v13482_v21 = vor.u32 %v16706_v63, %v13479_v61  ;;  %v16764_v42 = vld [vmem:[#allocation9 + $0x34c] sm:$0xf0]  ;;  %v13685_v61 = vld [vmem:[#allocation9 + $0x320] sm:$0xf] }
 0x33b   : > { %4400 = vmatmul.bf16.gmra.mxu2 %v19252_v16  ;;  %5098 = vmatmul.bf16.gmra.mxu3 %v21179_v11 }
 0x33c   : > { %5119 = vmatpush.bf16.msra.mxu0 %v13574_v60  ;;  %5146 = vmatpush.bf16.msra.mxu2 %v13734_v36  ;;  %v13541_v60 = vld [vmem:[#allocation9 + $0x200] sm:$0xf]  ;;  %v13702_v36 = vor.u32 %v16764_v42, %v13701_v6 }
 0x33d   : > { %v4142_v19 = vpop.f32.mrf.mxu0  ;;  %v4200_v51 = vpop.f32.mrf.mxu1  ;;  %5177 = vmatpush.bf16.msrb.mxu1 %v13322_v20  ;;  %5204 = vmatpush.bf16.msrb.mxu3 %v13482_v21  ;;  %v13542_v40 = vor.u32 %v16724_v9, %v13541_v60  ;;  %v13717_v20 = vld [vmem:[#allocation9 + $0x360] sm:$0xf]  ;;  %v16760_v21 = vld [vmem:[#allocation9 + $0x32c] sm:$0xf0]  ;;  %v16694_v60 = vld [vmem:[#allocation9 + $0x124] sm:$0xf] }
 0x33e   : > { %v4143_v58 = vadd.f32 %v4142_v19, %v19359_v30  ;;  %v4169_v16 = vpop.f32.mrf.mxu2  ;;  %v4227_v62 = vpop.f32.mrf.mxu3  ;;  %v13287_v19 = vld [vmem:[#allocation9 + $0x10] sm:$0xf0] }
 0x33f   : > { %v19412_v10 = vadd.f32 %v4169_v16, %v4141_v12  ;;  %v19415_v30 = vadd.f32 %v4227_v62, %v19400_v39  ;;  %v13290_v37 = vor.u32 %v16658_v44, %v13287_v19  ;;  %v13718_v12 = vor.u32 %v16768_v27, %v13717_v20  ;;  %v16698_v16 = vld [vmem:[#allocation9 + $0x144] sm:$0xf]  ;;  %v13669_v19 = vld [vmem:[#allocation9 + $0x300] sm:$0xf]  ;;  %v16756_v20 = vld [vmem:[#allocation9 + $0x30c] sm:$0xf0] }
 0x340   : > { %5120 = vmatpush.bf16.msra.mxu0 %v13558_v57  ;;  %v13686_v44 = vor.u32 %v16760_v21, %v13685_v61  ;;  %v13670_v27 = vor.u32 %v16756_v20, %v13669_v19  ;;  %v2833_v21 = vld [vmem:[#allocation3 + $0x10] sm:$0xff]  ;;  %v2834_v20 = vld [vmem:[#allocation3 + $0x18] sm:$0xff] }
 0x341   : > { %5178 = vmatpush.bf16.msrb.mxu1 %v13306_v25  ;;  %5147 = vmatpush.bf16.msra.mxu2 %v13718_v12 }
 0x342   : > { %5205 = vmatpush.bf16.msrb.mxu3 %v13466_v4 }
 0x344   : > { %5121 = vmatpush.bf16.msra.mxu0 %v13542_v40  ;;  %v13431_v40 = vld [vmem:[#allocation9 + $0x130] sm:$0xf0] }
 0x345   : > { %v4145_v5 = vpop.f32.mrf.mxu0  ;;  %v4203_v0 = vpop.f32.mrf.mxu1  ;;  %5179 = vmatpush.bf16.msrb.mxu1 %v13290_v37  ;;  %5148 = vmatpush.bf16.msra.mxu2 %v13702_v36  ;;  %v13415_v37 = vld [vmem:[#allocation9 + $0x110] sm:$0xf0] }
 0x346   : > { %v4146_v39 = vadd.f32 %v4145_v5, %v19366_v18  ;;  %v4171_v57 = vpop.f32.mrf.mxu2  ;;  %v4229_v31 = vpop.f32.mrf.mxu3  ;;  %v13447_v18 = vld [vmem:[#allocation9 + $0x150] sm:$0xf0]  ;;  %v16690_v5 = vld [vmem:[#allocation9 + $0x104] sm:$0xf] }
 0x347   : > { %v19420_v62 = vadd.f32 %v4171_v57, %v4143_v58  ;;  %v19422_v25 = vadd.f32 %v4229_v31, %v4200_v51  ;;  %v13450_v63 = vor.u32 %v16698_v16, %v13447_v18  ;;  %v13434_v51 = vor.u32 %v16694_v60, %v13431_v40 }
 0x348   : > { %4376 = vmatmul.bf16.gmra.mxu0 %v19271_v46  ;;  %5074 = vmatmul.bf16.gmra.mxu1 %v19042_v38 }
 0x349   : > { %5206 = vmatpush.bf16.msrb.mxu3 %v13450_v63  ;;  %5149 = vmatpush.bf16.msra.mxu2 %v13686_v44  ;;  %v17713_v44 = vld [vmem:[#allocation3 + $0x30] sm:$0xff] }
 0x34a   : > { %v19446_v40 = vpack.c.bf16 %v17713_v44, %v2833_v21  ;;  %v13783_v21 = vld [vmem:[#allocation9 + $0x3f0] sm:$0xf0] }
 0x34b   : > { %4405 = vmatmul.bf16.gmra.mxu2 %v19279_v54  ;;  %5103 = vmatmul.bf16.gmra.mxu3 %v19058_v41  ;;  %v13418_v54 = vor.u32 %v16690_v5, %v13415_v37  ;;  %v16689_v5 = vld [vmem:[#allocation9 + $0xf4] sm:$0xf0] }
 0x34d   : > { %v4147_v46 = vpop.f32.mrf.mxu0  ;;  %v4205_v9 = vpop.f32.mrf.mxu1  ;;  %5207 = vmatpush.bf16.msrb.mxu3 %v13434_v51  ;;  %5150 = vmatpush.bf16.msra.mxu2 %v13670_v27  ;;  %v13405_v51 = vld [vmem:[#allocation9 + $0xe8] sm:$0xf] }
 0x34e   : > { %v4148_v58 = vadd.f32 %v4147_v46, %v19373_v32  ;;  %v4174_v12 = vpop.f32.mrf.mxu2  ;;  %v4232_v8 = vpop.f32.mrf.mxu3 }
 0x34f   : > { %v19427_v14 = vadd.f32 %v4174_v12, %v4146_v39  ;;  %v19429_v4 = vadd.f32 %v4232_v8, %v4203_v0  ;;  %v17714_v8 = vld [vmem:[#allocation3 + $0x38] sm:$0xff] }
 0x351   : > { %5208 = vmatpush.bf16.msrb.mxu3 %v13418_v54  ;;  %v19454_v54 = vpack.c.bf16 %v17714_v8, %v2834_v20  ;;  %v13607_v8 = vld [vmem:[#allocation9 + $0x290] sm:$0xf0] }
 0x355   : > { %v4150_v57 = vpop.f32.mrf.mxu0  ;;  %v4208_v31 = vpop.f32.mrf.mxu1 }
 0x356   : > { %v4151_v32 = vadd.f32 %v4150_v57, %v19380_v23  ;;  %v4176_v6 = vpop.f32.mrf.mxu2  ;;  %v4234_v42 = vpop.f32.mrf.mxu3  ;;  %v16746_v57 = vld [vmem:[#allocation9 + $0x2c4] sm:$0xf] }
 0x357   : > { %v19434_v16 = vadd.f32 %v4176_v6, %v4148_v58  ;;  %v19436_v39 = vadd.f32 %v4234_v42, %v4205_v9  ;;  %v16750_v58 = vld [vmem:[#allocation9 + $0x2e4] sm:$0xf]  ;;  %v16685_v42 = vld [vmem:[#allocation9 + $0xd4] sm:$0xf0] }
 0x358   : > { %4381 = vmatmul.bf16.gmra.mxu0 %v19285_v2  ;;  %5079 = vmatmul.bf16.gmra.mxu1 %v19098_v13 }
 0x35b   : > { %4410 = vmatmul.bf16.gmra.mxu2 %v19291_v33  ;;  %5108 = vmatmul.bf16.gmra.mxu3 %v19115_v52  ;;  %v13655_v33 = vld [vmem:[#allocation9 + $0x2f0] sm:$0xf0] }
 0x35c   : > { %v13658_v27 = vor.u32 %v16750_v58, %v13655_v33  ;;  %v13623_v58 = vld [vmem:[#allocation9 + $0x2b0] sm:$0xf0]  ;;  %v13373_v33 = vld [vmem:[#allocation9 + $0xa8] sm:$0xf] }
 0x35d   : > { %v4152_v0 = vpop.f32.mrf.mxu0  ;;  %v4210_v36 = vpop.f32.mrf.mxu1 }
 0x35e   : > { %v4153_v18 = vadd.f32 %v4152_v0, %v19389_v7  ;;  %v4179_v23 = vpop.f32.mrf.mxu2  ;;  %v4237_v63 = vpop.f32.mrf.mxu3  ;;  %5230 = vmatpush.bf16.msrb.mxu0 %v13658_v27 }
 0x35f   : > { %v19441_v61 = vadd.f32 %v4179_v23, %v4151_v32  ;;  %v19443_v2 = vadd.f32 %v4237_v63, %v4208_v31  ;;  %v13639_v31 = vld [vmem:[#allocation9 + $0x2d0] sm:$0xf0]  ;;  %v13389_v32 = vld [vmem:[#allocation9 + $0xc8] sm:$0xf]  ;;  %v16782_v63 = vld [vmem:[#allocation9 + $0x3e4] sm:$0xf] }
 0x360   : > { %v13642_v6 = vor.u32 %v16746_v57, %v13639_v31  ;;  %v13786_v44 = vor.u32 %v16782_v63, %v13783_v21  ;;  %v13357_v57 = vld [vmem:[#allocation9 + $0x88] sm:$0xf] }
 0x362   : > { %5231 = vmatpush.bf16.msrb.mxu0 %v13642_v6  ;;  %5259 = vmatpush.bf16.msrb.mxu2 %v13786_v44  ;;  %v13533_v6 = vld [vmem:[#allocation9 + $0x1e8] sm:$0xf] }
 0x365   : > { %v4251_v60 = vpop.f32.mrf.mxu0  ;;  %v4309_v46 = vpop.f32.mrf.mxu1 }
 0x366   : > { %v4252_v9 = vadd.f32 %v4251_v60, %v19398_v3  ;;  %v4181_v7 = vpop.f32.mrf.mxu2  ;;  %v4239_v19 = vpop.f32.mrf.mxu3  ;;  %v13406_v3 = vor.u32 %v16689_v5, %v13405_v51  ;;  %v16742_v60 = vld [vmem:[#allocation9 + $0x2a4] sm:$0xf]  ;;  %v16681_v51 = vld [vmem:[#allocation9 + $0xb4] sm:$0xf0] }
 0x367   : > { %v19450_v37 = vadd.f32 %v4181_v7, %v4153_v18  ;;  %v19452_v12 = vadd.f32 %v4239_v19, %v4210_v36  ;;  %v13390_v18 = vor.u32 %v16685_v42, %v13389_v32  ;;  %v13626_v20 = vor.u32 %v16742_v60, %v13623_v58  ;;  %v16677_v32 = vld [vmem:[#allocation9 + $0x94] sm:$0xf0]  ;;  %v13767_v60 = vld [vmem:[#allocation9 + $0x3d0] sm:$0xf0]  ;;  %v16734_v58 = vld [vmem:[#allocation9 + $0x264] sm:$0xf] }
 0x368   : > { %5122 = vmatmul.bf16.vlgmr.msra.gmra.mxu0 %v19446_v40  ;;  %5180 = vmatmul.bf16.vlgmr.msrb.gmra.mxu1 %v19383_v34  ;;  %v13374_v27 = vor.u32 %v16681_v51, %v13373_v33  ;;  %v16721_v42 = vld [vmem:[#allocation9 + $0x1f4] sm:$0xf0]  ;;  %v13358_v63 = vor.u32 %v16677_v32, %v13357_v57  ;;  %v13591_v33 = vld [vmem:[#allocation9 + $0x270] sm:$0xf0]  ;;  %v13341_v51 = vld [vmem:[#allocation9 + $0x68] sm:$0xf] }
 0x369   : > { %5288 = vmatpush.bf16.msra.mxu1 %v13406_v3  ;;  %5232 = vmatpush.bf16.msrb.mxu0 %v13626_v20  ;;  %v13534_v21 = vor.u32 %v16721_v42, %v13533_v6  ;;  %v13594_v20 = vor.u32 %v16734_v58, %v13591_v33  ;;  %v16730_v6 = vld [vmem:[#allocation9 + $0x244] sm:$0xf]  ;;  %v13575_v42 = vld [vmem:[#allocation9 + $0x250] sm:$0xf0] }
 0x36b   : > { %5151 = vmatmul.bf16.vlgmr.msra.gmra.mxu2 %v19454_v54  ;;  %5209 = vmatmul.bf16.vlgmr.msrb.gmra.mxu3 %v19391_v17 }
 0x36c   : > { %5317 = vmatpush.bf16.msra.mxu3 %v13534_v21  ;;  %v16669_v21 = vld [vmem:[#allocation9 + $0x54] sm:$0xf0] }
 0x36d   : > { %v4253_v0 = vpop.f32.mrf.mxu0  ;;  %v4311_v23 = vpop.f32.mrf.mxu1  ;;  %5289 = vmatpush.bf16.msra.mxu1 %v13390_v18 }
 0x36e   : > { %v4254_v36 = vadd.f32 %v4253_v0, %v19407_v22  ;;  %v4280_v7 = vpop.f32.mrf.mxu2  ;;  %v4338_v19 = vpop.f32.mrf.mxu3  ;;  %v16738_v22 = vld [vmem:[#allocation9 + $0x284] sm:$0xf] }
 0x36f   : > { %v19459_v5 = vadd.f32 %v4280_v7, %v4252_v9  ;;  %v19461_v3 = vadd.f32 %v4338_v19, %v4309_v46  ;;  %v13610_v31 = vor.u32 %v16738_v22, %v13607_v8  ;;  %v16778_v46 = vld [vmem:[#allocation9 + $0x3c4] sm:$0xf]  ;;  %v13517_v22 = vld [vmem:[#allocation9 + $0x1c8] sm:$0xf]  ;;  %v16717_v8 = vld [vmem:[#allocation9 + $0x1d4] sm:$0xf0] }
 0x370   : > { %v13770_v44 = vor.u32 %v16778_v46, %v13767_v60  ;;  %v13518_v32 = vor.u32 %v16717_v8, %v13517_v22  ;;  %v16774_v46 = vld [vmem:[#allocation9 + $0x3a4] sm:$0xf]  ;;  %v13751_v60 = vld [vmem:[#allocation9 + $0x3b0] sm:$0xf0]  ;;  %v13309_v22 = vld [vmem:[#allocation9 + $0x28] sm:$0xf] }
 0x371   : > { %21180 = vst [vmem:[#allocation45_spill] sm:$0xff] %v19459_v5  ;;  %5290 = vmatpush.bf16.msra.mxu1 %v13374_v27  ;;  %5233 = vmatpush.bf16.msrb.mxu0 %v13610_v31  ;;  %v16673_v27 = vld [vmem:[#allocation9 + $0x74] sm:$0xf0] }
 0x372   : > { %5260 = vmatpush.bf16.msrb.mxu2 %v13770_v44  ;;  %v13342_v31 = vor.u32 %v16673_v27, %v13341_v51  ;;  %5318 = vmatpush.bf16.msra.mxu3 %v13518_v32  ;;  %v13501_v44 = vld [vmem:[#allocation9 + $0x1a8] sm:$0xf]  ;;  %v16713_v51 = vld [vmem:[#allocation9 + $0x1b4] sm:$0xf0]  ;;  %v13559_v27 = vld [vmem:[#allocation9 + $0x230] sm:$0xf0] }
 0x373   : > { %v16770_v32 = vld [vmem:[#allocation9 + $0x384] sm:$0xf] }
 0x375   : > { %v4256_v0 = vpop.f32.mrf.mxu0  ;;  %v19463_v18 = vpop.f32.mrf.mxu1  ;;  %5291 = vmatpush.bf16.msra.mxu1 %v13358_v63  ;;  %5234 = vmatpush.bf16.msrb.mxu0 %v13594_v20  ;;  %v13578_v63 = vor.u32 %v16730_v6, %v13575_v42  ;;  %v16726_v20 = vld [vmem:[#allocation9 + $0x224] sm:$0xf]  ;;  %v13735_v6 = vld [vmem:[#allocation9 + $0x390] sm:$0xf0] }
 0x376   : > { %v4257_v9 = vadd.f32 %v4256_v0, %v19415_v30  ;;  %v4282_v7 = vpop.f32.mrf.mxu2  ;;  %v4340_v19 = vpop.f32.mrf.mxu3  ;;  %v13325_v0 = vld [vmem:[#allocation9 + $0x48] sm:$0xf]  ;;  %v13562_v8 = vor.u32 %v16726_v20, %v13559_v27  ;;  %v13719_v20 = vld [vmem:[#allocation9 + $0x370] sm:$0xf0] }
 0x377   : > { %v19468_v30 = vadd.f32 %v4282_v7, %v4254_v36  ;;  %v19470_v57 = vadd.f32 %v4340_v19, %v4311_v23  ;;  %v13326_v23 = vor.u32 %v16669_v21, %v13325_v0  ;;  %v13754_v36 = vor.u32 %v16774_v46, %v13751_v60  ;;  %v13485_v46 = vld [vmem:[#allocation9 + $0x188] sm:$0xf]  ;;  %v16709_v60 = vld [vmem:[#allocation9 + $0x194] sm:$0xf0] }
 0x378   : > { %5127 = vmatmul.bf16.gmra.mxu0 %v19168_v59  ;;  %5185 = vmatmul.bf16.gmra.mxu1 %v21178_v48  ;;  %v13502_v19 = vor.u32 %v16713_v51, %v13501_v44  ;;  %v13738_v21 = vor.u32 %v16770_v32, %v13735_v6  ;;  %v16661_v51 = vld [vmem:[#allocation9 + $0x14] sm:$0xf0]  ;;  %v13469_v32 = vld [vmem:[#allocation9 + $0x168] sm:$0xf] }
 0x379   : > { %21181 = vst [vmem:[#allocation43_spill] sm:$0xff] %v19468_v30  ;;  %5292 = vmatpush.bf16.msra.mxu1 %v13342_v31  ;;  %5235 = vmatpush.bf16.msrb.mxu0 %v13578_v63  ;;  %v16665_v31 = vld [vmem:[#allocation9 + $0x34] sm:$0xf0]  ;;  %v13486_v63 = vor.u32 %v16709_v60, %v13485_v46  ;;  %v13453_v46 = vld [vmem:[#allocation9 + $0x148] sm:$0xf] }
 0x37a   : > { %5261 = vmatpush.bf16.msrb.mxu2 %v13754_v36  ;;  %5319 = vmatpush.bf16.msra.mxu3 %v13502_v19  ;;  %v13310_v0 = vor.u32 %v16665_v31, %v13309_v22  ;;  %v13293_v36 = vld [vmem:[#allocation9 + $0x8] sm:$0xf]  ;;  %v16766_v19 = vld [vmem:[#allocation9 + $0x364] sm:$0xf]  ;;  %v16705_v6 = vld [vmem:[#allocation9 + $0x174] sm:$0xf0] }
 0x37b   : > { %5156 = vmatmul.bf16.gmra.mxu2 %v19181_v56  ;;  %5214 = vmatmul.bf16.gmra.mxu3 %v21179_v11  ;;  %v13294_v31 = vor.u32 %v16661_v51, %v13293_v36  ;;  %v16758_v36 = vld [vmem:[#allocation9 + $0x324] sm:$0xf]  ;;  %v13437_v51 = vld [vmem:[#allocation9 + $0x128] sm:$0xf] }
 0x37d   : > { %v4258_v58 = vpop.f32.mrf.mxu0  ;;  %v4316_v33 = vpop.f32.mrf.mxu1  ;;  %5293 = vmatpush.bf16.msra.mxu1 %v13326_v23  ;;  %5236 = vmatpush.bf16.msrb.mxu0 %v13562_v8  ;;  %v13543_v23 = vld [vmem:[#allocation9 + $0x210] sm:$0xf0] }
 0x37e   : > { %v4259_v7 = vadd.f32 %v4258_v58, %v19422_v25  ;;  %v4285_v42 = vpop.f32.mrf.mxu2  ;;  %v4343_v30 = vpop.f32.mrf.mxu3  ;;  %5262 = vmatpush.bf16.msrb.mxu2 %v13738_v21  ;;  %v16722_v58 = vld [vmem:[#allocation9 + $0x204] sm:$0xf]  ;;  %5320 = vmatpush.bf16.msra.mxu3 %v13486_v63  ;;  %v13703_v21 = vld [vmem:[#allocation9 + $0x350] sm:$0xf0] }
 0x37f   : > { %v19475_v5 = vadd.f32 %v4285_v42, %v4257_v9  ;;  %v19478_v25 = vadd.f32 %v4343_v30, %v19463_v18  ;;  %v13546_v44 = vor.u32 %v16722_v58, %v13543_v23  ;;  %v13722_v9 = vor.u32 %v16766_v19, %v13719_v20 }
 0x380   : > { %v13470_v30 = vor.u32 %v16705_v6, %v13469_v32  ;;  %v13671_v32 = vld [vmem:[#allocation9 + $0x310] sm:$0xf0] }
 0x381   : > { %5294 = vmatpush.bf16.msra.mxu1 %v13310_v0  ;;  %5237 = vmatpush.bf16.msrb.mxu0 %v13546_v44  ;;  %v16762_v0 = vld [vmem:[#allocation9 + $0x344] sm:$0xf]  ;;  %v13687_v44 = vld [vmem:[#allocation9 + $0x330] sm:$0xf0] }
 0x382   : > { %5263 = vmatpush.bf16.msrb.mxu2 %v13722_v9  ;;  %5321 = vmatpush.bf16.msra.mxu3 %v13470_v30  ;;  %v13706_v58 = vor.u32 %v16762_v0, %v13703_v21  ;;  %v16754_v9 = vld [vmem:[#allocation9 + $0x304] sm:$0xf]  ;;  %v13421_v30 = vld [vmem:[#allocation9 + $0x108] sm:$0xf] }
 0x383   : > { %v13674_v6 = vor.u32 %v16754_v9, %v13671_v32 }
 0x385   : > { %v4261_v27 = vpop.f32.mrf.mxu0  ;;  %v4319_v22 = vpop.f32.mrf.mxu1  ;;  %5295 = vmatpush.bf16.msra.mxu1 %v13294_v31  ;;  %v16697_v31 = vld [vmem:[#allocation9 + $0x134] sm:$0xf0] }
 0x386   : > { %v4262_v18 = vadd.f32 %v4261_v27, %v19429_v4  ;;  %v4287_v8 = vpop.f32.mrf.mxu2  ;;  %v4345_v42 = vpop.f32.mrf.mxu3  ;;  %v16701_v4 = vld [vmem:[#allocation9 + $0x154] sm:$0xf0]  ;;  %5264 = vmatpush.bf16.msrb.mxu2 %v13706_v58  ;;  %v13690_v27 = vor.u32 %v16758_v36, %v13687_v44 }
 0x387   : > { %v19483_v60 = vadd.f32 %v4287_v8, %v4259_v7  ;;  %v19485_v63 = vadd.f32 %v4345_v42, %v4316_v33  ;;  %v13454_v23 = vor.u32 %v16701_v4, %v13453_v46  ;;  %v13438_v33 = vor.u32 %v16697_v31, %v13437_v51  ;;  %v16693_v8 = vld [vmem:[#allocation9 + $0x114] sm:$0xf0] }
 0x388   : > { %5132 = vmatmul.bf16.gmra.mxu0 %v19210_v45  ;;  %5190 = vmatmul.bf16.gmra.mxu1 %v19042_v38  ;;  %v13422_v58 = vor.u32 %v16693_v8, %v13421_v30  ;;  %v13661_v30 = vld [vmem:[#allocation9 + $0x2e8] sm:$0xf]  ;;  %v16753_v8 = vld [vmem:[#allocation9 + $0x2f4] sm:$0xf0] }
 0x389   : > { %5322 = vmatpush.bf16.msra.mxu3 %v13454_v23 }
 0x38a   : > { %5265 = vmatpush.bf16.msrb.mxu2 %v13690_v27 }
 0x38b   : > { %5161 = vmatmul.bf16.gmra.mxu2 %v19228_v55  ;;  %5219 = vmatmul.bf16.gmra.mxu3 %v19058_v41 }
 0x38d   : > { %v4263_v19 = vpop.f32.mrf.mxu0  ;;  %v4321_v20 = vpop.f32.mrf.mxu1  ;;  %5323 = vmatpush.bf16.msra.mxu3 %v13438_v33 }
 0x38e   : > { %v4264_v7 = vadd.f32 %v4263_v19, %v19436_v39  ;;  %v4290_v42 = vpop.f32.mrf.mxu2  ;;  %v4348_v0 = vpop.f32.mrf.mxu3  ;;  %5266 = vmatpush.bf16.msrb.mxu2 %v13674_v6 }
 0x38f   : > { %v19490_v21 = vadd.f32 %v4290_v42, %v4262_v18  ;;  %v19492_v46 = vadd.f32 %v4348_v0, %v4319_v22  ;;  %v16687_v42 = vld [vmem:[#allocation9 + $0xec] sm:$0xf] }
 0x391   : > { %21182 = vst [vmem:[#allocation46_spill] sm:$0xff] %v19490_v21  ;;  %5324 = vmatpush.bf16.msra.mxu3 %v13422_v58  ;;  %v13662_v58 = vor.u32 %v16753_v8, %v13661_v30  ;;  %v13789_v30 = vld [vmem:[#allocation9 + $0x3e8] sm:$0xf]  ;;  %v16785_v8 = vld [vmem:[#allocation9 + $0x3f4] sm:$0xf0] }
 0x393   : > { %5346 = vmatpush.bf16.msra.mxu0 %v13662_v58  ;;  %v16679_v58 = vld [vmem:[#allocation9 + $0xac] sm:$0xf] }
 0x395   : > { %v4266_v4 = vpop.f32.mrf.mxu0  ;;  %v4324_v36 = vpop.f32.mrf.mxu1 }
 0x396   : > { %v4267_v39 = vadd.f32 %v4266_v4, %v19443_v2  ;;  %v4292_v23 = vpop.f32.mrf.mxu2  ;;  %v4350_v44 = vpop.f32.mrf.mxu3  ;;  %v13407_v4 = vld [vmem:[#allocation9 + $0xf8] sm:$0xf0] }
 0x397   : > { %v19497_v51 = vadd.f32 %v4292_v23, %v4264_v7  ;;  %v19499_v18 = vadd.f32 %v4350_v44, %v4321_v20  ;;  %v13410_v23 = vor.u32 %v16687_v42, %v13407_v4  ;;  %v16683_v44 = vld [vmem:[#allocation9 + $0xcc] sm:$0xf]  ;;  %v13629_v42 = vld [vmem:[#allocation9 + $0x2a8] sm:$0xf]  ;;  %v13375_v4 = vld [vmem:[#allocation9 + $0xb8] sm:$0xf0] }
 0x398   : > { %5137 = vmatmul.bf16.gmra.mxu0 %v19262_v53  ;;  %5195 = vmatmul.bf16.gmra.mxu1 %v19098_v13 }
 0x399   : > { %21183 = vst [vmem:[#allocation47_spill] sm:$0xff] %v19497_v51  ;;  %5404 = vmatpush.bf16.msrb.mxu1 %v13410_v23 }
 0x39b   : > { %5166 = vmatmul.bf16.gmra.mxu2 %v19268_v1  ;;  %5224 = vmatmul.bf16.gmra.mxu3 %v19115_v52 }
 0x39d   : > { %v4268_v22 = vpop.f32.mrf.mxu0  ;;  %v4326_v19 = vpop.f32.mrf.mxu1 }
 0x39e   : > { %v4269_v27 = vadd.f32 %v4268_v22, %v19452_v12  ;;  %v4295_v2 = vpop.f32.mrf.mxu2  ;;  %v4353_v31 = vpop.f32.mrf.mxu3 }
 0x39f   : > { %v19504_v33 = vadd.f32 %v4295_v2, %v4267_v39  ;;  %v19506_v9 = vadd.f32 %v4353_v31, %v4324_v36  ;;  %v13391_v2 = vld [vmem:[#allocation9 + $0xd8] sm:$0xf0] }
 0x3a1   : > { %21184 = vst [vmem:[#allocation49_spill] sm:$0xff] %v19504_v33 }
 0x3a5   : > { %v4367_v32 = vpop.f32.mrf.mxu0  ;;  %v5065_v6 = vpop.f32.mrf.mxu1 }
 0x3a6   : > { %v4368_v7 = vadd.f32 %v4367_v32, %v19461_v3  ;;  %v5066_v20 = vadd.f32 %v5065_v6, %v19333_v50  ;;  %v4297_v12 = vpop.f32.mrf.mxu2  ;;  %v4355_v0 = vpop.f32.mrf.mxu3  ;;  %v13645_v3 = vld [vmem:[#allocation9 + $0x2c8] sm:$0xf]  ;;  %v16749_v50 = vld [vmem:[#allocation9 + $0x2d4] sm:$0xf0]  ;;  %v13394_v6 = vor.u32 %v16683_v44, %v13391_v2 }
 0x3a7   : > { %v19512_v39 = vadd.f32 %v4297_v12, %v4269_v27  ;;  %v19514_v36 = vadd.f32 %v4355_v0, %v4326_v19  ;;  %v13646_v22 = vor.u32 %v16749_v50, %v13645_v3  ;;  %v13790_v12 = vor.u32 %v16785_v8, %v13789_v30  ;;  %v16745_v0 = vld [vmem:[#allocation9 + $0x2b4] sm:$0xf0] }
 0x3a8   : > { %5238 = vmatmul.bf16.vlgmr.msrb.gmra.mxu0 %v19446_v40  ;;  %5296 = vmatmul.bf16.vlgmr.msra.gmra.mxu1 %v19383_v34  ;;  %v13630_v50 = vor.u32 %v16745_v0, %v13629_v42  ;;  %v13597_v0 = vld [vmem:[#allocation9 + $0x268] sm:$0xf] }
 0x3a9   : > { %21185 = vst [vmem:[#allocation53_spill] sm:$0xff] %v19512_v39  ;;  %5347 = vmatpush.bf16.msra.mxu0 %v13646_v22  ;;  %5405 = vmatpush.bf16.msrb.mxu1 %v13394_v6  ;;  %v13378_v39 = vor.u32 %v16679_v58, %v13375_v4  ;;  %v16675_v22 = vld [vmem:[#allocation9 + $0x8c] sm:$0xf]  ;;  %v13535_v6 = vld [vmem:[#allocation9 + $0x1f8] sm:$0xf0] }
 0x3aa   : > { %5375 = vmatpush.bf16.msra.mxu2 %v13790_v12  ;;  %v16781_v12 = vld [vmem:[#allocation9 + $0x3d4] sm:$0xf0]  ;;  %v16671_v4 = vld [vmem:[#allocation9 + $0x6c] sm:$0xf] }
 0x3ab   : > { %5267 = vmatmul.bf16.vlgmr.msrb.gmra.mxu2 %v19454_v54  ;;  %5325 = vmatmul.bf16.vlgmr.msra.gmra.mxu3 %v19391_v17  ;;  %v16737_v58 = vld [vmem:[#allocation9 + $0x274] sm:$0xf0] }
 0x3ad   : > { %v4369_v31 = vpop.f32.mrf.mxu0  ;;  %v5067_v32 = vpop.f32.mrf.mxu1  ;;  %5348 = vmatpush.bf16.msra.mxu0 %v13630_v50  ;;  %5406 = vmatpush.bf16.msrb.mxu1 %v13378_v39  ;;  %v13598_v50 = vor.u32 %v16737_v58, %v13597_v0  ;;  %v13503_v58 = vld [vmem:[#allocation9 + $0x1b8] sm:$0xf0] }
 0x3ae   : > { %v4370_v27 = vadd.f32 %v4369_v31, %v19470_v57  ;;  %v5068_v19 = vadd.f32 %v5067_v32, %v19342_v24  ;;  %v4396_v23 = vpop.f32.mrf.mxu2  ;;  %v5094_v3 = vpop.f32.mrf.mxu3  ;;  %v13613_v24 = vld [vmem:[#allocation9 + $0x288] sm:$0xf]  ;;  %v16741_v57 = vld [vmem:[#allocation9 + $0x294] sm:$0xf0]  ;;  %v13359_v31 = vld [vmem:[#allocation9 + $0x98] sm:$0xf0] }
 0x3af   : > { %v19520_v33 = vadd.f32 %v4396_v23, %v4368_v7  ;;  %v19522_v44 = vadd.f32 %v5094_v3, %v5066_v20  ;;  %v13614_v2 = vor.u32 %v16741_v57, %v13613_v24  ;;  %v16719_v32 = vld [vmem:[#allocation9 + $0x1ec] sm:$0xf]  ;;  %v13362_v51 = vor.u32 %v16675_v22, %v13359_v31  ;;  %v13773_v20 = vld [vmem:[#allocation9 + $0x3c8] sm:$0xf]  ;;  %v13343_v24 = vld [vmem:[#allocation9 + $0x78] sm:$0xf0] }
 0x3b0   : > { %v13538_v21 = vor.u32 %v16719_v32, %v13535_v6  ;;  %v13774_v39 = vor.u32 %v16781_v12, %v13773_v20  ;;  %v13519_v57 = vld [vmem:[#allocation9 + $0x1d8] sm:$0xf0]  ;;  %v16733_v31 = vld [vmem:[#allocation9 + $0x254] sm:$0xf0]  ;;  %v16667_v32 = vld [vmem:[#allocation9 + $0x4c] sm:$0xf] }
 0x3b1   : > { %5349 = vmatpush.bf16.msra.mxu0 %v13614_v2  ;;  %5407 = vmatpush.bf16.msrb.mxu1 %v13362_v51  ;;  %v13346_v51 = vor.u32 %v16671_v4, %v13343_v24  ;;  %v13581_v2 = vld [vmem:[#allocation9 + $0x248] sm:$0xf]  ;;  %v16777_v20 = vld [vmem:[#allocation9 + $0x3b4] sm:$0xf0] }
 0x3b2   : > { %5433 = vmatpush.bf16.msrb.mxu3 %v13538_v21  ;;  %5376 = vmatpush.bf16.msra.mxu2 %v13774_v39  ;;  %v13582_v6 = vor.u32 %v16733_v31, %v13581_v2  ;;  %v16711_v39 = vld [vmem:[#allocation9 + $0x1ac] sm:$0xf]  ;;  %v16729_v24 = vld [vmem:[#allocation9 + $0x234] sm:$0xf0] }
 0x3b3   : > { %v16773_v2 = vld [vmem:[#allocation9 + $0x394] sm:$0xf0] }
 0x3b5   : > { %v4372_v30 = vpop.f32.mrf.mxu0  ;;  %v5070_v8 = vpop.f32.mrf.mxu1  ;;  %5350 = vmatpush.bf16.msra.mxu0 %v13598_v50  ;;  %5408 = vmatpush.bf16.msrb.mxu1 %v13346_v51  ;;  %v13565_v50 = vld [vmem:[#allocation9 + $0x228] sm:$0xf]  ;;  %v13311_v51 = vld [vmem:[#allocation9 + $0x38] sm:$0xf0] }
 0x3b6   : > { %v4373_v42 = vadd.f32 %v4372_v30, %v19478_v25  ;;  %v5071_v7 = vadd.f32 %v5070_v8, %v19349_v28  ;;  %v4398_v23 = vpop.f32.mrf.mxu2  ;;  %v5096_v3 = vpop.f32.mrf.mxu3  ;;  %v16715_v25 = vld [vmem:[#allocation9 + $0x1cc] sm:$0xf]  ;;  %v13327_v30 = vld [vmem:[#allocation9 + $0x58] sm:$0xf0]  ;;  %v13757_v8 = vld [vmem:[#allocation9 + $0x3a8] sm:$0xf] }
 0x3b7   : > { %v19528_v28 = vadd.f32 %v4398_v23, %v4370_v27  ;;  %v19530_v22 = vadd.f32 %v5096_v3, %v5068_v19  ;;  %v13522_v21 = vor.u32 %v16715_v25, %v13519_v57  ;;  %v13330_v27 = vor.u32 %v16667_v32, %v13327_v30  ;;  %v16663_v25 = vld [vmem:[#allocation9 + $0x2c] sm:$0xf] }
 0x3b8   : > { %5243 = vmatmul.bf16.gmra.mxu0 %v19168_v59  ;;  %5301 = vmatmul.bf16.gmra.mxu1 %v21178_v48  ;;  %v13758_v19 = vor.u32 %v16777_v20, %v13757_v8  ;;  %v13506_v3 = vor.u32 %v16711_v39, %v13503_v58  ;;  %v13566_v57 = vor.u32 %v16729_v24, %v13565_v50  ;;  %v16707_v20 = vld [vmem:[#allocation9 + $0x18c] sm:$0xf]  ;;  %v13295_v58 = vld [vmem:[#allocation9 + $0x18] sm:$0xf0]  ;;  %v13725_v50 = vld [vmem:[#allocation9 + $0x368] sm:$0xf] }
 0x3b9   : > { %5434 = vmatpush.bf16.msrb.mxu3 %v13522_v21  ;;  %5351 = vmatpush.bf16.msra.mxu0 %v13582_v6  ;;  %v13741_v21 = vld [vmem:[#allocation9 + $0x388] sm:$0xf]  ;;  %v13314_v30 = vor.u32 %v16663_v25, %v13311_v51 }
 0x3ba   : > { %5409 = vmatpush.bf16.msrb.mxu1 %v13330_v27  ;;  %5377 = vmatpush.bf16.msra.mxu2 %v13758_v19  ;;  %v13742_v8 = vor.u32 %v16773_v2, %v13741_v21  ;;  %v16725_v27 = vld [vmem:[#allocation9 + $0x214] sm:$0xf0]  ;;  %v16659_v19 = vld [vmem:[#allocation9 + $0xc] sm:$0xf]  ;;  %v13471_v2 = vld [vmem:[#allocation9 + $0x178] sm:$0xf0] }
 0x3bb   : > { %5272 = vmatmul.bf16.gmra.mxu2 %v19181_v56  ;;  %5330 = vmatmul.bf16.gmra.mxu3 %v21179_v11  ;;  %v13298_v51 = vor.u32 %v16659_v19, %v13295_v58  ;;  %v13693_v19 = vld [vmem:[#allocation9 + $0x328] sm:$0xf]  ;;  %v16695_v58 = vld [vmem:[#allocation9 + $0x12c] sm:$0xf] }
 0x3bd   : > { %v4374_v12 = vpop.f32.mrf.mxu0  ;;  %v5072_v0 = vpop.f32.mrf.mxu1  ;;  %5435 = vmatpush.bf16.msrb.mxu3 %v13506_v3  ;;  %5352 = vmatpush.bf16.msra.mxu0 %v13566_v57  ;;  %v16769_v3 = vld [vmem:[#allocation9 + $0x374] sm:$0xf0] }
 0x3be   : > { %v4375_v4 = vadd.f32 %v4374_v12, %v19485_v63  ;;  %v5073_v23 = vadd.f32 %v5072_v0, %v19357_v29  ;;  %v4401_v31 = vpop.f32.mrf.mxu2  ;;  %v5099_v32 = vpop.f32.mrf.mxu3  ;;  %v13487_v63 = vld [vmem:[#allocation9 + $0x198] sm:$0xf0]  ;;  %5410 = vmatpush.bf16.msrb.mxu1 %v13314_v30  ;;  %5378 = vmatpush.bf16.msra.mxu2 %v13742_v8  ;;  %v13549_v0 = vld [vmem:[#allocation9 + $0x208] sm:$0xf]  ;;  %v13726_v21 = vor.u32 %v16769_v3, %v13725_v50 }
 0x3bf   : > { %v19536_v12 = vadd.f32 %v4401_v31, %v4373_v42  ;;  %v19538_v29 = vadd.f32 %v5099_v32, %v5071_v7  ;;  %v13490_v6 = vor.u32 %v16707_v20, %v13487_v63  ;;  %v13550_v39 = vor.u32 %v16725_v27, %v13549_v0  ;;  %v16703_v42 = vld [vmem:[#allocation9 + $0x16c] sm:$0xf]  ;;  %v13709_v8 = vld [vmem:[#allocation9 + $0x348] sm:$0xf]  ;;  %v16765_v20 = vld [vmem:[#allocation9 + $0x354] sm:$0xf0] }
 0x3c0   : > { %v13474_v31 = vor.u32 %v16703_v42, %v13471_v2  ;;  %v16699_v63 = vld [vmem:[#allocation9 + $0x14c] sm:$0xf]  ;;  %v16757_v42 = vld [vmem:[#allocation9 + $0x314] sm:$0xf0] }
 0x3c1   : > { %5436 = vmatpush.bf16.msrb.mxu3 %v13490_v6  ;;  %5353 = vmatpush.bf16.msra.mxu0 %v13550_v39  ;;  %v16761_v39 = vld [vmem:[#allocation9 + $0x334] sm:$0xf0] }
 0x3c2   : > { %5411 = vmatpush.bf16.msrb.mxu1 %v13298_v51  ;;  %5379 = vmatpush.bf16.msra.mxu2 %v13726_v21  ;;  %v13677_v21 = vld [vmem:[#allocation9 + $0x308] sm:$0xf] }
 0x3c3   : > { %v13678_v2 = vor.u32 %v16757_v42, %v13677_v21 }
 0x3c5   : > { %v4377_v24 = vpop.f32.mrf.mxu0  ;;  %v5075_v25 = vpop.f32.mrf.mxu1  ;;  %5437 = vmatpush.bf16.msrb.mxu3 %v13474_v31  ;;  %v16691_v31 = vld [vmem:[#allocation9 + $0x10c] sm:$0xf] }
 0x3c6   : > { %v4378_v7 = vadd.f32 %v4377_v24, %v19492_v46  ;;  %v5076_v57 = vadd.f32 %v5075_v25, %v19364_v26  ;;  %v4403_v32 = vpop.f32.mrf.mxu2  ;;  %v5101_v30 = vpop.f32.mrf.mxu3  ;;  %v13710_v46 = vor.u32 %v16765_v20, %v13709_v8  ;;  %v13455_v26 = vld [vmem:[#allocation9 + $0x158] sm:$0xf0]  ;;  %v13694_v24 = vor.u32 %v16761_v39, %v13693_v19 }
 0x3c7   : > { %v19544_v6 = vadd.f32 %v4403_v32, %v4375_v4  ;;  %v19546_v0 = vadd.f32 %v5101_v30, %v5073_v23  ;;  %v13458_v27 = vor.u32 %v16699_v63, %v13455_v26  ;;  %v13439_v25 = vld [vmem:[#allocation9 + $0x138] sm:$0xf0] }
 0x3c8   : > { %5248 = vmatmul.bf16.gmra.mxu0 %v19210_v45  ;;  %5306 = vmatmul.bf16.gmra.mxu1 %v19042_v38  ;;  %v13442_v51 = vor.u32 %v16695_v58, %v13439_v25  ;;  %v13423_v32 = vld [vmem:[#allocation9 + $0x118] sm:$0xf0] }
 0x3c9   : > { %5380 = vmatpush.bf16.msra.mxu2 %v13710_v46  ;;  %5438 = vmatpush.bf16.msrb.mxu3 %v13458_v27  ;;  %v13426_v46 = vor.u32 %v16691_v31, %v13423_v32  ;;  %v13663_v31 = vld [vmem:[#allocation9 + $0x2f8] sm:$0xf0]  ;;  %v13909_v32 = vld [vmem:[#allocation9 + $0x8e0] sm:$0xf] }
 0x3cb   : > { %5277 = vmatmul.bf16.gmra.mxu2 %v19228_v55  ;;  %5335 = vmatmul.bf16.gmra.mxu3 %v19058_v41 }
 0x3cd   : > { %v4379_v50 = vpop.f32.mrf.mxu0  ;;  %v5077_v3 = vpop.f32.mrf.mxu1  ;;  %5381 = vmatpush.bf16.msra.mxu2 %v13694_v24  ;;  %5439 = vmatpush.bf16.msrb.mxu3 %v13442_v51 }
 0x3ce   : > { %v4380_v4 = vadd.f32 %v4379_v50, %v19499_v18  ;;  %v5078_v23 = vadd.f32 %v5077_v3, %v19371_v15  ;;  %v4406_v30 = vpop.f32.mrf.mxu2  ;;  %v5104_v8 = vpop.f32.mrf.mxu3 }
 0x3cf   : > { %v19552_v20 = vadd.f32 %v4406_v30, %v4378_v7  ;;  %v19554_v63 = vadd.f32 %v5104_v8, %v5076_v57  ;;  %v16944_v8 = vld [vmem:[#allocation9 + $0x8ec] sm:$0xf0] }
 0x3d1   : > { %5382 = vmatpush.bf16.msra.mxu2 %v13678_v2  ;;  %5440 = vmatpush.bf16.msrb.mxu3 %v13426_v46  ;;  %v16751_v2 = vld [vmem:[#allocation9 + $0x2ec] sm:$0xf] }
 0x3d2   : > { %v13666_v30 = vor.u32 %v16751_v2, %v13663_v31  ;;  %v13877_v2 = vld [vmem:[#allocation9 + $0x8a0] sm:$0xf]  ;;  %v16936_v31 = vld [vmem:[#allocation9 + $0x8ac] sm:$0xf0] }
 0x3d4   : > { %5462 = vmatpush.bf16.msrb.mxu0 %v13666_v30  ;;  %v13878_v30 = vor.u32 %v16936_v31, %v13877_v2  ;;  %v13845_v2 = vld [vmem:[#allocation9 + $0x860] sm:$0xf] }
 0x3d5   : > { %v4382_v18 = vpop.f32.mrf.mxu0  ;;  %v5080_v26 = vpop.f32.mrf.mxu1 }
 0x3d6   : > { %v4383_v15 = vadd.f32 %v4382_v18, %v19506_v9  ;;  %v5081_v27 = vadd.f32 %v5080_v26, %v19378_v47  ;;  %v4408_v19 = vpop.f32.mrf.mxu2  ;;  %v5106_v39 = vpop.f32.mrf.mxu3  ;;  %v13910_v26 = vor.u32 %v16944_v8, %v13909_v32 }
 0x3d7   : > { %v19560_v7 = vadd.f32 %v4408_v19, %v4380_v4  ;;  %v19562_v57 = vadd.f32 %v5106_v39, %v5078_v23  ;;  %v16940_v19 = vld [vmem:[#allocation9 + $0x8cc] sm:$0xf0] }
 0x3d8   : > { %5253 = vmatmul.bf16.gmra.mxu0 %v19262_v53  ;;  %5311 = vmatmul.bf16.gmra.mxu1 %v19098_v13 }
 0x3d9   : > { %6377 = vmatpush.bf16.msra.mxu1 %v13910_v26  ;;  %v13861_v26 = vld [vmem:[#allocation9 + $0x880] sm:$0xf] }
 0x3db   : > { %5282 = vmatmul.bf16.gmra.mxu2 %v19268_v1  ;;  %5340 = vmatmul.bf16.gmra.mxu3 %v19115_v52 }
 0x3dd   : > { %v4384_v58 = vpop.f32.mrf.mxu0  ;;  %v5082_v50 = vpop.f32.mrf.mxu1 }
 0x3de   : > { %v4385_v9 = vadd.f32 %v4384_v58, %v19514_v36  ;;  %v5083_v47 = vadd.f32 %v5082_v50, %v19387_v43  ;;  %v4411_v3 = vpop.f32.mrf.mxu2  ;;  %v5109_v24 = vpop.f32.mrf.mxu3 }
 0x3df   : > { %v19568_v25 = vadd.f32 %v4411_v3, %v4383_v15  ;;  %v19570_v51 = vadd.f32 %v5109_v24, %v5081_v27  ;;  %v13893_v15 = vld [vmem:[#allocation9 + $0x8c0] sm:$0xf]  ;;  %v13791_v3 = vld [vmem:[#allocation9 + $0x3f8] sm:$0xf0]  ;;  %v16743_v24 = vld [vmem:[#allocation9 + $0x2ac] sm:$0xf] }
 0x3e5   : > { %v5123_v4 = vpop.f32.mrf.mxu0  ;;  %v5181_v21 = vpop.f32.mrf.mxu1 }
 0x3e6   : > { %v5124_v23 = vadd.f32 %v5123_v4, %v19522_v44  ;;  %v5182_v42 = vadd.f32 %v5181_v21, %v19396_v35  ;;  %v4413_v43 = vpop.f32.mrf.mxu2  ;;  %v5111_v36 = vpop.f32.mrf.mxu3  ;;  %v16747_v44 = vld [vmem:[#allocation9 + $0x2cc] sm:$0xf]  ;;  %v13647_v35 = vld [vmem:[#allocation9 + $0x2d8] sm:$0xf0] }
 0x3e7   : > { %v19576_v46 = vadd.f32 %v4413_v43, %v4385_v9  ;;  %v19578_v18 = vadd.f32 %v5111_v36, %v5083_v47  ;;  %v13650_v27 = vor.u32 %v16747_v44, %v13647_v35  ;;  %v16783_v47 = vld [vmem:[#allocation9 + $0x3ec] sm:$0xf]  ;;  %v13631_v21 = vld [vmem:[#allocation9 + $0x2b8] sm:$0xf0]  ;;  %v16932_v35 = vld [vmem:[#allocation9 + $0x88c] sm:$0xf0] }
 0x3e8   : > { %5354 = vmatmul.bf16.vlgmr.msra.gmra.mxu0 %v19446_v40  ;;  %5412 = vmatmul.bf16.vlgmr.msrb.gmra.mxu1 %v19383_v34  ;;  %v13894_v34 = vor.u32 %v16940_v19, %v13893_v15  ;;  %v13794_v4 = vor.u32 %v16783_v47, %v13791_v3  ;;  %v13634_v36 = vor.u32 %v16743_v24, %v13631_v21  ;;  %v14037_v15 = vld [vmem:[#allocation9 + $0x9e0] sm:$0xf]  ;;  %v13775_v3 = vld [vmem:[#allocation9 + $0x3d8] sm:$0xf0] }
 0x3e9   : > { %5463 = vmatpush.bf16.msrb.mxu0 %v13650_v27  ;;  %v16976_v27 = vld [vmem:[#allocation9 + $0x9ec] sm:$0xf0]  ;;  %v13599_v21 = vld [vmem:[#allocation9 + $0x278] sm:$0xf0] }
 0x3ea   : > { %6378 = vmatpush.bf16.msra.mxu1 %v13894_v34  ;;  %5491 = vmatpush.bf16.msrb.mxu2 %v13794_v4  ;;  %v14038_v34 = vor.u32 %v16976_v27, %v14037_v15  ;;  %v16735_v4 = vld [vmem:[#allocation9 + $0x26c] sm:$0xf]  ;;  %v13829_v15 = vld [vmem:[#allocation9 + $0x840] sm:$0xf] }
 0x3eb   : > { %5383 = vmatmul.bf16.vlgmr.msra.gmra.mxu2 %v19454_v54  ;;  %5441 = vmatmul.bf16.vlgmr.msrb.gmra.mxu3 %v19391_v17 }
 0x3ec   : > { %6406 = vmatpush.bf16.msra.mxu3 %v14038_v34 }
 0x3ed   : > { %v5125_v39 = vpop.f32.mrf.mxu0  ;;  %v5183_v58 = vpop.f32.mrf.mxu1  ;;  %5464 = vmatpush.bf16.msrb.mxu0 %v13634_v36  ;;  %v16928_v36 = vld [vmem:[#allocation9 + $0x86c] sm:$0xf0] }
 0x3ee   : > { %v5126_v50 = vadd.f32 %v5125_v39, %v19530_v22  ;;  %v5184_v9 = vadd.f32 %v5183_v58, %v19405_v49  ;;  %v5152_v32 = vpop.f32.mrf.mxu2  ;;  %v5210_v43 = vpop.f32.mrf.mxu3  ;;  %6379 = vmatpush.bf16.msra.mxu1 %v13878_v30  ;;  %v16739_v49 = vld [vmem:[#allocation9 + $0x28c] sm:$0xf]  ;;  %v13615_v22 = vld [vmem:[#allocation9 + $0x298] sm:$0xf0]  ;;  %v13862_v58 = vor.u32 %v16932_v35, %v13861_v26  ;;  %v16972_v30 = vld [vmem:[#allocation9 + $0x9cc] sm:$0xf0] }
 0x3ef   : > { %v19584_v8 = vadd.f32 %v5152_v32, %v5124_v23  ;;  %v19586_v17 = vadd.f32 %v5210_v43, %v5182_v42  ;;  %v13618_v44 = vor.u32 %v16739_v49, %v13615_v22  ;;  %v16779_v42 = vld [vmem:[#allocation9 + $0x3cc] sm:$0xf]  ;;  %v13602_v43 = vor.u32 %v16735_v4, %v13599_v21  ;;  %v13583_v35 = vld [vmem:[#allocation9 + $0x258] sm:$0xf0] }
 0x3f0   : > { %v13778_v24 = vor.u32 %v16779_v42, %v13775_v3  ;;  %v13846_v22 = vor.u32 %v16928_v36, %v13845_v2  ;;  %v14005_v3 = vld [vmem:[#allocation9 + $0x9a0] sm:$0xf] }
 0x3f1   : > { %5465 = vmatpush.bf16.msrb.mxu0 %v13618_v44  ;;  %v16731_v44 = vld [vmem:[#allocation9 + $0x24c] sm:$0xf] }
 0x3f2   : > { %6380 = vmatpush.bf16.msra.mxu1 %v13862_v58  ;;  %5492 = vmatpush.bf16.msrb.mxu2 %v13778_v24  ;;  %v13586_v27 = vor.u32 %v16731_v44, %v13583_v35  ;;  %v13759_v58 = vld [vmem:[#allocation9 + $0x3b8] sm:$0xf0]  ;;  %v16968_v24 = vld [vmem:[#allocation9 + $0x9ac] sm:$0xf0] }
 0x3f3   : > { %v14006_v2 = vor.u32 %v16968_v24, %v14005_v3  ;;  %v16767_v3 = vld [vmem:[#allocation9 + $0x36c] sm:$0xf]  ;;  %v13727_v24 = vld [vmem:[#allocation9 + $0x378] sm:$0xf0] }
 0x3f5   : > { %v5128_v19 = vpop.f32.mrf.mxu0  ;;  %v5186_v39 = vpop.f32.mrf.mxu1  ;;  %5466 = vmatpush.bf16.msrb.mxu0 %v13602_v43  ;;  %v13813_v43 = vld [vmem:[#allocation9 + $0x820] sm:$0xf] }
 0x3f6   : > { %v5129_v47 = vadd.f32 %v5128_v19, %v19538_v29  ;;  %v5187_v23 = vadd.f32 %v5186_v39, %v19412_v10  ;;  %v5154_v31 = vpop.f32.mrf.mxu2  ;;  %v5212_v32 = vpop.f32.mrf.mxu3  ;;  %v14021_v29 = vld [vmem:[#allocation9 + $0x9c0] sm:$0xf]  ;;  %6381 = vmatpush.bf16.msra.mxu1 %v13846_v22  ;;  %v16924_v19 = vld [vmem:[#allocation9 + $0x84c] sm:$0xf0]  ;;  %v16775_v39 = vld [vmem:[#allocation9 + $0x3ac] sm:$0xf] }
 0x3f7   : > { %v19592_v10 = vadd.f32 %v5154_v31, %v5126_v50  ;;  %v19594_v49 = vadd.f32 %v5212_v32, %v5184_v9  ;;  %v14022_v26 = vor.u32 %v16972_v30, %v14021_v29  ;;  %v13830_v50 = vor.u32 %v16924_v19, %v13829_v15  ;;  %v16727_v31 = vld [vmem:[#allocation9 + $0x22c] sm:$0xf]  ;;  %v13567_v32 = vld [vmem:[#allocation9 + $0x238] sm:$0xf0]  ;;  %v16920_v29 = vld [vmem:[#allocation9 + $0x82c] sm:$0xf0] }
 0x3f8   : > { %5359 = vmatmul.bf16.gmra.mxu0 %v19168_v59  ;;  %5417 = vmatmul.bf16.gmra.mxu1 %v21178_v48  ;;  %v13762_v9 = vor.u32 %v16775_v39, %v13759_v58  ;;  %v13570_v36 = vor.u32 %v16727_v31, %v13567_v32  ;;  %v16771_v30 = vld [vmem:[#allocation9 + $0x38c] sm:$0xf]  ;;  %v13743_v22 = vld [vmem:[#allocation9 + $0x398] sm:$0xf0]  ;;  %v13814_v35 = vor.u32 %v16920_v29, %v13813_v43  ;;  %v13989_v19 = vld [vmem:[#allocation9 + $0x980] sm:$0xf] }
 0x3f9   : > { %6407 = vmatpush.bf16.msra.mxu3 %v14022_v26  ;;  %5467 = vmatpush.bf16.msrb.mxu0 %v13586_v27  ;;  %v13746_v15 = vor.u32 %v16771_v30, %v13743_v22  ;;  %v16723_v58 = vld [vmem:[#allocation9 + $0x20c] sm:$0xf]  ;;  %v13730_v43 = vor.u32 %v16767_v3, %v13727_v24  ;;  %v16960_v29 = vld [vmem:[#allocation9 + $0x96c] sm:$0xf0] }
 0x3fa   : > { %6382 = vmatpush.bf16.msra.mxu1 %v13830_v50  ;;  %5493 = vmatpush.bf16.msrb.mxu2 %v13762_v9  ;;  %v16916_v9 = vld [vmem:[#allocation9 + $0x80c] sm:$0xf0] }
 0x3fb   : > { %5388 = vmatmul.bf16.gmra.mxu2 %v19181_v56  ;;  %5446 = vmatmul.bf16.gmra.mxu3 %v21179_v11  ;;  %v16952_v24 = vld [vmem:[#allocation9 + $0x92c] sm:$0xf0] }
 0x3fd   : > { %v5130_v34 = vpop.f32.mrf.mxu0  ;;  %v5188_v42 = vpop.f32.mrf.mxu1  ;;  %6408 = vmatpush.bf16.msra.mxu3 %v14006_v2  ;;  %5468 = vmatpush.bf16.msrb.mxu0 %v13570_v36 }
 0x3fe   : > { %v5131_v4 = vadd.f32 %v5130_v34, %v19546_v0  ;;  %v5189_v21 = vadd.f32 %v5188_v42, %v19420_v62  ;;  %v5157_v26 = vpop.f32.mrf.mxu2  ;;  %v5215_v44 = vpop.f32.mrf.mxu3  ;;  %v16964_v0 = vld [vmem:[#allocation9 + $0x98c] sm:$0xf0]  ;;  %6383 = vmatpush.bf16.msra.mxu1 %v13814_v35  ;;  %5494 = vmatpush.bf16.msrb.mxu2 %v13746_v15  ;;  %v13551_v34 = vld [vmem:[#allocation9 + $0x218] sm:$0xf0]  ;;  %v13797_v42 = vld [vmem:[#allocation9 + $0x800] sm:$0xf] }
 0x3ff   : > { %v19600_v39 = vadd.f32 %v5157_v26, %v5129_v47  ;;  %v19602_v62 = vadd.f32 %v5215_v44, %v5187_v23  ;;  %v13990_v27 = vor.u32 %v16964_v0, %v13989_v19  ;;  %v13554_v50 = vor.u32 %v16723_v58, %v13551_v34  ;;  %v13973_v47 = vld [vmem:[#allocation9 + $0x960] sm:$0xf]  ;;  %v16763_v44 = vld [vmem:[#allocation9 + $0x34c] sm:$0xf]  ;;  %v13711_v35 = vld [vmem:[#allocation9 + $0x358] sm:$0xf0] }
 0x400   : > { %v13798_v32 = vor.u32 %v16916_v9, %v13797_v42  ;;  %v13974_v30 = vor.u32 %v16960_v29, %v13973_v47  ;;  %v13957_v15 = vld [vmem:[#allocation9 + $0x940] sm:$0xf]  ;;  %v16759_v58 = vld [vmem:[#allocation9 + $0x32c] sm:$0xf]  ;;  %v13695_v34 = vld [vmem:[#allocation9 + $0x338] sm:$0xf0] }
 0x401   : > { %6409 = vmatpush.bf16.msra.mxu3 %v13990_v27  ;;  %5469 = vmatpush.bf16.msrb.mxu0 %v13554_v50  ;;  %v13941_v42 = vld [vmem:[#allocation9 + $0x920] sm:$0xf]  ;;  %v13698_v3 = vor.u32 %v16759_v58, %v13695_v34  ;;  %v16948_v29 = vld [vmem:[#allocation9 + $0x90c] sm:$0xf0] }
 0x402   : > { %6384 = vmatpush.bf16.msra.mxu1 %v13798_v32  ;;  %5495 = vmatpush.bf16.msrb.mxu2 %v13730_v43  ;;  %v13679_v32 = vld [vmem:[#allocation9 + $0x318] sm:$0xf0]  ;;  %v13925_v47 = vld [vmem:[#allocation9 + $0x900] sm:$0xf] }
 0x405   : > { %v5133_v2 = vpop.f32.mrf.mxu0  ;;  %v5191_v31 = vpop.f32.mrf.mxu1  ;;  %6410 = vmatpush.bf16.msra.mxu3 %v13974_v30 }
 0x406   : > { %v5134_v23 = vadd.f32 %v5133_v2, %v19554_v63  ;;  %v5192_v36 = vadd.f32 %v5191_v31, %v19427_v14  ;;  %v5159_v22 = vpop.f32.mrf.mxu2  ;;  %v5217_v26 = vpop.f32.mrf.mxu3  ;;  %v13714_v63 = vor.u32 %v16763_v44, %v13711_v35  ;;  %v16956_v14 = vld [vmem:[#allocation9 + $0x94c] sm:$0xf0]  ;;  %v13942_v2 = vor.u32 %v16952_v24, %v13941_v42  ;;  %v16755_v31 = vld [vmem:[#allocation9 + $0x30c] sm:$0xf]  ;;  %v5520_v42 = vld [vmem:[#allocation3] sm:$0xfc] }
 0x407   : > { %v19608_v19 = vadd.f32 %v5159_v22, %v5131_v4  ;;  %v19610_v0 = vadd.f32 %v5217_v26, %v5189_v21  ;;  %v13958_v27 = vor.u32 %v16956_v14, %v13957_v15  ;;  %v13682_v43 = vor.u32 %v16755_v31, %v13679_v32  ;;  %v5521_v31 = vld [vmem:[#allocation3 + $0x8] sm:$0xfc] }
 0x408   : > { %5364 = vmatmul.bf16.gmra.mxu0 %v19210_v45  ;;  %5422 = vmatmul.bf16.gmra.mxu1 %v19042_v38  ;;  %v13926_v35 = vor.u32 %v16948_v29, %v13925_v47 }
 0x409   : > { %5496 = vmatpush.bf16.msrb.mxu2 %v13714_v63  ;;  %6411 = vmatpush.bf16.msra.mxu3 %v13958_v27 }
 0x40b   : > { %5393 = vmatmul.bf16.gmra.mxu2 %v19228_v55  ;;  %5451 = vmatmul.bf16.gmra.mxu3 %v19058_v41 }
 0x40d   : > { %v5135_v50 = vpop.f32.mrf.mxu0  ;;  %v5193_v9 = vpop.f32.mrf.mxu1  ;;  %5497 = vmatpush.bf16.msrb.mxu2 %v13698_v3  ;;  %6412 = vmatpush.bf16.msra.mxu3 %v13942_v2  ;;  %v5686_v2 = vrot.slane %v21178_v48, 1 }
 0x40e   : > { %v5136_v4 = vadd.f32 %v5135_v50, %v19562_v57  ;;  %v5194_v21 = vadd.f32 %v5193_v9, %v19434_v16  ;;  %v5162_v30 = vpop.f32.mrf.mxu2  ;;  %v5220_v22 = vpop.f32.mrf.mxu3 }
 0x40f   : > { %v19616_v26 = vadd.f32 %v5162_v30, %v5134_v23  ;;  %v19618_v44 = vadd.f32 %v5220_v22, %v5192_v36 }
 0x411   : > { %5498 = vmatpush.bf16.msrb.mxu2 %v13682_v43  ;;  %6413 = vmatpush.bf16.msra.mxu3 %v13926_v35 }
 0x415   : > { %v5138_v57 = vpop.f32.mrf.mxu0  ;;  %v5196_v15 = vpop.f32.mrf.mxu1 }
 0x416   : > { %v5139_v16 = vadd.f32 %v5138_v57, %v19570_v51  ;;  %v5197_v63 = vadd.f32 %v5196_v15, %v19441_v61  ;;  %v5164_v14 = vpop.f32.mrf.mxu2  ;;  %v5222_v27 = vpop.f32.mrf.mxu3  ;;  %v21125_v57 = vrot.slane %v21179_v11, 1 }
 0x417   : > { %v19624_v23 = vadd.f32 %v5164_v14, %v5136_v4  ;;  %v19626_v36 = vadd.f32 %v5222_v27, %v5194_v21  ;;  %v17715_v4 = vld [vmem:[#allocation3 + $0x20] sm:$0xff]  ;;  %v17008_v14 = vld [vmem:[#allocation9 + $0xaec] sm:$0xf0] }
 0x418   : > { %5369 = vmatmul.bf16.gmra.mxu0 %v19262_v53  ;;  %5427 = vmatmul.bf16.gmra.mxu1 %v19098_v13  ;;  %v5528_v21 = vpack.c.bf16 %v17715_v4, %v5520_v42  ;;  %v13911_v42 = vld [vmem:[#allocation9 + $0x8f0] sm:$0xf0] }
 0x41a   : > { %v5685_v47 = vrot.slane %v5528_v21, 1 }
 0x41b   : > { %5398 = vmatmul.bf16.gmra.mxu2 %v19268_v1  ;;  %5456 = vmatmul.bf16.gmra.mxu3 %v19115_v52 }
 0x41c   : > { %v19642_v35 = vsel %vm2047_vm6, %v5685_v47, %v5686_v2  ;;  %v16938_v47 = vld [vmem:[#allocation9 + $0x8c4] sm:$0xf] }
 0x41d   : > { %v5140_v58 = vpop.f32.mrf.mxu0  ;;  %v5198_v34 = vpop.f32.mrf.mxu1 }
 0x41e   : > { %v5141_v51 = vadd.f32 %v5140_v58, %v19578_v18  ;;  %v5199_v61 = vadd.f32 %v5198_v34, %v19450_v37  ;;  %v5167_v50 = vpop.f32.mrf.mxu2  ;;  %v5225_v9 = vpop.f32.mrf.mxu3  ;;  %v21186_v18 = vld [vmem:[#allocation45_spill] sm:$0xff]  ;;  %v17716_v37 = vld [vmem:[#allocation3 + $0x28] sm:$0xff] }
 0x41f   : > { %v19632_v3 = vadd.f32 %v5167_v50, %v5139_v16  ;;  %v19634_v24 = vadd.f32 %v5225_v9, %v5197_v63  ;;  %v5529_v22 = vpack.c.bf16 %v17716_v37, %v5521_v31  ;;  %v14165_v63 = vld [vmem:[#allocation9 + $0xae0] sm:$0xf]  ;;  %v13895_v37 = vld [vmem:[#allocation9 + $0x8d0] sm:$0xf0] }
 0x420   : > { %v14166_v34 = vor.u32 %v17008_v14, %v14165_v63  ;;  %v13898_v14 = vor.u32 %v16938_v47, %v13895_v37  ;;  %v14023_v47 = vld [vmem:[#allocation9 + $0x9d0] sm:$0xf0] }
 0x421   : > { %v5688_v50 = vrot.slane %v5529_v22, 1  ;;  %v14293_v22 = vld [vmem:[#allocation9 + $0xbe0] sm:$0xf] }
 0x422   : > { %6435 = vmatpush.bf16.msra.mxu0 %v14166_v34  ;;  %v14133_v34 = vld [vmem:[#allocation9 + $0xaa0] sm:$0xf] }
 0x425   : > { %v5239_v32 = vpop.f32.mrf.mxu0  ;;  %v5297_v43 = vpop.f32.mrf.mxu1 }
 0x426   : > { %v5240_v29 = vadd.f32 %v5239_v32, %v19586_v17  ;;  %v5298_v30 = vadd.f32 %v5297_v43, %v21186_v18  ;;  %v5169_v15 = vpop.f32.mrf.mxu2  ;;  %v5227_v16 = vpop.f32.mrf.mxu3  ;;  %v16942_v17 = vld [vmem:[#allocation9 + $0x8e4] sm:$0xf]  ;;  %v14149_v32 = vld [vmem:[#allocation9 + $0xac0] sm:$0xf]  ;;  %v17004_v43 = vld [vmem:[#allocation9 + $0xacc] sm:$0xf0] }
 0x427   : > { %v19647_v27 = vadd.f32 %v5169_v15, %v5141_v51  ;;  %v19649_v58 = vadd.f32 %v5227_v16, %v5199_v61  ;;  %v13914_v9 = vor.u32 %v16942_v17, %v13911_v42  ;;  %v21187_v61 = vld [vmem:[#allocation43_spill] sm:$0xff]  ;;  %v14150_v18 = vor.u32 %v17004_v43, %v14149_v32  ;;  %v17040_v15 = vld [vmem:[#allocation9 + $0xbec] sm:$0xf0] }
 0x428   : > { %5470 = vmatmul.bf16.vlgmr.msrb.gmra.mxu0 %v19446_v40  ;;  %6385 = vmatmul.bf16.vlgmr.msra.gmra.mxu1 %v19642_v35  ;;  %v19654_v40 = vsel %vm2047_vm6, %v5688_v50, %v21125_v57  ;;  %v14294_v17 = vor.u32 %v17040_v15, %v14293_v22  ;;  %v17000_v42 = vld [vmem:[#allocation9 + $0xaac] sm:$0xf0]  ;;  %v16970_v57 = vld [vmem:[#allocation9 + $0x9c4] sm:$0xf] }
 0x429   : > { %6493 = vmatpush.bf16.msrb.mxu1 %v13914_v9  ;;  %6436 = vmatpush.bf16.msra.mxu0 %v14150_v18  ;;  %v16996_v22 = vld [vmem:[#allocation9 + $0xa8c] sm:$0xf0]  ;;  %v16930_v18 = vld [vmem:[#allocation9 + $0x884] sm:$0xf] }
 0x42a   : > { %6464 = vmatpush.bf16.msra.mxu2 %v14294_v17  ;;  %v17036_v17 = vld [vmem:[#allocation9 + $0xbcc] sm:$0xf0] }
 0x42b   : > { %5499 = vmatmul.bf16.vlgmr.msrb.gmra.mxu2 %v19454_v54  ;;  %6414 = vmatmul.bf16.vlgmr.msra.gmra.mxu3 %v19654_v40  ;;  %v16934_v54 = vld [vmem:[#allocation9 + $0x8a4] sm:$0xf] }
 0x42d   : > { %v5241_v4 = vpop.f32.mrf.mxu0  ;;  %v5299_v21 = vpop.f32.mrf.mxu1  ;;  %6494 = vmatpush.bf16.msrb.mxu1 %v13898_v14  ;;  %v14277_v14 = vld [vmem:[#allocation9 + $0xbc0] sm:$0xf] }
 0x42e   : > { %v5242_v51 = vadd.f32 %v5241_v4, %v19594_v49  ;;  %v5300_v31 = vadd.f32 %v5299_v21, %v21187_v61  ;;  %v5268_v16 = vpop.f32.mrf.mxu2  ;;  %v5326_v63 = vpop.f32.mrf.mxu3  ;;  %v14134_v49 = vor.u32 %v17000_v42, %v14133_v34  ;;  %v13879_v4 = vld [vmem:[#allocation9 + $0x8b0] sm:$0xf0]  ;;  %v21124_v61 = vrot.slane %v19042_v38, 1 }
 0x42f   : > { %v19660_v50 = vadd.f32 %v5268_v16, %v5240_v29  ;;  %v19662_v9 = vadd.f32 %v5326_v63, %v5298_v30  ;;  %v13882_v21 = vor.u32 %v16934_v54, %v13879_v4  ;;  %v14117_v30 = vld [vmem:[#allocation9 + $0xa80] sm:$0xf]  ;;  %v13863_v63 = vld [vmem:[#allocation9 + $0x890] sm:$0xf0]  ;;  %v14278_v42 = vor.u32 %v17036_v17, %v14277_v14  ;;  %v16974_v54 = vld [vmem:[#allocation9 + $0x9e4] sm:$0xf] }
 0x430   : > { %6437 = vmatpush.bf16.msra.mxu0 %v14134_v49  ;;  %v19673_v15 = vsel %vm2047_vm6, %v5686_v2, %v21124_v61  ;;  %v14118_v16 = vor.u32 %v16996_v22, %v14117_v30  ;;  %v13866_v34 = vor.u32 %v16930_v18, %v13863_v63  ;;  %v14039_v49 = vld [vmem:[#allocation9 + $0x9f0] sm:$0xf0]  ;;  %v14101_v4 = vld [vmem:[#allocation9 + $0xa60] sm:$0xf]  ;;  %v14026_v18 = vor.u32 %v16970_v57, %v14023_v47  ;;  %v16988_v47 = vld [vmem:[#allocation9 + $0xa4c] sm:$0xf0] }
 0x431   : > { %6495 = vmatpush.bf16.msrb.mxu1 %v13882_v21  ;;  %v14042_v2 = vor.u32 %v16974_v54, %v14039_v49  ;;  %v13847_v30 = vld [vmem:[#allocation9 + $0x870] sm:$0xf0]  ;;  %6465 = vmatpush.bf16.msra.mxu2 %v14278_v42  ;;  %v21189_v63 = vrot.slane %v19058_v41, 1  ;;  %v14085_v57 = vld [vmem:[#allocation9 + $0xa40] sm:$0xf] }
 0x432   : > { %v14261_v42 = vld [vmem:[#allocation9 + $0xba0] sm:$0xf]  ;;  %v17032_v54 = vld [vmem:[#allocation9 + $0xbac] sm:$0xf0] }
 0x433   : > { %6522 = vmatpush.bf16.msrb.mxu3 %v14042_v2 }
 0x434   : > { %6438 = vmatpush.bf16.msra.mxu0 %v14118_v16 }
 0x435   : > { %v5244_v32 = vpop.f32.mrf.mxu0  ;;  %v5302_v43 = vpop.f32.mrf.mxu1  ;;  %6496 = vmatpush.bf16.msrb.mxu1 %v13866_v34  ;;  %v13831_v34 = vld [vmem:[#allocation9 + $0x850] sm:$0xf0] }
 0x436   : > { %v5245_v37 = vadd.f32 %v5244_v32, %v19602_v62  ;;  %v5303_v29 = vadd.f32 %v5302_v43, %v19475_v5  ;;  %v5270_v5 = vpop.f32.mrf.mxu2  ;;  %v5328_v62 = vpop.f32.mrf.mxu3  ;;  %v16992_v32 = vld [vmem:[#allocation9 + $0xa6c] sm:$0xf0]  ;;  %v16926_v43 = vld [vmem:[#allocation9 + $0x864] sm:$0xf] }
 0x437   : > { %v19677_v21 = vadd.f32 %v5270_v5, %v5242_v51  ;;  %v19679_v48 = vadd.f32 %v5328_v62, %v5300_v31  ;;  %v14102_v22 = vor.u32 %v16992_v32, %v14101_v4  ;;  %v13850_v61 = vor.u32 %v16926_v43, %v13847_v30  ;;  %6523 = vmatpush.bf16.msrb.mxu3 %v14026_v18  ;;  %v16966_v43 = vld [vmem:[#allocation9 + $0x9a4] sm:$0xf]  ;;  %v14069_v30 = vld [vmem:[#allocation9 + $0xa20] sm:$0xf] }
 0x438   : > { %5475 = vmatmul.bf16.gmra.mxu0 %v19168_v59  ;;  %6390 = vmatmul.bf16.gmra.mxu1 %v19673_v15  ;;  %v21190_v51 = vrot.slane %v21179_v11, 1  ;;  %v16922_v11 = vld [vmem:[#allocation9 + $0x844] sm:$0xf]  ;;  %v14086_v62 = vor.u32 %v16988_v47, %v14085_v57  ;;  %v14262_v32 = vor.u32 %v17032_v54, %v14261_v42  ;;  %v14245_v57 = vld [vmem:[#allocation9 + $0xb80] sm:$0xf] }
 0x439   : > { %21188 = vst [vmem:[#allocation44_spill] sm:$0xff] %v19677_v21  ;;  %6439 = vmatpush.bf16.msra.mxu0 %v14102_v22  ;;  %6497 = vmatpush.bf16.msrb.mxu1 %v13850_v61  ;;  %v13834_v2 = vor.u32 %v16922_v11, %v13831_v34  ;;  %v16984_v22 = vld [vmem:[#allocation9 + $0xa2c] sm:$0xf0]  ;;  %v16962_v21 = vld [vmem:[#allocation9 + $0x984] sm:$0xf]  ;;  %v21127_v11 = vrot.slane %v19098_v13, 1 }
 0x43a   : > { %v19686_v31 = vsel %vm2047_vm6, %v21190_v51, %v21189_v63  ;;  %v16918_v51 = vld [vmem:[#allocation9 + $0x824] sm:$0xf]  ;;  %v14070_v18 = vor.u32 %v16984_v22, %v14069_v30  ;;  %v17028_v47 = vld [vmem:[#allocation9 + $0xb8c] sm:$0xf0]  ;;  %6466 = vmatpush.bf16.msra.mxu2 %v14262_v32  ;;  %v21192_v32 = vrot.slane %v19042_v38, 1 }
 0x43b   : > { %5504 = vmatmul.bf16.gmra.mxu2 %v19181_v56  ;;  %6419 = vmatmul.bf16.gmra.mxu3 %v19686_v31  ;;  %v14246_v34 = vor.u32 %v17028_v47, %v14245_v57  ;;  %v16914_v30 = vld [vmem:[#allocation9 + $0x804] sm:$0xf]  ;;  %v13799_v22 = vld [vmem:[#allocation9 + $0x810] sm:$0xf0]  ;;  %v14213_v38 = vld [vmem:[#allocation9 + $0xb40] sm:$0xf] }
 0x43c   : > { %v16958_v47 = vld [vmem:[#allocation9 + $0x964] sm:$0xf] }
 0x43d   : > { %v5246_v16 = vpop.f32.mrf.mxu0  ;;  %v5304_v14 = vpop.f32.mrf.mxu1  ;;  %6440 = vmatpush.bf16.msra.mxu0 %v14086_v62  ;;  %6498 = vmatpush.bf16.msrb.mxu1 %v13834_v2  ;;  %v21191_v62 = vld [vmem:[#allocation46_spill] sm:$0xff] }
 0x43e   : > { %v19691_v17 = vadd.f32 %v5246_v16, %v19610_v0  ;;  %v19694_v5 = vadd.f32 %v5304_v14, %v19483_v60  ;;  %v5273_v49 = vpop.f32.mrf.mxu2  ;;  %v5331_v4 = vpop.f32.mrf.mxu3  ;;  %v14007_v0 = vld [vmem:[#allocation9 + $0x9b0] sm:$0xf0]  ;;  %6467 = vmatpush.bf16.msra.mxu2 %v14246_v34 }
 0x43f   : > { %v19696_v63 = vadd.f32 %v5273_v49, %v5245_v37  ;;  %v19698_v60 = vadd.f32 %v5331_v4, %v5303_v29  ;;  %v14010_v61 = vor.u32 %v16966_v43, %v14007_v0  ;;  %v13815_v16 = vld [vmem:[#allocation9 + $0x830] sm:$0xf0]  ;;  %v21126_v49 = vrot.slane %v19115_v52, 1  ;;  %v14053_v43 = vld [vmem:[#allocation9 + $0xa00] sm:$0xf] }
 0x440   : > { %v13818_v14 = vor.u32 %v16918_v51, %v13815_v16  ;;  %v13991_v37 = vld [vmem:[#allocation9 + $0x990] sm:$0xf0]  ;;  %v16980_v0 = vld [vmem:[#allocation9 + $0xa0c] sm:$0xf0]  ;;  %v14229_v51 = vld [vmem:[#allocation9 + $0xb60] sm:$0xf] }
 0x441   : > { %6524 = vmatpush.bf16.msrb.mxu3 %v14010_v61  ;;  %v13994_v42 = vor.u32 %v16962_v21, %v13991_v37  ;;  %6441 = vmatpush.bf16.msra.mxu0 %v14070_v18  ;;  %v19709_v61 = vsel %vm2047_vm6, %v21192_v32, %v21127_v11  ;;  %v14054_v21 = vor.u32 %v16980_v0, %v14053_v43  ;;  %v13975_v37 = vld [vmem:[#allocation9 + $0x970] sm:$0xf0]  ;;  %v21194_v32 = vrot.slane %v19058_v41, 1 }
 0x442   : > { %6499 = vmatpush.bf16.msrb.mxu1 %v13818_v14  ;;  %v13802_v14 = vor.u32 %v16914_v30, %v13799_v22  ;;  %v13959_v43 = vld [vmem:[#allocation9 + $0x950] sm:$0xf0]  ;;  %v5524_v22 = vld [vmem:[#allocation3 + $0x100] sm:$0x3] }
 0x445   : > { %v5249_v29 = vpop.f32.mrf.mxu0  ;;  %v5307_v54 = vpop.f32.mrf.mxu1  ;;  %6525 = vmatpush.bf16.msrb.mxu3 %v13994_v42  ;;  %v13978_v42 = vor.u32 %v16958_v47, %v13975_v37  ;;  %6442 = vmatpush.bf16.msra.mxu0 %v14054_v21  ;;  %v5532_v47 = vpack.c.bf16 %v5524_v22, %v5524_v22  ;;  %v13943_v37 = vld [vmem:[#allocation9 + $0x930] sm:$0xf0] }
 0x446   : > { %v5250_v4 = vadd.f32 %v5249_v29, %v19618_v44  ;;  %v5308_v2 = vadd.f32 %v5307_v54, %v21191_v62  ;;  %v17024_v44 = vld [vmem:[#allocation9 + $0xb6c] sm:$0xf0]  ;;  %v5275_v16 = vpop.f32.mrf.mxu2  ;;  %v5333_v18 = vpop.f32.mrf.mxu3  ;;  %v16954_v62 = vld [vmem:[#allocation9 + $0x944] sm:$0xf]  ;;  %6500 = vmatpush.bf16.msrb.mxu1 %v13802_v14 }
 0x447   : > { %v14230_v57 = vor.u32 %v17024_v44, %v14229_v51  ;;  %v19714_v29 = vadd.f32 %v5275_v16, %v19691_v17  ;;  %v19717_v34 = vadd.f32 %v5333_v18, %v19694_v5  ;;  %v17020_v54 = vld [vmem:[#allocation9 + $0xb4c] sm:$0xf0]  ;;  %v13962_v30 = vor.u32 %v16954_v62, %v13959_v43  ;;  %v21195_v44 = vld [vmem:[#allocation47_spill] sm:$0xff] }
 0x448   : > { %5480 = vmatmul.bf16.gmra.mxu0 %v19210_v45  ;;  %6395 = vmatmul.bf16.gmra.mxu1 %v19709_v61  ;;  %v14214_v0 = vor.u32 %v17020_v54, %v14213_v38  ;;  %v19724_v17 = vsel %vm2047_vm6, %v21194_v32, %v21126_v49  ;;  %v14197_v18 = vld [vmem:[#allocation9 + $0xb20] sm:$0xf]  ;;  %v17016_v14 = vld [vmem:[#allocation9 + $0xb2c] sm:$0xf0]  ;;  %v16946_v32 = vld [vmem:[#allocation9 + $0x904] sm:$0xf] }
 0x449   : > { %21193 = vst [vmem:[#allocation48_spill] sm:$0xff] %v19714_v29  ;;  %6468 = vmatpush.bf16.msra.mxu2 %v14230_v57  ;;  %6526 = vmatpush.bf16.msrb.mxu3 %v13978_v42  ;;  %v16950_v57 = vld [vmem:[#allocation9 + $0x924] sm:$0xf]  ;;  %v14198_v41 = vor.u32 %v17016_v14, %v14197_v18  ;;  %v14181_v38 = vld [vmem:[#allocation9 + $0xb00] sm:$0xf]  ;;  %v21196_v29 = vld [vmem:[#allocation49_spill] sm:$0xff] }
 0x44a   : > { %v13946_v62 = vor.u32 %v16950_v57, %v13943_v37  ;;  %v17012_v43 = vld [vmem:[#allocation9 + $0xb0c] sm:$0xf0]  ;;  %v13927_v49 = vld [vmem:[#allocation9 + $0x910] sm:$0xf0]  ;;  %v21197_v37 = vrot.slane %v19098_v13, 1 }
 0x44b   : > { %5509 = vmatmul.bf16.gmra.mxu2 %v19228_v55  ;;  %6424 = vmatmul.bf16.gmra.mxu3 %v19724_v17  ;;  %v14182_v22 = vor.u32 %v17012_v43, %v14181_v38 }
 0x44d   : > { %v5251_v5 = vpop.f32.mrf.mxu0  ;;  %v5309_v51 = vpop.f32.mrf.mxu1  ;;  %6469 = vmatpush.bf16.msra.mxu2 %v14214_v0  ;;  %6527 = vmatpush.bf16.msrb.mxu3 %v13962_v30  ;;  %v13930_v0 = vor.u32 %v16946_v32, %v13927_v49  ;;  %v5522_v32 = vld [vmem:[#allocation3 + $0x10] sm:$0xfc] }
 0x44e   : > { %v5252_v21 = vadd.f32 %v5251_v5, %v19626_v36  ;;  %v5310_v16 = vadd.f32 %v5309_v51, %v21195_v44  ;;  %v5278_v42 = vpop.f32.mrf.mxu2  ;;  %v5336_v54 = vpop.f32.mrf.mxu3  ;;  %v5525_v5 = vld [vmem:[#allocation3 + $0x108] sm:$0x3]  ;;  %v5713_v51 = vrot.slane %v5532_v47, 1 }
 0x44f   : > { %v19730_v11 = vadd.f32 %v5278_v42, %v5250_v4  ;;  %v19732_v36 = vadd.f32 %v5336_v54, %v5308_v2  ;;  %v5533_v30 = vpack.c.bf16 %v5525_v5, %v5525_v5 }
 0x450   : > { %v19739_v4 = vsel %vm2047_vm6, %v21197_v37, %v5713_v51 }
 0x451   : > { %6470 = vmatpush.bf16.msra.mxu2 %v14198_v41  ;;  %6528 = vmatpush.bf16.msrb.mxu3 %v13946_v62  ;;  %v5715_v47 = vrot.slane %v5533_v30, 1  ;;  %v21200_v62 = vld [vmem:[#allocation53_spill] sm:$0xff]  ;;  %v5523_v30 = vld [vmem:[#allocation3 + $0x18] sm:$0xfc] }
 0x455   : > { %v5254_v44 = vpop.f32.mrf.mxu0  ;;  %v5312_v18 = vpop.f32.mrf.mxu1  ;;  %6471 = vmatpush.bf16.msra.mxu2 %v14182_v22  ;;  %6529 = vmatpush.bf16.msrb.mxu3 %v13930_v0  ;;  %v21129_v0 = vrot.slane %v19168_v59, 1 }
 0x456   : > { %v5255_v14 = vadd.f32 %v5254_v44, %v19634_v24  ;;  %v5313_v57 = vadd.f32 %v5312_v18, %v21196_v29  ;;  %v5280_v2 = vpop.f32.mrf.mxu2  ;;  %v5338_v49 = vpop.f32.mrf.mxu3  ;;  %v21199_v24 = vrot.slane %v19115_v52, 1  ;;  %v17717_v52 = vld [vmem:[#allocation3 + $0x30] sm:$0xff] }
 0x457   : > { %v19743_v41 = vadd.f32 %v5280_v2, %v5252_v21  ;;  %v19745_v38 = vadd.f32 %v5338_v49, %v5310_v16  ;;  %v5530_v22 = vpack.c.bf16 %v17717_v52, %v5522_v32  ;;  %v17718_v49 = vld [vmem:[#allocation3 + $0x38] sm:$0xff] }
 0x458   : > { %5485 = vmatmul.bf16.gmra.mxu0 %v19262_v53  ;;  %6400 = vmatmul.bf16.gmra.mxu1 %v19739_v4  ;;  %v19750_v13 = vsel %vm2047_vm6, %v21199_v24, %v5715_v47  ;;  %v5531_v47 = vpack.c.bf16 %v17718_v49, %v5523_v30  ;;  %v14151_v49 = vld [vmem:[#allocation9 + $0xad0] sm:$0xf0] }
 0x459   : > { %21198 = vst [vmem:[#allocation50_spill] sm:$0xff] %v19743_v41  ;;  %v5691_v37 = vrot.slane %v5530_v22, 1  ;;  %v16973_v41 = vld [vmem:[#allocation9 + $0x9d4] sm:$0xf0] }
 0x45a   : > { %v5694_v52 = vrot.slane %v5531_v47, 1  ;;  %v13901_v47 = vld [vmem:[#allocation9 + $0x8c8] sm:$0xf] }
 0x45b   : > { %5514 = vmatmul.bf16.gmra.mxu2 %v19268_v1  ;;  %6429 = vmatmul.bf16.gmra.mxu3 %v19750_v13 }
 0x45d   : > { %v5256_v29 = vpop.f32.mrf.mxu0  ;;  %v5314_v42 = vpop.f32.mrf.mxu1 }
 0x45e   : > { %v5257_v54 = vadd.f32 %v5256_v29, %v19649_v58  ;;  %v5315_v43 = vadd.f32 %v5314_v42, %v21200_v62  ;;  %v5283_v21 = vpop.f32.mrf.mxu2  ;;  %v5341_v5 = vpop.f32.mrf.mxu3  ;;  %v17006_v42 = vld [vmem:[#allocation9 + $0xae4] sm:$0xf]  ;;  %v14167_v62 = vld [vmem:[#allocation9 + $0xaf0] sm:$0xf0] }
 0x45f   : > { %v19756_v16 = vadd.f32 %v5283_v21, %v5255_v14  ;;  %v19758_v51 = vadd.f32 %v5341_v5, %v5313_v57  ;;  %v19766_v14 = vsel %vm2047_vm6, %v5691_v37, %v21129_v0  ;;  %v21128_v57 = vrot.slane %v19181_v56, 1  ;;  %v16945_v5 = vld [vmem:[#allocation9 + $0x8f4] sm:$0xf0]  ;;  %v17002_v37 = vld [vmem:[#allocation9 + $0xac4] sm:$0xf] }
 0x460   : > { %v14170_v21 = vor.u32 %v17006_v42, %v14167_v62  ;;  %v17038_v42 = vld [vmem:[#allocation9 + $0xbe4] sm:$0xf]  ;;  %v14295_v62 = vld [vmem:[#allocation9 + $0xbf0] sm:$0xf0]  ;;  %v13885_v0 = vld [vmem:[#allocation9 + $0x8a8] sm:$0xf] }
 0x461   : > { %21201 = vst [vmem:[#allocation51_spill] sm:$0xff] %v19756_v16  ;;  %v19778_v30 = vsel %vm2047_vm6, %v5694_v52, %v21128_v57  ;;  %v14298_v52 = vor.u32 %v17038_v42, %v14295_v62  ;;  %v14135_v57 = vld [vmem:[#allocation9 + $0xab0] sm:$0xf0] }
 0x462   : > { %6551 = vmatpush.bf16.msrb.mxu0 %v14170_v21  ;;  %v14119_v42 = vld [vmem:[#allocation9 + $0xa90] sm:$0xf0] }
 0x463   : > { %6580 = vmatpush.bf16.msrb.mxu2 %v14298_v52 }
 0x465   : > { %v5355_v44 = vpop.f32.mrf.mxu0  ;;  %v5413_v18 = vpop.f32.mrf.mxu1 }
 0x466   : > { %v5356_v2 = vadd.f32 %v5355_v44, %v19662_v9  ;;  %v5414_v58 = vadd.f32 %v5413_v18, %v19520_v33  ;;  %v5285_v24 = vpop.f32.mrf.mxu2  ;;  %v5343_v29 = vpop.f32.mrf.mxu3  ;;  %v13917_v9 = vld [vmem:[#allocation9 + $0x8e8] sm:$0xf] }
 0x467   : > { %v19771_v32 = vadd.f32 %v5285_v24, %v5257_v54  ;;  %v19773_v33 = vadd.f32 %v5343_v29, %v5315_v43  ;;  %v13918_v22 = vor.u32 %v16945_v5, %v13917_v9  ;;  %v14154_v24 = vor.u32 %v17002_v37, %v14151_v49  ;;  %v16941_v29 = vld [vmem:[#allocation9 + $0x8d4] sm:$0xf0] }
 0x468   : > { %6443 = vmatmul.bf16.vlgmr.msra.gmra.mxu0 %v19766_v14  ;;  %6501 = vmatmul.bf16.vlgmr.msrb.gmra.mxu1 %v19642_v35  ;;  %v13902_v5 = vor.u32 %v16941_v29, %v13901_v47 }
 0x469   : > { %21202 = vst [vmem:[#allocation52_spill] sm:$0xff] %v19771_v32  ;;  %6609 = vmatpush.bf16.msra.mxu1 %v13918_v22  ;;  %v16998_v22 = vld [vmem:[#allocation9 + $0xaa4] sm:$0xf]  ;;  %6552 = vmatpush.bf16.msrb.mxu0 %v14154_v24  ;;  %v13869_v24 = vld [vmem:[#allocation9 + $0x888] sm:$0xf] }
 0x46b   : > { %6472 = vmatmul.bf16.vlgmr.msra.gmra.mxu2 %v19778_v30  ;;  %6530 = vmatmul.bf16.vlgmr.msrb.gmra.mxu3 %v19654_v40 }
 0x46d   : > { %v5357_v44 = vpop.f32.mrf.mxu0  ;;  %v5415_v18 = vpop.f32.mrf.mxu1  ;;  %6610 = vmatpush.bf16.msra.mxu1 %v13902_v5  ;;  %v14279_v5 = vld [vmem:[#allocation9 + $0xbd0] sm:$0xf0] }
 0x46e   : > { %v5358_v54 = vadd.f32 %v5357_v44, %v19679_v48  ;;  %v5416_v43 = vadd.f32 %v5415_v18, %v19528_v28  ;;  %v5384_v9 = vpop.f32.mrf.mxu2  ;;  %v5442_v21 = vpop.f32.mrf.mxu3  ;;  %v14138_v28 = vor.u32 %v16998_v22, %v14135_v57  ;;  %v16937_v48 = vld [vmem:[#allocation9 + $0x8b4] sm:$0xf0]  ;;  %v21130_v18 = vrot.slane %v19210_v45, 1 }
 0x46f   : > { %v19784_v32 = vadd.f32 %v5384_v9, %v5356_v2  ;;  %v19786_v16 = vadd.f32 %v5442_v21, %v5414_v58  ;;  %v13886_v44 = vor.u32 %v16937_v48, %v13885_v0  ;;  %v16994_v58 = vld [vmem:[#allocation9 + $0xa84] sm:$0xf]  ;;  %v21204_v57 = vrot.slane %v19168_v59, 1  ;;  %v16933_v9 = vld [vmem:[#allocation9 + $0x894] sm:$0xf0] }
 0x470   : > { %6553 = vmatpush.bf16.msrb.mxu0 %v14138_v28  ;;  %v14122_v62 = vor.u32 %v16994_v58, %v14119_v42  ;;  %v17034_v21 = vld [vmem:[#allocation9 + $0xbc4] sm:$0xf]  ;;  %v13870_v52 = vor.u32 %v16933_v9, %v13869_v24  ;;  %v14045_v28 = vld [vmem:[#allocation9 + $0x9e8] sm:$0xf]  ;;  %v16977_v48 = vld [vmem:[#allocation9 + $0x9f4] sm:$0xf0] }
 0x471   : > { %21203 = vst [vmem:[#allocation45_spill] sm:$0xff] %v19784_v32  ;;  %6611 = vmatpush.bf16.msra.mxu1 %v13886_v44  ;;  %v19797_v0 = vsel %vm2047_vm6, %v21204_v57, %v21130_v18  ;;  %v14282_v22 = vor.u32 %v17034_v21, %v14279_v5  ;;  %v16990_v44 = vld [vmem:[#allocation9 + $0xa64] sm:$0xf]  ;;  %v14103_v58 = vld [vmem:[#allocation9 + $0xa70] sm:$0xf0]  ;;  %v21206_v9 = vrot.slane %v19228_v55, 1 }
 0x472   : > { %v13853_v42 = vld [vmem:[#allocation9 + $0x868] sm:$0xf]  ;;  %v16929_v57 = vld [vmem:[#allocation9 + $0x874] sm:$0xf0]  ;;  %v14106_v18 = vor.u32 %v16990_v44, %v14103_v58 }
 0x473   : > { %6581 = vmatpush.bf16.msrb.mxu2 %v14282_v22  ;;  %v13854_v47 = vor.u32 %v16929_v57, %v13853_v42  ;;  %v14029_v32 = vld [vmem:[#allocation9 + $0x9c8] sm:$0xf]  ;;  %v17030_v22 = vld [vmem:[#allocation9 + $0xba4] sm:$0xf] }
 0x474   : > { %6554 = vmatpush.bf16.msrb.mxu0 %v14122_v62  ;;  %v14030_v24 = vor.u32 %v16973_v41, %v14029_v32  ;;  %v16986_v41 = vld [vmem:[#allocation9 + $0xa44] sm:$0xf]  ;;  %v14087_v32 = vld [vmem:[#allocation9 + $0xa50] sm:$0xf0]  ;;  %v14013_v42 = vld [vmem:[#allocation9 + $0x9a8] sm:$0xf] }
 0x475   : > { %v5360_v37 = vpop.f32.mrf.mxu0  ;;  %v5418_v49 = vpop.f32.mrf.mxu1  ;;  %6612 = vmatpush.bf16.msra.mxu1 %v13870_v52  ;;  %v16925_v52 = vld [vmem:[#allocation9 + $0x854] sm:$0xf0]  ;;  %v16982_v57 = vld [vmem:[#allocation9 + $0xa24] sm:$0xf] }
 0x476   : > { %v5361_v29 = vadd.f32 %v5360_v37, %v19698_v60  ;;  %v5419_v2 = vadd.f32 %v5418_v49, %v19536_v12  ;;  %v5386_v12 = vpop.f32.mrf.mxu2  ;;  %v5444_v60 = vpop.f32.mrf.mxu3  ;;  %v14046_v49 = vor.u32 %v16977_v48, %v14045_v28  ;;  %v14263_v28 = vld [vmem:[#allocation9 + $0xbb0] sm:$0xf0] }
 0x477   : > { %v19801_v37 = vadd.f32 %v5386_v12, %v5358_v54  ;;  %v19803_v59 = vadd.f32 %v5444_v60, %v5416_v43  ;;  %v21207_v54 = vrot.slane %v19181_v56, 1  ;;  %v13837_v56 = vld [vmem:[#allocation9 + $0x848] sm:$0xf]  ;;  %v14090_v60 = vor.u32 %v16986_v41, %v14087_v32  ;;  %v17026_v41 = vld [vmem:[#allocation9 + $0xb84] sm:$0xf] }
 0x478   : > { %6448 = vmatmul.bf16.gmra.mxu0 %v19797_v0  ;;  %6506 = vmatmul.bf16.gmra.mxu1 %v19673_v15  ;;  %v14266_v58 = vor.u32 %v17030_v22, %v14263_v28  ;;  %v14247_v32 = vld [vmem:[#allocation9 + $0xb90] sm:$0xf0] }
 0x479   : > { %21205 = vst [vmem:[#allocation43_spill] sm:$0xff] %v19801_v37  ;;  %6638 = vmatpush.bf16.msra.mxu3 %v14046_v49  ;;  %v19810_v43 = vsel %vm2047_vm6, %v21207_v54, %v21206_v9  ;;  %6555 = vmatpush.bf16.msrb.mxu0 %v14106_v18  ;;  %v13838_v49 = vor.u32 %v16925_v52, %v13837_v56  ;;  %v13821_v54 = vld [vmem:[#allocation9 + $0x828] sm:$0xf]  ;;  %v5709_v56 = vrot.slane %v19262_v53, 1 }
 0x47a   : > { %6613 = vmatpush.bf16.msra.mxu1 %v13854_v47  ;;  %v14071_v47 = vld [vmem:[#allocation9 + $0xa30] sm:$0xf0]  ;;  %v13997_v37 = vld [vmem:[#allocation9 + $0x988] sm:$0xf]  ;;  %6582 = vmatpush.bf16.msrb.mxu2 %v14266_v58  ;;  %v14250_v52 = vor.u32 %v17026_v41, %v14247_v32  ;;  %v21208_v58 = vrot.slane %v19210_v45, 1 }
 0x47b   : > { %6477 = vmatmul.bf16.gmra.mxu2 %v19810_v43  ;;  %6535 = vmatmul.bf16.gmra.mxu3 %v19686_v31  ;;  %v16961_v41 = vld [vmem:[#allocation9 + $0x974] sm:$0xf0]  ;;  %v17018_v45 = vld [vmem:[#allocation9 + $0xb44] sm:$0xf] }
 0x47d   : > { %v5362_v62 = vpop.f32.mrf.mxu0  ;;  %v5420_v21 = vpop.f32.mrf.mxu1  ;;  %6639 = vmatpush.bf16.msra.mxu3 %v14030_v24  ;;  %6556 = vmatpush.bf16.msrb.mxu0 %v14090_v60  ;;  %v14074_v24 = vor.u32 %v16982_v57, %v14071_v47  ;;  %v19833_v57 = vsel %vm2047_vm6, %v21208_v58, %v5709_v56  ;;  %v17022_v47 = vld [vmem:[#allocation9 + $0xb64] sm:$0xf]  ;;  %v5526_v58 = vld [vmem:[#allocation3 + $0x110] sm:$0x3] }
 0x47e   : > { %v19815_v5 = vadd.f32 %v5362_v62, %v19717_v34  ;;  %v19818_v12 = vadd.f32 %v5420_v21, %v19544_v6  ;;  %v5389_v48 = vpop.f32.mrf.mxu2  ;;  %v5447_v44 = vpop.f32.mrf.mxu3  ;;  %v16969_v34 = vld [vmem:[#allocation9 + $0x9b4] sm:$0xf0]  ;;  %6614 = vmatpush.bf16.msra.mxu1 %v13838_v49  ;;  %v16978_v49 = vld [vmem:[#allocation9 + $0xa04] sm:$0xf]  ;;  %6583 = vmatpush.bf16.msrb.mxu2 %v14250_v52 }
 0x47f   : > { %v19820_v9 = vadd.f32 %v5389_v48, %v5361_v29  ;;  %v19822_v6 = vadd.f32 %v5447_v44, %v5419_v2  ;;  %v14014_v18 = vor.u32 %v16969_v34, %v14013_v42  ;;  %v16921_v62 = vld [vmem:[#allocation9 + $0x834] sm:$0xf0]  ;;  %v5711_v48 = vrot.slane %v19268_v1, 1  ;;  %v14055_v42 = vld [vmem:[#allocation9 + $0xa10] sm:$0xf0] }
 0x480   : > { %v13822_v21 = vor.u32 %v16921_v62, %v13821_v54  ;;  %v16965_v29 = vld [vmem:[#allocation9 + $0x994] sm:$0xf0]  ;;  %v13805_v34 = vld [vmem:[#allocation9 + $0x808] sm:$0xf] }
 0x481   : > { %6640 = vmatpush.bf16.msra.mxu3 %v14014_v18  ;;  %v13998_v22 = vor.u32 %v16965_v29, %v13997_v37  ;;  %6557 = vmatpush.bf16.msrb.mxu0 %v14074_v24  ;;  %v14058_v37 = vor.u32 %v16978_v49, %v14055_v42  ;;  %v16917_v18 = vld [vmem:[#allocation9 + $0x814] sm:$0xf0] }
 0x482   : > { %6615 = vmatpush.bf16.msra.mxu1 %v13822_v21  ;;  %v13806_v62 = vor.u32 %v16917_v18, %v13805_v34  ;;  %v13981_v21 = vld [vmem:[#allocation9 + $0x968] sm:$0xf]  ;;  %v21210_v34 = vrot.slane %v19228_v55, 1 }
 0x483   : > { %v13982_v29 = vor.u32 %v16961_v41, %v13981_v21  ;;  %v17010_v21 = vld [vmem:[#allocation9 + $0xb04] sm:$0xf] }
 0x485   : > { %v5365_v2 = vpop.f32.mrf.mxu0  ;;  %v5423_v28 = vpop.f32.mrf.mxu1  ;;  %6641 = vmatpush.bf16.msra.mxu3 %v13998_v22  ;;  %v14215_v22 = vld [vmem:[#allocation9 + $0xb50] sm:$0xf0]  ;;  %6558 = vmatpush.bf16.msrb.mxu0 %v14058_v37 }
 0x486   : > { %v5366_v44 = vadd.f32 %v5365_v2, %v19732_v36  ;;  %v5424_v60 = vadd.f32 %v5423_v28, %v19552_v20  ;;  %v14231_v36 = vld [vmem:[#allocation9 + $0xb70] sm:$0xf0]  ;;  %v5391_v20 = vpop.f32.mrf.mxu2  ;;  %v5449_v54 = vpop.f32.mrf.mxu3  ;;  %v13965_v2 = vld [vmem:[#allocation9 + $0x948] sm:$0xf]  ;;  %v16957_v28 = vld [vmem:[#allocation9 + $0x954] sm:$0xf0]  ;;  %6616 = vmatpush.bf16.msra.mxu1 %v13806_v62  ;;  %v14218_v49 = vor.u32 %v17018_v45, %v14215_v22  ;;  %v5534_v62 = vpack.c.bf16 %v5526_v58, %v5526_v58 }
 0x487   : > { %v14234_v24 = vor.u32 %v17022_v47, %v14231_v36  ;;  %v19838_v32 = vadd.f32 %v5391_v20, %v19815_v5  ;;  %v19841_v52 = vadd.f32 %v5449_v54, %v19818_v12  ;;  %v13966_v42 = vor.u32 %v16957_v28, %v13965_v2  ;;  %v17014_v36 = vld [vmem:[#allocation9 + $0xb24] sm:$0xf]  ;;  %v14199_v20 = vld [vmem:[#allocation9 + $0xb30] sm:$0xf0]  ;;  %v13949_v54 = vld [vmem:[#allocation9 + $0x928] sm:$0xf] }
 0x488   : > { %6453 = vmatmul.bf16.gmra.mxu0 %v19833_v57  ;;  %6511 = vmatmul.bf16.gmra.mxu1 %v19709_v61  ;;  %v19848_v5 = vsel %vm2047_vm6, %v21210_v34, %v5711_v48  ;;  %v14202_v55 = vor.u32 %v17014_v36, %v14199_v20  ;;  %v14183_v22 = vld [vmem:[#allocation9 + $0xb10] sm:$0xf0]  ;;  %v13933_v2 = vld [vmem:[#allocation9 + $0x908] sm:$0xf]  ;;  %v16949_v28 = vld [vmem:[#allocation9 + $0x914] sm:$0xf0] }
 0x489   : > { %21209 = vst [vmem:[#allocation46_spill] sm:$0xff] %v19838_v32  ;;  %6584 = vmatpush.bf16.msrb.mxu2 %v14234_v24  ;;  %6642 = vmatpush.bf16.msra.mxu3 %v13982_v29  ;;  %v16953_v24 = vld [vmem:[#allocation9 + $0x934] sm:$0xf0]  ;;  %v14186_v58 = vor.u32 %v17010_v21, %v14183_v22 }
 0x48a   : > { %v13950_v29 = vor.u32 %v16953_v24, %v13949_v54 }
 0x48b   : > { %6482 = vmatmul.bf16.gmra.mxu2 %v19848_v5  ;;  %6540 = vmatmul.bf16.gmra.mxu3 %v19724_v17 }
 0x48d   : > { %v5367_v12 = vpop.f32.mrf.mxu0  ;;  %v5425_v18 = vpop.f32.mrf.mxu1  ;;  %6585 = vmatpush.bf16.msrb.mxu2 %v14218_v49  ;;  %6643 = vmatpush.bf16.msra.mxu3 %v13966_v42  ;;  %v13934_v49 = vor.u32 %v16949_v28, %v13933_v2 }
 0x48e   : > { %v5368_v37 = vadd.f32 %v5367_v12, %v19745_v38  ;;  %v5426_v47 = vadd.f32 %v5425_v18, %v19560_v7  ;;  %v5394_v41 = vpop.f32.mrf.mxu2  ;;  %v5452_v45 = vpop.f32.mrf.mxu3  ;;  %v5527_v7 = vld [vmem:[#allocation3 + $0x118] sm:$0x3]  ;;  %v5717_v12 = vrot.slane %v5534_v62, 1 }
 0x48f   : > { %v19854_v34 = vadd.f32 %v5394_v41, %v5366_v44  ;;  %v19856_v38 = vadd.f32 %v5452_v45, %v5424_v60  ;;  %v5535_v42 = vpack.c.bf16 %v5527_v7, %v5527_v7  ;;  %v14173_v7 = vld [vmem:[#allocation9 + $0xae8] sm:$0xf] }
 0x490   : > { %v19863_v44 = vsel %vm2047_vm6, %v5709_v56, %v5717_v12  ;;  %v16943_v12 = vld [vmem:[#allocation9 + $0x8ec] sm:$0xf] }
 0x491   : > { %21211 = vst [vmem:[#allocation47_spill] sm:$0xff] %v19854_v34  ;;  %6586 = vmatpush.bf16.msrb.mxu2 %v14202_v55  ;;  %6644 = vmatpush.bf16.msra.mxu3 %v13950_v29  ;;  %v5719_v55 = vrot.slane %v5535_v42, 1  ;;  %v13919_v42 = vld [vmem:[#allocation9 + $0x8f8] sm:$0xf0] }
 0x493   : > { %v19874_v53 = vsel %vm2047_vm6, %v5711_v48, %v5719_v55 }
 0x495   : > { %v5370_v18 = vpop.f32.mrf.mxu0  ;;  %v5428_v36 = vpop.f32.mrf.mxu1  ;;  %6587 = vmatpush.bf16.msrb.mxu2 %v14186_v58  ;;  %6645 = vmatpush.bf16.msra.mxu3 %v13934_v49 }
 0x496   : > { %v5371_v20 = vadd.f32 %v5370_v18, %v19758_v51  ;;  %v5429_v54 = vadd.f32 %v5428_v36, %v19568_v25  ;;  %v5396_v60 = vpop.f32.mrf.mxu2  ;;  %v5454_v62 = vpop.f32.mrf.mxu3  ;;  %v13922_v18 = vor.u32 %v16943_v12, %v13919_v42 }
 0x497   : > { %v19867_v24 = vadd.f32 %v5396_v60, %v5368_v37  ;;  %v19869_v21 = vadd.f32 %v5454_v62, %v5426_v47  ;;  %v17005_v60 = vld [vmem:[#allocation9 + $0xad4] sm:$0xf0]  ;;  %v16939_v62 = vld [vmem:[#allocation9 + $0x8cc] sm:$0xf] }
 0x498   : > { %6458 = vmatmul.bf16.gmra.mxu0 %v19863_v44  ;;  %6516 = vmatmul.bf16.gmra.mxu1 %v19739_v4 }
 0x499   : > { %21212 = vst [vmem:[#allocation49_spill] sm:$0xff] %v19867_v24  ;;  %6725 = vmatpush.bf16.msrb.mxu1 %v13922_v18 }
 0x49b   : > { %6487 = vmatmul.bf16.gmra.mxu2 %v19874_v53  ;;  %6545 = vmatmul.bf16.gmra.mxu3 %v19750_v13 }
 0x49d   : > { %v5372_v25 = vpop.f32.mrf.mxu0  ;;  %v5430_v51 = vpop.f32.mrf.mxu1 }
 0x49e   : > { %v5373_v56 = vadd.f32 %v5372_v25, %v19773_v33  ;;  %v5431_v41 = vadd.f32 %v5430_v51, %v19576_v46  ;;  %v5399_v45 = vpop.f32.mrf.mxu2  ;;  %v5457_v37 = vpop.f32.mrf.mxu3  ;;  %v17009_v33 = vld [vmem:[#allocation9 + $0xaf4] sm:$0xf0]  ;;  %v13903_v25 = vld [vmem:[#allocation9 + $0x8d8] sm:$0xf0]  ;;  %v14301_v51 = vld [vmem:[#allocation9 + $0xbe8] sm:$0xf] }
 0x49f   : > { %v19880_v29 = vadd.f32 %v5399_v45, %v5371_v20  ;;  %v19882_v47 = vadd.f32 %v5457_v37, %v5429_v54  ;;  %v14174_v49 = vor.u32 %v17009_v33, %v14173_v7  ;;  %v14157_v54 = vld [vmem:[#allocation9 + $0xac8] sm:$0xf]  ;;  %v13906_v37 = vor.u32 %v16939_v62, %v13903_v25  ;;  %v16935_v7 = vld [vmem:[#allocation9 + $0x8ac] sm:$0xf]  ;;  %v16997_v62 = vld [vmem:[#allocation9 + $0xa94] sm:$0xf0] }
 0x4a0   : > { %v14158_v55 = vor.u32 %v17005_v60, %v14157_v54  ;;  %v14125_v60 = vld [vmem:[#allocation9 + $0xa88] sm:$0xf]  ;;  %v16931_v25 = vld [vmem:[#allocation9 + $0x88c] sm:$0xf] }
 0x4a1   : > { %21213 = vst [vmem:[#allocation53_spill] sm:$0xff] %v19880_v29  ;;  %6667 = vmatpush.bf16.msra.mxu0 %v14174_v49  ;;  %v13887_v49 = vld [vmem:[#allocation9 + $0x8b8] sm:$0xf0]  ;;  %6726 = vmatpush.bf16.msrb.mxu1 %v13906_v37 }
 0x4a2   : > { %v13890_v42 = vor.u32 %v16935_v7, %v13887_v49  ;;  %v16993_v49 = vld [vmem:[#allocation9 + $0xa74] sm:$0xf0] }
 0x4a5   : > { %v5471_v1 = vpop.f32.mrf.mxu0  ;;  %v6386_v22 = vpop.f32.mrf.mxu1  ;;  %6668 = vmatpush.bf16.msra.mxu0 %v14158_v55  ;;  %6727 = vmatpush.bf16.msrb.mxu1 %v13890_v42  ;;  %v16927_v42 = vld [vmem:[#allocation9 + $0x86c] sm:$0xf] }
 0x4a6   : > { %v5472_v48 = vadd.f32 %v5471_v1, %v19786_v16  ;;  %v5401_v2 = vpop.f32.mrf.mxu2  ;;  %v5459_v28 = vpop.f32.mrf.mxu3 }
 0x4a7   : > { %v19887_v46 = vadd.f32 %v5401_v2, %v5373_v56  ;;  %v19889_v58 = vadd.f32 %v5459_v28, %v5431_v41  ;;  %v17041_v56 = vld [vmem:[#allocation9 + $0xbf4] sm:$0xf0]  ;;  %v14141_v2 = vld [vmem:[#allocation9 + $0xaa8] sm:$0xf] }
 0x4a8   : > { %6559 = vmatmul.bf16.vlgmr.msrb.gmra.mxu0 %v19766_v14  ;;  %6617 = vmatmul.bf16.vlgmr.msra.gmra.mxu1 %v19642_v35  ;;  %v14302_v1 = vor.u32 %v17041_v56, %v14301_v51  ;;  %v17001_v28 = vld [vmem:[#allocation9 + $0xab4] sm:$0xf0]  ;;  %v13871_v51 = vld [vmem:[#allocation9 + $0x898] sm:$0xf0] }
 0x4a9   : > { %21214 = vst [vmem:[#allocation54_spill] sm:$0xff] %v19887_v46  ;;  %v17037_v56 = vld [vmem:[#allocation9 + $0xbd4] sm:$0xf0]  ;;  %v14031_v46 = vld [vmem:[#allocation9 + $0x9d8] sm:$0xf0] }
 0x4aa   : > { %6696 = vmatpush.bf16.msra.mxu2 %v14302_v1  ;;  %v16975_v1 = vld [vmem:[#allocation9 + $0x9ec] sm:$0xf] }
 0x4ab   : > { %6588 = vmatmul.bf16.vlgmr.msrb.gmra.mxu2 %v19778_v30  ;;  %6646 = vmatmul.bf16.vlgmr.msra.gmra.mxu3 %v19654_v40 }
 0x4ad   : > { %v5473_v36 = vpop.f32.mrf.mxu0  ;;  %v6388_v16 = vpop.f32.mrf.mxu1 }
 0x4ae   : > { %v5474_v20 = vadd.f32 %v5473_v36, %v19803_v59  ;;  %v5500_v41 = vpop.f32.mrf.mxu2  ;;  %v6415_v45 = vpop.f32.mrf.mxu3  ;;  %v14142_v59 = vor.u32 %v17001_v28, %v14141_v2  ;;  %v14047_v2 = vld [vmem:[#allocation9 + $0x9f8] sm:$0xf0]  ;;  %v14109_v28 = vld [vmem:[#allocation9 + $0xa68] sm:$0xf] }
 0x4af   : > { %v19894_v33 = vadd.f32 %v5500_v41, %v5472_v48  ;;  %v19896_v12 = vadd.f32 %v6415_v45, %v6386_v22  ;;  %v14126_v48 = vor.u32 %v16997_v62, %v14125_v60  ;;  %v14285_v22 = vld [vmem:[#allocation9 + $0xbc8] sm:$0xf]  ;;  %v13874_v45 = vor.u32 %v16931_v25, %v13871_v51 }
 0x4b0   : > { %6669 = vmatpush.bf16.msra.mxu0 %v14142_v59  ;;  %v14286_v37 = vor.u32 %v17037_v56, %v14285_v22  ;;  %v14050_v59 = vor.u32 %v16975_v1, %v14047_v2  ;;  %v14110_v60 = vor.u32 %v16993_v49, %v14109_v28  ;;  %v16923_v56 = vld [vmem:[#allocation9 + $0x84c] sm:$0xf]  ;;  %v14077_v49 = vld [vmem:[#allocation9 + $0xa28] sm:$0xf] }
 0x4b1   : > { %21215 = vst [vmem:[#allocation55_spill] sm:$0xff] %v19894_v33  ;;  %6728 = vmatpush.bf16.msrb.mxu1 %v13874_v45  ;;  %v16971_v33 = vld [vmem:[#allocation9 + $0x9cc] sm:$0xf]  ;;  %v14269_v45 = vld [vmem:[#allocation9 + $0xba8] sm:$0xf] }
 0x4b2   : > { %6697 = vmatpush.bf16.msra.mxu2 %v14286_v37  ;;  %6754 = vmatpush.bf16.msrb.mxu3 %v14050_v59  ;;  %v14034_v25 = vor.u32 %v16971_v33, %v14031_v46  ;;  %v17033_v37 = vld [vmem:[#allocation9 + $0xbb4] sm:$0xf0]  ;;  %v16967_v28 = vld [vmem:[#allocation9 + $0x9ac] sm:$0xf]  ;;  %v14015_v59 = vld [vmem:[#allocation9 + $0x9b8] sm:$0xf0] }
 0x4b3   : > { %v14270_v2 = vor.u32 %v17033_v37, %v14269_v45 }
 0x4b4   : > { %6670 = vmatpush.bf16.msra.mxu0 %v14126_v48  ;;  %v16989_v48 = vld [vmem:[#allocation9 + $0xa54] sm:$0xf0] }
 0x4b5   : > { %v5476_v18 = vpop.f32.mrf.mxu0  ;;  %v19898_v36 = vpop.f32.mrf.mxu1 }
 0x4b6   : > { %v5477_v54 = vadd.f32 %v5476_v18, %v19822_v6  ;;  %v5502_v55 = vpop.f32.mrf.mxu2  ;;  %v6417_v41 = vpop.f32.mrf.mxu3  ;;  %v13855_v18 = vld [vmem:[#allocation9 + $0x878] sm:$0xf0]  ;;  %6755 = vmatpush.bf16.msrb.mxu3 %v14034_v25  ;;  %6698 = vmatpush.bf16.msra.mxu2 %v14270_v2  ;;  %v17025_v2 = vld [vmem:[#allocation9 + $0xb74] sm:$0xf0] }
 0x4b7   : > { %v19903_v6 = vadd.f32 %v5502_v55, %v5474_v20  ;;  %v19905_v7 = vadd.f32 %v6417_v41, %v6388_v16  ;;  %v13858_v62 = vor.u32 %v16927_v42, %v13855_v18  ;;  %v14093_v20 = vld [vmem:[#allocation9 + $0xa48] sm:$0xf]  ;;  %v13839_v41 = vld [vmem:[#allocation9 + $0x858] sm:$0xf0]  ;;  %v16985_v18 = vld [vmem:[#allocation9 + $0xa34] sm:$0xf0] }
 0x4b8   : > { %6564 = vmatmul.bf16.gmra.mxu0 %v19797_v0  ;;  %6622 = vmatmul.bf16.gmra.mxu1 %v19673_v15  ;;  %v14094_v55 = vor.u32 %v16989_v48, %v14093_v20  ;;  %v13842_v1 = vor.u32 %v16923_v56, %v13839_v41  ;;  %v14078_v25 = vor.u32 %v16985_v18, %v14077_v49  ;;  %v14253_v20 = vld [vmem:[#allocation9 + $0xb88] sm:$0xf]  ;;  %v17029_v48 = vld [vmem:[#allocation9 + $0xb94] sm:$0xf0]  ;;  %v13999_v41 = vld [vmem:[#allocation9 + $0x998] sm:$0xf0] }
 0x4b9   : > { %21216 = vst [vmem:[#allocation56_spill] sm:$0xff] %v19903_v6  ;;  %6671 = vmatpush.bf16.msra.mxu0 %v14110_v60  ;;  %6729 = vmatpush.bf16.msrb.mxu1 %v13858_v62  ;;  %v16919_v60 = vld [vmem:[#allocation9 + $0x82c] sm:$0xf]  ;;  %v13823_v62 = vld [vmem:[#allocation9 + $0x838] sm:$0xf0]  ;;  %v14254_v56 = vor.u32 %v17029_v48, %v14253_v20 }
 0x4ba   : > { %v16963_v6 = vld [vmem:[#allocation9 + $0x98c] sm:$0xf]  ;;  %v14237_v49 = vld [vmem:[#allocation9 + $0xb68] sm:$0xf]  ;;  %v17021_v48 = vld [vmem:[#allocation9 + $0xb54] sm:$0xf0] }
 0x4bb   : > { %6593 = vmatmul.bf16.gmra.mxu2 %v19810_v43  ;;  %6651 = vmatmul.bf16.gmra.mxu3 %v19686_v31  ;;  %v14002_v45 = vor.u32 %v16963_v6, %v13999_v41  ;;  %v13967_v41 = vld [vmem:[#allocation9 + $0x958] sm:$0xf0] }
 0x4bc   : > { %6699 = vmatpush.bf16.msra.mxu2 %v14254_v56  ;;  %v16955_v56 = vld [vmem:[#allocation9 + $0x94c] sm:$0xf] }
 0x4bd   : > { %v5478_v51 = vpop.f32.mrf.mxu0  ;;  %v19907_v22 = vpop.f32.mrf.mxu1  ;;  %6672 = vmatpush.bf16.msra.mxu0 %v14094_v55  ;;  %6730 = vmatpush.bf16.msrb.mxu1 %v13842_v1  ;;  %v16981_v55 = vld [vmem:[#allocation9 + $0xa14] sm:$0xf0]  ;;  %v16915_v1 = vld [vmem:[#allocation9 + $0x80c] sm:$0xf] }
 0x4be   : > { %v5479_v16 = vadd.f32 %v5478_v51, %v19841_v52  ;;  %v5505_v46 = vpop.f32.mrf.mxu2  ;;  %v19912_v33 = vpop.f32.mrf.mxu3  ;;  %v14018_v52 = vor.u32 %v16967_v28, %v14015_v59  ;;  %v13826_v51 = vor.u32 %v16919_v60, %v13823_v62  ;;  %v13807_v59 = vld [vmem:[#allocation9 + $0x818] sm:$0xf0]  ;;  %v16959_v60 = vld [vmem:[#allocation9 + $0x96c] sm:$0xf] }
 0x4bf   : > { %v19914_v42 = vadd.f32 %v5505_v46, %v5477_v54  ;;  %v14061_v46 = vld [vmem:[#allocation9 + $0xa08] sm:$0xf]  ;;  %v13810_v18 = vor.u32 %v16915_v1, %v13807_v59  ;;  %v13983_v62 = vld [vmem:[#allocation9 + $0x978] sm:$0xf0]  ;;  %v17017_v59 = vld [vmem:[#allocation9 + $0xb34] sm:$0xf0] }
 0x4c0   : > { %6756 = vmatpush.bf16.msrb.mxu3 %v14018_v52  ;;  %v14062_v28 = vor.u32 %v16981_v55, %v14061_v46  ;;  %v13986_v20 = vor.u32 %v16959_v60, %v13983_v62  ;;  %v14205_v1 = vld [vmem:[#allocation9 + $0xb28] sm:$0xf]  ;;  %v17013_v62 = vld [vmem:[#allocation9 + $0xb14] sm:$0xf0] }
 0x4c1   : > { %21217 = vst [vmem:[#allocation57_spill] sm:$0xff] %v19914_v42  ;;  %6673 = vmatpush.bf16.msra.mxu0 %v14078_v25  ;;  %6731 = vmatpush.bf16.msrb.mxu1 %v13826_v51  ;;  %v14221_v25 = vld [vmem:[#allocation9 + $0xb48] sm:$0xf]  ;;  %v17035_v42 = vld [vmem:[#allocation9 + $0xbcc] sm:$0xf] }
 0x4c4   : > { %6757 = vmatpush.bf16.msrb.mxu3 %v14002_v45  ;;  %v14222_v45 = vor.u32 %v17021_v48, %v14221_v25  ;;  %v16947_v25 = vld [vmem:[#allocation9 + $0x90c] sm:$0xf] }
 0x4c5   : > { %v5481_v37 = vpop.f32.mrf.mxu0  ;;  %v19916_v29 = vpop.f32.mrf.mxu1  ;;  %6674 = vmatpush.bf16.msra.mxu0 %v14062_v28  ;;  %6732 = vmatpush.bf16.msrb.mxu1 %v13810_v18  ;;  %v14206_v28 = vor.u32 %v17017_v59, %v14205_v1 }
 0x4c6   : > { %v5482_v54 = vadd.f32 %v5481_v37, %v19856_v38  ;;  %v5507_v6 = vpop.f32.mrf.mxu2  ;;  %v19921_v52 = vpop.f32.mrf.mxu3  ;;  %v14238_v38 = vor.u32 %v17025_v2, %v14237_v49  ;;  %v13970_v37 = vor.u32 %v16955_v56, %v13967_v41  ;;  %v16951_v49 = vld [vmem:[#allocation9 + $0x92c] sm:$0xf]  ;;  %v13951_v2 = vld [vmem:[#allocation9 + $0x938] sm:$0xf0] }
 0x4c7   : > { %v19923_v51 = vadd.f32 %v5507_v6, %v5479_v16  ;;  %v14189_v6 = vld [vmem:[#allocation9 + $0xb08] sm:$0xf]  ;;  %v13954_v60 = vor.u32 %v16951_v49, %v13951_v2 }
 0x4c8   : > { %6569 = vmatmul.bf16.gmra.mxu0 %v19833_v57  ;;  %6627 = vmatmul.bf16.gmra.mxu1 %v19709_v61 }
 0x4c9   : > { %21218 = vst [vmem:[#allocation58_spill] sm:$0xff] %v19923_v51  ;;  %6700 = vmatpush.bf16.msra.mxu2 %v14238_v38  ;;  %6758 = vmatpush.bf16.msrb.mxu3 %v13986_v20  ;;  %v13935_v20 = vld [vmem:[#allocation9 + $0x918] sm:$0xf0]  ;;  %v19968_v51 = vld [vmem:[#allocation15] sm:$0xf] }
 0x4ca   : > { %v13938_v56 = vor.u32 %v16947_v25, %v13935_v20  ;;  %v17007_v20 = vld [vmem:[#allocation9 + $0xaec] sm:$0xf] }
 0x4cb   : > { %6598 = vmatmul.bf16.gmra.mxu2 %v19848_v5  ;;  %6656 = vmatmul.bf16.gmra.mxu3 %v19724_v17 }
 0x4cd   : > { %v5483_v46 = vpop.f32.mrf.mxu0  ;;  %v19925_v55 = vpop.f32.mrf.mxu1  ;;  %6701 = vmatpush.bf16.msra.mxu2 %v14222_v45  ;;  %6759 = vmatpush.bf16.msrb.mxu3 %v13970_v37 }
 0x4ce   : > { %v5484_v16 = vadd.f32 %v5483_v46, %v19869_v21  ;;  %v5510_v18 = vpop.f32.mrf.mxu2  ;;  %v19930_v38 = vpop.f32.mrf.mxu3  ;;  %v14190_v21 = vor.u32 %v17013_v62, %v14189_v6 }
 0x4cf   : > { %v19932_v48 = vadd.f32 %v5510_v18, %v5482_v54 }
 0x4d1   : > { %21219 = vst [vmem:[#allocation59_spill] sm:$0xff] %v19932_v48  ;;  %6702 = vmatpush.bf16.msra.mxu2 %v14206_v28  ;;  %6760 = vmatpush.bf16.msrb.mxu3 %v13954_v60 }
 0x4d5   : > { %v5486_v41 = vpop.f32.mrf.mxu0  ;;  %v19934_v46 = vpop.f32.mrf.mxu1  ;;  %6703 = vmatpush.bf16.msra.mxu2 %v14190_v21  ;;  %6761 = vmatpush.bf16.msrb.mxu3 %v13938_v56  ;;  %v14175_v21 = vld [vmem:[#allocation9 + $0xaf8] sm:$0xf0] }
 0x4d6   : > { %v5487_v45 = vadd.f32 %v5486_v41, %v19882_v47  ;;  %v5512_v37 = vpop.f32.mrf.mxu2  ;;  %v19939_v1 = vpop.f32.mrf.mxu3 }
 0x4d7   : > { %v19941_v54 = vadd.f32 %v5512_v37, %v5484_v16  ;;  %v14159_v37 = vld [vmem:[#allocation9 + $0xad8] sm:$0xf0] }
 0x4d8   : > { %6574 = vmatmul.bf16.gmra.mxu0 %v19863_v44  ;;  %6632 = vmatmul.bf16.gmra.mxu1 %v19739_v4 }
 0x4d9   : > { %21220 = vst [vmem:[#allocation60_spill] sm:$0xff] %v19941_v54 }
 0x4db   : > { %6603 = vmatmul.bf16.gmra.mxu2 %v19874_v53  ;;  %6661 = vmatmul.bf16.gmra.mxu3 %v19750_v13 }
 0x4dd   : > { %v5488_v59 = vpop.f32.mrf.mxu0  ;;  %v19943_v49 = vpop.f32.mrf.mxu1 }
 0x4de   : > { %v5489_v47 = vadd.f32 %v5488_v59, %v19889_v58  ;;  %v5515_v28 = vpop.f32.mrf.mxu2  ;;  %v19948_v2 = vpop.f32.mrf.mxu3  ;;  %v14178_v58 = vor.u32 %v17007_v20, %v14175_v21  ;;  %v17039_v59 = vld [vmem:[#allocation9 + $0xbec] sm:$0xf] }
 0x4df   : > { %v19950_v6 = vadd.f32 %v5515_v28, %v5487_v45  ;;  %v14303_v28 = vld [vmem:[#allocation9 + $0xbf8] sm:$0xf0] }
 0x4e0   : > { %6783 = vmatpush.bf16.msrb.mxu0 %v14178_v58 }
 0x4e1   : > { %21221 = vst [vmem:[#allocation61_spill] sm:$0xff] %v19950_v6  ;;  %v14143_v6 = vld [vmem:[#allocation9 + $0xab8] sm:$0xf0] }
 0x4e5   : > { %v6444_v18 = vpop.f32.mrf.mxu0  ;;  %v6502_v60 = vpop.f32.mrf.mxu1 }
 0x4e6   : > { %v6445_v62 = vadd.f32 %v6444_v18, %v19896_v12  ;;  %v5517_v16 = vpop.f32.mrf.mxu2  ;;  %v19955_v25 = vpop.f32.mrf.mxu3  ;;  %v17003_v12 = vld [vmem:[#allocation9 + $0xacc] sm:$0xf] }
 0x4e7   : > { %v19957_v56 = vadd.f32 %v5517_v16, %v5489_v47  ;;  %v16999_v18 = vld [vmem:[#allocation9 + $0xaac] sm:$0xf]  ;;  %v14306_v47 = vor.u32 %v17039_v59, %v14303_v28 }
 0x4e8   : > { %6675 = vmatmul.bf16.vlgmr.msra.gmra.mxu0 %v19766_v14  ;;  %6733 = vmatmul.bf16.vlgmr.msrb.gmra.mxu1 %v19642_v35  ;;  %v14162_v35 = vor.u32 %v17003_v12, %v14159_v37  ;;  %v14146_v21 = vor.u32 %v16999_v18, %v14143_v6  ;;  %v16995_v12 = vld [vmem:[#allocation9 + $0xa8c] sm:$0xf]  ;;  %v14127_v37 = vld [vmem:[#allocation9 + $0xa98] sm:$0xf0] }
 0x4e9   : > { %21222 = vst [vmem:[#allocation62_spill] sm:$0xff] %v19957_v56  ;;  %6812 = vmatpush.bf16.msrb.mxu2 %v14306_v47  ;;  %v14130_v59 = vor.u32 %v16995_v12, %v14127_v37  ;;  %v6421_v12 = vadd.f32 %v19912_v33, %v19898_v36  ;;  %v6423_v33 = vadd.f32 %v19921_v52, %v19907_v22  ;;  %v17019_v52 = vld [vmem:[#allocation9 + $0xb4c] sm:$0xf] }
 0x4ea   : > { %6784 = vmatpush.bf16.msrb.mxu0 %v14162_v35  ;;  %v14111_v35 = vld [vmem:[#allocation9 + $0xa78] sm:$0xf0] }
 0x4eb   : > { %6704 = vmatmul.bf16.vlgmr.msra.gmra.mxu2 %v19778_v30  ;;  %6762 = vmatmul.bf16.vlgmr.msrb.gmra.mxu3 %v19654_v40 }
 0x4ed   : > { %v6446_v41 = vpop.f32.mrf.mxu0  ;;  %v19959_v45 = vpop.f32.mrf.mxu1 }
 0x4ee   : > { %v6473_v54 = vpop.f32.mrf.mxu2  ;;  %v6531_v48 = vpop.f32.mrf.mxu3  ;;  %6785 = vmatpush.bf16.msrb.mxu0 %v14146_v21  ;;  %v6447_v24 = vadd.f32 %v6446_v41, %v19905_v7 }
 0x4ef   : > { %v6474_v16 = vadd.f32 %v6473_v54, %v6445_v62  ;;  %v19963_v20 = vadd.f32 %v6531_v48, %v6502_v60  ;;  %v14287_v54 = vld [vmem:[#allocation9 + $0xbd8] sm:$0xf0]  ;;  %v19972_v48 = vperm.slane %v19968_v51, 0  ;;  %v16991_v62 = vld [vmem:[#allocation9 + $0xa6c] sm:$0xf] }
 0x4f0   : > { %v14290_v60 = vor.u32 %v17035_v42, %v14287_v54  ;;  %v14114_v18 = vor.u32 %v16991_v62, %v14111_v35  ;;  %v14095_v42 = vld [vmem:[#allocation9 + $0xa58] sm:$0xf0]  ;;  %v17027_v35 = vld [vmem:[#allocation9 + $0xb8c] sm:$0xf] }
 0x4f1   : > { %v6841_v58 = vadd.f32 %v6474_v16, %v19584_v8 }
 0x4f2   : > { %6786 = vmatpush.bf16.msrb.mxu0 %v14130_v59  ;;  %6813 = vmatpush.bf16.msrb.mxu2 %v14290_v60  ;;  %v16983_v59 = vld [vmem:[#allocation9 + $0xa2c] sm:$0xf] }
 0x4f3   : > { %v6883_v41 = vadd.f32 %v19972_v48, %v6841_v58  ;;  %v14079_v58 = vld [vmem:[#allocation9 + $0xa38] sm:$0xf0] }
 0x4f5   : > { %v6449_v56 = vpop.f32.mrf.mxu0  ;;  %v19966_v40 = vpop.f32.mrf.mxu1  ;;  %v6915_v54 = vmax.f32 %v6883_v41, 0.0 }
 0x4f6   : > { %v6475_v8 = vpop.f32.mrf.mxu2  ;;  %v19976_v6 = vpop.f32.mrf.mxu3  ;;  %6787 = vmatpush.bf16.msrb.mxu0 %v14114_v18  ;;  %v14082_v18 = vor.u32 %v16983_v59, %v14079_v58 }
 0x4f7   : > { %v6476_v28 = vadd.f32 %v6475_v8, %v6447_v24  ;;  %v17031_v24 = vld [vmem:[#allocation9 + $0xbac] sm:$0xf] }
 0x4f8   : > { %6680 = vmatmul.bf16.gmra.mxu0 %v19797_v0  ;;  %6738 = vmatmul.bf16.gmra.mxu1 %v19673_v15  ;;  %v16987_v15 = vld [vmem:[#allocation9 + $0xa4c] sm:$0xf] }
 0x4f9   : > { %v6845_v7 = vadd.f32 %v6476_v28, %v19592_v10  ;;  %v14098_v37 = vor.u32 %v16987_v15, %v14095_v42  ;;  %v14271_v10 = vld [vmem:[#allocation9 + $0xbb8] sm:$0xf0]  ;;  %v16979_v42 = vld [vmem:[#allocation9 + $0xa0c] sm:$0xf] }
 0x4fa   : > { %v14274_v62 = vor.u32 %v17031_v24, %v14271_v10  ;;  %v14255_v28 = vld [vmem:[#allocation9 + $0xb98] sm:$0xf0]  ;;  %v17023_v10 = vld [vmem:[#allocation9 + $0xb6c] sm:$0xf] }
 0x4fb   : > { %v6887_v21 = vadd.f32 %v19972_v48, %v6845_v7  ;;  %6709 = vmatmul.bf16.gmra.mxu2 %v19810_v43  ;;  %6767 = vmatmul.bf16.gmra.mxu3 %v19686_v31  ;;  %v6450_v31 = vadd.f32 %v6449_v56, %v6421_v12  ;;  %v14258_v34 = vor.u32 %v17027_v35, %v14255_v28  ;;  %v14063_v24 = vld [vmem:[#allocation9 + $0xa18] sm:$0xf0] }
 0x4fc   : > { %6788 = vmatpush.bf16.msrb.mxu0 %v14098_v37  ;;  %6814 = vmatpush.bf16.msrb.mxu2 %v14274_v62  ;;  %v14066_v12 = vor.u32 %v16979_v42, %v14063_v24  ;;  %v14239_v37 = vld [vmem:[#allocation9 + $0xb78] sm:$0xf0] }
 0x4fd   : > { %v6451_v47 = vpop.f32.mrf.mxu0  ;;  %v19980_v16 = vpop.f32.mrf.mxu1  ;;  %v6919_v7 = vmax.f32 %v6887_v21, 0.0  ;;  %v14242_v22 = vor.u32 %v17023_v10, %v14239_v37  ;;  %v14191_v42 = vld [vmem:[#allocation9 + $0xb18] sm:$0xf0]  ;;  %v6428_v37 = vadd.f32 %v19939_v1, %v19925_v55 }
 0x4fe   : > { %v6478_v8 = vpop.f32.mrf.mxu2  ;;  %v19987_v60 = vpop.f32.mrf.mxu3  ;;  %v6452_v21 = vadd.f32 %v6451_v47, %v6423_v33  ;;  %v17011_v33 = vld [vmem:[#allocation9 + $0xb0c] sm:$0xf] }
 0x4ff   : > { %v19989_v32 = vpack.c.bf16 %v6919_v7, %v6915_v54  ;;  %v6479_v36 = vadd.f32 %v6478_v8, %v6450_v31  ;;  %v14223_v54 = vld [vmem:[#allocation9 + $0xb58] sm:$0xf0]  ;;  %v6426_v31 = vadd.f32 %v19930_v38, %v19916_v29 }
 0x500   : > { %6789 = vmatpush.bf16.msrb.mxu0 %v14082_v18  ;;  %6815 = vmatpush.bf16.msrb.mxu2 %v14258_v34  ;;  %v14226_v34 = vor.u32 %v17019_v52, %v14223_v54  ;;  %v14207_v7 = vld [vmem:[#allocation9 + $0xb38] sm:$0xf0] }
 0x501   : > { %v6849_v56 = vadd.f32 %v6479_v36, %v19600_v39 }
 0x503   : > { %v6891_v47 = vadd.f32 %v19972_v48, %v6849_v56 }
 0x504   : > { %6790 = vmatpush.bf16.msrb.mxu0 %v14066_v12  ;;  %6816 = vmatpush.bf16.msrb.mxu2 %v14242_v22  ;;  %v14194_v12 = vor.u32 %v17011_v33, %v14191_v42 }
 0x505   : > { %v6454_v15 = vpop.f32.mrf.mxu0  ;;  %v19993_v41 = vpop.f32.mrf.mxu1  ;;  %v6923_v18 = vmax.f32 %v6891_v47, 0.0 }
 0x506   : > { %v6480_v59 = vpop.f32.mrf.mxu2  ;;  %v19998_v58 = vpop.f32.mrf.mxu3 }
 0x507   : > { %v6481_v8 = vadd.f32 %v6480_v59, %v6452_v21  ;;  %v6455_v21 = vadd.f32 %v6454_v15, %v6426_v31  ;;  %v6433_v31 = vadd.f32 %v19955_v25, %v19943_v49 }
 0x508   : > { %6685 = vmatmul.bf16.gmra.mxu0 %v19833_v57  ;;  %6743 = vmatmul.bf16.gmra.mxu1 %v19709_v61  ;;  %v17015_v61 = vld [vmem:[#allocation9 + $0xb2c] sm:$0xf] }
 0x509   : > { %v6853_v39 = vadd.f32 %v6481_v8, %v19608_v19  ;;  %6817 = vmatpush.bf16.msrb.mxu2 %v14226_v34  ;;  %v14210_v36 = vor.u32 %v17015_v61, %v14207_v7 }
 0x50b   : > { %v6895_v28 = vadd.f32 %v19972_v48, %v6853_v39  ;;  %6714 = vmatmul.bf16.gmra.mxu2 %v19848_v5  ;;  %6772 = vmatmul.bf16.gmra.mxu3 %v19724_v17 }
 0x50d   : > { %v6456_v62 = vpop.f32.mrf.mxu0  ;;  %v20002_v35 = vpop.f32.mrf.mxu1  ;;  %v6927_v19 = vmax.f32 %v6895_v28, 0.0  ;;  %6818 = vmatpush.bf16.msrb.mxu2 %v14210_v36 }
 0x50e   : > { %v6483_v24 = vpop.f32.mrf.mxu2  ;;  %v20009_v10 = vpop.f32.mrf.mxu3  ;;  %v6457_v29 = vadd.f32 %v6456_v62, %v6428_v37 }
 0x50f   : > { %v20011_v56 = vpack.c.bf16 %v6927_v19, %v6923_v18  ;;  %v6484_v17 = vadd.f32 %v6483_v24, %v6455_v21 }
 0x511   : > { %6819 = vmatpush.bf16.msrb.mxu2 %v14194_v12  ;;  %v6857_v38 = vadd.f32 %v6484_v17, %v19616_v26  ;;  %v6431_v26 = vadd.f32 %v19948_v2, %v19934_v46 }
 0x513   : > { %v6899_v8 = vadd.f32 %v19972_v48, %v6857_v38 }
 0x515   : > { %v6459_v59 = vpop.f32.mrf.mxu0  ;;  %v20015_v22 = vpop.f32.mrf.mxu1 }
 0x516   : > { %v6485_v15 = vpop.f32.mrf.mxu2  ;;  %v20020_v52 = vpop.f32.mrf.mxu3  ;;  %v6460_v61 = vadd.f32 %v6459_v59, %v6431_v26 }
 0x517   : > { %v6486_v54 = vadd.f32 %v6485_v15, %v6457_v29 }
 0x518   : > { %6690 = vmatmul.bf16.gmra.mxu0 %v19863_v44  ;;  %6748 = vmatmul.bf16.gmra.mxu1 %v19739_v4  ;;  %v6931_v4 = vmax.f32 %v6899_v8, 0.0 }
 0x519   : > { %v6861_v34 = vadd.f32 %v6486_v54, %v19624_v23 }
 0x51b   : > { %v6903_v47 = vadd.f32 %v19972_v48, %v6861_v34  ;;  %6719 = vmatmul.bf16.gmra.mxu2 %v19874_v53  ;;  %6777 = vmatmul.bf16.gmra.mxu3 %v19750_v13 }
 0x51d   : > { %v6461_v55 = vpop.f32.mrf.mxu0  ;;  %v20024_v1 = vpop.f32.mrf.mxu1  ;;  %v6935_v39 = vmax.f32 %v6903_v47, 0.0  ;;  %v21223_v47 = vld [vmem:[#allocation44_spill] sm:$0xff] }
 0x51e   : > { %v6488_v62 = vpop.f32.mrf.mxu2  ;;  %v20031_v28 = vpop.f32.mrf.mxu3  ;;  %v6462_v42 = vadd.f32 %v6461_v55, %v6433_v31 }
 0x51f   : > { %v6955_v7 = vpack.c.bf16 %v6935_v39, %v6931_v4  ;;  %v6489_v23 = vadd.f32 %v6488_v62, %v6460_v61 }
 0x521   : > { %v6865_v13 = vadd.f32 %v6489_v23, %v19632_v3 }
 0x523   : > { %v6907_v24 = vadd.f32 %v19972_v48, %v6865_v13 }
 0x525   : > { %v6560_v18 = vpop.f32.mrf.mxu0  ;;  %v6618_v36 = vpop.f32.mrf.mxu1  ;;  %v6939_v25 = vmax.f32 %v6907_v24, 0.0 }
 0x526   : > { %v6561_v33 = vadd.f32 %v6560_v18, %v19963_v20  ;;  %v6490_v46 = vpop.f32.mrf.mxu2  ;;  %v20038_v2 = vpop.f32.mrf.mxu3 }
 0x527   : > { %v6491_v19 = vadd.f32 %v6490_v46, %v6462_v42 }
 0x528   : > { %6791 = vmatmul.bf16.vlgmr.msrb.gmra.mxu0 %v19766_v14 }
 0x529   : > { %v6869_v21 = vadd.f32 %v6491_v19, %v19647_v27  ;;  %v6534_v27 = vadd.f32 %v19976_v6, %v19959_v45 }
 0x52b   : > { %v6911_v49 = vadd.f32 %v19972_v48, %v6869_v21  ;;  %6820 = vmatmul.bf16.vlgmr.msrb.gmra.mxu2 %v19778_v30  ;;  %v20054_v30 = vperm.slane %v19968_v51, 1 }
 0x52d   : > { %v6562_v12 = vpop.f32.mrf.mxu0  ;;  %v20042_v17 = vpop.f32.mrf.mxu1  ;;  %v6943_v20 = vmax.f32 %v6911_v49, 0.0 }
 0x52e   : > { %v6589_v3 = vpop.f32.mrf.mxu2  ;;  %v6647_v37 = vpop.f32.mrf.mxu3  ;;  %v6563_v48 = vadd.f32 %v6562_v12, %v6534_v27 }
 0x52f   : > { %v6590_v14 = vadd.f32 %v6589_v3, %v6561_v33  ;;  %v20046_v59 = vadd.f32 %v6647_v37, %v6618_v36  ;;  %v6959_v29 = vpack.c.bf16 %v6943_v20, %v6939_v25  ;;  %v6539_v33 = vadd.f32 %v19998_v58, %v19980_v16 }
 0x531   : > { %v6842_v38 = vadd.f32 %v6590_v14, %v19660_v50  ;;  %6987 = vmatpush.bf16.msra.mxu1 %v6959_v29 }
 0x533   : > { %v6884_v50 = vadd.f32 %v20054_v30, %v6842_v38 }
 0x535   : > { %v6565_v15 = vpop.f32.mrf.mxu0  ;;  %v20051_v54 = vpop.f32.mrf.mxu1  ;;  %6988 = vmatpush.bf16.msra.mxu1 %v6955_v7  ;;  %v6916_v39 = vmax.f32 %v6884_v50, 0.0 }
 0x536   : > { %v6591_v8 = vpop.f32.mrf.mxu2  ;;  %v20057_v34 = vpop.f32.mrf.mxu3 }
 0x537   : > { %v6592_v55 = vadd.f32 %v6591_v8, %v6563_v48  ;;  %v21225_v48 = vld [vmem:[#allocation50_spill] sm:$0xff] }
 0x538   : > { %6796 = vmatmul.bf16.gmra.mxu0 %v19797_v0  ;;  %v6537_v0 = vadd.f32 %v19987_v60, %v19966_v40 }
 0x539   : > { %v6846_v26 = vadd.f32 %v6592_v55, %v21223_v47  ;;  %6989 = vmatpush.bf16.msra.mxu1 %v20011_v56 }
 0x53a   : > { %v6566_v31 = vadd.f32 %v6565_v15, %v6537_v0 }
 0x53b   : > { %v6888_v4 = vadd.f32 %v20054_v30, %v6846_v26  ;;  %6825 = vmatmul.bf16.gmra.mxu2 %v19810_v43 }
 0x53d   : > { %v6567_v45 = vpop.f32.mrf.mxu0  ;;  %v20062_v6 = vpop.f32.mrf.mxu1  ;;  %6990 = vmatpush.bf16.msra.mxu1 %v19989_v32  ;;  %v6920_v62 = vmax.f32 %v6888_v4, 0.0 }
 0x53e   : > { %v6594_v61 = vpop.f32.mrf.mxu2  ;;  %v20069_v23 = vpop.f32.mrf.mxu3  ;;  %v6568_v42 = vadd.f32 %v6567_v45, %v6539_v33 }
 0x53f   : > { %v20071_v18 = vpack.c.bf16 %v6920_v62, %v6916_v39  ;;  %v6595_v36 = vadd.f32 %v6594_v61, %v6566_v31  ;;  %v6549_v39 = vadd.f32 %v20038_v2, %v20024_v1  ;;  %v20126_v1 = vld [vmem:[#allocation20 + $0x8] sm:$0xff] }
 0x541   : > { %7084 = vmatpush.bf16.msrb.mxu1 %v6959_v29  ;;  %v6850_v40 = vadd.f32 %v6595_v36, %v19696_v63  ;;  %v6542_v63 = vadd.f32 %v20009_v10, %v19993_v41 }
 0x543   : > { %v6892_v24 = vadd.f32 %v20054_v30, %v6850_v40  ;;  %v21227_v40 = vld [vmem:[#allocation52_spill] sm:$0xff] }
 0x545   : > { %7085 = vmatpush.bf16.msrb.mxu1 %v6955_v7  ;;  %v6570_v43 = vpop.f32.mrf.mxu0  ;;  %v20075_v13 = vpop.f32.mrf.mxu1  ;;  %v21224_v7 = vld [vmem:[#allocation48_spill] sm:$0xff] }
 0x546   : > { %v6596_v60 = vpop.f32.mrf.mxu2  ;;  %v20079_v46 = vpop.f32.mrf.mxu3 }
 0x547   : > { %v6597_v19 = vadd.f32 %v6596_v60, %v6568_v42 }
 0x548   : > { %6801 = vmatmul.bf16.gmra.mxu0 %v19833_v57  ;;  %v6924_v57 = vmax.f32 %v6892_v24, 0.0 }
 0x549   : > { %7086 = vmatpush.bf16.msrb.mxu1 %v20011_v56  ;;  %v6854_v21 = vadd.f32 %v6597_v19, %v21224_v7  ;;  %v6571_v56 = vadd.f32 %v6570_v43, %v6542_v63 }
 0x54b   : > { %v6896_v58 = vadd.f32 %v20054_v30, %v6854_v21  ;;  %6830 = vmatmul.bf16.gmra.mxu2 %v19848_v5 }
 0x54d   : > { %7087 = vmatpush.bf16.msrb.mxu1 %v19989_v32  ;;  %v6572_v16 = vpop.f32.mrf.mxu0  ;;  %v6928_v12 = vmax.f32 %v6896_v58, 0.0  ;;  %v20091_v20 = vpop.f32.mrf.mxu1  ;;  %v6544_v32 = vadd.f32 %v20020_v52, %v20002_v35  ;;  %v20107_v35 = vld [vmem:[#allocation20] sm:$0xff] }
 0x54e   : > { %v6599_v49 = vpop.f32.mrf.mxu2  ;;  %v20089_v25 = vpop.f32.mrf.mxu3  ;;  %14315 = vmatmul.msk.bf16.vlgmr.msra.gmra.mxu1 %vm792_vm2, %v20107_v35 }
 0x54f   : > { %v20093_v3 = vpack.c.bf16 %v6928_v12, %v6924_v57  ;;  %v6600_v37 = vadd.f32 %v6599_v49, %v6571_v56  ;;  %v6573_v29 = vadd.f32 %v6572_v16, %v6544_v32  ;;  %v21228_v12 = vld [vmem:[#allocation45_spill] sm:$0xff]  ;;  %v20136_v32 = vperm.slane %v19968_v51, 2 }
 0x551   : > { %v6858_v5 = vadd.f32 %v6600_v37, %v19730_v11  ;;  %v6547_v11 = vadd.f32 %v20031_v28, %v20015_v22  ;;  %v21226_v28 = vld [vmem:[#allocation51_spill] sm:$0xff] }
 0x553   : > { %v6900_v15 = vadd.f32 %v20054_v30, %v6858_v5 }
 0x555   : > { %v6575_v14 = vpop.f32.mrf.mxu0  ;;  %v20101_v27 = vpop.f32.mrf.mxu1 }
 0x556   : > { %v6601_v41 = vpop.f32.mrf.mxu2  ;;  %v20099_v10 = vpop.f32.mrf.mxu3  ;;  %v6576_v45 = vadd.f32 %v6575_v14, %v6547_v11 }
 0x557   : > { %v6602_v38 = vadd.f32 %v6601_v41, %v6573_v29  ;;  %v21229_v41 = vld [vmem:[#allocation43_spill] sm:$0xff] }
 0x558   : > { %6806 = vmatmul.bf16.gmra.mxu0 %v19863_v44  ;;  %v6932_v44 = vmax.f32 %v6900_v15, 0.0 }
 0x559   : > { %v6862_v8 = vadd.f32 %v6602_v38, %v21225_v48 }
 0x55b   : > { %v6904_v50 = vadd.f32 %v20054_v30, %v6862_v8  ;;  %6835 = vmatmul.bf16.gmra.mxu2 %v19874_v53  ;;  %v20142_v8 = vld [vmem:[#allocation20 + $0x10] sm:$0xff] }
 0x55d   : > { %v6577_v55 = vpop.f32.mrf.mxu0  ;;  %v6936_v52 = vmax.f32 %v6904_v50, 0.0  ;;  %v20117_v53 = vpop.f32.mrf.mxu1 }
 0x55e   : > { %v6604_v47 = vpop.f32.mrf.mxu2  ;;  %v20111_v26 = vpop.f32.mrf.mxu3  ;;  %v6578_v22 = vadd.f32 %v6577_v55, %v6549_v39  ;;  %14316 = vmatmul.msk.bf16.gmra.mxu1 %vm792_vm2, %v20126_v1 }
 0x55f   : > { %v6956_v4 = vpack.c.bf16 %v6936_v52, %v6932_v44  ;;  %v6605_v0 = vadd.f32 %v6604_v47, %v6576_v45 }
 0x561   : > { %v6866_v31 = vadd.f32 %v6605_v0, %v21226_v28 }
 0x563   : > { %v6908_v42 = vadd.f32 %v20054_v30, %v6866_v31  ;;  %v20163_v31 = vld [vmem:[#allocation20 + $0x18] sm:$0xff] }
 0x565   : > { %v6676_v62 = vpop.f32.mrf.mxu0  ;;  %v6734_v2 = vpop.f32.mrf.mxu1  ;;  %v6940_v7 = vmax.f32 %v6908_v42, 0.0  ;;  %v6660_v42 = vadd.f32 %v20099_v10, %v20091_v20 }
 0x566   : > { %v6677_v61 = vadd.f32 %v6676_v62, %v20046_v59  ;;  %v6606_v36 = vpop.f32.mrf.mxu2  ;;  %v20121_v33 = vpop.f32.mrf.mxu3 }
 0x567   : > { %v6607_v43 = vadd.f32 %v6606_v36, %v6578_v22 }
 0x569   : > { %v6870_v60 = vadd.f32 %v6607_v43, %v21227_v40 }
 0x56b   : > { %v6912_v24 = vadd.f32 %v20054_v30, %v6870_v60  ;;  %v6650_v30 = vadd.f32 %v20057_v34, %v20042_v17  ;;  %v6653_v17 = vadd.f32 %v20069_v23, %v20051_v54  ;;  %v6655_v54 = vadd.f32 %v20079_v46, %v20062_v6 }
 0x56c   : > { %v6658_v6 = vadd.f32 %v20089_v25, %v20075_v13  ;;  %v21231_v25 = vld [vmem:[#allocation47_spill] sm:$0xff] }
 0x56d   : > { %v6678_v19 = vpop.f32.mrf.mxu0  ;;  %v6944_v21 = vmax.f32 %v6912_v24, 0.0  ;;  %v6736_v24 = vpop.f32.mrf.mxu1 }
 0x56e   : > { %v6705_v59 = vpop.f32.mrf.mxu2  ;;  %v6763_v16 = vpop.f32.mrf.mxu3  ;;  %v6679_v37 = vadd.f32 %v6678_v19, %v6650_v30  ;;  %14331 = vmatmul.msk.bf16.vlgmr.msrb.gmra.mxu1 %vm792_vm2, %v20142_v8 }
 0x56f   : > { %v6706_v58 = vadd.f32 %v6705_v59, %v6677_v61  ;;  %v20130_v63 = vadd.f32 %v6763_v16, %v6734_v2  ;;  %v6960_v57 = vpack.c.bf16 %v6944_v21, %v6940_v7  ;;  %v21230_v61 = vld [vmem:[#allocation46_spill] sm:$0xff]  ;;  %v21232_v21 = vld [vmem:[#allocation49_spill] sm:$0xff] }
 0x571   : > { %v6843_v49 = vadd.f32 %v6706_v58, %v21228_v12  ;;  %7006 = vmatpush.bf16.msra.mxu3 %v6960_v57 }
 0x573   : > { %v6885_v5 = vadd.f32 %v20136_v32, %v6843_v49 }
 0x575   : > { %v6681_v56 = vpop.f32.mrf.mxu0  ;;  %7007 = vmatpush.bf16.msra.mxu3 %v6956_v4  ;;  %v6917_v34 = vmax.f32 %v6885_v5, 0.0 }
 0x576   : > { %v6707_v14 = vpop.f32.mrf.mxu2  ;;  %v6682_v11 = vadd.f32 %v6681_v56, %v6653_v17  ;;  %v6739_v56 = vpop.f32.mrf.mxu1 }
 0x577   : > { %v6708_v29 = vadd.f32 %v6707_v14, %v6679_v37  ;;  %v6665_v14 = vadd.f32 %v20121_v33, %v20117_v53  ;;  %v6765_v5 = vpop.f32.mrf.mxu3 }
 0x579   : > { %v6847_v38 = vadd.f32 %v6708_v29, %v21229_v41  ;;  %7008 = vmatpush.bf16.msra.mxu3 %v20093_v3 }
 0x57b   : > { %v6889_v48 = vadd.f32 %v20136_v32, %v6847_v38 }
 0x57d   : > { %v6683_v15 = vpop.f32.mrf.mxu0  ;;  %7009 = vmatpush.bf16.msra.mxu3 %v20071_v18  ;;  %v6921_v55 = vmax.f32 %v6889_v48, 0.0 }
 0x57e   : > { %v6710_v50 = vpop.f32.mrf.mxu2  ;;  %v6684_v47 = vadd.f32 %v6683_v15, %v6655_v54  ;;  %14332 = vmatmul.msk.bf16.gmra.mxu1 %vm792_vm2, %v20163_v31  ;;  %v21233_v15 = vld [vmem:[#allocation53_spill] sm:$0xff] }
 0x57f   : > { %v20149_v44 = vpack.c.bf16 %v6921_v55, %v6917_v34  ;;  %v6711_v52 = vadd.f32 %v6710_v50, %v6682_v11  ;;  %v21234_v34 = vld [vmem:[#allocation54_spill] sm:$0xff]  ;;  %v6741_v50 = vpop.f32.mrf.mxu1  ;;  %v6768_v53 = vpop.f32.mrf.mxu3 }
 0x580   : > { %14317 = vmatmul.msk.bf16.vlgmr.msra.gmra.mxu3 %vm792_vm2, %v20107_v35 }
 0x581   : > { %7103 = vmatpush.bf16.msrb.mxu3 %v6960_v57  ;;  %v6851_v45 = vadd.f32 %v6711_v52, %v19820_v9  ;;  %v6663_v57 = vadd.f32 %v20111_v26, %v20101_v27 }
 0x583   : > { %v6893_v62 = vadd.f32 %v20136_v32, %v6851_v45 }
 0x585   : > { %7104 = vmatpush.bf16.msrb.mxu3 %v6956_v4  ;;  %v6686_v23 = vpop.f32.mrf.mxu0  ;;  %v6925_v46 = vmax.f32 %v6893_v62, 0.0 }
 0x586   : > { %v6712_v0 = vpop.f32.mrf.mxu2  ;;  %v6687_v43 = vadd.f32 %v6686_v23, %v6658_v6 }
 0x587   : > { %v6713_v39 = vadd.f32 %v6712_v0, %v6684_v47  ;;  %v6770_v6 = vpop.f32.mrf.mxu3 }
 0x589   : > { %7105 = vmatpush.bf16.msrb.mxu3 %v20093_v3  ;;  %v6855_v22 = vadd.f32 %v6713_v39, %v21230_v61  ;;  %v6766_v39 = vadd.f32 %v6765_v5, %v6736_v24  ;;  %v6744_v61 = vpop.f32.mrf.mxu1 }
 0x58b   : > { %v6897_v4 = vadd.f32 %v20136_v32, %v6855_v22 }
 0x58d   : > { %7106 = vmatpush.bf16.msrb.mxu3 %v20071_v18  ;;  %v6688_v28 = vpop.f32.mrf.mxu0  ;;  %v6929_v9 = vmax.f32 %v6897_v4, 0.0 }
 0x58e   : > { %v6715_v36 = vpop.f32.mrf.mxu2  ;;  %v6689_v13 = vadd.f32 %v6688_v28, %v6660_v42  ;;  %v20192_v28 = vperm.slane %v19968_v51, 3  ;;  %v6769_v42 = vadd.f32 %v6768_v53, %v6739_v56 }
 0x58f   : > { %v20167_v3 = vpack.c.bf16 %v6929_v9, %v6925_v46  ;;  %v6716_v18 = vadd.f32 %v6715_v36, %v6687_v43  ;;  %v21236_v9 = vld [vmem:[#allocation56_spill] sm:$0xff] }
 0x590   : > { %14318 = vmatmul.msk.bf16.gmra.mxu3 %vm792_vm2, %v20126_v1 }
 0x591   : > { %v6859_v60 = vadd.f32 %v6716_v18, %v21231_v25  ;;  %v6746_v25 = vpop.f32.mrf.mxu1 }
 0x593   : > { %v6901_v7 = vadd.f32 %v20136_v32, %v6859_v60 }
 0x595   : > { %v6691_v40 = vpop.f32.mrf.mxu0  ;;  %v6933_v12 = vmax.f32 %v6901_v7, 0.0  ;;  %v6771_v7 = vadd.f32 %v6770_v6, %v6741_v50 }
 0x596   : > { %v6717_v19 = vpop.f32.mrf.mxu2  ;;  %v6692_v10 = vadd.f32 %v6691_v40, %v6663_v57 }
 0x597   : > { %v6718_v2 = vadd.f32 %v6717_v19, %v6689_v13 }
 0x599   : > { %v6863_v59 = vadd.f32 %v6718_v2, %v21232_v21  ;;  %v6773_v2 = vpop.f32.mrf.mxu3 }
 0x59b   : > { %v6905_v58 = vadd.f32 %v20136_v32, %v6863_v59 }
 0x59d   : > { %v6693_v16 = vpop.f32.mrf.mxu0  ;;  %v6937_v49 = vmax.f32 %v6905_v58, 0.0 }
 0x59e   : > { %v6720_v20 = vpop.f32.mrf.mxu2  ;;  %v6694_v38 = vadd.f32 %v6693_v16, %v6665_v14  ;;  %v21237_v16 = vld [vmem:[#allocation57_spill] sm:$0xff] }
 0x59f   : > { %v6957_v30 = vpack.c.bf16 %v6937_v49, %v6933_v12  ;;  %v6721_v37 = vadd.f32 %v6720_v20, %v6692_v10  ;;  %v6749_v49 = vpop.f32.mrf.mxu1  ;;  %v21238_v10 = vld [vmem:[#allocation58_spill] sm:$0xff] }
 0x5a0   : > { %14333 = vmatmul.msk.bf16.vlgmr.msrb.gmra.mxu3 %vm792_vm2, %v20142_v8 }
 0x5a1   : > { %v6867_v27 = vadd.f32 %v6721_v37, %v21233_v15  ;;  %v6775_v14 = vpop.f32.mrf.mxu3 }
 0x5a3   : > { %v6909_v17 = vadd.f32 %v20136_v32, %v6867_v27 }
 0x5a5   : > { %v6792_v29 = vpop.f32.mrf.mxu0  ;;  %v6941_v54 = vmax.f32 %v6909_v17, 0.0 }
 0x5a6   : > { %v6793_v41 = vadd.f32 %v6792_v29, %v20130_v63  ;;  %v6722_v26 = vpop.f32.mrf.mxu2  ;;  %v21235_v63 = vld [vmem:[#allocation55_spill] sm:$0xff] }
 0x5a7   : > { %v6723_v48 = vadd.f32 %v6722_v26, %v6694_v38  ;;  %v6751_v26 = vpop.f32.mrf.mxu1 }
 0x5a9   : > { %v6871_v55 = vadd.f32 %v6723_v48, %v21234_v34  ;;  %v6776_v48 = vadd.f32 %v6775_v14, %v6746_v25  ;;  %v21239_v34 = vld [vmem:[#allocation59_spill] sm:$0xff]  ;;  %v17059_v25 = vld [vmem:[#allocation21 + $0x64] sm:$0xf0] }
 0x5ab   : > { %v6913_v52 = vadd.f32 %v20136_v32, %v6871_v55  ;;  %v6778_v55 = vpop.f32.mrf.mxu3 }
 0x5ad   : > { %v6794_v11 = vpop.f32.mrf.mxu0  ;;  %v6945_v23 = vmax.f32 %v6913_v52, 0.0 }
 0x5ae   : > { %v6821_v33 = vpop.f32.mrf.mxu2  ;;  %v6795_v22 = vadd.f32 %v6794_v11, %v6766_v39 }
 0x5af   : > { %v6822_v47 = vadd.f32 %v6821_v33, %v6793_v41  ;;  %v6961_v45 = vpack.c.bf16 %v6945_v23, %v6941_v54  ;;  %v21240_v23 = vld [vmem:[#allocation60_spill] sm:$0xff] }
 0x5b0   : > { %14334 = vmatmul.msk.bf16.gmra.mxu3 %vm792_vm2, %v20163_v31 }
 0x5b1   : > { %v6844_v0 = vadd.f32 %v6822_v47, %v21235_v63  ;;  %7025 = vmatpush.bf16.msra.mxu0 %v6961_v45  ;;  %17528 = vmatpush.bf16.msra.mxu2 %v6961_v45 }
 0x5b3   : > { %v6886_v46 = vadd.f32 %v20192_v28, %v6844_v0 }
 0x5b5   : > { %v6797_v62 = vpop.f32.mrf.mxu0  ;;  %7026 = vmatpush.bf16.msra.mxu0 %v6957_v30  ;;  %17529 = vmatpush.bf16.msra.mxu2 %v6957_v30  ;;  %v6918_v40 = vmax.f32 %v6886_v46, 0.0 }
 0x5b6   : > { %v6823_v32 = vpop.f32.mrf.mxu2  ;;  %v6798_v60 = vadd.f32 %v6797_v62, %v6769_v42  ;;  %v21241_v42 = vld [vmem:[#allocation61_spill] sm:$0xff] }
 0x5b7   : > { %v6824_v4 = vadd.f32 %v6823_v32, %v6795_v22  ;;  %v6780_v22 = vpop.f32.mrf.mxu3 }
 0x5b8   : > { %v6781_v6 = vadd.f32 %v6780_v22, %v6751_v26  ;;  %v17075_v26 = vld [vmem:[#allocation21 + $0xe4] sm:$0xf0]  ;;  %v14429_v22 = vld [vmem:[#allocation21 + $0xb0] sm:$0xf] }
 0x5b9   : > { %v6848_v36 = vadd.f32 %v6824_v4, %v21236_v9  ;;  %7027 = vmatpush.bf16.msra.mxu0 %v20167_v3  ;;  %17530 = vmatpush.bf16.msra.mxu2 %v20167_v3  ;;  %v14397_v9 = vld [vmem:[#allocation21 + $0x70] sm:$0xf] }
 0x5bb   : > { %v6890_v18 = vadd.f32 %v20192_v28, %v6848_v36  ;;  %v17061_v36 = vld [vmem:[#allocation21 + $0x74] sm:$0xf0] }
 0x5bd   : > { %v6799_v43 = vpop.f32.mrf.mxu0  ;;  %7028 = vmatpush.bf16.msra.mxu0 %v20149_v44  ;;  %17531 = vmatpush.bf16.msra.mxu2 %v20149_v44  ;;  %v6922_v51 = vmax.f32 %v6890_v18, 0.0 }
 0x5be   : > { %v6826_v13 = vpop.f32.mrf.mxu2  ;;  %v6800_v59 = vadd.f32 %v6799_v43, %v6771_v7  ;;  %v14398_v43 = vor.u32 %v17061_v36, %v14397_v9  ;;  %v21242_v7 = vld [vmem:[#allocation62_spill] sm:$0xff] }
 0x5bf   : > { %v20201_v19 = vpack.c.bf16 %v6922_v51, %v6918_v40  ;;  %v6827_v24 = vadd.f32 %v6826_v13, %v6798_v60  ;;  %v14389_v13 = vld [vmem:[#allocation21 + $0x60] sm:$0xf] }
 0x5c0   : > { %14319 = vmatmul.msk.bf16.vlgmr.msra.gmra.mxu0 %vm792_vm2, %v20107_v35  ;;  %14320 = vmatmul.msk.bf16.vlgmr.msra.gmra.mxu2 %vm792_vm2, %v20126_v1 }
 0x5c1   : > { %7122 = vmatpush.bf16.msrb.mxu0 %v6961_v45  ;;  %v6852_v58 = vadd.f32 %v6827_v24, %v21237_v16  ;;  %v6779_v45 = vadd.f32 %v6778_v55, %v6749_v49  ;;  %7564 = vmatpush.bf16.msra.mxu1 %v14398_v43  ;;  %v14390_v24 = vor.u32 %v17059_v25, %v14389_v13  ;;  %v17073_v55 = vld [vmem:[#allocation21 + $0xd4] sm:$0xf0]  ;;  %v17067_v13 = vld [vmem:[#allocation21 + $0xa4] sm:$0xf0]  ;;  %v14391_v25 = vld [vmem:[#allocation21 + $0x68] sm:$0xf0] }
 0x5c3   : > { %v6894_v20 = vadd.f32 %v20192_v28, %v6852_v58  ;;  %v14381_v58 = vld [vmem:[#allocation21 + $0x50] sm:$0xf] }
 0x5c5   : > { %7123 = vmatpush.bf16.msrb.mxu0 %v6957_v30  ;;  %v6802_v21 = vpop.f32.mrf.mxu0  ;;  %v6774_v30 = vadd.f32 %v6773_v2, %v6744_v61  ;;  %v6926_v29 = vmax.f32 %v6894_v20, 0.0  ;;  %7565 = vmatpush.bf16.msra.mxu1 %v14390_v24  ;;  %v17055_v20 = vld [vmem:[#allocation21 + $0x44] sm:$0xf0]  ;;  %v17065_v24 = vld [vmem:[#allocation21 + $0x94] sm:$0xf0] }
 0x5c6   : > { %v6828_v57 = vpop.f32.mrf.mxu2 }
 0x5c7   : > { %v6829_v12 = vadd.f32 %v6828_v57, %v6800_v59  ;;  %v6803_v15 = vadd.f32 %v6802_v21, %v6774_v30  ;;  %v17057_v57 = vld [vmem:[#allocation21 + $0x54] sm:$0xf0]  ;;  %v14461_v30 = vld [vmem:[#allocation21 + $0xf0] sm:$0xf] }
 0x5c8   : > { %v14382_v49 = vor.u32 %v17057_v57, %v14381_v58  ;;  %v14405_v58 = vld [vmem:[#allocation21 + $0x80] sm:$0xf] }
 0x5c9   : > { %7124 = vmatpush.bf16.msrb.mxu0 %v20167_v3  ;;  %v6856_v56 = vadd.f32 %v6829_v12, %v21238_v10  ;;  %v14373_v12 = vld [vmem:[#allocation21 + $0x40] sm:$0xf] }
 0x5ca   : > { %7566 = vmatpush.bf16.msra.mxu1 %v14382_v49  ;;  %v17054_v49 = vld [vmem:[#allocation21 + $0x44] sm:$0xf] }
 0x5cb   : > { %v6898_v37 = vadd.f32 %v20192_v28, %v6856_v56  ;;  %v20221_v47 = vpop.f32.mrf.mxu1 }
 0x5cd   : > { %7125 = vmatpush.bf16.msrb.mxu0 %v20149_v44  ;;  %v6930_v5 = vmax.f32 %v6898_v37, 0.0  ;;  %v6804_v41 = vpop.f32.mrf.mxu0  ;;  %v14374_v37 = vor.u32 %v17055_v20, %v14373_v12  ;;  %v17063_v12 = vld [vmem:[#allocation21 + $0x84] sm:$0xf0]  ;;  %v14375_v20 = vld [vmem:[#allocation21 + $0x48] sm:$0xf0] }
 0x5ce   : > { %v6831_v38 = vpop.f32.mrf.mxu2  ;;  %v6805_v17 = vadd.f32 %v6804_v41, %v6776_v48  ;;  %v14357_v48 = vld [vmem:[#allocation21 + $0x20] sm:$0xf] }
 0x5cf   : > { %v20213_v27 = vpack.c.bf16 %v6930_v5, %v6926_v29  ;;  %v6832_v3 = vadd.f32 %v6831_v38, %v6803_v15  ;;  %v17077_v29 = vld [vmem:[#allocation21 + $0xf4] sm:$0xf0]  ;;  %7567 = vmatpush.bf16.msra.mxu1 %v14374_v37  ;;  %v14453_v15 = vld [vmem:[#allocation21 + $0xe0] sm:$0xf]  ;;  %v14463_v37 = vld [vmem:[#allocation21 + $0xf8] sm:$0xf0] }
 0x5d0   : > { %14335 = vmatmul.msk.bf16.vlgmr.msrb.gmra.mxu0 %vm792_vm2, %v20142_v8  ;;  %v14462_v5 = vor.u32 %v17077_v29, %v14461_v30  ;;  %v17053_v38 = vld [vmem:[#allocation21 + $0x34] sm:$0xf0] }
 0x5d1   : > { %v6860_v44 = vadd.f32 %v6832_v3, %v21239_v34  ;;  %v14454_v34 = vor.u32 %v17075_v26, %v14453_v15  ;;  %v17074_v15 = vld [vmem:[#allocation21 + $0xe4] sm:$0xf] }
 0x5d2   : > { %7583 = vmatpush.bf16.msra.mxu3 %v14462_v5 }
 0x5d3   : > { %v6902_v54 = vadd.f32 %v20192_v28, %v6860_v44  ;;  %v20227_v46 = vpop.f32.mrf.mxu1  ;;  %v14445_v44 = vld [vmem:[#allocation21 + $0xd0] sm:$0xf] }
 0x5d5   : > { %v6807_v52 = vpop.f32.mrf.mxu0  ;;  %v6934_v63 = vmax.f32 %v6902_v54, 0.0  ;;  %v14349_v54 = vld [vmem:[#allocation21 + $0x10] sm:$0xf] }
 0x5d6   : > { %v6833_v50 = vpop.f32.mrf.mxu2  ;;  %v6808_v62 = vadd.f32 %v6807_v52, %v6779_v45  ;;  %7584 = vmatpush.bf16.msra.mxu3 %v14454_v34  ;;  %v17071_v45 = vld [vmem:[#allocation21 + $0xc4] sm:$0xf0]  ;;  %v14447_v34 = vld [vmem:[#allocation21 + $0xd8] sm:$0xf0] }
 0x5d7   : > { %v6834_v11 = vadd.f32 %v6833_v50, %v6805_v17  ;;  %v17051_v17 = vld [vmem:[#allocation21 + $0x24] sm:$0xf0] }
 0x5d8   : > { %v14358_v50 = vor.u32 %v17051_v17, %v14357_v48  ;;  %v17072_v17 = vld [vmem:[#allocation21 + $0xd4] sm:$0xf] }
 0x5d9   : > { %v6864_v53 = vadd.f32 %v6834_v11, %v21240_v23  ;;  %v14446_v11 = vor.u32 %v17073_v55, %v14445_v44  ;;  %v17049_v23 = vld [vmem:[#allocation21 + $0x14] sm:$0xf0]  ;;  %v17050_v55 = vld [vmem:[#allocation21 + $0x24] sm:$0xf] }
 0x5db   : > { %v6906_v33 = vadd.f32 %v20192_v28, %v6864_v53  ;;  %v20233_v16 = vpop.f32.mrf.mxu1  ;;  %7585 = vmatpush.bf16.msra.mxu3 %v14446_v11  ;;  %v14437_v53 = vld [vmem:[#allocation21 + $0xc0] sm:$0xf]  ;;  %v14450_v11 = vor.u32 %v17072_v17, %v14447_v34  ;;  %v17119_v34 = vld [vmem:[#allocation21 + $0x244] sm:$0xf0] }
 0x5dc   : > { %v14629_v17 = vld [vmem:[#allocation21 + $0x240] sm:$0xf] }
 0x5dd   : > { %v6938_v0 = vmax.f32 %v6906_v33, 0.0  ;;  %v6809_v4 = vpop.f32.mrf.mxu0  ;;  %v14350_v33 = vor.u32 %v17049_v23, %v14349_v54  ;;  %v17093_v54 = vld [vmem:[#allocation21 + $0x174] sm:$0xf0]  ;;  %v17048_v23 = vld [vmem:[#allocation21 + $0x14] sm:$0xf] }
 0x5de   : > { %v6836_v39 = vpop.f32.mrf.mxu2  ;;  %v6810_v18 = vadd.f32 %v6809_v4, %v6781_v6 }
 0x5df   : > { %v20223_v61 = vpack.c.bf16 %v6938_v0, %v6934_v63  ;;  %v6837_v32 = vadd.f32 %v6836_v39, %v6808_v62  ;;  %v14341_v63 = vld [vmem:[#allocation21] sm:$0xf]  ;;  %v17047_v0 = vld [vmem:[#allocation21 + $0x4] sm:$0xf0]  ;;  %v14438_v39 = vor.u32 %v17071_v45, %v14437_v53  ;;  %v17070_v45 = vld [vmem:[#allocation21 + $0xc4] sm:$0xf] }
 0x5e0   : > { %14336 = vmatmul.msk.bf16.gmra.mxu0 %vm792_vm2, %v20163_v31  ;;  %v14342_v62 = vor.u32 %v17047_v0, %v14341_v63  ;;  %v14439_v63 = vld [vmem:[#allocation21 + $0xc8] sm:$0xf0] }
 0x5e1   : > { %v6868_v40 = vadd.f32 %v6837_v32, %v21241_v42  ;;  %7586 = vmatpush.bf16.msra.mxu3 %v14438_v39  ;;  %v17069_v32 = vld [vmem:[#allocation21 + $0xb4] sm:$0xf0]  ;;  %v14399_v42 = vld [vmem:[#allocation21 + $0x78] sm:$0xf0]  ;;  %v14442_v39 = vor.u32 %v17070_v45, %v14439_v63 }
 0x5e2   : > { %v14430_v4 = vor.u32 %v17069_v32, %v14429_v22  ;;  %v17091_v22 = vld [vmem:[#allocation21 + $0x164] sm:$0xf0]  ;;  %v17046_v32 = vld [vmem:[#allocation21 + $0x4] sm:$0xf] }
 0x5e3   : > { %v6910_v2 = vadd.f32 %v20192_v28, %v6868_v40  ;;  %v20235_v41 = vpop.f32.mrf.mxu1  ;;  %v14421_v40 = vld [vmem:[#allocation21 + $0xa0] sm:$0xf] }
 0x5e5   : > { %v6942_v10 = vmax.f32 %v6910_v2, 0.0  ;;  %7587 = vmatpush.bf16.msra.mxu3 %v14430_v4 }
 0x5e6   : > { %v6838_v51 = vpop.f32.mrf.mxu2 }
 0x5e7   : > { %v6839_v60 = vadd.f32 %v6838_v51, %v6810_v18  ;;  %v17060_v18 = vld [vmem:[#allocation21 + $0x74] sm:$0xf] }
 0x5e8   : > { %v14402_v51 = vor.u32 %v17060_v18, %v14399_v42 }
 0x5e9   : > { %v6872_v21 = vadd.f32 %v6839_v60, %v21242_v7 }
 0x5eb   : > { %v6914_v59 = vadd.f32 %v20192_v28, %v6872_v21  ;;  %v14365_v28 = vld [vmem:[#allocation21 + $0x30] sm:$0xf]  ;;  %v7089_v52 = vpop.f32.mrf.mxu1 }
 0x5ec   : > { %v14366_v3 = vor.u32 %v17053_v38, %v14365_v28  ;;  %v7156_v6 = vmax.f32 %v20221_v47, %v7089_v52  ;;  %v14413_v47 = vld [vmem:[#allocation21 + $0x90] sm:$0xf]  ;;  %v17052_v28 = vld [vmem:[#allocation21 + $0x34] sm:$0xf]  ;;  %v14367_v38 = vld [vmem:[#allocation21 + $0x38] sm:$0xf0] }
 0x5ed   : > { %v6946_v56 = vmax.f32 %v6914_v59, 0.0  ;;  %v17056_v59 = vld [vmem:[#allocation21 + $0x54] sm:$0xf]  ;;  %v14370_v26 = vor.u32 %v17052_v28, %v14367_v38 }
 0x5ee   : > { %7568 = vmatpush.bf16.msra.mxu1 %v14366_v3 }
 0x5ef   : > { %v6962_v14 = vpack.c.bf16 %v6946_v56, %v6942_v10  ;;  %v14406_v10 = vor.u32 %v17063_v12, %v14405_v58  ;;  %v17076_v56 = vld [vmem:[#allocation21 + $0xf4] sm:$0xf]  ;;  %v14415_v12 = vld [vmem:[#allocation21 + $0x98] sm:$0xf0] }
 0x5f1   : > { %7044 = vmatpush.bf16.msrb.mxu2 %v6962_v14 }
 0x5f2   : > { %7569 = vmatpush.bf16.msra.mxu1 %v14358_v50  ;;  %v14359_v50 = vld [vmem:[#allocation21 + $0x28] sm:$0xf0] }
 0x5f3   : > { %v7091_v36 = vpop.f32.mrf.mxu1 }
 0x5f4   : > { %v7160_v43 = vmax.f32 %v20227_v46, %v7091_v36  ;;  %v14414_v46 = vor.u32 %v17065_v24, %v14413_v47  ;;  %v17068_v36 = vld [vmem:[#allocation21 + $0xb4] sm:$0xf]  ;;  %v17066_v47 = vld [vmem:[#allocation21 + $0xa4] sm:$0xf]  ;;  %v14423_v24 = vld [vmem:[#allocation21 + $0xa8] sm:$0xf0] }
 0x5f5   : > { %7045 = vmatpush.bf16.msrb.mxu2 %v20223_v61 }
 0x5f6   : > { %7570 = vmatpush.bf16.msra.mxu1 %v14350_v33  ;;  %v20248_v60 = vpack.c.bf16 %v7160_v43, %v7156_v6  ;;  %v14351_v33 = vld [vmem:[#allocation21 + $0x18] sm:$0xf0]  ;;  %v14343_v6 = vld [vmem:[#allocation21 + $0x8] sm:$0xf0] }
 0x5f7   : > { %v14354_v0 = vor.u32 %v17048_v23, %v14351_v33  ;;  %v14431_v43 = vld [vmem:[#allocation21 + $0xb8] sm:$0xf0]  ;;  %v14346_v18 = vor.u32 %v17046_v32, %v14343_v6  ;;  %v14477_v23 = vld [vmem:[#allocation21 + $0x110] sm:$0xf]  ;;  %v14613_v32 = vld [vmem:[#allocation21 + $0x220] sm:$0xf] }
 0x5f8   : > { %v14434_v42 = vor.u32 %v17068_v36, %v14431_v43 }
 0x5f9   : > { %7046 = vmatpush.bf16.msrb.mxu2 %v20213_v27 }
 0x5fa   : > { %7571 = vmatpush.bf16.msra.mxu1 %v14342_v62  ;;  %v14517_v62 = vld [vmem:[#allocation21 + $0x160] sm:$0xf] }
 0x5fb   : > { %v7094_v21 = vpop.f32.mrf.mxu1  ;;  %v14518_v4 = vor.u32 %v17091_v22, %v14517_v62  ;;  %v17079_v22 = vld [vmem:[#allocation21 + $0x104] sm:$0xf0] }
 0x5fc   : > { %v7164_v29 = vmax.f32 %v20233_v16, %v7094_v21  ;;  %v14362_v16 = vor.u32 %v17050_v55, %v14359_v50  ;;  %v17087_v21 = vld [vmem:[#allocation21 + $0x144] sm:$0xf0]  ;;  %v14630_v55 = vor.u32 %v17119_v34, %v14629_v17  ;;  %v17141_v50 = vld [vmem:[#allocation21 + $0x2f4] sm:$0xf0]  ;;  %v17122_v17 = vld [vmem:[#allocation21 + $0x264] sm:$0xf] }
 0x5fd   : > { %7047 = vmatpush.bf16.msrb.mxu2 %v20201_v19  ;;  %7572 = vmatmul.bf16.vlgmr.msra.gmra.mxu1 %v20248_v60  ;;  %v14647_v34 = vld [vmem:[#allocation21 + $0x268] sm:$0xf0] }
 0x5fe   : > { %7640 = vmatpush.bf16.msrb.mxu1 %v14402_v51  ;;  %v17089_v51 = vld [vmem:[#allocation21 + $0x154] sm:$0xf0] }
 0x600   : > { %14321 = vmatmul.msk.bf16.vlgmr.msrb.gmra.mxu2 %vm792_vm2, %v20107_v35  ;;  %v17058_v35 = vld [vmem:[#allocation21 + $0x64] sm:$0xf] }
 0x601   : > { %7141 = vmatpush.bf16.msra.mxu2 %v6962_v14  ;;  %v14394_v2 = vor.u32 %v17058_v35, %v14391_v25  ;;  %v14466_v14 = vor.u32 %v17076_v56, %v14463_v37  ;;  %v17125_v25 = vld [vmem:[#allocation21 + $0x274] sm:$0xf0] }
 0x603   : > { %v20244_v9 = vpop.f32.mrf.mxu3  ;;  %7641 = vmatpush.bf16.msrb.mxu1 %v14394_v2  ;;  %v7096_v5 = vpop.f32.mrf.mxu1  ;;  %v14501_v2 = vld [vmem:[#allocation21 + $0x140] sm:$0xf] }
 0x604   : > { %v7168_v3 = vmax.f32 %v20235_v41, %v7096_v5  ;;  %v14525_v41 = vld [vmem:[#allocation21 + $0x170] sm:$0xf] }
 0x605   : > { %7142 = vmatpush.bf16.msra.mxu2 %v20223_v61  ;;  %v14422_v61 = vor.u32 %v17067_v13, %v14421_v40  ;;  %v14526_v53 = vor.u32 %v17093_v54, %v14525_v41  ;;  %v14509_v40 = vld [vmem:[#allocation21 + $0x150] sm:$0xf]  ;;  %v17117_v54 = vld [vmem:[#allocation21 + $0x234] sm:$0xf0] }
 0x606   : > { %v20260_v44 = vpack.c.bf16 %v7168_v3, %v7164_v29  ;;  %v14653_v13 = vld [vmem:[#allocation21 + $0x270] sm:$0xf]  ;;  %v17062_v3 = vld [vmem:[#allocation21 + $0x84] sm:$0xf] }
 0x607   : > { %7588 = vmatpush.bf16.msra.mxu3 %v14422_v61  ;;  %7602 = vmatpush.bf16.msra.mxu0 %v14526_v53  ;;  %v14510_v61 = vor.u32 %v17089_v51, %v14509_v40  ;;  %v14621_v41 = vld [vmem:[#allocation21 + $0x230] sm:$0xf]  ;;  %v17081_v53 = vld [vmem:[#allocation21 + $0x114] sm:$0xf0]  ;;  %v17092_v40 = vld [vmem:[#allocation21 + $0x174] sm:$0xf] }
 0x608   : > { %v14622_v45 = vor.u32 %v17117_v54, %v14621_v41  ;;  %v14478_v63 = vor.u32 %v17081_v53, %v14477_v23  ;;  %v14495_v54 = vld [vmem:[#allocation21 + $0x138] sm:$0xf0]  ;;  %v17120_v23 = vld [vmem:[#allocation21 + $0x254] sm:$0xf] }
 0x609   : > { %7143 = vmatpush.bf16.msra.mxu2 %v20213_v27  ;;  %v14383_v27 = vld [vmem:[#allocation21 + $0x58] sm:$0xf0] }
 0x60a   : > { %v14386_v57 = vor.u32 %v17056_v59, %v14383_v27  ;;  %v14645_v59 = vld [vmem:[#allocation21 + $0x260] sm:$0xf]  ;;  %v17123_v27 = vld [vmem:[#allocation21 + $0x264] sm:$0xf0]  ;;  %v14639_v53 = vld [vmem:[#allocation21 + $0x258] sm:$0xf0] }
 0x60b   : > { %v20252_v7 = vpop.f32.mrf.mxu3  ;;  %7589 = vmatpush.bf16.msra.mxu3 %v14414_v46  ;;  %7603 = vmatpush.bf16.msra.mxu0 %v14518_v4  ;;  %v14426_v46 = vor.u32 %v17066_v47, %v14423_v24  ;;  %v14646_v58 = vor.u32 %v17123_v27, %v14645_v59  ;;  %v17115_v4 = vld [vmem:[#allocation21 + $0x224] sm:$0xf0]  ;;  %v17090_v59 = vld [vmem:[#allocation21 + $0x164] sm:$0xf] }
 0x60c   : > { %7642 = vmatpush.bf16.msrb.mxu1 %v14386_v57  ;;  %v17064_v57 = vld [vmem:[#allocation21 + $0x94] sm:$0xf]  ;;  %v14614_v43 = vor.u32 %v17115_v4, %v14613_v32  ;;  %v14631_v32 = vld [vmem:[#allocation21 + $0x248] sm:$0xf0] }
 0x60d   : > { %7144 = vmatpush.bf16.msra.mxu2 %v20201_v19  ;;  %v14378_v19 = vor.u32 %v17054_v49, %v14375_v20  ;;  %7577 = vmatmul.bf16.gmra.mxu1 %v20260_v44  ;;  %v14637_v49 = vld [vmem:[#allocation21 + $0x250] sm:$0xf]  ;;  %v17121_v20 = vld [vmem:[#allocation21 + $0x254] sm:$0xf0]  ;;  %v14418_v37 = vor.u32 %v17064_v57, %v14415_v12  ;;  %v14597_v57 = vld [vmem:[#allocation21 + $0x200] sm:$0xf] }
 0x60e   : > { %v14638_v5 = vor.u32 %v17121_v20, %v14637_v49  ;;  %v17111_v12 = vld [vmem:[#allocation21 + $0x204] sm:$0xf0]  ;;  %v14685_v20 = vld [vmem:[#allocation21 + $0x2b0] sm:$0xf] }
 0x60f   : > { %7590 = vmatpush.bf16.msra.mxu3 %v14406_v10  ;;  %7604 = vmatpush.bf16.msra.mxu0 %v14510_v61  ;;  %v14502_v10 = vor.u32 %v17087_v21, %v14501_v2  ;;  %v17135_v21 = vld [vmem:[#allocation21 + $0x2c4] sm:$0xf0]  ;;  %v14598_v49 = vor.u32 %v17111_v12, %v14597_v57 }
 0x610   : > { %14322 = vmatmul.msk.bf16.gmra.mxu2 %vm792_vm2, %v20126_v1  ;;  %7643 = vmatpush.bf16.msrb.mxu1 %v14378_v19  ;;  %v14455_v1 = vld [vmem:[#allocation21 + $0xe8] sm:$0xf0]  ;;  %v14493_v19 = vld [vmem:[#allocation21 + $0x130] sm:$0xf] }
 0x611   : > { %v14458_v48 = vor.u32 %v17074_v15, %v14455_v1  ;;  %v14407_v1 = vld [vmem:[#allocation21 + $0x88] sm:$0xf0] }
 0x613   : > { %v20256_v30 = vpop.f32.mrf.mxu3  ;;  %7659 = vmatpush.bf16.msrb.mxu3 %v14466_v14  ;;  %v17085_v14 = vld [vmem:[#allocation21 + $0x134] sm:$0xf0]  ;;  %7605 = vmatpush.bf16.msra.mxu0 %v14502_v10 }
 0x614   : > { %7644 = vmatpush.bf16.msrb.mxu1 %v14370_v26  ;;  %v14494_v38 = vor.u32 %v17085_v14, %v14493_v19  ;;  %v14485_v26 = vld [vmem:[#allocation21 + $0x120] sm:$0xf]  ;;  %v17133_v10 = vld [vmem:[#allocation21 + $0x2b4] sm:$0xf0]  ;;  %v17124_v19 = vld [vmem:[#allocation21 + $0x274] sm:$0xf] }
 0x615   : > { %v14655_v14 = vld [vmem:[#allocation21 + $0x278] sm:$0xf0] }
 0x617   : > { %7660 = vmatpush.bf16.msrb.mxu3 %v14458_v48  ;;  %v14410_v48 = vor.u32 %v17062_v3, %v14407_v1  ;;  %7606 = vmatpush.bf16.msra.mxu0 %v14494_v38  ;;  %v14677_v3 = vld [vmem:[#allocation21 + $0x2a0] sm:$0xf]  ;;  %v17131_v1 = vld [vmem:[#allocation21 + $0x2a4] sm:$0xf0] }
 0x618   : > { %7645 = vmatpush.bf16.msrb.mxu1 %v14362_v16 }
 0x61b   : > { %v20263_v52 = vpop.f32.mrf.mxu3  ;;  %7661 = vmatpush.bf16.msrb.mxu3 %v14450_v11 }
 0x61c   : > { %7646 = vmatpush.bf16.msrb.mxu1 %v14354_v0  ;;  %v17139_v0 = vld [vmem:[#allocation21 + $0x2e4] sm:$0xf0] }
 0x61f   : > { %7662 = vmatpush.bf16.msrb.mxu3 %v14442_v39  ;;  %v14469_v39 = vld [vmem:[#allocation21 + $0x100] sm:$0xf] }
 0x620   : > { %14337 = vmatmul.msk.bf16.vlgmr.msra.gmra.mxu2 %vm792_vm2, %v20142_v8  ;;  %v14654_v8 = vor.u32 %v17125_v25, %v14653_v13  ;;  %7647 = vmatpush.bf16.msrb.mxu1 %v14346_v18  ;;  %v14470_v36 = vor.u32 %v17079_v22, %v14469_v39  ;;  %v14701_v18 = vld [vmem:[#allocation21 + $0x2d0] sm:$0xf]  ;;  %v17082_v39 = vld [vmem:[#allocation21 + $0x124] sm:$0xf] }
 0x621   : > { %v14605_v25 = vld [vmem:[#allocation21 + $0x210] sm:$0xf]  ;;  %v17118_v22 = vld [vmem:[#allocation21 + $0x244] sm:$0xf] }
 0x623   : > { %v7108_v35 = vpop.f32.mrf.mxu3  ;;  %7663 = vmatpush.bf16.msrb.mxu3 %v14434_v42  ;;  %7648 = vmatmul.bf16.vlgmr.msrb.gmra.mxu1 %v20248_v60  ;;  %v17137_v42 = vld [vmem:[#allocation21 + $0x2d4] sm:$0xf0] }
 0x624   : > { %8101 = vmatpush.bf16.msra.mxu1 %v14654_v8  ;;  %v7157_v56 = vmax.f32 %v20244_v9, %v7108_v35  ;;  %v17083_v9 = vld [vmem:[#allocation21 + $0x124] sm:$0xf0]  ;;  %v14702_v13 = vor.u32 %v17137_v42, %v14701_v18  ;;  %v14527_v35 = vld [vmem:[#allocation21 + $0x178] sm:$0xf0]  ;;  %v17113_v8 = vld [vmem:[#allocation21 + $0x214] sm:$0xf0]  ;;  %v14634_v18 = vor.u32 %v17118_v22, %v14631_v32 }
 0x625   : > { %v14486_v11 = vor.u32 %v17083_v9, %v14485_v26  ;;  %v14530_v47 = vor.u32 %v17092_v40, %v14527_v35  ;;  %v14606_v24 = vor.u32 %v17113_v8, %v14605_v25  ;;  %v17086_v26 = vld [vmem:[#allocation21 + $0x144] sm:$0xf]  ;;  %v14503_v9 = vld [vmem:[#allocation21 + $0x148] sm:$0xf0]  ;;  %v17080_v40 = vld [vmem:[#allocation21 + $0x114] sm:$0xf] }
 0x626   : > { %v14711_v35 = vld [vmem:[#allocation21 + $0x2e8] sm:$0xf0]  ;;  %v17116_v25 = vld [vmem:[#allocation21 + $0x234] sm:$0xf]  ;;  %v14623_v8 = vld [vmem:[#allocation21 + $0x238] sm:$0xf0] }
 0x627   : > { %7664 = vmatpush.bf16.msrb.mxu3 %v14426_v46  ;;  %7607 = vmatpush.bf16.msra.mxu0 %v14486_v11  ;;  %v14693_v46 = vld [vmem:[#allocation21 + $0x2c0] sm:$0xf]  ;;  %v17129_v11 = vld [vmem:[#allocation21 + $0x294] sm:$0xf0]  ;;  %v14626_v12 = vor.u32 %v17116_v25, %v14623_v8  ;;  %v17147_v8 = vld [vmem:[#allocation21 + $0x324] sm:$0xf0] }
 0x628   : > { %8102 = vmatpush.bf16.msra.mxu1 %v14646_v58  ;;  %v14694_v27 = vor.u32 %v17135_v21, %v14693_v46  ;;  %v14519_v58 = vld [vmem:[#allocation21 + $0x168] sm:$0xf0]  ;;  %v17078_v46 = vld [vmem:[#allocation21 + $0x104] sm:$0xf]  ;;  %v14741_v25 = vld [vmem:[#allocation21 + $0x320] sm:$0xf] }
 0x62b   : > { %v7110_v29 = vpop.f32.mrf.mxu3  ;;  %7665 = vmatpush.bf16.msrb.mxu3 %v14418_v37  ;;  %7608 = vmatpush.bf16.msra.mxu0 %v14478_v63  ;;  %v14511_v37 = vld [vmem:[#allocation21 + $0x158] sm:$0xf0]  ;;  %v17127_v63 = vld [vmem:[#allocation21 + $0x284] sm:$0xf0] }
 0x62c   : > { %v7161_v28 = vmax.f32 %v20252_v7, %v7110_v29  ;;  %8103 = vmatpush.bf16.msra.mxu1 %v14638_v5  ;;  %v14717_v7 = vld [vmem:[#allocation21 + $0x2f0] sm:$0xf]  ;;  %v14658_v5 = vor.u32 %v17124_v19, %v14655_v14  ;;  %v17157_v14 = vld [vmem:[#allocation21 + $0x374] sm:$0xf0] }
 0x62d   : > { %v14718_v16 = vor.u32 %v17141_v50, %v14717_v7  ;;  %v14650_v7 = vor.u32 %v17122_v17, %v14647_v34  ;;  %v14669_v50 = vld [vmem:[#allocation21 + $0x290] sm:$0xf] }
 0x62e   : > { %v20270_v15 = vpack.c.bf16 %v7161_v28, %v7157_v56  ;;  %v17088_v56 = vld [vmem:[#allocation21 + $0x154] sm:$0xf]  ;;  %v14686_v28 = vor.u32 %v17133_v10, %v14685_v20  ;;  %v14670_v41 = vor.u32 %v17129_v11, %v14669_v50  ;;  %v14781_v19 = vld [vmem:[#allocation21 + $0x370] sm:$0xf]  ;;  %v14687_v11 = vld [vmem:[#allocation21 + $0x2b8] sm:$0xf0] }
 0x62f   : > { %7666 = vmatpush.bf16.msrb.mxu3 %v14410_v48  ;;  %7609 = vmatpush.bf16.msra.mxu0 %v14470_v36  ;;  %v14514_v29 = vor.u32 %v17088_v56, %v14511_v37  ;;  %v14678_v48 = vor.u32 %v17131_v1, %v14677_v3  ;;  %v17140_v36 = vld [vmem:[#allocation21 + $0x2f4] sm:$0xf]  ;;  %v14695_v3 = vld [vmem:[#allocation21 + $0x2c8] sm:$0xf0]  ;;  %v14773_v1 = vld [vmem:[#allocation21 + $0x360] sm:$0xf] }
 0x630   : > { %14338 = vmatmul.msk.bf16.gmra.mxu2 %vm792_vm2, %v20163_v31  ;;  %7591 = vmatmul.bf16.vlgmr.msra.gmra.mxu3 %v20270_v15  ;;  %v14709_v31 = vld [vmem:[#allocation21 + $0x2e0] sm:$0xf]  ;;  %v17132_v50 = vld [vmem:[#allocation21 + $0x2b4] sm:$0xf] }
 0x631   : > { %8104 = vmatpush.bf16.msra.mxu1 %v14630_v55  ;;  %v14710_v62 = vor.u32 %v17139_v0, %v14709_v31  ;;  %v14506_v55 = vor.u32 %v17086_v26, %v14503_v9  ;;  %v14642_v0 = vor.u32 %v17120_v23, %v14639_v53  ;;  %v17155_v26 = vld [vmem:[#allocation21 + $0x364] sm:$0xf0]  ;;  %v14765_v23 = vld [vmem:[#allocation21 + $0x350] sm:$0xf]  ;;  %v17153_v53 = vld [vmem:[#allocation21 + $0x354] sm:$0xf0] }
 0x632   : > { %v14774_v17 = vor.u32 %v17155_v26, %v14773_v1 }
 0x633   : > { %v7113_v33 = vpop.f32.mrf.mxu3  ;;  %8120 = vmatpush.bf16.msra.mxu3 %v14718_v16  ;;  %7653 = vmatmul.bf16.gmra.mxu1 %v20260_v44  ;;  %v17084_v16 = vld [vmem:[#allocation21 + $0x134] sm:$0xf] }
 0x634   : > { %v7165_v6 = vmax.f32 %v20256_v30, %v7113_v33  ;;  %7678 = vmatpush.bf16.msrb.mxu0 %v14530_v47  ;;  %v14498_v33 = vor.u32 %v17084_v16, %v14495_v54  ;;  %v14690_v16 = vor.u32 %v17132_v50, %v14687_v11  ;;  %v17099_v11 = vld [vmem:[#allocation21 + $0x1a4] sm:$0xf0] }
 0x635   : > { %8105 = vmatpush.bf16.msra.mxu1 %v14622_v45  ;;  %v14661_v45 = vld [vmem:[#allocation21 + $0x280] sm:$0xf] }
 0x636   : > { %v14662_v4 = vor.u32 %v17127_v63, %v14661_v45  ;;  %v14766_v63 = vor.u32 %v17153_v53, %v14765_v23  ;;  %v14541_v23 = vld [vmem:[#allocation21 + $0x190] sm:$0xf]  ;;  %v17097_v53 = vld [vmem:[#allocation21 + $0x194] sm:$0xf0] }
 0x637   : > { %8121 = vmatpush.bf16.msra.mxu3 %v14710_v62  ;;  %v14487_v62 = vld [vmem:[#allocation21 + $0x128] sm:$0xf0] }
 0x639   : > { %8106 = vmatpush.bf16.msra.mxu1 %v14614_v43  ;;  %v14719_v43 = vld [vmem:[#allocation21 + $0x2f8] sm:$0xf0] }
 0x63a   : > { %v14722_v42 = vor.u32 %v17140_v36, %v14719_v43 }
 0x63b   : > { %v7115_v51 = vpop.f32.mrf.mxu3  ;;  %8122 = vmatpush.bf16.msra.mxu3 %v14702_v13  ;;  %v17138_v13 = vld [vmem:[#allocation21 + $0x2e4] sm:$0xf] }
 0x63c   : > { %v7169_v61 = vmax.f32 %v20263_v52, %v7115_v51  ;;  %v14522_v52 = vor.u32 %v17090_v59, %v14519_v58  ;;  %v14479_v51 = vld [vmem:[#allocation21 + $0x118] sm:$0xf0]  ;;  %v14471_v59 = vld [vmem:[#allocation21 + $0x108] sm:$0xf0] }
 0x63d   : > { %v20278_v2 = vpop.f32.mrf.mxu0  ;;  %8107 = vmatpush.bf16.msra.mxu1 %v14606_v24  ;;  %v14482_v47 = vor.u32 %v17080_v40, %v14479_v51  ;;  %v14714_v24 = vor.u32 %v17138_v13, %v14711_v35  ;;  %v14703_v58 = vld [vmem:[#allocation21 + $0x2d8] sm:$0xf0]  ;;  %v17149_v40 = vld [vmem:[#allocation21 + $0x334] sm:$0xf0]  ;;  %v17126_v51 = vld [vmem:[#allocation21 + $0x284] sm:$0xf] }
 0x63e   : > { %v20280_v30 = vpack.c.bf16 %v7169_v61, %v7165_v6  ;;  %7679 = vmatpush.bf16.msrb.mxu0 %v14522_v52  ;;  %v14490_v6 = vor.u32 %v17082_v39, %v14487_v62  ;;  %v17114_v52 = vld [vmem:[#allocation21 + $0x224] sm:$0xf]  ;;  %v17151_v39 = vld [vmem:[#allocation21 + $0x344] sm:$0xf0]  ;;  %v14663_v35 = vld [vmem:[#allocation21 + $0x288] sm:$0xf0] }
 0x63f   : > { %8123 = vmatpush.bf16.msra.mxu3 %v14694_v27  ;;  %v17136_v27 = vld [vmem:[#allocation21 + $0x2d4] sm:$0xf] }
 0x640   : > { %7596 = vmatmul.bf16.gmra.mxu3 %v20280_v30  ;;  %v14706_v10 = vor.u32 %v17136_v27, %v14703_v58  ;;  %v14581_v27 = vld [vmem:[#allocation21 + $0x1e0] sm:$0xf] }
 0x641   : > { %8108 = vmatpush.bf16.msra.mxu1 %v14598_v49  ;;  %v14615_v49 = vld [vmem:[#allocation21 + $0x228] sm:$0xf0] }
 0x642   : > { %7680 = vmatpush.bf16.msrb.mxu0 %v14514_v29  ;;  %v14618_v37 = vor.u32 %v17114_v52, %v14615_v49  ;;  %v17112_v29 = vld [vmem:[#allocation21 + $0x214] sm:$0xf]  ;;  %v17143_v52 = vld [vmem:[#allocation21 + $0x304] sm:$0xf0] }
 0x643   : > { %8124 = vmatpush.bf16.msra.mxu3 %v14686_v28  ;;  %v7035_v56 = vpop.f32.mrf.mxu2  ;;  %v14607_v28 = vld [vmem:[#allocation21 + $0x218] sm:$0xf0] }
 0x644   : > { %8109 = vmatmul.bf16.vlgmr.msra.gmra.mxu1 %v20248_v60  ;;  %v14610_v34 = vor.u32 %v17112_v29, %v14607_v28  ;;  %v14565_v29 = vld [vmem:[#allocation21 + $0x1c0] sm:$0xf]  ;;  %v17103_v28 = vld [vmem:[#allocation21 + $0x1c4] sm:$0xf0] }
 0x645   : > { %v20283_v38 = vpop.f32.mrf.mxu0  ;;  %8177 = vmatpush.bf16.msrb.mxu1 %v14658_v5  ;;  %v14782_v5 = vor.u32 %v17157_v14, %v14781_v19  ;;  %v17156_v19 = vld [vmem:[#allocation21 + $0x374] sm:$0xf]  ;;  %v14783_v14 = vld [vmem:[#allocation21 + $0x378] sm:$0xf0]  ;;  %v14566_v1 = vor.u32 %v17103_v28, %v14565_v29 }
 0x646   : > { %7681 = vmatpush.bf16.msrb.mxu0 %v14506_v55  ;;  %v17110_v55 = vld [vmem:[#allocation21 + $0x204] sm:$0xf]  ;;  %v17096_v29 = vld [vmem:[#allocation21 + $0x194] sm:$0xf] }
 0x647   : > { %8125 = vmatpush.bf16.msra.mxu3 %v14678_v48 }
 0x649   : > { %8178 = vmatpush.bf16.msrb.mxu1 %v14650_v7  ;;  %v14599_v7 = vld [vmem:[#allocation21 + $0x208] sm:$0xf0] }
 0x64a   : > { %7682 = vmatpush.bf16.msrb.mxu0 %v14498_v33  ;;  %v17130_v33 = vld [vmem:[#allocation21 + $0x2a4] sm:$0xf] }
 0x64b   : > { %8126 = vmatpush.bf16.msra.mxu3 %v14670_v41  ;;  %v14602_v41 = vor.u32 %v17110_v55, %v14599_v7  ;;  %v7037_v54 = vpop.f32.mrf.mxu2  ;;  %v14767_v55 = vld [vmem:[#allocation21 + $0x358] sm:$0xf0]  ;;  %v14549_v7 = vld [vmem:[#allocation21 + $0x1a0] sm:$0xf] }
 0x64d   : > { %v7127_v31 = vpop.f32.mrf.mxu0  ;;  %8179 = vmatpush.bf16.msrb.mxu1 %v14642_v0  ;;  %v14757_v0 = vld [vmem:[#allocation21 + $0x340] sm:$0xf] }
 0x64e   : > { %v7158_v61 = vmax.f32 %v20278_v2, %v7127_v31  ;;  %7683 = vmatpush.bf16.msrb.mxu0 %v14490_v6  ;;  %v14474_v2 = vor.u32 %v17078_v46, %v14471_v59  ;;  %v14679_v31 = vld [vmem:[#allocation21 + $0x2a8] sm:$0xf0]  ;;  %v14671_v6 = vld [vmem:[#allocation21 + $0x298] sm:$0xf0]  ;;  %v14758_v36 = vor.u32 %v17151_v39, %v14757_v0  ;;  %v17145_v59 = vld [vmem:[#allocation21 + $0x314] sm:$0xf0] }
 0x64f   : > { %8127 = vmatpush.bf16.msra.mxu3 %v14662_v4  ;;  %v14682_v22 = vor.u32 %v17130_v33, %v14679_v31  ;;  %v17128_v4 = vld [vmem:[#allocation21 + $0x294] sm:$0xf]  ;;  %v14751_v0 = vld [vmem:[#allocation21 + $0x338] sm:$0xf0]  ;;  %v14533_v39 = vld [vmem:[#allocation21 + $0x180] sm:$0xf] }
 0x650   : > { %7667 = vmatmul.bf16.vlgmr.msrb.gmra.mxu3 %v20270_v15  ;;  %v17148_v31 = vld [vmem:[#allocation21 + $0x334] sm:$0xf] }
 0x651   : > { %8180 = vmatpush.bf16.msrb.mxu1 %v14634_v18  ;;  %v14674_v18 = vor.u32 %v17128_v4, %v14671_v6  ;;  %v14743_v4 = vld [vmem:[#allocation21 + $0x328] sm:$0xf0] }
 0x652   : > { %7684 = vmatpush.bf16.msrb.mxu0 %v14482_v47  ;;  %v14742_v47 = vor.u32 %v17147_v8, %v14741_v25  ;;  %v17106_v25 = vld [vmem:[#allocation21 + $0x1e4] sm:$0xf] }
 0x653   : > { %8196 = vmatpush.bf16.msrb.mxu3 %v14722_v42  ;;  %v14749_v42 = vld [vmem:[#allocation21 + $0x330] sm:$0xf] }
 0x654   : > { %8114 = vmatmul.bf16.gmra.mxu1 %v20260_v44  ;;  %v14750_v13 = vor.u32 %v17149_v40, %v14749_v42 }
 0x655   : > { %v7129_v21 = vpop.f32.mrf.mxu0  ;;  %8181 = vmatpush.bf16.msrb.mxu1 %v14626_v12  ;;  %v14725_v12 = vld [vmem:[#allocation21 + $0x300] sm:$0xf] }
 0x656   : > { %v7162_v57 = vmax.f32 %v20283_v38, %v7129_v21  ;;  %v17134_v38 = vld [vmem:[#allocation21 + $0x2c4] sm:$0xf]  ;;  %7685 = vmatpush.bf16.msrb.mxu0 %v14474_v2  ;;  %v14733_v21 = vld [vmem:[#allocation21 + $0x310] sm:$0xf] }
 0x657   : > { %8197 = vmatpush.bf16.msrb.mxu3 %v14714_v24  ;;  %v14698_v9 = vor.u32 %v17134_v38, %v14695_v3  ;;  %v14589_v24 = vld [vmem:[#allocation21 + $0x1f0] sm:$0xf]  ;;  %v14734_v58 = vor.u32 %v17145_v59, %v14733_v21  ;;  %v17154_v38 = vld [vmem:[#allocation21 + $0x364] sm:$0xf]  ;;  %v14775_v3 = vld [vmem:[#allocation21 + $0x368] sm:$0xf0] }
 0x658   : > { %v20289_v20 = vpack.c.bf16 %v7162_v57, %v7158_v61  ;;  %v14666_v61 = vor.u32 %v17126_v51, %v14663_v35  ;;  %v17107_v57 = vld [vmem:[#allocation21 + $0x1e4] sm:$0xf0]  ;;  %v14573_v2 = vld [vmem:[#allocation21 + $0x1d0] sm:$0xf]  ;;  %v14778_v26 = vor.u32 %v17154_v38, %v14775_v3  ;;  %v14735_v35 = vld [vmem:[#allocation21 + $0x318] sm:$0xf0] }
 0x659   : > { %8182 = vmatpush.bf16.msrb.mxu1 %v14618_v37  ;;  %v14582_v49 = vor.u32 %v17107_v57, %v14581_v27  ;;  %v14567_v57 = vld [vmem:[#allocation21 + $0x1c8] sm:$0xf0] }
 0x65a   : > { %7610 = vmatmul.bf16.vlgmr.msra.gmra.mxu0 %v20289_v20 }
 0x65b   : > { %8198 = vmatpush.bf16.msrb.mxu3 %v14706_v10  ;;  %8139 = vmatpush.bf16.msra.mxu0 %v14782_v5  ;;  %v17105_v10 = vld [vmem:[#allocation21 + $0x1d4] sm:$0xf0]  ;;  %v14786_v5 = vor.u32 %v17156_v19, %v14783_v14 }
 0x65c   : > { %v14574_v37 = vor.u32 %v17105_v10, %v14573_v2 }
 0x65d   : > { %v7132_v48 = vpop.f32.mrf.mxu0  ;;  %8183 = vmatpush.bf16.msrb.mxu1 %v14610_v34  ;;  %v17152_v34 = vld [vmem:[#allocation21 + $0x354] sm:$0xf] }
 0x65e   : > { %v7166_v45 = vmax.f32 %v7035_v56, %v7132_v48  ;;  %v14726_v56 = vor.u32 %v17143_v52, %v14725_v12  ;;  %v14557_v48 = vld [vmem:[#allocation21 + $0x1b0] sm:$0xf]  ;;  %v14770_v50 = vor.u32 %v17152_v34, %v14767_v55  ;;  %v17100_v52 = vld [vmem:[#allocation21 + $0x1b4] sm:$0xf]  ;;  %v17173_v55 = vld [vmem:[#allocation21 + $0x3f4] sm:$0xf0] }
 0x65f   : > { %8199 = vmatpush.bf16.msrb.mxu3 %v14698_v9  ;;  %8140 = vmatpush.bf16.msra.mxu0 %v14774_v17  ;;  %v17101_v9 = vld [vmem:[#allocation21 + $0x1b4] sm:$0xf0]  ;;  %v14845_v34 = vld [vmem:[#allocation21 + $0x3f0] sm:$0xf] }
 0x660   : > { %7672 = vmatmul.bf16.gmra.mxu3 %v20280_v30 }
 0x661   : > { %8184 = vmatpush.bf16.msrb.mxu1 %v14602_v41  ;;  %v14759_v41 = vld [vmem:[#allocation21 + $0x348] sm:$0xf0] }
 0x663   : > { %8200 = vmatpush.bf16.msrb.mxu3 %v14690_v16  ;;  %8141 = vmatpush.bf16.msra.mxu0 %v14766_v63  ;;  %v17150_v16 = vld [vmem:[#allocation21 + $0x344] sm:$0xf] }
 0x664   : > { %8185 = vmatmul.bf16.vlgmr.msrb.gmra.mxu1 %v20248_v60  ;;  %v17109_v60 = vld [vmem:[#allocation21 + $0x1f4] sm:$0xf0]  ;;  %v14762_v33 = vor.u32 %v17150_v16, %v14759_v41  ;;  %v14837_v16 = vld [vmem:[#allocation21 + $0x3e0] sm:$0xf]  ;;  %v17171_v41 = vld [vmem:[#allocation21 + $0x3e4] sm:$0xf0] }
 0x665   : > { %v7134_v62 = vpop.f32.mrf.mxu0  ;;  %v14590_v46 = vor.u32 %v17109_v60, %v14589_v24  ;;  %v14727_v60 = vld [vmem:[#allocation21 + $0x308] sm:$0xf0] }
 0x666   : > { %v7170_v32 = vmax.f32 %v7037_v54, %v7134_v62  ;;  %v14550_v54 = vor.u32 %v17099_v11, %v14549_v7  ;;  %v14754_v62 = vor.u32 %v17148_v31, %v14751_v0  ;;  %v14846_v7 = vor.u32 %v17173_v55, %v14845_v34  ;;  %v17162_v55 = vld [vmem:[#allocation21 + $0x3a4] sm:$0xf] }
 0x667   : > { %8201 = vmatpush.bf16.msrb.mxu3 %v14682_v22  ;;  %8142 = vmatpush.bf16.msra.mxu0 %v14758_v36  ;;  %v17095_v22 = vld [vmem:[#allocation21 + $0x184] sm:$0xf0]  ;;  %v17108_v36 = vld [vmem:[#allocation21 + $0x1f4] sm:$0xf] }
 0x668   : > { %v20294_v43 = vpack.c.bf16 %v7170_v32, %v7166_v45  ;;  %7621 = vmatpush.bf16.msrb.mxu2 %v14590_v46  ;;  %v14542_v45 = vor.u32 %v17097_v53, %v14541_v23  ;;  %v17146_v32 = vld [vmem:[#allocation21 + $0x324] sm:$0xf]  ;;  %v14534_v6 = vor.u32 %v17095_v22, %v14533_v39  ;;  %v14575_v46 = vld [vmem:[#allocation21 + $0x1d8] sm:$0xf0]  ;;  %v14829_v23 = vld [vmem:[#allocation21 + $0x3d0] sm:$0xf] }
 0x669   : > { %v14746_v42 = vor.u32 %v17146_v32, %v14743_v4  ;;  %v17169_v53 = vld [vmem:[#allocation21 + $0x3d4] sm:$0xf0]  ;;  %v17167_v22 = vld [vmem:[#allocation21 + $0x3c4] sm:$0xf0] }
 0x66a   : > { %7615 = vmatmul.bf16.gmra.mxu0 %v20294_v43 }
 0x66b   : > { %8202 = vmatpush.bf16.msrb.mxu3 %v14674_v18  ;;  %8143 = vmatpush.bf16.msra.mxu0 %v14750_v13  ;;  %v14591_v18 = vld [vmem:[#allocation21 + $0x1f8] sm:$0xf0]  ;;  %v17144_v13 = vld [vmem:[#allocation21 + $0x314] sm:$0xf] }
 0x66c   : > { %7622 = vmatpush.bf16.msrb.mxu2 %v14582_v49  ;;  %v14594_v40 = vor.u32 %v17108_v36, %v14591_v18  ;;  %v14738_v8 = vor.u32 %v17144_v13, %v14735_v35  ;;  %v14559_v49 = vld [vmem:[#allocation21 + $0x1b8] sm:$0xf0]  ;;  %v17165_v36 = vld [vmem:[#allocation21 + $0x3b4] sm:$0xf0]  ;;  %v17163_v13 = vld [vmem:[#allocation21 + $0x3a4] sm:$0xf0] }
 0x66d   : > { %v14562_v2 = vor.u32 %v17100_v52, %v14559_v49  ;;  %v14839_v52 = vld [vmem:[#allocation21 + $0x3e8] sm:$0xf0] }
 0x66f   : > { %8203 = vmatpush.bf16.msrb.mxu3 %v14666_v61  ;;  %8144 = vmatpush.bf16.msra.mxu0 %v14742_v47  ;;  %v14583_v61 = vld [vmem:[#allocation21 + $0x1e8] sm:$0xf0]  ;;  %v17142_v47 = vld [vmem:[#allocation21 + $0x304] sm:$0xf] }
 0x670   : > { %8128 = vmatmul.bf16.vlgmr.msra.gmra.mxu3 %v20270_v15  ;;  %7623 = vmatpush.bf16.msrb.mxu2 %v14574_v37  ;;  %v14586_v24 = vor.u32 %v17106_v25, %v14583_v61  ;;  %v14730_v59 = vor.u32 %v17142_v47, %v14727_v60  ;;  %v14551_v37 = vld [vmem:[#allocation21 + $0x1a8] sm:$0xf0]  ;;  %v14797_v25 = vld [vmem:[#allocation21 + $0x390] sm:$0xf]  ;;  %v17159_v60 = vld [vmem:[#allocation21 + $0x384] sm:$0xf0] }
 0x673   : > { %8145 = vmatpush.bf16.msra.mxu0 %v14734_v58  ;;  %v17102_v58 = vld [vmem:[#allocation21 + $0x1c4] sm:$0xf] }
 0x674   : > { %8190 = vmatmul.bf16.gmra.mxu1 %v20260_v44  ;;  %7624 = vmatpush.bf16.msrb.mxu2 %v14566_v1  ;;  %v14558_v44 = vor.u32 %v17101_v9, %v14557_v48  ;;  %v14570_v12 = vor.u32 %v17102_v58, %v14567_v57  ;;  %v17094_v1 = vld [vmem:[#allocation21 + $0x184] sm:$0xf] }
 0x677   : > { %8146 = vmatpush.bf16.msra.mxu0 %v14726_v56  ;;  %v17098_v56 = vld [vmem:[#allocation21 + $0x1a4] sm:$0xf] }
 0x678   : > { %7625 = vmatpush.bf16.msrb.mxu2 %v14558_v44  ;;  %v14554_v19 = vor.u32 %v17098_v56, %v14551_v37  ;;  %v14831_v56 = vld [vmem:[#allocation21 + $0x3d8] sm:$0xf0] }
 0x67a   : > { %7686 = vmatmul.bf16.vlgmr.msrb.gmra.mxu0 %v20289_v20  ;;  %v7573_v14 = vpop.f32.mrf.mxu1 }
 0x67b   : > { %8215 = vmatpush.bf16.msrb.mxu0 %v14786_v5  ;;  %v14543_v5 = vld [vmem:[#allocation21 + $0x198] sm:$0xf0] }
 0x67c   : > { %7626 = vmatpush.bf16.msrb.mxu2 %v14550_v54  ;;  %v14546_v28 = vor.u32 %v17096_v29, %v14543_v5  ;;  %v14838_v54 = vor.u32 %v17171_v41, %v14837_v16  ;;  %v17166_v29 = vld [vmem:[#allocation21 + $0x3c4] sm:$0xf]  ;;  %v14823_v5 = vld [vmem:[#allocation21 + $0x3c8] sm:$0xf0]  ;;  %v17160_v16 = vld [vmem:[#allocation21 + $0x394] sm:$0xf] }
 0x67d   : > { %v14799_v41 = vld [vmem:[#allocation21 + $0x398] sm:$0xf0] }
 0x67f   : > { %8216 = vmatpush.bf16.msrb.mxu0 %v14778_v26  ;;  %v14535_v26 = vld [vmem:[#allocation21 + $0x188] sm:$0xf0] }
 0x680   : > { %8133 = vmatmul.bf16.gmra.mxu3 %v20280_v30  ;;  %7627 = vmatpush.bf16.msrb.mxu2 %v14542_v45  ;;  %v14538_v48 = vor.u32 %v17094_v1, %v14535_v26 }
 0x682   : > { %v20317_v44 = vpop.f32.mrf.mxu1 }
 0x683   : > { %v20302_v17 = vpop.f32.mrf.mxu2  ;;  %8217 = vmatpush.bf16.msrb.mxu0 %v14770_v50 }
 0x684   : > { %7628 = vmatpush.bf16.msrb.mxu2 %v14534_v6  ;;  %v14813_v6 = vld [vmem:[#allocation21 + $0x3b0] sm:$0xf] }
 0x685   : > { %v14814_v18 = vor.u32 %v17165_v36, %v14813_v6 }
 0x687   : > { %8218 = vmatpush.bf16.msrb.mxu0 %v14762_v33  ;;  %v14830_v33 = vor.u32 %v17169_v53, %v14829_v23  ;;  %v17158_v23 = vld [vmem:[#allocation21 + $0x384] sm:$0xf]  ;;  %v14791_v53 = vld [vmem:[#allocation21 + $0x388] sm:$0xf0] }
 0x688   : > { %7697 = vmatpush.bf16.msra.mxu2 %v14594_v40  ;;  %v14805_v40 = vld [vmem:[#allocation21 + $0x3a0] sm:$0xf] }
 0x68a   : > { %7691 = vmatmul.bf16.gmra.mxu0 %v20294_v43  ;;  %v7578_v45 = vpop.f32.mrf.mxu1 }
 0x68b   : > { %v20305_v63 = vpop.f32.mrf.mxu2  ;;  %8219 = vmatpush.bf16.msrb.mxu0 %v14754_v62  ;;  %v14821_v62 = vld [vmem:[#allocation21 + $0x3c0] sm:$0xf] }
 0x68c   : > { %7698 = vmatpush.bf16.msra.mxu2 %v14586_v24  ;;  %v14822_v32 = vor.u32 %v17167_v22, %v14821_v62  ;;  %v14789_v24 = vld [vmem:[#allocation21 + $0x380] sm:$0xf] }
 0x68f   : > { %8220 = vmatpush.bf16.msrb.mxu0 %v14746_v42 }
 0x690   : > { %8204 = vmatmul.bf16.vlgmr.msrb.gmra.mxu3 %v20270_v15  ;;  %v17104_v15 = vld [vmem:[#allocation21 + $0x1d4] sm:$0xf] }
 0x691   : > { %v14578_v21 = vor.u32 %v17104_v15, %v14575_v46  ;;  %v14790_v15 = vor.u32 %v17159_v60, %v14789_v24 }
 0x692   : > { %v20327_v35 = vpop.f32.mrf.mxu1 }
 0x693   : > { %v20308_v51 = vpop.f32.mrf.mxu2  ;;  %8221 = vmatpush.bf16.msrb.mxu0 %v14738_v8  ;;  %7699 = vmatpush.bf16.msra.mxu2 %v14578_v21  ;;  %v17161_v8 = vld [vmem:[#allocation21 + $0x394] sm:$0xf0]  ;;  %v17172_v21 = vld [vmem:[#allocation21 + $0x3f4] sm:$0xf] }
 0x694   : > { %v14798_v61 = vor.u32 %v17161_v8, %v14797_v25 }
 0x697   : > { %8222 = vmatpush.bf16.msrb.mxu0 %v14730_v59  ;;  %7700 = vmatpush.bf16.msra.mxu2 %v14570_v12  ;;  %v14847_v59 = vld [vmem:[#allocation21 + $0x3f8] sm:$0xf0]  ;;  %v17170_v12 = vld [vmem:[#allocation21 + $0x3e4] sm:$0xf] }
 0x698   : > { %v14842_v49 = vor.u32 %v17170_v12, %v14839_v52  ;;  %v17211_v12 = vld [vmem:[#allocation11 + $0x124] sm:$0xf0] }
 0x69a   : > { %8147 = vmatmul.bf16.vlgmr.msra.gmra.mxu0 %v20289_v20 }
 0x69b   : > { %v7056_v27 = vpop.f32.mrf.mxu2  ;;  %7701 = vmatpush.bf16.msra.mxu2 %v14562_v2 }
 0x69f   : > { %7702 = vmatpush.bf16.msra.mxu2 %v14554_v19 }
 0x6a0   : > { %8209 = vmatmul.bf16.gmra.mxu3 %v20280_v30  ;;  %v7649_v46 = vpop.f32.mrf.mxu1 }
 0x6a3   : > { %v7146_v10 = vpop.f32.mrf.mxu2  ;;  %7703 = vmatpush.bf16.msra.mxu2 %v14546_v28  ;;  %v14826_v28 = vor.u32 %v17166_v29, %v14823_v5 }
 0x6a4   : > { %v7159_v3 = vmax.f32 %v20302_v17, %v7146_v10  ;;  %v17168_v10 = vld [vmem:[#allocation21 + $0x3d4] sm:$0xf] }
 0x6a5   : > { %v14834_v19 = vor.u32 %v17168_v10, %v14831_v56  ;;  %v14901_v10 = vld [vmem:[#allocation11 + $0x160] sm:$0xf]  ;;  %v17219_v56 = vld [vmem:[#allocation11 + $0x164] sm:$0xf0] }
 0x6a7   : > { %7704 = vmatpush.bf16.msra.mxu2 %v14538_v48 }
 0x6a8   : > { %v20333_v37 = vpop.f32.mrf.mxu1 }
 0x6aa   : > { %8152 = vmatmul.bf16.gmra.mxu0 %v20294_v43 }
 0x6ab   : > { %v7148_v38 = vpop.f32.mrf.mxu2 }
 0x6ac   : > { %v7163_v30 = vmax.f32 %v20305_v63, %v7148_v38 }
 0x6ae   : > { %v20315_v9 = vpack.c.bf16 %v7163_v30, %v7159_v3  ;;  %v17164_v3 = vld [vmem:[#allocation21 + $0x3b4] sm:$0xf]  ;;  %v14815_v30 = vld [vmem:[#allocation21 + $0x3b8] sm:$0xf0] }
 0x6af   : > { %v14818_v1 = vor.u32 %v17164_v3, %v14815_v30  ;;  %v14903_v3 = vld [vmem:[#allocation11 + $0x168] sm:$0xf0] }
 0x6b0   : > { %7629 = vmatmul.bf16.vlgmr.msrb.gmra.mxu2 %v20315_v9  ;;  %v7654_v26 = vpop.f32.mrf.mxu1 }
 0x6b1   : > { %8158 = vmatpush.bf16.msrb.mxu2 %v14846_v7  ;;  %v14807_v7 = vld [vmem:[#allocation21 + $0x3a8] sm:$0xf0] }
 0x6b3   : > { %v7151_v50 = vpop.f32.mrf.mxu2  ;;  %v7592_v11 = vpop.f32.mrf.mxu3 }
 0x6b4   : > { %v7593_v17 = vadd.f32 %v7592_v11, %v7573_v14  ;;  %v7167_v0 = vmax.f32 %v20308_v51, %v7151_v50  ;;  %v14806_v51 = vor.u32 %v17163_v13, %v14805_v40  ;;  %v14810_v50 = vor.u32 %v17162_v55, %v14807_v7  ;;  %v14895_v55 = vld [vmem:[#allocation11 + $0x158] sm:$0xf0] }
 0x6b5   : > { %8159 = vmatpush.bf16.msrb.mxu2 %v14838_v54  ;;  %v14802_v54 = vor.u32 %v17160_v16, %v14799_v41  ;;  %v17215_v16 = vld [vmem:[#allocation11 + $0x144] sm:$0xf0]  ;;  %v17214_v41 = vld [vmem:[#allocation11 + $0x144] sm:$0xf] }
 0x6b8   : > { %v20360_v25 = vpop.f32.mrf.mxu1 }
 0x6b9   : > { %8160 = vmatpush.bf16.msrb.mxu2 %v14830_v33  ;;  %v14794_v33 = vor.u32 %v17158_v23, %v14791_v53 }
 0x6ba   : > { %8223 = vmatmul.bf16.vlgmr.msrb.gmra.mxu0 %v20289_v20 }
 0x6bb   : > { %v7153_v63 = vpop.f32.mrf.mxu2  ;;  %v20321_v31 = vpop.f32.mrf.mxu3 }
 0x6bc   : > { %v7171_v39 = vmax.f32 %v7056_v27, %v7153_v63  ;;  %v14850_v27 = vor.u32 %v17172_v21, %v14847_v59  ;;  %v17221_v21 = vld [vmem:[#allocation11 + $0x174] sm:$0xf0]  ;;  %v17220_v59 = vld [vmem:[#allocation11 + $0x174] sm:$0xf] }
 0x6bd   : > { %8161 = vmatpush.bf16.msrb.mxu2 %v14822_v32 }
 0x6be   : > { %v20324_v4 = vpack.c.bf16 %v7171_v39, %v7167_v0 }
 0x6c0   : > { %7634 = vmatmul.bf16.gmra.mxu2 %v20324_v4 }
 0x6c1   : > { %8162 = vmatpush.bf16.msrb.mxu2 %v14814_v18 }
 0x6c3   : > { %v7597_v42 = vpop.f32.mrf.mxu3 }
 0x6c4   : > { %v7598_v20 = vadd.f32 %v7597_v42, %v7578_v45 }
 0x6c5   : > { %8163 = vmatpush.bf16.msrb.mxu2 %v14806_v51 }
 0x6c9   : > { %8164 = vmatpush.bf16.msrb.mxu2 %v14798_v61  ;;  %v8110_v61 = vpop.f32.mrf.mxu1 }
 0x6ca   : > { %8228 = vmatmul.bf16.gmra.mxu0 %v20294_v43 }
 0x6cb   : > { %v20330_v47 = vpop.f32.mrf.mxu3 }
 0x6cd   : > { %8165 = vmatpush.bf16.msrb.mxu2 %v14790_v15 }
 0x6d0   : > { %7705 = vmatmul.bf16.vlgmr.msra.gmra.mxu2 %v20315_v9 }
 0x6d1   : > { %8234 = vmatpush.bf16.msra.mxu2 %v14850_v27 }
 0x6d3   : > { %v7668_v58 = vpop.f32.mrf.mxu3 }
 0x6d4   : > { %v7669_v57 = vadd.f32 %v7668_v58, %v7649_v46  ;;  %v14909_v46 = vld [vmem:[#allocation11 + $0x170] sm:$0xf]  ;;  %v14911_v58 = vld [vmem:[#allocation11 + $0x178] sm:$0xf0] }
 0x6d5   : > { %8235 = vmatpush.bf16.msra.mxu2 %v14842_v49  ;;  %v14910_v27 = vor.u32 %v17221_v21, %v14909_v46  ;;  %v14914_v52 = vor.u32 %v17220_v59, %v14911_v58  ;;  %v21246_v49 = vmov 0.0  }
 0x6d7   : > { %v7611_v43 = vpop.f32.mrf.mxu0  ;;  %8599 = vmatpush.bf16.msra.mxu1 %v14910_v27  ;;  %8637 = vmatpush.bf16.msra.mxu0 %v14914_v52  ;;  %v14871_v52 = vld [vmem:[#allocation11 + $0x128] sm:$0xf0] }
 0x6d8   : > { %v7612_v2 = vadd.f32 %v7611_v43, %v7593_v17 }
 0x6d9   : > { %8236 = vmatpush.bf16.msra.mxu2 %v14834_v19  ;;  %v17218_v19 = vld [vmem:[#allocation11 + $0x164] sm:$0xf] }
 0x6da   : > { %v14906_v30 = vor.u32 %v17218_v19, %v14903_v3 }
 0x6db   : > { %v20335_v14 = vpop.f32.mrf.mxu3 }
 0x6dc   : > { %8638 = vmatpush.bf16.msra.mxu0 %v14906_v30 }
 0x6dd   : > { %8237 = vmatpush.bf16.msra.mxu2 %v14826_v28  ;;  %v14902_v28 = vor.u32 %v17219_v56, %v14901_v10 }
 0x6df   : > { %v20337_v38 = vpop.f32.mrf.mxu0  ;;  %8600 = vmatpush.bf16.msra.mxu1 %v14902_v28  ;;  %v14861_v28 = vld [vmem:[#allocation11 + $0x110] sm:$0xf] }
 0x6e0   : > { %7710 = vmatmul.bf16.gmra.mxu2 %v20324_v4 }
 0x6e1   : > { %8238 = vmatpush.bf16.msra.mxu2 %v14818_v1  ;;  %v14893_v1 = vld [vmem:[#allocation11 + $0x150] sm:$0xf] }
 0x6e3   : > { %v7673_v48 = vpop.f32.mrf.mxu3 }
 0x6e4   : > { %v7674_v34 = vadd.f32 %v7673_v48, %v7654_v26  ;;  %v17217_v26 = vld [vmem:[#allocation11 + $0x154] sm:$0xf0]  ;;  %v17216_v48 = vld [vmem:[#allocation11 + $0x154] sm:$0xf] }
 0x6e5   : > { %8239 = vmatpush.bf16.msra.mxu2 %v14810_v50  ;;  %v14898_v50 = vor.u32 %v17216_v48, %v14895_v55 }
 0x6e7   : > { %v7616_v11 = vpop.f32.mrf.mxu0  ;;  %8639 = vmatpush.bf16.msra.mxu0 %v14898_v50  ;;  %v17207_v50 = vld [vmem:[#allocation11 + $0x104] sm:$0xf0] }
 0x6e8   : > { %v7617_v17 = vadd.f32 %v7616_v11, %v7598_v20 }
 0x6e9   : > { %8240 = vmatpush.bf16.msra.mxu2 %v14802_v54 }
 0x6eb   : > { %v20358_v51 = vpop.f32.mrf.mxu3 }
 0x6ed   : > { %8241 = vmatpush.bf16.msra.mxu2 %v14794_v33  ;;  %v14887_v33 = vld [vmem:[#allocation11 + $0x148] sm:$0xf0] }
 0x6ef   : > { %v20340_v45 = vpop.f32.mrf.mxu0 }
 0x6f0   : > { %8166 = vmatmul.bf16.vlgmr.msrb.gmra.mxu2 %v20315_v9 }
 0x6f3   : > { %v8129_v8 = vpop.f32.mrf.mxu3 }
 0x6f4   : > { %v8130_v7 = vadd.f32 %v8129_v8, %v8110_v61  ;;  %v17213_v8 = vld [vmem:[#allocation11 + $0x134] sm:$0xf0]  ;;  %v17212_v61 = vld [vmem:[#allocation11 + $0x134] sm:$0xf] }
 0x6f7   : > { %v7687_v63 = vpop.f32.mrf.mxu0 }
 0x6f8   : > { %v7688_v0 = vadd.f32 %v7687_v63, %v7669_v57  ;;  %v21243_v57 = vlaneseq }
 0x6fa   : > { %vm20369_vm8 = vcmp.lt.s32.totalorder %v21243_v57, 256  ;;  %v14869_v57 = vld [vmem:[#allocation11 + $0x120] sm:$0xf] }
 0x6fb   : > { %8263 = vst.msk [vmem:[#allocation4] ss:$8 sm:$0x3] %vm20369_vm8, %v21246_v49  ;;  %v8131_v43 = vpop.f32.mrf.mxu3 }
 0x6fc   : > { %8266 = vst.msk [vmem:[#allocation4 + $0x41] ss:$8 sm:$0x3] %vm20369_vm8, %v21246_v49 }
 0x6fd   : > { %9238 = vst.msk [vmem:[#allocation5] ss:$8 sm:$0x3] %vm20369_vm8, %v21246_v49 }
 0x6fe   : > { %9241 = vst.msk [vmem:[#allocation5 + $0x41] ss:$8 sm:$0x3] %vm20369_vm8, %v21246_v49 }
 0x6ff   : > { %v20343_v39 = vpop.f32.mrf.mxu0 }
 0x700   : > { %8171 = vmatmul.bf16.gmra.mxu2 %v20324_v4 }
 0x703   : > { %v8134_v54 = vpop.f32.mrf.mxu3 }
 0x707   : > { %v7692_v62 = vpop.f32.mrf.mxu0 }
 0x708   : > { %v7693_v22 = vadd.f32 %v7692_v62, %v7674_v34  ;;  %v14894_v34 = vor.u32 %v17217_v26, %v14893_v1  ;;  %v14890_v62 = vor.u32 %v17214_v41, %v14887_v33  ;;  %v14863_v1 = vld [vmem:[#allocation11 + $0x118] sm:$0xf0]  ;;  %v14855_v41 = vld [vmem:[#allocation11 + $0x108] sm:$0xf0] }
 0x70a   : > { %8601 = vmatpush.bf16.msra.mxu1 %v14894_v34  ;;  %8640 = vmatpush.bf16.msra.mxu0 %v14890_v62  ;;  %v17237_v62 = vld [vmem:[#allocation11 + $0x1f4] sm:$0xf0] }
 0x70b   : > { %v8136_v19 = vpop.f32.mrf.mxu3 }
 0x710   : > { %8242 = vmatmul.bf16.vlgmr.msra.gmra.mxu2 %v20315_v9  ;;  %v20362_v9 = vpop.f32.mrf.mxu0 }
 0x718   : > { %v8148_v24 = vpop.f32.mrf.mxu0 }
 0x719   : > { %v8149_v11 = vadd.f32 %v8148_v24, %v8130_v7  ;;  %v14853_v7 = vld [vmem:[#allocation11 + $0x100] sm:$0xf] }
 0x720   : > { %8247 = vmatmul.bf16.gmra.mxu2 %v20324_v4  ;;  %v8150_v29 = vpop.f32.mrf.mxu0 }
 0x733   : > { %v7630_v32 = vpop.f32.mrf.mxu2 }
 0x734   : > { %v20348_v6 = vadd.f32 %v7630_v32, %v7612_v2  ;;  %v8112_v2 = vpop.f32.mrf.mxu1  ;;  %v7595_v32 = vadd.f32 %v20321_v31, %v20317_v44  ;;  %v14870_v31 = vor.u32 %v17211_v12, %v14869_v57 }
 0x735   : > { %v8132_v46 = vadd.f32 %v8131_v43, %v8112_v2 }
 0x736   : > { %v7614_v27 = vadd.f32 %v20337_v38, %v7595_v32  ;;  %v17209_v38 = vld [vmem:[#allocation11 + $0x114] sm:$0xf0]  ;;  %v8205_v32 = vpop.f32.mrf.mxu3 }
 0x737   : > { %v8151_v58 = vadd.f32 %v8150_v29, %v8132_v46  ;;  %v17208_v29 = vld [vmem:[#allocation11 + $0x114] sm:$0xf]  ;;  %v14862_v30 = vor.u32 %v17209_v38, %v14861_v28  ;;  %v17187_v38 = vld [vmem:[#allocation11 + $0x64] sm:$0xf0] }
 0x738   : > { %v14866_v34 = vor.u32 %v17208_v29, %v14863_v1  ;;  %v15031_v29 = vld [vmem:[#allocation11 + $0x68] sm:$0xf0] }
 0x73b   : > { %v20350_v36 = vpop.f32.mrf.mxu2 }
 0x73c   : > { %v8115_v63 = vpop.f32.mrf.mxu1  ;;  %v7633_v49 = vadd.f32 %v20350_v36, %v7614_v27 }
 0x73d   : > { %v8135_v26 = vadd.f32 %v8134_v54, %v8115_v63  ;;  %v7600_v54 = vadd.f32 %v20330_v47, %v20327_v35  ;;  %v15039_v47 = vld [vmem:[#allocation11 + $0x78] sm:$0xf0] }
 0x743   : > { %v7635_v18 = vpop.f32.mrf.mxu2 }
 0x744   : > { %v20352_v42 = vadd.f32 %v7635_v18, %v7617_v17  ;;  %v14885_v17 = vld [vmem:[#allocation11 + $0x140] sm:$0xf]  ;;  %v8117_v43 = vpop.f32.mrf.mxu1 }
 0x745   : > { %v14886_v53 = vor.u32 %v17215_v16, %v14885_v17  ;;  %v14854_v16 = vor.u32 %v17207_v50, %v14853_v7  ;;  %v17232_v7 = vld [vmem:[#allocation11 + $0x1d4] sm:$0xf] }
 0x747   : > { %8602 = vmatpush.bf16.msra.mxu1 %v14886_v53 }
 0x74b   : > { %v20354_v20 = vpop.f32.mrf.mxu2 }
 0x753   : > { %v7706_v40 = vpop.f32.mrf.mxu2 }
 0x754   : > { %v20356_v13 = vadd.f32 %v7706_v40, %v7688_v0  ;;  %v14877_v40 = vld [vmem:[#allocation11 + $0x130] sm:$0xf] }
 0x755   : > { %v14878_v24 = vor.u32 %v17213_v8, %v14877_v40  ;;  %v14975_v40 = vld [vmem:[#allocation11 + $0x1f8] sm:$0xf0]  ;;  %v15037_v8 = vld [vmem:[#allocation11 + $0x70] sm:$0xf] }
 0x757   : > { %8603 = vmatpush.bf16.msra.mxu1 %v14878_v24  ;;  %v8137_v24 = vadd.f32 %v8136_v19, %v8117_v43  ;;  %v15029_v19 = vld [vmem:[#allocation11 + $0x60] sm:$0xf] }
 0x75b   : > { %v20364_v4 = vpop.f32.mrf.mxu2  ;;  %8604 = vmatpush.bf16.msra.mxu1 %v14870_v31  ;;  %v14965_v31 = vld [vmem:[#allocation11 + $0x1e0] sm:$0xf] }
 0x75f   : > { %8605 = vmatpush.bf16.msra.mxu1 %v14862_v30  ;;  %v15030_v30 = vor.u32 %v17187_v38, %v15029_v19  ;;  %v14943_v38 = vld [vmem:[#allocation11 + $0x1b8] sm:$0xf0] }
 0x763   : > { %v7711_v60 = vpop.f32.mrf.mxu2  ;;  %8606 = vmatpush.bf16.msra.mxu1 %v14854_v16 }
 0x764   : > { %v20366_v15 = vadd.f32 %v7711_v60, %v7693_v22  ;;  %v8153_v22 = vpop.f32.mrf.mxu0  ;;  %v14879_v60 = vld [vmem:[#allocation11 + $0x138] sm:$0xf0] }
 0x765   : > { %v14882_v59 = vor.u32 %v17212_v61, %v14879_v60  ;;  %v8154_v55 = vadd.f32 %v8153_v22, %v8135_v26  ;;  %v17236_v22 = vld [vmem:[#allocation11 + $0x1f4] sm:$0xf]  ;;  %v8186_v61 = vpop.f32.mrf.mxu1 }
 0x766   : > { %v14978_v46 = vor.u32 %v17236_v22, %v14975_v40  ;;  %v8206_v16 = vadd.f32 %v8205_v32, %v8186_v61  ;;  %v17231_v32 = vld [vmem:[#allocation11 + $0x1c4] sm:$0xf0] }
 0x767   : > { %8641 = vmatpush.bf16.msra.mxu0 %v14882_v59  ;;  %v17188_v59 = vld [vmem:[#allocation11 + $0x74] sm:$0xf] }
 0x768   : > { %8656 = vmatpush.bf16.msrb.mxu2 %v14978_v46 }
 0x76b   : > { %v20379_v5 = vpop.f32.mrf.mxu2 }
 0x76c   : > { %v8155_v3 = vpop.f32.mrf.mxu0 }
 0x76d   : > { %v8156_v57 = vadd.f32 %v8155_v3, %v8137_v24  ;;  %v14949_v24 = vld [vmem:[#allocation11 + $0x1c0] sm:$0xf] }
 0x773   : > { %v8167_v23 = vpop.f32.mrf.mxu2 }
 0x774   : > { %v8168_v0 = vadd.f32 %v8167_v23, %v8149_v11  ;;  %v17206_v11 = vld [vmem:[#allocation11 + $0x104] sm:$0xf]  ;;  %v8224_v27 = vpop.f32.mrf.mxu0 }
 0x775   : > { %v14858_v53 = vor.u32 %v17206_v11, %v14855_v41  ;;  %v15021_v11 = vld [vmem:[#allocation11 + $0x50] sm:$0xf]  ;;  %v8225_v40 = vadd.f32 %v8224_v27, %v8206_v16  ;;  %v15013_v27 = vld [vmem:[#allocation11 + $0x40] sm:$0xf] }
 0x776   : > { %v8253_v18 = vmax.f32 %v20348_v6, %v8168_v0  ;;  %v17210_v6 = vld [vmem:[#allocation11 + $0x124] sm:$0xf]  ;;  %v14973_v0 = vld [vmem:[#allocation11 + $0x1f0] sm:$0xf] }
 0x777   : > { %v14874_v56 = vor.u32 %v17210_v6, %v14871_v52  ;;  %v17235_v6 = vld [vmem:[#allocation11 + $0x1e4] sm:$0xf0]  ;;  %v17234_v52 = vld [vmem:[#allocation11 + $0x1e4] sm:$0xf] }
 0x778   : > { %v8276_v21 = vrot.slane %v8253_v18, 7  ;;  %v14974_v18 = vor.u32 %v17237_v62, %v14973_v0 }
 0x779   : > { %8642 = vmatpush.bf16.msra.mxu0 %v14874_v56  ;;  %v14967_v56 = vld [vmem:[#allocation11 + $0x1e8] sm:$0xf0] }
 0x77a   : > { %8300 = vst [vmem:[#allocation4] sm:$0xfe] %v8276_v21  ;;  %8618 = vmatpush.bf16.msra.mxu3 %v14974_v18  ;;  %v14970_v28 = vor.u32 %v17234_v52, %v14967_v56  ;;  %v8188_v18 = vpop.f32.mrf.mxu1 }
 0x77b   : > { %v8169_v44 = vpop.f32.mrf.mxu2 }
 0x77c   : > { %v8170_v10 = vadd.f32 %v8169_v44, %v8151_v58  ;;  %v15042_v44 = vor.u32 %v17188_v59, %v15039_v47  ;;  %8657 = vmatpush.bf16.msrb.mxu2 %v14970_v28  ;;  %v8226_v61 = vpop.f32.mrf.mxu0  ;;  %v17230_v47 = vld [vmem:[#allocation11 + $0x1c4] sm:$0xf]  ;;  %v17228_v28 = vld [vmem:[#allocation11 + $0x1b4] sm:$0xf] }
 0x77d   : > { %8643 = vmatpush.bf16.msra.mxu0 %v14866_v34  ;;  %v14957_v34 = vld [vmem:[#allocation11 + $0x1d0] sm:$0xf] }
 0x77e   : > { %v8255_v2 = vmax.f32 %v7633_v49, %v8170_v10  ;;  %v14966_v10 = vor.u32 %v17235_v6, %v14965_v31  ;;  %v17183_v31 = vld [vmem:[#allocation11 + $0x44] sm:$0xf0] }
 0x77f   : > { %v15014_v52 = vor.u32 %v17183_v31, %v15013_v27  ;;  %v14989_v31 = vld [vmem:[#allocation11 + $0x10] sm:$0xf] }
 0x780   : > { %v8278_v48 = vrot.slane %v8255_v2, 7  ;;  %8619 = vmatpush.bf16.msra.mxu3 %v14966_v10  ;;  %v14941_v10 = vld [vmem:[#allocation11 + $0x1b0] sm:$0xf] }
 0x781   : > { %v8354_v33 = vld [vmem:[#allocation4] sm:$0xfe]  ;;  %8644 = vmatpush.bf16.msra.mxu0 %v14858_v53 }
 0x782   : > { %v20393_v36 = vsel %vm739_vm0, %v8276_v21, %v8278_v48  ;;  %v17189_v21 = vld [vmem:[#allocation11 + $0x74] sm:$0xf0]  ;;  %v8911_v26 = vld [vmem:[#allocation4] sm:$0xfc] }
 0x783   : > { %v8172_v17 = vpop.f32.mrf.mxu2  ;;  %v20399_v58 = vpack.c.bf16 %v20393_v36, %v8354_v33  ;;  %v15038_v35 = vor.u32 %v17189_v21, %v15037_v8  ;;  %v17184_v33 = vld [vmem:[#allocation11 + $0x54] sm:$0xf]  ;;  %v8915_v22 = vpack.c.bf16 %v20393_v36, %v8911_v26 }
 0x784   : > { %v8173_v23 = vadd.f32 %v8172_v17, %v8154_v55  ;;  %v17233_v55 = vld [vmem:[#allocation11 + $0x1d4] sm:$0xf0] }
 0x785   : > { %8835 = vmatpush.bf16.msrb.mxu1 %v15038_v35  ;;  %8873 = vmatpush.bf16.msrb.mxu0 %v15042_v44  ;;  %v8398_v3 = vshll.u32 %v20399_v58, 16  ;;  %v14958_v50 = vor.u32 %v17233_v55, %v14957_v34  ;;  %v17185_v17 = vld [vmem:[#allocation11 + $0x54] sm:$0xf0]  ;;  %v8396_v59 = vshrl.u32 %v20399_v58, 16  ;;  %v14950_v35 = vor.u32 %v17231_v32, %v14949_v24  ;;  %v14999_v32 = vld [vmem:[#allocation11 + $0x28] sm:$0xf0] }
 0x786   : > { %v8257_v63 = vmax.f32 %v20352_v42, %v8173_v23  ;;  %v7619_v42 = vadd.f32 %v20340_v45, %v7600_v54  ;;  %v17186_v45 = vld [vmem:[#allocation11 + $0x64] sm:$0xf]  ;;  %v15022_v53 = vor.u32 %v17185_v17, %v15021_v11  ;;  %v15023_v54 = vld [vmem:[#allocation11 + $0x58] sm:$0xf0]  ;;  %v7671_v58 = vadd.f32 %v20335_v14, %v20333_v37  ;;  %v17180_v14 = vld [vmem:[#allocation11 + $0x34] sm:$0xf] }
 0x787   : > { %v15034_v1 = vor.u32 %v17186_v45, %v15031_v29  ;;  %v8400_v0 = vrot.slane %v8398_v3, 1  ;;  %8620 = vmatpush.bf16.msra.mxu3 %v14958_v50  ;;  %v15026_v62 = vor.u32 %v17184_v33, %v15023_v54  ;;  %v14946_v3 = vor.u32 %v17228_v28, %v14943_v38  ;;  %v17227_v11 = vld [vmem:[#allocation11 + $0x1a4] sm:$0xf0]  ;;  %v14935_v33 = vld [vmem:[#allocation11 + $0x1a8] sm:$0xf0] }
 0x788   : > { %v8282_v60 = vrot.slane %v8257_v63, 7  ;;  %v7638_v43 = vadd.f32 %v20354_v20, %v7619_v42  ;;  %v14959_v20 = vld [vmem:[#allocation11 + $0x1d8] sm:$0xf0]  ;;  %v8207_v63 = vpop.f32.mrf.mxu3  ;;  %v14951_v42 = vld [vmem:[#allocation11 + $0x1c8] sm:$0xf0]  ;;  %v7690_v16 = vadd.f32 %v20343_v39, %v7671_v58 }
 0x789   : > { %8836 = vmatpush.bf16.msrb.mxu1 %v15030_v30  ;;  %8874 = vmatpush.bf16.msrb.mxu0 %v15034_v1  ;;  %v14962_v23 = vor.u32 %v17232_v7, %v14959_v20  ;;  %v14954_v44 = vor.u32 %v17230_v47, %v14951_v42  ;;  %v8401_v19 = vor.u32 %v8400_v0, %v8396_v59  ;;  %v15005_v30 = vld [vmem:[#allocation11 + $0x30] sm:$0xf]  ;;  %v17181_v1 = vld [vmem:[#allocation11 + $0x34] sm:$0xf0]  ;;  %v14933_v20 = vld [vmem:[#allocation11 + $0x1a0] sm:$0xf]  ;;  %v8229_v59 = vpop.f32.mrf.mxu0 }
 0x78a   : > { %v8283_v12 = vsel %vm739_vm0, %v8278_v48, %v8282_v60  ;;  %v15006_v37 = vor.u32 %v17181_v1, %v15005_v30  ;;  %v17225_v47 = vld [vmem:[#allocation11 + $0x194] sm:$0xf0]  ;;  %v17224_v42 = vld [vmem:[#allocation11 + $0x194] sm:$0xf]  ;;  %v14919_v38 = vld [vmem:[#allocation11 + $0x188] sm:$0xf0] }
 0x78b   : > { %v8174_v49 = vpop.f32.mrf.mxu2  ;;  %8658 = vmatpush.bf16.msrb.mxu2 %v14962_v23  ;;  %8621 = vmatpush.bf16.msra.mxu3 %v14950_v35  ;;  %v14934_v23 = vor.u32 %v17227_v11, %v14933_v20 }
 0x78c   : > { %v8175_v2 = vadd.f32 %v8174_v49, %v8156_v57  ;;  %v15015_v49 = vld [vmem:[#allocation11 + $0x48] sm:$0xf0] }
 0x78d   : > { %8837 = vmatpush.bf16.msrb.mxu1 %v15022_v53  ;;  %8875 = vmatpush.bf16.msrb.mxu0 %v15026_v62  ;;  %v17226_v53 = vld [vmem:[#allocation11 + $0x1a4] sm:$0xf]  ;;  %v14997_v62 = vld [vmem:[#allocation11 + $0x20] sm:$0xf] }
 0x78e   : > { %v8259_v48 = vmax.f32 %v7638_v43, %v8175_v2  ;;  %v17229_v2 = vld [vmem:[#allocation11 + $0x1b4] sm:$0xf0]  ;;  %v14938_v0 = vor.u32 %v17226_v53, %v14935_v33  ;;  %v15165_v53 = vld [vmem:[#allocation11 + $0x270] sm:$0xf] }
 0x78f   : > { %8659 = vmatpush.bf16.msrb.mxu2 %v14954_v44  ;;  %v14942_v29 = vor.u32 %v17229_v2, %v14941_v10  ;;  %v14917_v10 = vld [vmem:[#allocation11 + $0x180] sm:$0xf]  ;;  %v17222_v2 = vld [vmem:[#allocation11 + $0x184] sm:$0xf] }
 0x790   : > { %v8286_v41 = vrot.slane %v8259_v48, 7  ;;  %v8208_v48 = vadd.f32 %v8207_v63, %v8188_v18  ;;  %v8210_v54 = vpop.f32.mrf.mxu3  ;;  %v17178_v18 = vld [vmem:[#allocation11 + $0x24] sm:$0xf] }
 0x791   : > { %8838 = vmatpush.bf16.msrb.mxu1 %v15014_v52  ;;  %8622 = vmatpush.bf16.msra.mxu3 %v14942_v29  ;;  %v15002_v35 = vor.u32 %v17178_v18, %v14999_v32  ;;  %v17176_v52 = vld [vmem:[#allocation11 + $0x14] sm:$0xf]  ;;  %v14981_v29 = vld [vmem:[#allocation11] sm:$0xf] }
 0x792   : > { %v8287_v8 = vsel %vm739_vm0, %v8282_v60, %v8286_v41  ;;  %8308 = vst [vmem:[#allocation4 + $0x40] sm:$0x1] %v8286_v41  ;;  %v17182_v60 = vld [vmem:[#allocation11 + $0x44] sm:$0xf]  ;;  %v8227_v41 = vadd.f32 %v8226_v61, %v8208_v48  ;;  %v14925_v61 = vld [vmem:[#allocation11 + $0x190] sm:$0xf] }
 0x793   : > { %v8243_v46 = vpop.f32.mrf.mxu2  ;;  %v20407_v21 = vpack.c.bf16 %v8287_v8, %v8283_v12  ;;  %v8958_v12 = vrot.slane %v8915_v22, 1  ;;  %v15018_v43 = vor.u32 %v17182_v60, %v15015_v49  ;;  %8660 = vmatpush.bf16.msrb.mxu2 %v14946_v3  ;;  %v17179_v22 = vld [vmem:[#allocation11 + $0x24] sm:$0xf0]  ;;  %v14926_v27 = vor.u32 %v17225_v47, %v14925_v61  ;;  %v17177_v60 = vld [vmem:[#allocation11 + $0x14] sm:$0xf0]  ;;  %v8231_v61 = vpop.f32.mrf.mxu0 }
 0x794   : > { %v8244_v57 = vadd.f32 %v8243_v46, %v8225_v40  ;;  %v7709_v40 = vadd.f32 %v20364_v4, %v7690_v16  ;;  %v14998_v24 = vor.u32 %v17179_v22, %v14997_v62  ;;  %v8191_v46 = vpop.f32.mrf.mxu1  ;;  %v14991_v49 = vld [vmem:[#allocation11 + $0x18] sm:$0xf0]  ;;  %v17175_v3 = vld [vmem:[#allocation11 + $0x4] sm:$0xf0]  ;;  %v17174_v48 = vld [vmem:[#allocation11 + $0x4] sm:$0xf] }
 0x795   : > { %v8403_v6 = vshll.u32 %v20407_v21, 16  ;;  %v8959_v26 = vrot.slane %v20407_v21, 1  ;;  %8876 = vmatpush.bf16.msrb.mxu0 %v15018_v43  ;;  %8839 = vmatpush.bf16.msrb.mxu1 %v15006_v37  ;;  %v17223_v43 = vld [vmem:[#allocation11 + $0x184] sm:$0xf0]  ;;  %v14983_v37 = vld [vmem:[#allocation11 + $0x8] sm:$0xf0] }
 0x796   : > { %v8254_v56 = vmax.f32 %v20356_v13, %v8244_v57  ;;  %v15007_v13 = vld [vmem:[#allocation11 + $0x38] sm:$0xf0]  ;;  %8623 = vmatpush.bf16.msra.mxu3 %v14934_v23  ;;  %v14918_v28 = vor.u32 %v17223_v43, %v14917_v10  ;;  %v14986_v11 = vor.u32 %v17174_v48, %v14983_v37  ;;  %v17253_v62 = vld [vmem:[#allocation11 + $0x274] sm:$0xf0]  ;;  %v17252_v22 = vld [vmem:[#allocation11 + $0x274] sm:$0xf] }
 0x797   : > { %v20414_v45 = vrot.slane %v8403_v6, 1  ;;  %v15010_v50 = vor.u32 %v17180_v14, %v15007_v13  ;;  %v20424_v17 = vsel %vm2047_vm6, %v8958_v12, %v8959_v26  ;;  %v14927_v57 = vld [vmem:[#allocation11 + $0x198] sm:$0xf0]  ;;  %8661 = vmatpush.bf16.msrb.mxu2 %v14938_v0  ;;  %v14990_v6 = vor.u32 %v17177_v60, %v14989_v31  ;;  %v15095_v47 = vld [vmem:[#allocation11 + $0xe8] sm:$0xf0] }
 0x798   : > { %v20417_v34 = vrot.slane %v8254_v56, 7  ;;  %v14930_v4 = vor.u32 %v17224_v42, %v14927_v57  ;;  %v8211_v12 = vadd.f32 %v8210_v54, %v8191_v46  ;;  %v14922_v13 = vor.u32 %v17222_v2, %v14919_v38  ;;  %v15103_v23 = vld [vmem:[#allocation11 + $0xf8] sm:$0xf0]  ;;  %v8212_v33 = vpop.f32.mrf.mxu3  ;;  %v15149_v38 = vld [vmem:[#allocation11 + $0x250] sm:$0xf] }
 0x799   : > { %v8406_v55 = vsel %vm938_vm3, %v8401_v19, %v20414_v45  ;;  %v8356_v7 = vld [vmem:[#allocation4 + $0x40] sm:$0x1]  ;;  %8877 = vmatpush.bf16.msrb.mxu0 %v15010_v50  ;;  %8840 = vmatpush.bf16.msrb.mxu1 %v14998_v24  ;;  %v14994_v19 = vor.u32 %v17176_v52, %v14991_v49  ;;  %v17205_v50 = vld [vmem:[#allocation11 + $0xf4] sm:$0xf0]  ;;  %v8419_v54 = vshrl.u32 %v20407_v21, 16 }
 0x79a   : > { %8301 = vst [vmem:[#allocation4 + $0x8] sm:$0xfe] %v20417_v34  ;;  %8607 = vmatmul.bf16.vlgmr.msra.gmra.mxu1 %v8406_v55  ;;  %8645 = vmatmul.bf16.vlgmr.msra.gmra.mxu0 %v8406_v55  ;;  %v8360_v39 = vpack.c.bf16 %v8356_v7, %v8356_v7  ;;  %v8230_v30 = vadd.f32 %v8229_v59, %v8211_v12  ;;  %v15101_v7 = vld [vmem:[#allocation11 + $0xf0] sm:$0xf]  ;;  %v17203_v24 = vld [vmem:[#allocation11 + $0xe4] sm:$0xf0] }
 0x79b   : > { %v8245_v63 = vpop.f32.mrf.mxu2  ;;  %8624 = vmatpush.bf16.msra.mxu3 %v14926_v27  ;;  %8662 = vmatpush.bf16.msrb.mxu2 %v14930_v4  ;;  %v14982_v55 = vor.u32 %v17175_v3, %v14981_v29  ;;  %v15102_v16 = vor.u32 %v17205_v50, %v15101_v7  ;;  %v8421_v46 = vor.u32 %v8419_v54, %v20414_v45  ;;  %v17251_v27 = vld [vmem:[#allocation11 + $0x264] sm:$0xf0]  ;;  %v17250_v4 = vld [vmem:[#allocation11 + $0x264] sm:$0xf]  ;;  %v15085_v52 = vld [vmem:[#allocation11 + $0xd0] sm:$0xf] }
 0x79c   : > { %v8246_v8 = vadd.f32 %v8245_v63, %v8227_v41  ;;  %v8423_v56 = vshll.u32 %v8360_v39, 16  ;;  %v17204_v41 = vld [vmem:[#allocation11 + $0xf4] sm:$0xf]  ;;  %v15093_v39 = vld [vmem:[#allocation11 + $0xe0] sm:$0xf]  ;;  %v8193_v32 = vpop.f32.mrf.mxu1 }
 0x79d   : > { %8878 = vmatpush.bf16.msrb.mxu0 %v15002_v35  ;;  %8841 = vmatpush.bf16.msrb.mxu1 %v14990_v6  ;;  %v15106_v0 = vor.u32 %v17204_v41, %v15103_v23  ;;  %v15094_v59 = vor.u32 %v17203_v24, %v15093_v39  ;;  %v17202_v35 = vld [vmem:[#allocation11 + $0xe4] sm:$0xf]  ;;  %v8213_v42 = vadd.f32 %v8212_v33, %v8193_v32  ;;  %v15159_v6 = vld [vmem:[#allocation11 + $0x268] sm:$0xf0]  ;;  %v15087_v43 = vld [vmem:[#allocation11 + $0xd8] sm:$0xf0] }
 0x79e   : > { %v8256_v44 = vmax.f32 %v7709_v40, %v8246_v8  ;;  %v8425_v63 = vrot.slane %v8423_v56, 1  ;;  %v15166_v40 = vor.u32 %v17253_v62, %v15165_v53  ;;  %v15167_v8 = vld [vmem:[#allocation11 + $0x278] sm:$0xf0]  ;;  %v15162_v12 = vor.u32 %v17250_v4, %v15159_v6  ;;  %v17201_v56 = vld [vmem:[#allocation11 + $0xd4] sm:$0xf0] }
 0x79f   : > { %8625 = vmatpush.bf16.msra.mxu3 %v14918_v28  ;;  %8663 = vmatpush.bf16.msrb.mxu2 %v14922_v13  ;;  %v8232_v49 = vadd.f32 %v8231_v61, %v8213_v42  ;;  %v15086_v28 = vor.u32 %v17201_v56, %v15085_v52  ;;  %v17249_v29 = vld [vmem:[#allocation11 + $0x254] sm:$0xf0]  ;;  %v15151_v37 = vld [vmem:[#allocation11 + $0x258] sm:$0xf0]  ;;  %v17199_v7 = vld [vmem:[#allocation11 + $0xc4] sm:$0xf0] }
 0x7a0   : > { %v20429_v58 = vrot.slane %v8256_v44, 7  ;;  %v15157_v44 = vld [vmem:[#allocation11 + $0x260] sm:$0xf]  ;;  %v8426_v60 = vsel %vm938_vm3, %v8421_v46, %v8425_v63  ;;  %v15150_v13 = vor.u32 %v17249_v29, %v15149_v38  ;;  %v17198_v50 = vld [vmem:[#allocation11 + $0xc4] sm:$0xf] }
 0x7a1   : > { %8879 = vmatpush.bf16.msrb.mxu0 %v14994_v19  ;;  %8842 = vmatpush.bf16.msrb.mxu1 %v14982_v55  ;;  %v15158_v45 = vor.u32 %v17251_v27, %v15157_v44  ;;  %v17200_v19 = vld [vmem:[#allocation11 + $0xd4] sm:$0xf]  ;;  %v17247_v41 = vld [vmem:[#allocation11 + $0x244] sm:$0xf0]  ;;  %v17246_v23 = vld [vmem:[#allocation11 + $0x244] sm:$0xf] }
 0x7a2   : > { %v20434_v1 = vsel %vm739_vm0, %v20417_v34, %v20429_v58  ;;  %v7676_v34 = vadd.f32 %v20358_v51, %v20360_v25  ;;  %v8355_v51 = vld [vmem:[#allocation4 + $0x8] sm:$0xfe]  ;;  %v15170_v25 = vor.u32 %v17252_v22, %v15167_v8  ;;  %v15090_v48 = vor.u32 %v17200_v19, %v15087_v43  ;;  %v15069_v33 = vld [vmem:[#allocation11 + $0xb0] sm:$0xf]  ;;  %v17196_v62 = vld [vmem:[#allocation11 + $0xb4] sm:$0xf] }
 0x7a3   : > { %v8248_v14 = vpop.f32.mrf.mxu2  ;;  %8854 = vmatpush.bf16.msrb.mxu3 %v15102_v16  ;;  %8892 = vmatpush.bf16.msra.mxu2 %v15106_v0  ;;  %v20449_v2 = vpack.c.bf16 %v20434_v1, %v8355_v51  ;;  %v15141_v16 = vld [vmem:[#allocation11 + $0x240] sm:$0xf]  ;;  %v17197_v0 = vld [vmem:[#allocation11 + $0xb4] sm:$0xf0]  ;;  %v15133_v8 = vld [vmem:[#allocation11 + $0x230] sm:$0xf] }
 0x7a4   : > { %v8249_v20 = vadd.f32 %v8248_v14, %v8230_v30  ;;  %v7695_v31 = vadd.f32 %v20362_v9, %v7676_v34  ;;  %v15077_v14 = vld [vmem:[#allocation11 + $0xc0] sm:$0xf]  ;;  %v15143_v34 = vld [vmem:[#allocation11 + $0x248] sm:$0xf0]  ;;  %v15142_v22 = vor.u32 %v17247_v41, %v15141_v16  ;;  %v17245_v39 = vld [vmem:[#allocation11 + $0x234] sm:$0xf0] }
 0x7a5   : > { %8880 = vmatpush.bf16.msrb.mxu0 %v14986_v11  ;;  %9132 = vmatpush.bf16.msra.mxu1 %v15166_v40  ;;  %v8410_v53 = vshll.u32 %v20449_v2, 16  ;;  %v15071_v40 = vld [vmem:[#allocation11 + $0xb8] sm:$0xf0]  ;;  %v17244_v32 = vld [vmem:[#allocation11 + $0x234] sm:$0xf]  ;;  %v8408_v44 = vshrl.u32 %v20449_v2, 16 }
 0x7a6   : > { %v8258_v18 = vmax.f32 %v20366_v15, %v8249_v20  ;;  %v15098_v15 = vor.u32 %v17202_v35, %v15095_v47  ;;  %v7714_v3 = vadd.f32 %v20379_v5, %v7695_v31  ;;  %v15079_v20 = vld [vmem:[#allocation11 + $0xc8] sm:$0xf0]  ;;  %v15078_v5 = vor.u32 %v17199_v7, %v15077_v14  ;;  %v15135_v61 = vld [vmem:[#allocation11 + $0x238] sm:$0xf0]  ;;  %v15061_v47 = vld [vmem:[#allocation11 + $0xa0] sm:$0xf] }
 0x7a7   : > { %8855 = vmatpush.bf16.msrb.mxu3 %v15094_v59  ;;  %v15082_v63 = vor.u32 %v17198_v50, %v15079_v20  ;;  %v8412_v51 = vrot.slane %v8410_v53, 1  ;;  %v15070_v59 = vor.u32 %v17197_v0, %v15069_v33  ;;  %v15074_v35 = vor.u32 %v17196_v62, %v15071_v40  ;;  %v17195_v42 = vld [vmem:[#allocation11 + $0xa4] sm:$0xf0]  ;;  %v17242_v6 = vld [vmem:[#allocation11 + $0x224] sm:$0xf] }
 0x7a8   : > { %v20441_v57 = vrot.slane %v8258_v18, 7  ;;  %8893 = vmatpush.bf16.msra.mxu2 %v15098_v15  ;;  %v15146_v18 = vor.u32 %v17246_v23, %v15143_v34  ;;  %v17194_v15 = vld [vmem:[#allocation11 + $0xa4] sm:$0xf]  ;;  %v15138_v31 = vor.u32 %v17244_v32, %v15135_v61  ;;  %v17243_v4 = vld [vmem:[#allocation11 + $0x224] sm:$0xf0]  ;;  %v15062_v56 = vor.u32 %v17195_v42, %v15061_v47 }
 0x7a9   : > { %9170 = vmatpush.bf16.msra.mxu0 %v15170_v25  ;;  %9133 = vmatpush.bf16.msra.mxu1 %v15158_v45  ;;  %v8310_v25 = vld [vmem:[#allocation4] sm:$0xff]  ;;  %v15127_v52 = vld [vmem:[#allocation11 + $0x228] sm:$0xf0]  ;;  %v15053_v43 = vld [vmem:[#allocation11 + $0x90] sm:$0xf] }
 0x7aa   : > { %v8285_v10 = vsel %vm739_vm0, %v20429_v58, %v20441_v57  ;;  %8612 = vmatmul.bf16.gmra.mxu1 %v8426_v60  ;;  %8650 = vmatmul.bf16.gmra.mxu0 %v8426_v60  ;;  %v17248_v58 = vld [vmem:[#allocation11 + $0x254] sm:$0xf]  ;;  %v15063_v60 = vld [vmem:[#allocation11 + $0xa8] sm:$0xf0]  ;;  %v15125_v45 = vld [vmem:[#allocation11 + $0x220] sm:$0xf]  ;;  %v15130_v29 = vor.u32 %v17242_v6, %v15127_v52 }
 0x7ab   : > { %v8250_v9 = vpop.f32.mrf.mxu2  ;;  %v15154_v55 = vor.u32 %v17248_v58, %v15151_v37  ;;  %8856 = vmatpush.bf16.msrb.mxu3 %v15086_v28  ;;  %v15066_v19 = vor.u32 %v17194_v15, %v15063_v60  ;;  %v17192_v2 = vld [vmem:[#allocation11 + $0x94] sm:$0xf]  ;;  %v15126_v38 = vor.u32 %v17243_v4, %v15125_v45  ;;  %v15119_v37 = vld [vmem:[#allocation11 + $0x218] sm:$0xf0]  ;;  %v17191_v7 = vld [vmem:[#allocation11 + $0x84] sm:$0xf0] }
 0x7ac   : > { %v8251_v30 = vadd.f32 %v8250_v9, %v8232_v49  ;;  %8894 = vmatpush.bf16.msra.mxu2 %v15090_v48  ;;  %v8413_v49 = vor.u32 %v8412_v51, %v8408_v44  ;;  %v17193_v9 = vld [vmem:[#allocation11 + $0x94] sm:$0xf0]  ;;  %v17190_v50 = vld [vmem:[#allocation11 + $0x84] sm:$0xf]  ;;  %v15047_v41 = vld [vmem:[#allocation11 + $0x88] sm:$0xf0] }
 0x7ad   : > { %9171 = vmatpush.bf16.msra.mxu0 %v15162_v12  ;;  %9134 = vmatpush.bf16.msra.mxu1 %v15150_v13  ;;  %v8318_v12 = vpack.c.bf16 %v20393_v36, %v8310_v25  ;;  %v17241_v48 = vld [vmem:[#allocation11 + $0x214] sm:$0xf0]  ;;  %v17240_v36 = vld [vmem:[#allocation11 + $0x214] sm:$0xf]  ;;  %v15054_v14 = vor.u32 %v17193_v9, %v15053_v43  ;;  %v15109_v23 = vld [vmem:[#allocation11 + $0x200] sm:$0xf] }
 0x7ae   : > { %v8260_v11 = vmax.f32 %v7714_v3, %v8251_v30  ;;  %v15055_v3 = vld [vmem:[#allocation11 + $0x98] sm:$0xf0]  ;;  %v15117_v30 = vld [vmem:[#allocation11 + $0x210] sm:$0xf]  ;;  %v15122_v16 = vor.u32 %v17240_v36, %v15119_v37  ;;  %v17239_v53 = vld [vmem:[#allocation11 + $0x204] sm:$0xf0] }
 0x7af   : > { %8857 = vmatpush.bf16.msrb.mxu3 %v15078_v5  ;;  %v15058_v13 = vor.u32 %v17192_v2, %v15055_v3  ;;  %v17238_v5 = vld [vmem:[#allocation11 + $0x204] sm:$0xf]  ;;  %v15111_v34 = vld [vmem:[#allocation11 + $0x208] sm:$0xf0]  ;;  %v15229_v33 = vld [vmem:[#allocation11 + $0x2f0] sm:$0xf]  ;;  %v15110_v40 = vor.u32 %v17239_v53, %v15109_v23 }
 0x7b0   : > { %v8288_v54 = vrot.slane %v8260_v11, 7  ;;  %8895 = vmatpush.bf16.msra.mxu2 %v15082_v63  ;;  %v15118_v11 = vor.u32 %v17241_v48, %v15117_v30  ;;  %v17268_v63 = vld [vmem:[#allocation11 + $0x2f4] sm:$0xf]  ;;  %v15231_v0 = vld [vmem:[#allocation11 + $0x2f8] sm:$0xf0]  ;;  %v8311_v48 = vld [vmem:[#allocation4 + $0x8] sm:$0xff] }
 0x7b1   : > { %9172 = vmatpush.bf16.msra.mxu0 %v15154_v55  ;;  %9135 = vmatpush.bf16.msra.mxu1 %v15142_v22  ;;  %v15045_v55 = vld [vmem:[#allocation11 + $0x80] sm:$0xf]  ;;  %v15050_v22 = vor.u32 %v17190_v50, %v15047_v41  ;;  %v8912_v32 = vld [vmem:[#allocation4 + $0x8] sm:$0xfc]  ;;  %v17266_v42 = vld [vmem:[#allocation11 + $0x2e4] sm:$0xf] }
 0x7b2   : > { %v8289_v24 = vsel %vm739_vm0, %v20441_v57, %v8288_v54  ;;  %8309 = vst [vmem:[#allocation4 + $0x48] sm:$0x1] %v8288_v54  ;;  %v15134_v57 = vor.u32 %v17245_v39, %v15133_v8  ;;  %v17269_v54 = vld [vmem:[#allocation11 + $0x2f4] sm:$0xf0]  ;;  %v15046_v62 = vor.u32 %v17191_v7, %v15045_v55  ;;  %v15114_v8 = vor.u32 %v17238_v5, %v15111_v34  ;;  %v15223_v15 = vld [vmem:[#allocation11 + $0x2e8] sm:$0xf0] }
 0x7b3   : > { %v20455_v46 = vpack.c.bf16 %v8289_v24, %v8285_v10  ;;  %8858 = vmatpush.bf16.msrb.mxu3 %v15070_v59  ;;  %v15230_v39 = vor.u32 %v17269_v54, %v15229_v33  ;;  %v15234_v24 = vor.u32 %v17268_v63, %v15231_v0  ;;  %v8916_v61 = vpack.c.bf16 %v20434_v1, %v8912_v32  ;;  %v15221_v59 = vld [vmem:[#allocation11 + $0x2e0] sm:$0xf]  ;;  %v15213_v45 = vld [vmem:[#allocation11 + $0x2d0] sm:$0xf]  ;;  %v17265_v6 = vld [vmem:[#allocation11 + $0x2d4] sm:$0xf0] }
 0x7b4   : > { %8896 = vmatpush.bf16.msra.mxu2 %v15074_v35  ;;  %v17267_v35 = vld [vmem:[#allocation11 + $0x2e4] sm:$0xf0]  ;;  %v15226_v60 = vor.u32 %v17266_v42, %v15223_v15  ;;  %v17264_v52 = vld [vmem:[#allocation11 + $0x2d4] sm:$0xf]  ;;  %v17262_v43 = vld [vmem:[#allocation11 + $0x2c4] sm:$0xf]  ;;  %v8319_v7 = vpack.c.bf16 %v20434_v1, %v8311_v48 }
 0x7b5   : > { %v8415_v27 = vshll.u32 %v20455_v46, 16  ;;  %9173 = vmatpush.bf16.msra.mxu0 %v15146_v18  ;;  %9136 = vmatpush.bf16.msra.mxu1 %v15134_v57  ;;  %v8962_v51 = vrot.slane %v20455_v46, 1  ;;  %v8427_v25 = vshrl.u32 %v20455_v46, 16  ;;  %v8961_v44 = vrot.slane %v8916_v61, 1  ;;  %v15207_v9 = vld [vmem:[#allocation11 + $0x2c8] sm:$0xf0] }
 0x7b6   : > { %v17260_v3 = vld [vmem:[#allocation11 + $0x2b4] sm:$0xf]  ;;  %v15199_v30 = vld [vmem:[#allocation11 + $0x2b8] sm:$0xf0]  ;;  %v15189_v37 = vld [vmem:[#allocation11 + $0x2a0] sm:$0xf] }
 0x7b7   : > { %v20459_v10 = vrot.slane %v8415_v27, 1  ;;  %8859 = vmatpush.bf16.msrb.mxu3 %v15062_v56  ;;  %v20471_v57 = vsel %vm2047_vm6, %v8961_v44, %v8962_v51  ;;  %v15205_v56 = vld [vmem:[#allocation11 + $0x2c0] sm:$0xf]  ;;  %v15202_v36 = vor.u32 %v17260_v3, %v15199_v30  ;;  %v15191_v55 = vld [vmem:[#allocation11 + $0x2a8] sm:$0xf0] }
 0x7b8   : > { %8897 = vmatpush.bf16.msra.mxu2 %v15066_v19  ;;  %v17263_v19 = vld [vmem:[#allocation11 + $0x2c4] sm:$0xf0]  ;;  %v17256_v41 = vld [vmem:[#allocation11 + $0x294] sm:$0xf]  ;;  %v15183_v23 = vld [vmem:[#allocation11 + $0x298] sm:$0xf0] }
 0x7b9   : > { %v8418_v28 = vsel %vm938_vm3, %v8413_v49, %v20459_v10  ;;  %9174 = vmatpush.bf16.msra.mxu0 %v15138_v31  ;;  %v8357_v58 = vld [vmem:[#allocation4 + $0x48] sm:$0x1]  ;;  %9137 = vmatpush.bf16.msra.mxu1 %v15126_v38  ;;  %v8429_v27 = vor.u32 %v8427_v25, %v20459_v10  ;;  %v15222_v31 = vor.u32 %v17267_v35, %v15221_v59  ;;  %v15215_v49 = vld [vmem:[#allocation11 + $0x2d8] sm:$0xf0]  ;;  %v15197_v38 = vld [vmem:[#allocation11 + $0x2b0] sm:$0xf] }
 0x7ba   : > { %8626 = vmatmul.bf16.vlgmr.msra.gmra.mxu3 %v8418_v28  ;;  %8664 = vmatmul.bf16.vlgmr.msrb.gmra.mxu2 %v8418_v28  ;;  %v8361_v20 = vpack.c.bf16 %v8357_v58, %v8357_v58  ;;  %v15214_v10 = vor.u32 %v17265_v6, %v15213_v45  ;;  %v15206_v2 = vor.u32 %v17263_v19, %v15205_v56  ;;  %v15173_v34 = vld [vmem:[#allocation11 + $0x280] sm:$0xf]  ;;  %v17255_v1 = vld [vmem:[#allocation11 + $0x284] sm:$0xf0]  ;;  %v17254_v33 = vld [vmem:[#allocation11 + $0x284] sm:$0xf] }
 0x7bb   : > { %8843 = vmatmul.bf16.vlgmr.msrb.gmra.mxu1 %v8318_v12  ;;  %8881 = vmatmul.bf16.vlgmr.msrb.gmra.mxu0 %v8318_v12  ;;  %v15218_v12 = vor.u32 %v17264_v52, %v15215_v49  ;;  %v15210_v28 = vor.u32 %v17262_v43, %v15207_v9  ;;  %v15186_v5 = vor.u32 %v17256_v41, %v15183_v23  ;;  %v15175_v54 = vld [vmem:[#allocation11 + $0x288] sm:$0xf0]  ;;  %v8913_v63 = vld [vmem:[#allocation4 + $0x40] sm:$0x3] }
 0x7bc   : > { %8860 = vmatpush.bf16.msrb.mxu3 %v15054_v14  ;;  %8898 = vmatpush.bf16.msra.mxu2 %v15058_v13  ;;  %v8431_v18 = vshll.u32 %v8361_v20, 16  ;;  %v17259_v14 = vld [vmem:[#allocation11 + $0x2a4] sm:$0xf0]  ;;  %v17258_v13 = vld [vmem:[#allocation11 + $0x2a4] sm:$0xf]  ;;  %v15174_v0 = vor.u32 %v17255_v1, %v15173_v34 }
 0x7bd   : > { %9175 = vmatpush.bf16.msra.mxu0 %v15130_v29  ;;  %9138 = vmatpush.bf16.msra.mxu1 %v15118_v11  ;;  %v17261_v29 = vld [vmem:[#allocation11 + $0x2b4] sm:$0xf0]  ;;  %v15190_v50 = vor.u32 %v17259_v14, %v15189_v37  ;;  %v15194_v20 = vor.u32 %v17258_v13, %v15191_v55  ;;  %v15181_v11 = vld [vmem:[#allocation11 + $0x290] sm:$0xf] }
 0x7be   : > { %v8433_v47 = vrot.slane %v8431_v18, 1  ;;  %v15198_v58 = vor.u32 %v17261_v29, %v15197_v38  ;;  %v15293_v37 = vld [vmem:[#allocation12 + $0x170] sm:$0xf]  ;;  %v17317_v14 = vld [vmem:[#allocation12 + $0x174] sm:$0xf0] }
 0x7bf   : > { %v15357_v13 = vld [vmem:[#allocation12 + $0x1f0] sm:$0xf] }
 0x7c0   : > { %8861 = vmatpush.bf16.msrb.mxu3 %v15046_v62  ;;  %8899 = vmatpush.bf16.msra.mxu2 %v15050_v22  ;;  %v8434_v4 = vsel %vm938_vm3, %v8429_v27, %v8433_v47  ;;  %v15178_v62 = vor.u32 %v17254_v33, %v15175_v54  ;;  %v8917_v22 = vpack.c.bf16 %v8913_v63, %v8913_v63 }
 0x7c1   : > { %9176 = vmatpush.bf16.msra.mxu0 %v15122_v16  ;;  %9139 = vmatpush.bf16.msra.mxu1 %v15110_v40  ;;  %v17257_v16 = vld [vmem:[#allocation11 + $0x294] sm:$0xf0]  ;;  %v8914_v40 = vld [vmem:[#allocation4 + $0x48] sm:$0x3] }
 0x7c2   : > { %v15182_v53 = vor.u32 %v17257_v16, %v15181_v11  ;;  %v8964_v18 = vrot.slane %v8917_v22, 1  ;;  %v17316_v11 = vld [vmem:[#allocation12 + $0x174] sm:$0xf]  ;;  %v15295_v16 = vld [vmem:[#allocation12 + $0x178] sm:$0xf0] }
 0x7c3   : > { %v15298_v23 = vor.u32 %v17316_v11, %v15295_v16  ;;  %v15277_v11 = vld [vmem:[#allocation12 + $0x150] sm:$0xf]  ;;  %v17313_v16 = vld [vmem:[#allocation12 + $0x154] sm:$0xf0] }
 0x7c4   : > { %9151 = vmatpush.bf16.msra.mxu3 %v15230_v39  ;;  %9189 = vmatpush.bf16.msrb.mxu2 %v15234_v24 }
 0x7c5   : > { %9177 = vmatpush.bf16.msra.mxu0 %v15114_v8  ;;  %v8918_v8 = vpack.c.bf16 %v8914_v40, %v8914_v40 }
 0x7c7   : > { %v8966_v39 = vrot.slane %v8918_v8, 1 }
 0x7c8   : > { %9152 = vmatpush.bf16.msra.mxu3 %v15222_v31  ;;  %9190 = vmatpush.bf16.msrb.mxu2 %v15226_v60 }
 0x7c9   : > { %v8967_v24 = vsel %vm2047_vm6, %v8962_v51, %v8966_v39  ;;  %9612 = vmatpush.bf16.msrb.mxu0 %v15298_v23  ;;  %v17329_v23 = vld [vmem:[#allocation12 + $0x1d4] sm:$0xf0] }
 0x7ca   : > { %8631 = vmatmul.bf16.gmra.mxu3 %v8434_v4  ;;  %8669 = vmatmul.bf16.gmra.mxu2 %v8434_v4 }
 0x7cb   : > { %8848 = vmatmul.bf16.gmra.mxu1 %v20407_v21  ;;  %8886 = vmatmul.bf16.gmra.mxu0 %v20407_v21 }
 0x7cc   : > { %9153 = vmatpush.bf16.msra.mxu3 %v15214_v10  ;;  %9191 = vmatpush.bf16.msrb.mxu2 %v15218_v12 }
 0x7d0   : > { %9154 = vmatpush.bf16.msra.mxu3 %v15206_v2  ;;  %9192 = vmatpush.bf16.msrb.mxu2 %v15210_v28 }
 0x7d4   : > { %9155 = vmatpush.bf16.msra.mxu3 %v15198_v58  ;;  %9193 = vmatpush.bf16.msrb.mxu2 %v15202_v36  ;;  %v9216_v36 = vld [vmem:[#allocation17] sm:$0x3] }
 0x7d8   : > { %9156 = vmatpush.bf16.msra.mxu3 %v15190_v50  ;;  %9194 = vmatpush.bf16.msrb.mxu2 %v15194_v20  ;;  %v15294_v50 = vor.u32 %v17317_v14, %v15293_v37  ;;  %v17333_v20 = vld [vmem:[#allocation12 + $0x1f4] sm:$0xf0] }
 0x7d9   : > { %v15358_v41 = vor.u32 %v17333_v20, %v15357_v13  ;;  %v15287_v13 = vld [vmem:[#allocation12 + $0x168] sm:$0xf0] }
 0x7da   : > { %8862 = vmatmul.bf16.vlgmr.msrb.gmra.mxu3 %v8319_v7  ;;  %8900 = vmatmul.bf16.vlgmr.msra.gmra.mxu2 %v8319_v7 }
 0x7db   : > { %9140 = vmatmul.bf16.vlgmr.msra.gmra.mxu1 %v20424_v17  ;;  %9178 = vmatmul.bf16.vlgmr.msra.gmra.mxu0 %v20424_v17  ;;  %v8965_v17 = vsel %vm2047_vm6, %v8959_v26, %v8964_v18  ;;  %v20523_v18 = vperm.slane %v9216_v36, 1 }
 0x7dc   : > { %9157 = vmatpush.bf16.msra.mxu3 %v15182_v53  ;;  %9195 = vmatpush.bf16.msrb.mxu2 %v15186_v5  ;;  %v17332_v53 = vld [vmem:[#allocation12 + $0x1f4] sm:$0xf]  ;;  %v15359_v5 = vld [vmem:[#allocation12 + $0x1f8] sm:$0xf0] }
 0x7dd   : > { %9574 = vmatpush.bf16.msrb.mxu1 %v15294_v50  ;;  %v15362_v63 = vor.u32 %v17332_v53, %v15359_v5  ;;  %v17312_v53 = vld [vmem:[#allocation12 + $0x154] sm:$0xf] }
 0x7e0   : > { %9158 = vmatpush.bf16.msra.mxu3 %v15174_v0  ;;  %9196 = vmatpush.bf16.msrb.mxu2 %v15178_v62  ;;  %v20521_v62 = vperm.slane %v9216_v36, 0 }
 0x7e4   : > { %9593 = vmatpush.bf16.msrb.mxu3 %v15358_v41  ;;  %9631 = vmatpush.bf16.msra.mxu2 %v15362_v63  ;;  %v15341_v41 = vld [vmem:[#allocation12 + $0x1d0] sm:$0xf] }
 0x7ea   : > { %8867 = vmatmul.bf16.gmra.mxu3 %v20455_v46  ;;  %8905 = vmatmul.bf16.gmra.mxu2 %v20455_v46 }
 0x7eb   : > { %9145 = vmatmul.bf16.gmra.mxu1 %v8965_v17  ;;  %9183 = vmatmul.bf16.gmra.mxu0 %v8965_v17 }
 0x7fa   : > { %9159 = vmatmul.bf16.vlgmr.msra.gmra.mxu3 %v20471_v57  ;;  %9197 = vmatmul.bf16.vlgmr.msrb.gmra.mxu2 %v20471_v57 }
 0x80a   : > { %9164 = vmatmul.bf16.gmra.mxu3 %v8967_v24  ;;  %9202 = vmatmul.bf16.gmra.mxu2 %v8967_v24 }
 0x817   : > { %v8608_v32 = vpop.f32.mrf.mxu1  ;;  %v8646_v61 = vpop.f32.mrf.mxu0 }
 0x81f   : > { %v8610_v21 = vpop.f32.mrf.mxu1  ;;  %v8648_v25 = vpop.f32.mrf.mxu0 }
 0x827   : > { %v20489_v26 = vpop.f32.mrf.mxu1  ;;  %v20491_v59 = vpop.f32.mrf.mxu0 }
 0x82f   : > { %v20493_v42 = vpop.f32.mrf.mxu1  ;;  %v20495_v15 = vpop.f32.mrf.mxu0 }
 0x838   : > { %v8844_v57 = vpop.f32.mrf.mxu1  ;;  %v8882_v31 = vpop.f32.mrf.mxu0 }
 0x83d   : > { %v8627_v35 = vpop.f32.mrf.mxu3  ;;  %v8665_v47 = vpop.f32.mrf.mxu2 }
 0x83e   : > { %v8628_v48 = vadd.f32 %v8627_v35, %v8608_v32  ;;  %v8666_v58 = vadd.f32 %v8665_v47, %v8646_v61 }
 0x840   : > { %v8846_v4 = vpop.f32.mrf.mxu1  ;;  %v8884_v6 = vpop.f32.mrf.mxu0  ;;  %v8845_v55 = vadd.f32 %v8844_v57, %v8628_v48  ;;  %v8883_v7 = vadd.f32 %v8882_v31, %v8666_v58  ;;  %v15285_v31 = vld [vmem:[#allocation12 + $0x160] sm:$0xf]  ;;  %v17331_v58 = vld [vmem:[#allocation12 + $0x1e4] sm:$0xf0] }
 0x845   : > { %v8629_v44 = vpop.f32.mrf.mxu3  ;;  %v8667_v46 = vpop.f32.mrf.mxu2 }
 0x846   : > { %v8630_v17 = vadd.f32 %v8629_v44, %v8610_v21  ;;  %v8668_v40 = vadd.f32 %v8667_v46, %v8648_v25  ;;  %v17314_v21 = vld [vmem:[#allocation12 + $0x164] sm:$0xf] }
 0x848   : > { %v20505_v10 = vpop.f32.mrf.mxu1  ;;  %v20507_v12 = vpop.f32.mrf.mxu0  ;;  %v8847_v47 = vadd.f32 %v8846_v4, %v8630_v17  ;;  %v8885_v57 = vadd.f32 %v8884_v6, %v8668_v40  ;;  %v15351_v4 = vld [vmem:[#allocation12 + $0x1e8] sm:$0xf0] }
 0x84d   : > { %v20497_v27 = vpop.f32.mrf.mxu3  ;;  %v20499_v51 = vpop.f32.mrf.mxu2 }
 0x84e   : > { %v8633_v25 = vadd.f32 %v20497_v27, %v20489_v26  ;;  %v8671_v26 = vadd.f32 %v20499_v51, %v20491_v59  ;;  %v15290_v27 = vor.u32 %v17314_v21, %v15287_v13  ;;  %v15343_v59 = vld [vmem:[#allocation12 + $0x1d8] sm:$0xf0]  ;;  %v15269_v51 = vld [vmem:[#allocation12 + $0x140] sm:$0xf]  ;;  %v15335_v21 = vld [vmem:[#allocation12 + $0x1c8] sm:$0xf0] }
 0x850   : > { %v20509_v43 = vpop.f32.mrf.mxu1  ;;  %v20511_v9 = vpop.f32.mrf.mxu0  ;;  %9613 = vmatpush.bf16.msrb.mxu0 %v15290_v27  ;;  %v8850_v17 = vadd.f32 %v20505_v10, %v8633_v25  ;;  %v17326_v10 = vld [vmem:[#allocation12 + $0x1c4] sm:$0xf]  ;;  %v15261_v25 = vld [vmem:[#allocation12 + $0x130] sm:$0xf] }
 0x855   : > { %v20501_v60 = vpop.f32.mrf.mxu3  ;;  %v20503_v45 = vpop.f32.mrf.mxu2 }
 0x858   : > { %v9141_v3 = vpop.f32.mrf.mxu1  ;;  %v9179_v30 = vpop.f32.mrf.mxu0 }
 0x85d   : > { %v8863_v52 = vpop.f32.mrf.mxu3  ;;  %v8901_v49 = vpop.f32.mrf.mxu2 }
 0x85e   : > { %v8864_v34 = vadd.f32 %v8863_v52, %v8845_v55  ;;  %v8902_v1 = vadd.f32 %v8901_v49, %v8883_v7  ;;  %v17315_v52 = vld [vmem:[#allocation12 + $0x164] sm:$0xf0]  ;;  %v15349_v49 = vld [vmem:[#allocation12 + $0x1e0] sm:$0xf]  ;;  %v17330_v55 = vld [vmem:[#allocation12 + $0x1e4] sm:$0xf] }
 0x85f   : > { %v15286_v48 = vor.u32 %v17315_v52, %v15285_v31  ;;  %v15350_v14 = vor.u32 %v17331_v58, %v15349_v49  ;;  %v17310_v52 = vld [vmem:[#allocation12 + $0x144] sm:$0xf]  ;;  %v15271_v49 = vld [vmem:[#allocation12 + $0x148] sm:$0xf0] }
 0x860   : > { %v9143_v8 = vpop.f32.mrf.mxu1  ;;  %v9181_v39 = vpop.f32.mrf.mxu0 }
 0x861   : > { %9575 = vmatpush.bf16.msrb.mxu1 %v15286_v48  ;;  %9594 = vmatpush.bf16.msrb.mxu3 %v15350_v14  ;;  %v17325_v14 = vld [vmem:[#allocation12 + $0x1b4] sm:$0xf0] }
 0x865   : > { %v8865_v56 = vpop.f32.mrf.mxu3  ;;  %v8903_v19 = vpop.f32.mrf.mxu2 }
 0x866   : > { %v8866_v44 = vadd.f32 %v8865_v56, %v8847_v47  ;;  %v8904_v46 = vadd.f32 %v8903_v19, %v8885_v57  ;;  %v15354_v56 = vor.u32 %v17330_v55, %v15351_v4  ;;  %v15278_v19 = vor.u32 %v17313_v16, %v15277_v11  ;;  %v17308_v55 = vld [vmem:[#allocation12 + $0x134] sm:$0xf]  ;;  %v15263_v4 = vld [vmem:[#allocation12 + $0x138] sm:$0xf0] }
 0x867   : > { %v8888_v47 = vadd.f32 %v20507_v12, %v8671_v26  ;;  %v15274_v12 = vor.u32 %v17310_v52, %v15271_v49  ;;  %v17324_v11 = vld [vmem:[#allocation12 + $0x1b4] sm:$0xf]  ;;  %v15327_v16 = vld [vmem:[#allocation12 + $0x1b8] sm:$0xf0]  ;;  %v15253_v26 = vld [vmem:[#allocation12 + $0x120] sm:$0xf] }
 0x868   : > { %9632 = vmatpush.bf16.msra.mxu2 %v15354_v56  ;;  %9576 = vmatpush.bf16.msrb.mxu1 %v15278_v19 }
 0x86d   : > { %v20513_v2 = vpop.f32.mrf.mxu3  ;;  %v20515_v28 = vpop.f32.mrf.mxu2 }
 0x875   : > { %v20517_v38 = vpop.f32.mrf.mxu3  ;;  %v20519_v29 = vpop.f32.mrf.mxu2 }
 0x87d   : > { %v9160_v33 = vpop.f32.mrf.mxu3  ;;  %v9198_v54 = vpop.f32.mrf.mxu2 }
 0x87e   : > { %v9161_v0 = vadd.f32 %v9160_v33, %v9141_v3  ;;  %v9199_v22 = vadd.f32 %v9198_v54, %v9179_v30  ;;  %v15279_v33 = vld [vmem:[#allocation12 + $0x158] sm:$0xf0]  ;;  %v17328_v54 = vld [vmem:[#allocation12 + $0x1d4] sm:$0xf] }
 0x87f   : > { %v15282_v63 = vor.u32 %v17312_v53, %v15279_v33  ;;  %v17323_v53 = vld [vmem:[#allocation12 + $0x1a4] sm:$0xf0]  ;;  %v17306_v33 = vld [vmem:[#allocation12 + $0x124] sm:$0xf] }
 0x880   : > { %v9208_v24 = vadd.f32 %v9161_v0, %v8864_v34  ;;  %v9209_v32 = vadd.f32 %v9199_v22, %v8902_v1  ;;  %v15342_v1 = vor.u32 %v17329_v23, %v15341_v41  ;;  %v9146_v0 = vpop.f32.mrf.mxu1  ;;  %v9184_v22 = vpop.f32.mrf.mxu0  ;;  %v17307_v23 = vld [vmem:[#allocation12 + $0x124] sm:$0xf0] }
 0x881   : > { %9614 = vmatpush.bf16.msrb.mxu0 %v15282_v63 }
 0x882   : > { %v9222_v61 = vadd.f32 %v20521_v62, %v9208_v24  ;;  %v9223_v35 = vadd.f32 %v20523_v18, %v9209_v32  ;;  %v17311_v24 = vld [vmem:[#allocation12 + $0x144] sm:$0xf0]  ;;  %v15333_v32 = vld [vmem:[#allocation12 + $0x1c0] sm:$0xf]  ;;  %9595 = vmatpush.bf16.msrb.mxu3 %v15342_v1  ;;  %v15330_v1 = vor.u32 %v17324_v11, %v15327_v16 }
 0x883   : > { %v15270_v57 = vor.u32 %v17311_v24, %v15269_v51  ;;  %v15319_v51 = vld [vmem:[#allocation12 + $0x1a8] sm:$0xf0] }
 0x884   : > { %v9230_v3 = vmax.f32 %v9222_v61, 0.0  ;;  %v9231_v30 = vmax.f32 %v9223_v35, 0.0  ;;  %v17327_v61 = vld [vmem:[#allocation12 + $0x1c4] sm:$0xf0]  ;;  %v8635_v35 = vadd.f32 %v20501_v60, %v20493_v42 }
 0x885   : > { %v9162_v36 = vpop.f32.mrf.mxu3  ;;  %v9200_v37 = vpop.f32.mrf.mxu2  ;;  %v15334_v31 = vor.u32 %v17327_v61, %v15333_v32  ;;  %9577 = vmatpush.bf16.msrb.mxu1 %v15270_v57  ;;  %9615 = vmatpush.bf16.msrb.mxu0 %v15274_v12  ;;  %v15301_v12 = vld [vmem:[#allocation12 + $0x180] sm:$0xf] }
 0x886   : > { %v20529_v6 = vrot.slane %v9230_v3, 7  ;;  %v20531_v7 = vrot.slane %v9231_v30, 7  ;;  %v9163_v50 = vadd.f32 %v9162_v36, %v9143_v8  ;;  %v9201_v20 = vadd.f32 %v9200_v37, %v9181_v39  ;;  %v17309_v36 = vld [vmem:[#allocation12 + $0x134] sm:$0xf0]  ;;  %v15325_v37 = vld [vmem:[#allocation12 + $0x1b0] sm:$0xf] }
 0x887   : > { %v15346_v39 = vor.u32 %v17328_v54, %v15343_v59  ;;  %v8673_v3 = vadd.f32 %v20503_v45, %v20495_v15  ;;  %v8869_v30 = vadd.f32 %v20513_v2, %v8850_v17  ;;  %9596 = vmatpush.bf16.msrb.mxu3 %v15334_v31  ;;  %v15255_v54 = vld [vmem:[#allocation12 + $0x128] sm:$0xf0]  ;;  %v17322_v59 = vld [vmem:[#allocation12 + $0x1a4] sm:$0xf]  ;;  %v17305_v17 = vld [vmem:[#allocation12 + $0x114] sm:$0xf0] }
 0x888   : > { %9275 = vst [vmem:[#allocation5] sm:$0xfe] %v20529_v6  ;;  %v9210_v5 = vadd.f32 %v9163_v50, %v8866_v44  ;;  %v9211_v34 = vadd.f32 %v9201_v20, %v8904_v46  ;;  %v8907_v44 = vadd.f32 %v20515_v28, %v8888_v47  ;;  %v15338_v46 = vor.u32 %v17326_v10, %v15335_v21  ;;  %v17304_v47 = vld [vmem:[#allocation12 + $0x114] sm:$0xf] }
 0x889   : > { %9276 = vst [vmem:[#allocation5 + $0x8] sm:$0xfe] %v20531_v7  ;;  %9633 = vmatpush.bf16.msra.mxu2 %v15346_v39  ;;  %v8852_v28 = vadd.f32 %v20509_v43, %v8635_v35  ;;  %v15262_v50 = vor.u32 %v17309_v36, %v15261_v25  ;;  %v15326_v20 = vor.u32 %v17325_v14, %v15325_v37  ;;  %v15317_v43 = vld [vmem:[#allocation12 + $0x1a0] sm:$0xf]  ;;  %v17321_v35 = vld [vmem:[#allocation12 + $0x194] sm:$0xf0] }
 0x88a   : > { %v9224_v40 = vadd.f32 %v20521_v62, %v9210_v5  ;;  %v9225_v8 = vadd.f32 %v20523_v18, %v9211_v34  ;;  %v8890_v5 = vadd.f32 %v20511_v9, %v8673_v3  ;;  %v15266_v34 = vor.u32 %v17308_v55, %v15263_v4  ;;  %v9148_v9 = vpop.f32.mrf.mxu1  ;;  %v15247_v3 = vld [vmem:[#allocation12 + $0x118] sm:$0xf0]  ;;  %v15237_v25 = vld [vmem:[#allocation12 + $0x100] sm:$0xf]  ;;  %v17302_v36 = vld [vmem:[#allocation12 + $0x104] sm:$0xf] }
 0x88b   : > { %9578 = vmatpush.bf16.msrb.mxu1 %v15262_v50  ;;  %9597 = vmatpush.bf16.msrb.mxu3 %v15326_v20  ;;  %v8871_v39 = vadd.f32 %v20517_v38, %v8852_v28  ;;  %v15258_v52 = vor.u32 %v17306_v33, %v15255_v54  ;;  %v15322_v49 = vor.u32 %v17322_v59, %v15319_v51  ;;  %v15239_v55 = vld [vmem:[#allocation12 + $0x108] sm:$0xf0]  ;;  %v17318_v4 = vld [vmem:[#allocation12 + $0x184] sm:$0xf]  ;;  %v17301_v33 = vld [vmem:[#allocation12 + $0xf4] sm:$0xf0] }
 0x88c   : > { %v9232_v48 = vmax.f32 %v9224_v40, 0.0  ;;  %v9233_v58 = vmax.f32 %v9225_v8, 0.0  ;;  %v15309_v40 = vld [vmem:[#allocation12 + $0x190] sm:$0xf]  ;;  %v9186_v8 = vpop.f32.mrf.mxu0  ;;  %v8909_v24 = vadd.f32 %v20519_v29, %v8890_v5  ;;  %9616 = vmatpush.bf16.msrb.mxu0 %v15266_v34  ;;  %v15303_v28 = vld [vmem:[#allocation12 + $0x188] sm:$0xf0] }
 0x88d   : > { %v9165_v42 = vpop.f32.mrf.mxu3  ;;  %v9203_v60 = vpop.f32.mrf.mxu2  ;;  %9634 = vmatpush.bf16.msra.mxu2 %v15338_v46  ;;  %v17319_v46 = vld [vmem:[#allocation12 + $0x184] sm:$0xf0]  ;;  %v17284_v54 = vld [vmem:[#allocation12 + $0x74] sm:$0xf] }
 0x88e   : > { %v20547_v13 = vrot.slane %v9232_v48, 7  ;;  %v20549_v15 = vrot.slane %v9233_v58, 7  ;;  %v9166_v45 = vadd.f32 %v9165_v42, %v9146_v0  ;;  %v9204_v2 = vadd.f32 %v9203_v60, %v9184_v22  ;;  %v15245_v22 = vld [vmem:[#allocation12 + $0x110] sm:$0xf]  ;;  %v15311_v48 = vld [vmem:[#allocation12 + $0x198] sm:$0xf0] }
 0x88f   : > { %v15318_v0 = vor.u32 %v17323_v53, %v15317_v43  ;;  %v15246_v10 = vor.u32 %v17305_v17, %v15245_v22  ;;  %v15310_v42 = vor.u32 %v17321_v35, %v15309_v40  ;;  %v15250_v60 = vor.u32 %v17304_v47, %v15247_v3  ;;  %v9329_v16 = vld [vmem:[#allocation5] sm:$0xfe]  ;;  %v15487_v40 = vld [vmem:[#allocation12 + $0xf8] sm:$0xf0]  ;;  %v15477_v35 = vld [vmem:[#allocation12 + $0xe0] sm:$0xf] }
 0x890   : > { %v20555_v27 = vsel %vm739_vm0, %v20529_v6, %v20547_v13  ;;  %v20560_v56 = vsel %vm739_vm0, %v20531_v7, %v20549_v15  ;;  %v9212_v19 = vadd.f32 %v9166_v45, %v8869_v30  ;;  %v9213_v41 = vadd.f32 %v9204_v2, %v8907_v44  ;;  %v17320_v30 = vld [vmem:[#allocation12 + $0x194] sm:$0xf]  ;;  %v17303_v44 = vld [vmem:[#allocation12 + $0x104] sm:$0xf0]  ;;  %9617 = vmatpush.bf16.msrb.mxu0 %v15258_v52  ;;  %v17282_v52 = vld [vmem:[#allocation12 + $0x64] sm:$0xf] }
 0x891   : > { %v15254_v7 = vor.u32 %v17307_v23, %v15253_v26  ;;  %9635 = vmatpush.bf16.msra.mxu2 %v15330_v1  ;;  %9598 = vmatpush.bf16.msrb.mxu3 %v15318_v0  ;;  %v15314_v50 = vor.u32 %v17320_v30, %v15311_v48  ;;  %v15238_v20 = vor.u32 %v17303_v44, %v15237_v25  ;;  %v9330_v26 = vld [vmem:[#allocation5 + $0x8] sm:$0xfe]  ;;  %v15485_v1 = vld [vmem:[#allocation12 + $0xf0] sm:$0xf]  ;;  %v17300_v17 = vld [vmem:[#allocation12 + $0xf4] sm:$0xf] }
 0x892   : > { %v9226_v6 = vadd.f32 %v20521_v62, %v9212_v19  ;;  %v9227_v63 = vadd.f32 %v20523_v18, %v9213_v41  ;;  %v15302_v11 = vor.u32 %v17319_v46, %v15301_v12  ;;  %v20580_v41 = vpack.c.bf16 %v20555_v27, %v9329_v16  ;;  %v17285_v23 = vld [vmem:[#allocation12 + $0x74] sm:$0xf0]  ;;  %v15415_v30 = vld [vmem:[#allocation12 + $0x68] sm:$0xf0]  ;;  %v17298_v48 = vld [vmem:[#allocation12 + $0xe4] sm:$0xf] }
 0x893   : > { %9579 = vmatpush.bf16.msrb.mxu1 %v15254_v7  ;;  %v15242_v43 = vor.u32 %v17302_v36, %v15239_v55  ;;  %v15306_v53 = vor.u32 %v17318_v4, %v15303_v28  ;;  %v9334_v5 = vpack.c.bf16 %v20560_v56, %v9330_v26  ;;  %v15423_v7 = vld [vmem:[#allocation12 + $0x78] sm:$0xf0]  ;;  %v15486_v0 = vor.u32 %v17301_v33, %v15485_v1  ;;  %v15479_v25 = vld [vmem:[#allocation12 + $0xe8] sm:$0xf0]  ;;  %v15405_v44 = vld [vmem:[#allocation12 + $0x50] sm:$0xf] }
 0x894   : > { %v9234_v32 = vmax.f32 %v9226_v6, 0.0  ;;  %v9235_v61 = vmax.f32 %v9227_v63, 0.0  ;;  %9618 = vmatpush.bf16.msrb.mxu0 %v15250_v60  ;;  %v15426_v22 = vor.u32 %v17284_v54, %v15423_v7  ;;  %v15482_v60 = vor.u32 %v17298_v48, %v15479_v25  ;;  %v17281_v12 = vld [vmem:[#allocation12 + $0x54] sm:$0xf0]  ;;  %v15469_v46 = vld [vmem:[#allocation12 + $0xd0] sm:$0xf] }
 0x895   : > { %v9167_v57 = vpop.f32.mrf.mxu3  ;;  %v9205_v31 = vpop.f32.mrf.mxu2  ;;  %9636 = vmatpush.bf16.msra.mxu2 %v15322_v49  ;;  %9599 = vmatpush.bf16.msrb.mxu3 %v15310_v42  ;;  %v9383_v59 = vshrl.u32 %v9334_v5, 16  ;;  %v9385_v51 = vshll.u32 %v9334_v5, 16  ;;  %v17297_v36 = vld [vmem:[#allocation12 + $0xd4] sm:$0xf0]  ;;  %v15407_v4 = vld [vmem:[#allocation12 + $0x58] sm:$0xf0] }
 0x896   : > { %v20567_v58 = vrot.slane %v9234_v32, 7  ;;  %v20569_v21 = vrot.slane %v9235_v61, 7  ;;  %v9168_v38 = vadd.f32 %v9167_v57, %v9148_v9  ;;  %v9206_v29 = vadd.f32 %v9205_v31, %v9186_v8  ;;  %v15413_v32 = vld [vmem:[#allocation12 + $0x60] sm:$0xf]  ;;  %v17283_v61 = vld [vmem:[#allocation12 + $0x64] sm:$0xf0] }
 0x897   : > { %9580 = vmatpush.bf16.msrb.mxu1 %v15246_v10  ;;  %v17299_v31 = vld [vmem:[#allocation12 + $0xe4] sm:$0xf0]  ;;  %v9387_v3 = vrot.slane %v9385_v51, 1  ;;  %v17296_v28 = vld [vmem:[#allocation12 + $0xd4] sm:$0xf] }
 0x898   : > { %v9258_v37 = vsel %vm739_vm0, %v20547_v13, %v20567_v58  ;;  %v9260_v14 = vsel %vm739_vm0, %v20549_v15, %v20569_v21  ;;  %v9214_v45 = vadd.f32 %v9168_v38, %v8871_v39  ;;  %v9215_v2 = vadd.f32 %v9206_v29, %v8909_v24  ;;  %v15421_v15 = vld [vmem:[#allocation12 + $0x70] sm:$0xf]  ;;  %9619 = vmatpush.bf16.msrb.mxu0 %v15242_v43  ;;  %v15397_v16 = vld [vmem:[#allocation12 + $0x40] sm:$0xf]  ;;  %v17279_v26 = vld [vmem:[#allocation12 + $0x44] sm:$0xf0] }
 0x899   : > { %v15422_v34 = vor.u32 %v17285_v23, %v15421_v15  ;;  %9637 = vmatpush.bf16.msra.mxu2 %v15314_v50  ;;  %v15490_v24 = vor.u32 %v17300_v17, %v15487_v40  ;;  %9600 = vmatpush.bf16.msrb.mxu3 %v15302_v11  ;;  %v15414_v38 = vor.u32 %v17283_v61, %v15413_v32  ;;  %v15471_v11 = vld [vmem:[#allocation12 + $0xd8] sm:$0xf0]  ;;  %v15461_v23 = vld [vmem:[#allocation12 + $0xc0] sm:$0xf]  ;;  %v17295_v43 = vld [vmem:[#allocation12 + $0xc4] sm:$0xf0] }
 0x89a   : > { %v9228_v19 = vadd.f32 %v20521_v62, %v9214_v45  ;;  %v9229_v13 = vadd.f32 %v20523_v18, %v9215_v2  ;;  %v9371_v62 = vshrl.u32 %v20580_v41, 16  ;;  %v9373_v18 = vshll.u32 %v20580_v41, 16  ;;  %v15399_v5 = vld [vmem:[#allocation12 + $0x48] sm:$0xf0]  ;;  %v17277_v7 = vld [vmem:[#allocation12 + $0x34] sm:$0xf0] }
 0x89b   : > { %9581 = vmatpush.bf16.msrb.mxu1 %v15238_v20  ;;  %v15418_v29 = vor.u32 %v17282_v52, %v15415_v30  ;;  %v9388_v2 = vor.u32 %v9387_v3, %v9383_v59  ;;  %v15406_v50 = vor.u32 %v17281_v12, %v15405_v44  ;;  %v15470_v20 = vor.u32 %v17297_v36, %v15469_v46  ;;  %v15463_v1 = vld [vmem:[#allocation12 + $0xc8] sm:$0xf0]  ;;  %v17293_v17 = vld [vmem:[#allocation12 + $0xb4] sm:$0xf0]  ;;  %v17276_v40 = vld [vmem:[#allocation12 + $0x34] sm:$0xf] }
 0x89c   : > { %v9236_v6 = vmax.f32 %v9228_v19, 0.0  ;;  %v9237_v63 = vmax.f32 %v9229_v13, 0.0  ;;  %v9375_v39 = vrot.slane %v9373_v18, 1  ;;  %9848 = vmatpush.bf16.msra.mxu0 %v15426_v22  ;;  %v15474_v15 = vor.u32 %v17296_v28, %v15471_v11  ;;  %v15389_v18 = vld [vmem:[#allocation12 + $0x30] sm:$0xf] }
 0x89d   : > { %9829 = vmatpush.bf16.msra.mxu3 %v15486_v0  ;;  %9638 = vmatpush.bf16.msra.mxu2 %v15306_v53  ;;  %v17278_v53 = vld [vmem:[#allocation12 + $0x44] sm:$0xf]  ;;  %v15398_v54 = vor.u32 %v17279_v26, %v15397_v16  ;;  %v15453_v22 = vld [vmem:[#allocation12 + $0xb0] sm:$0xf]  ;;  %v15390_v61 = vor.u32 %v17277_v7, %v15389_v18  ;;  %v15445_v3 = vld [vmem:[#allocation12 + $0xa0] sm:$0xf] }
 0x89e   : > { %v9261_v9 = vrot.slane %v9236_v6, 7  ;;  %v9263_v8 = vrot.slane %v9237_v63, 7  ;;  %v15462_v6 = vor.u32 %v17295_v43, %v15461_v23  ;;  %v15402_v59 = vor.u32 %v17278_v53, %v15399_v5  ;;  %v17291_v30 = vld [vmem:[#allocation12 + $0xa4] sm:$0xf0]  ;;  %v17274_v48 = vld [vmem:[#allocation12 + $0x24] sm:$0xf] }
 0x89f   : > { %9810 = vmatpush.bf16.msra.mxu1 %v15422_v34  ;;  %v17294_v34 = vld [vmem:[#allocation12 + $0xc4] sm:$0xf]  ;;  %v15446_v12 = vor.u32 %v17291_v30, %v15445_v3  ;;  %v15373_v46 = vld [vmem:[#allocation12 + $0x10] sm:$0xf]  ;;  %v17273_v36 = vld [vmem:[#allocation12 + $0x14] sm:$0xf0] }
 0x8a0   : > { %v9262_v47 = vsel %vm739_vm0, %v20567_v58, %v9261_v9  ;;  %9283 = vst [vmem:[#allocation5 + $0x40] sm:$0x1] %v9261_v9  ;;  %v9264_v57 = vsel %vm739_vm0, %v20569_v21, %v9263_v8  ;;  %v15478_v58 = vor.u32 %v17299_v31, %v15477_v35  ;;  %9849 = vmatpush.bf16.msra.mxu0 %v15418_v29  ;;  %v15391_v9 = vld [vmem:[#allocation12 + $0x38] sm:$0xf0]  ;;  %v15447_v29 = vld [vmem:[#allocation12 + $0xa8] sm:$0xf0] }
 0x8a1   : > { %v20589_v49 = vpack.c.bf16 %v9262_v47, %v9258_v37  ;;  %v20591_v10 = vpack.c.bf16 %v9264_v57, %v9260_v14  ;;  %9867 = vmatpush.bf16.msrb.mxu2 %v15490_v24  ;;  %9284 = vst [vmem:[#allocation5 + $0x48] sm:$0x1] %v9263_v8  ;;  %v17280_v37 = vld [vmem:[#allocation12 + $0x54] sm:$0xf]  ;;  %v9376_v14 = vor.u32 %v9375_v39, %v9371_v62  ;;  %v15455_v39 = vld [vmem:[#allocation12 + $0xb8] sm:$0xf0] }
 0x8a2   : > { %9830 = vmatpush.bf16.msra.mxu3 %v15478_v58  ;;  %v15410_v41 = vor.u32 %v17280_v37, %v15407_v4  ;;  %v15466_v51 = vor.u32 %v17294_v34, %v15463_v1  ;;  %v17292_v8 = vld [vmem:[#allocation12 + $0xb4] sm:$0xf]  ;;  %v15454_v35 = vor.u32 %v17293_v17, %v15453_v22  ;;  %v15381_v47 = vld [vmem:[#allocation12 + $0x20] sm:$0xf]  ;;  %v17275_v57 = vld [vmem:[#allocation12 + $0x24] sm:$0xf0]  ;;  %v15394_v31 = vor.u32 %v17276_v40, %v15391_v9 }
 0x8a3   : > { %v9378_v21 = vshll.u32 %v20589_v49, 16  ;;  %v9390_v42 = vshll.u32 %v20591_v10, 16  ;;  %9811 = vmatpush.bf16.msra.mxu1 %v15414_v38  ;;  %v15458_v52 = vor.u32 %v17292_v8, %v15455_v39  ;;  %v15383_v38 = vld [vmem:[#allocation12 + $0x28] sm:$0xf0]  ;;  %v17290_v58 = vld [vmem:[#allocation12 + $0xa4] sm:$0xf] }
 0x8a4   : > { %9850 = vmatpush.bf16.msra.mxu0 %v15410_v41  ;;  %v9394_v25 = vshrl.u32 %v20589_v49, 16  ;;  %v9402_v44 = vshrl.u32 %v20591_v10, 16  ;;  %v15386_v37 = vor.u32 %v17274_v48, %v15383_v38  ;;  %v17289_v4 = vld [vmem:[#allocation12 + $0x94] sm:$0xf0]  ;;  %v17272_v28 = vld [vmem:[#allocation12 + $0x14] sm:$0xf]  ;;  %v15374_v41 = vor.u32 %v17273_v36, %v15373_v46 }
 0x8a5   : > { %v20595_v45 = vrot.slane %v9378_v21, 1  ;;  %v20597_v55 = vrot.slane %v9390_v42, 1  ;;  %9868 = vmatpush.bf16.msrb.mxu2 %v15482_v60  ;;  %v15382_v60 = vor.u32 %v17275_v57, %v15381_v47  ;;  %v17288_v11 = vld [vmem:[#allocation12 + $0x94] sm:$0xf]  ;;  %v15439_v16 = vld [vmem:[#allocation12 + $0x98] sm:$0xf0] }
 0x8a6   : > { %9831 = vmatpush.bf16.msra.mxu3 %v15470_v20  ;;  %v15375_v20 = vld [vmem:[#allocation12 + $0x18] sm:$0xf0]  ;;  %v17271_v23 = vld [vmem:[#allocation12 + $0x4] sm:$0xf0]  ;;  %v15429_v43 = vld [vmem:[#allocation12 + $0x80] sm:$0xf]  ;;  %v15442_v34 = vor.u32 %v17288_v11, %v15439_v16 }
 0x8a7   : > { %v9381_v19 = vsel %vm938_vm3, %v9376_v14, %v20595_v45  ;;  %v9393_v13 = vsel %vm938_vm3, %v9388_v2, %v20597_v55  ;;  %v9331_v33 = vld [vmem:[#allocation5 + $0x40] sm:$0x1]  ;;  %9812 = vmatpush.bf16.msra.mxu1 %v15406_v50  ;;  %v15450_v14 = vor.u32 %v17290_v58, %v15447_v29  ;;  %v9396_v50 = vor.u32 %v9394_v25, %v20595_v45  ;;  %v17287_v53 = vld [vmem:[#allocation12 + $0x84] sm:$0xf0]  ;;  %v17270_v1 = vld [vmem:[#allocation12 + $0x4] sm:$0xf] }
 0x8a8   : > { %9582 = vmatmul.bf16.vlgmr.msrb.gmra.mxu1 %v9381_v19  ;;  %9601 = vmatmul.bf16.vlgmr.msrb.gmra.mxu3 %v9393_v13  ;;  %v9335_v63 = vpack.c.bf16 %v9331_v33, %v9331_v33  ;;  %v9332_v62 = vld [vmem:[#allocation5 + $0x48] sm:$0x1]  ;;  %v15437_v2 = vld [vmem:[#allocation12 + $0x90] sm:$0xf]  ;;  %v9404_v26 = vor.u32 %v9402_v44, %v20597_v55  ;;  %v15378_v45 = vor.u32 %v17272_v28, %v15375_v20  ;;  %v15367_v33 = vld [vmem:[#allocation12 + $0x8] sm:$0xf0] }
 0x8a9   : > { %9620 = vmatmul.bf16.vlgmr.msrb.gmra.mxu0 %v9381_v19  ;;  %9639 = vmatmul.bf16.vlgmr.msra.gmra.mxu2 %v9393_v13  ;;  %v9336_v0 = vpack.c.bf16 %v9332_v62, %v9332_v62  ;;  %v15365_v19 = vld [vmem:[#allocation12] sm:$0xf]  ;;  %v15431_v55 = vld [vmem:[#allocation12 + $0x88] sm:$0xf0]  ;;  %v15613_v62 = vld [vmem:[#allocation12 + $0x2f0] sm:$0xf]  ;;  %v15370_v40 = vor.u32 %v17270_v1, %v15367_v33 }
 0x8aa   : > { %9869 = vmatpush.bf16.msrb.mxu2 %v15474_v15  ;;  %9832 = vmatpush.bf16.msra.mxu3 %v15462_v6  ;;  %v9398_v24 = vshll.u32 %v9335_v63, 16  ;;  %v15438_v15 = vor.u32 %v17289_v4, %v15437_v2  ;;  %v15549_v6 = vld [vmem:[#allocation12 + $0x270] sm:$0xf]  ;;  %v17349_v63 = vld [vmem:[#allocation12 + $0x274] sm:$0xf0] }
 0x8ab   : > { %9813 = vmatpush.bf16.msra.mxu1 %v15398_v54  ;;  %v9406_v32 = vshll.u32 %v9336_v0, 16  ;;  %9851 = vmatpush.bf16.msra.mxu0 %v15402_v59  ;;  %v17286_v54 = vld [vmem:[#allocation12 + $0x84] sm:$0xf]  ;;  %v17365_v18 = vld [vmem:[#allocation12 + $0x2f4] sm:$0xf0]  ;;  %v15366_v59 = vor.u32 %v17271_v23, %v15365_v19  ;;  %v15550_v8 = vor.u32 %v17349_v63, %v15549_v6  ;;  %v9285_v58 = vld [vmem:[#allocation5] sm:$0xff] }
 0x8ac   : > { %v9400_v21 = vrot.slane %v9398_v24, 1  ;;  %v17348_v7 = vld [vmem:[#allocation12 + $0x274] sm:$0xf]  ;;  %v15551_v0 = vld [vmem:[#allocation12 + $0x278] sm:$0xf0]  ;;  %v15434_v9 = vor.u32 %v17286_v54, %v15431_v55  ;;  %v15614_v39 = vor.u32 %v17365_v18, %v15613_v62  ;;  %v9293_v2 = vpack.c.bf16 %v20555_v27, %v9285_v58 }
 0x8ad   : > { %v9408_v42 = vrot.slane %v9406_v32, 1  ;;  %v17364_v22 = vld [vmem:[#allocation12 + $0x2f4] sm:$0xf]  ;;  %v15615_v17 = vld [vmem:[#allocation12 + $0x2f8] sm:$0xf0] }
 0x8ae   : > { %9870 = vmatpush.bf16.msrb.mxu2 %v15466_v51  ;;  %9833 = vmatpush.bf16.msra.mxu3 %v15454_v35  ;;  %v9401_v13 = vsel %vm938_vm3, %v9396_v50, %v9400_v21  ;;  %v15430_v51 = vor.u32 %v17287_v53, %v15429_v43  ;;  %v15541_v24 = vld [vmem:[#allocation12 + $0x260] sm:$0xf]  ;;  %v17347_v32 = vld [vmem:[#allocation12 + $0x264] sm:$0xf0]  ;;  %v15618_v35 = vor.u32 %v17364_v22, %v15615_v17  ;;  %v17362_v3 = vld [vmem:[#allocation12 + $0x2e4] sm:$0xf] }
 0x8af   : > { %9814 = vmatpush.bf16.msra.mxu1 %v15390_v61  ;;  %9852 = vmatpush.bf16.msra.mxu0 %v15394_v31  ;;  %v9409_v5 = vsel %vm938_vm3, %v9404_v26, %v9408_v42  ;;  %v15554_v61 = vor.u32 %v17348_v7, %v15551_v0  ;;  %v15605_v47 = vld [vmem:[#allocation12 + $0x2e0] sm:$0xf]  ;;  %v17363_v57 = vld [vmem:[#allocation12 + $0x2e4] sm:$0xf0]  ;;  %v17346_v31 = vld [vmem:[#allocation12 + $0x264] sm:$0xf]  ;;  %v15542_v48 = vor.u32 %v17347_v32, %v15541_v24 }
 0x8b0   : > { %v15607_v30 = vld [vmem:[#allocation12 + $0x2e8] sm:$0xf0]  ;;  %v15606_v38 = vor.u32 %v17363_v57, %v15605_v47  ;;  %v9286_v44 = vld [vmem:[#allocation5 + $0x8] sm:$0xff]  ;;  %v15533_v21 = vld [vmem:[#allocation12 + $0x250] sm:$0xf] }
 0x8b1   : > { %v15610_v25 = vor.u32 %v17362_v3, %v15607_v30  ;;  %v17345_v42 = vld [vmem:[#allocation12 + $0x254] sm:$0xf0]  ;;  %v17344_v46 = vld [vmem:[#allocation12 + $0x254] sm:$0xf]  ;;  %v15535_v36 = vld [vmem:[#allocation12 + $0x258] sm:$0xf0]  ;;  %v9294_v4 = vpack.c.bf16 %v20560_v56, %v9286_v44 }
 0x8b2   : > { %9871 = vmatpush.bf16.msrb.mxu2 %v15458_v52  ;;  %9834 = vmatpush.bf16.msra.mxu3 %v15446_v12  ;;  %v15543_v52 = vld [vmem:[#allocation12 + $0x268] sm:$0xf0]  ;;  %v17361_v12 = vld [vmem:[#allocation12 + $0x2d4] sm:$0xf0]  ;;  %v15534_v28 = vor.u32 %v17345_v42, %v15533_v21  ;;  %v15525_v20 = vld [vmem:[#allocation12 + $0x240] sm:$0xf]  ;;  %v15538_v16 = vor.u32 %v17344_v46, %v15535_v36 }
 0x8b3   : > { %9815 = vmatpush.bf16.msra.mxu1 %v15382_v60  ;;  %9853 = vmatpush.bf16.msra.mxu0 %v15386_v37  ;;  %v15546_v29 = vor.u32 %v17346_v31, %v15543_v52  ;;  %v15597_v60 = vld [vmem:[#allocation12 + $0x2d0] sm:$0xf]  ;;  %v17360_v37 = vld [vmem:[#allocation12 + $0x2d4] sm:$0xf]  ;;  %v17343_v11 = vld [vmem:[#allocation12 + $0x244] sm:$0xf0] }
 0x8b4   : > { %v15598_v50 = vor.u32 %v17361_v12, %v15597_v60  ;;  %v15589_v19 = vld [vmem:[#allocation12 + $0x2c0] sm:$0xf]  ;;  %v17358_v23 = vld [vmem:[#allocation12 + $0x2c4] sm:$0xf]  ;;  %v15591_v43 = vld [vmem:[#allocation12 + $0x2c8] sm:$0xf0] }
 0x8b5   : > { %v15517_v53 = vld [vmem:[#allocation12 + $0x230] sm:$0xf]  ;;  %v17357_v33 = vld [vmem:[#allocation12 + $0x2b4] sm:$0xf0]  ;;  %v17340_v54 = vld [vmem:[#allocation12 + $0x234] sm:$0xf]  ;;  %v15594_v6 = vor.u32 %v17358_v23, %v15591_v43 }
 0x8b6   : > { %9872 = vmatpush.bf16.msrb.mxu2 %v15450_v14  ;;  %9835 = vmatpush.bf16.msra.mxu3 %v15438_v15  ;;  %v15599_v14 = vld [vmem:[#allocation12 + $0x2d8] sm:$0xf0]  ;;  %v15527_v15 = vld [vmem:[#allocation12 + $0x248] sm:$0xf0]  ;;  %v15581_v1 = vld [vmem:[#allocation12 + $0x2b0] sm:$0xf] }
 0x8b7   : > { %9816 = vmatpush.bf16.msra.mxu1 %v15374_v41  ;;  %9854 = vmatpush.bf16.msra.mxu0 %v15378_v45  ;;  %v15602_v26 = vor.u32 %v17360_v37, %v15599_v14  ;;  %v17342_v41 = vld [vmem:[#allocation12 + $0x244] sm:$0xf]  ;;  %v15526_v45 = vor.u32 %v17343_v11, %v15525_v20  ;;  %v15519_v63 = vld [vmem:[#allocation12 + $0x238] sm:$0xf0]  ;;  %v17356_v62 = vld [vmem:[#allocation12 + $0x2b4] sm:$0xf] }
 0x8b8   : > { %9587 = vmatmul.bf16.gmra.mxu1 %v9401_v13  ;;  %9606 = vmatmul.bf16.gmra.mxu3 %v9409_v5  ;;  %v15530_v55 = vor.u32 %v17342_v41, %v15527_v15  ;;  %v9886_v18 = vld [vmem:[#allocation5] sm:$0xfc]  ;;  %v15583_v7 = vld [vmem:[#allocation12 + $0x2b8] sm:$0xf0]  ;;  %v15509_v22 = vld [vmem:[#allocation12 + $0x220] sm:$0xf] }
 0x8b9   : > { %9625 = vmatmul.bf16.gmra.mxu0 %v9401_v13  ;;  %9644 = vmatmul.bf16.gmra.mxu2 %v9409_v5  ;;  %v17359_v13 = vld [vmem:[#allocation12 + $0x2c4] sm:$0xf0]  ;;  %v17341_v5 = vld [vmem:[#allocation12 + $0x234] sm:$0xf0]  ;;  %v15573_v24 = vld [vmem:[#allocation12 + $0x2a0] sm:$0xf] }
 0x8ba   : > { %9873 = vmatpush.bf16.msrb.mxu2 %v15442_v34  ;;  %9836 = vmatpush.bf16.msra.mxu3 %v15430_v51  ;;  %v15590_v34 = vor.u32 %v17359_v13, %v15589_v19  ;;  %v9934_v51 = vrot.slane %v20589_v49, 1  ;;  %v9887_v0 = vld [vmem:[#allocation5 + $0x8] sm:$0xfc]  ;;  %v17338_v47 = vld [vmem:[#allocation12 + $0x224] sm:$0xf] }
 0x8bb   : > { %9817 = vmatpush.bf16.msra.mxu1 %v15366_v59  ;;  %9855 = vmatpush.bf16.msra.mxu0 %v15370_v40  ;;  %v9890_v59 = vpack.c.bf16 %v20555_v27, %v9886_v18  ;;  %v9891_v17 = vpack.c.bf16 %v20560_v56, %v9887_v0  ;;  %v9937_v40 = vrot.slane %v20591_v10, 1  ;;  %v17355_v27 = vld [vmem:[#allocation12 + $0x2a4] sm:$0xf0]  ;;  %v15511_v31 = vld [vmem:[#allocation12 + $0x228] sm:$0xf0] }
 0x8bc   : > { %v17354_v52 = vld [vmem:[#allocation12 + $0x2a4] sm:$0xf]  ;;  %v15575_v3 = vld [vmem:[#allocation12 + $0x2a8] sm:$0xf0]  ;;  %v15501_v58 = vld [vmem:[#allocation12 + $0x210] sm:$0xf] }
 0x8bd   : > { %v9933_v32 = vrot.slane %v9890_v59, 1  ;;  %v9936_v57 = vrot.slane %v9891_v17, 1  ;;  %v15578_v44 = vor.u32 %v17354_v52, %v15575_v3  ;;  %v15565_v21 = vld [vmem:[#allocation12 + $0x290] sm:$0xf]  ;;  %v17353_v42 = vld [vmem:[#allocation12 + $0x294] sm:$0xf0] }
 0x8be   : > { %9874 = vmatpush.bf16.msrb.mxu2 %v15434_v9  ;;  %10126 = vmatpush.bf16.msrb.mxu3 %v15614_v39  ;;  %v15518_v9 = vor.u32 %v17341_v5, %v15517_v53  ;;  %v17339_v39 = vld [vmem:[#allocation12 + $0x224] sm:$0xf0]  ;;  %v17336_v60 = vld [vmem:[#allocation12 + $0x214] sm:$0xf]  ;;  %v15503_v12 = vld [vmem:[#allocation12 + $0x218] sm:$0xf0]  ;;  %v15566_v14 = vor.u32 %v17353_v42, %v15565_v21 }
 0x8bf   : > { %10107 = vmatpush.bf16.msrb.mxu1 %v15550_v8  ;;  %10145 = vmatpush.bf16.msrb.mxu0 %v15554_v61  ;;  %v15582_v8 = vor.u32 %v17357_v33, %v15581_v1  ;;  %v15522_v61 = vor.u32 %v17340_v54, %v15519_v63  ;;  %v9935_v56 = vsel %vm2047_vm6, %v9933_v32, %v9934_v51  ;;  %v17352_v46 = vld [vmem:[#allocation12 + $0x294] sm:$0xf]  ;;  %v15567_v36 = vld [vmem:[#allocation12 + $0x298] sm:$0xf0]  ;;  %v15557_v20 = vld [vmem:[#allocation12 + $0x280] sm:$0xf] }
 0x8c0   : > { %v9938_v30 = vsel %vm2047_vm6, %v9936_v57, %v9937_v40  ;;  %v17351_v11 = vld [vmem:[#allocation12 + $0x284] sm:$0xf0]  ;;  %v17350_v19 = vld [vmem:[#allocation12 + $0x284] sm:$0xf]  ;;  %v15559_v13 = vld [vmem:[#allocation12 + $0x288] sm:$0xf0] }
 0x8c1   : > { %v15558_v15 = vor.u32 %v17351_v11, %v15557_v20  ;;  %v15562_v43 = vor.u32 %v17350_v19, %v15559_v13  ;;  %v9888_v53 = vld [vmem:[#allocation5 + $0x40] sm:$0x3]  ;;  %v9889_v5 = vld [vmem:[#allocation5 + $0x48] sm:$0x3] }
 0x8c2   : > { %10164 = vmatpush.bf16.msra.mxu2 %v15618_v35  ;;  %10127 = vmatpush.bf16.msrb.mxu3 %v15606_v38  ;;  %v15586_v35 = vor.u32 %v17356_v62, %v15583_v7  ;;  %v15574_v38 = vor.u32 %v17355_v27, %v15573_v24 }
 0x8c3   : > { %10108 = vmatpush.bf16.msrb.mxu1 %v15542_v48  ;;  %10146 = vmatpush.bf16.msrb.mxu0 %v15546_v29  ;;  %v15510_v48 = vor.u32 %v17339_v39, %v15509_v22  ;;  %v17337_v29 = vld [vmem:[#allocation12 + $0x214] sm:$0xf0] }
 0x8c4   : > { %v15502_v37 = vor.u32 %v17337_v29, %v15501_v58 }
 0x8c6   : > { %10165 = vmatpush.bf16.msra.mxu2 %v15610_v25  ;;  %10128 = vmatpush.bf16.msrb.mxu3 %v15598_v50  ;;  %v15514_v25 = vor.u32 %v17338_v47, %v15511_v31  ;;  %v15570_v50 = vor.u32 %v17352_v46, %v15567_v36 }
 0x8c7   : > { %10109 = vmatpush.bf16.msrb.mxu1 %v15534_v28  ;;  %10147 = vmatpush.bf16.msrb.mxu0 %v15538_v16  ;;  %v15506_v28 = vor.u32 %v17336_v60, %v15503_v12  ;;  %v17334_v16 = vld [vmem:[#allocation12 + $0x204] sm:$0xf] }
 0x8c8   : > { %9818 = vmatmul.bf16.vlgmr.msra.gmra.mxu1 %v9293_v2  ;;  %9837 = vmatmul.bf16.vlgmr.msra.gmra.mxu3 %v9294_v4 }
 0x8c9   : > { %9856 = vmatmul.bf16.vlgmr.msra.gmra.mxu0 %v9293_v2  ;;  %9875 = vmatmul.bf16.vlgmr.msrb.gmra.mxu2 %v9294_v4  ;;  %v15493_v2 = vld [vmem:[#allocation12 + $0x200] sm:$0xf]  ;;  %v17335_v4 = vld [vmem:[#allocation12 + $0x204] sm:$0xf0] }
 0x8ca   : > { %10166 = vmatpush.bf16.msra.mxu2 %v15602_v26  ;;  %10129 = vmatpush.bf16.msrb.mxu3 %v15590_v34  ;;  %v15495_v26 = vld [vmem:[#allocation12 + $0x208] sm:$0xf0]  ;;  %v15494_v41 = vor.u32 %v17335_v4, %v15493_v2  ;;  %v9893_v34 = vpack.c.bf16 %v9889_v5, %v9889_v5 }
 0x8cb   : > { %10110 = vmatpush.bf16.msrb.mxu1 %v15526_v45  ;;  %10148 = vmatpush.bf16.msrb.mxu0 %v15530_v55  ;;  %v15498_v23 = vor.u32 %v17334_v16, %v15495_v26  ;;  %v9892_v45 = vpack.c.bf16 %v9888_v53, %v9888_v53 }
 0x8cc   : > { %v9941_v33 = vrot.slane %v9893_v34, 1 }
 0x8cd   : > { %v9939_v1 = vrot.slane %v9892_v45, 1 }
 0x8ce   : > { %10167 = vmatpush.bf16.msra.mxu2 %v15594_v6  ;;  %10130 = vmatpush.bf16.msrb.mxu3 %v15582_v8  ;;  %v9942_v55 = vsel %vm2047_vm6, %v9937_v40, %v9941_v33 }
 0x8cf   : > { %10111 = vmatpush.bf16.msrb.mxu1 %v15518_v9  ;;  %10149 = vmatpush.bf16.msrb.mxu0 %v15522_v61  ;;  %v9940_v54 = vsel %vm2047_vm6, %v9934_v51, %v9939_v1 }
 0x8d2   : > { %10168 = vmatpush.bf16.msra.mxu2 %v15586_v35  ;;  %10131 = vmatpush.bf16.msrb.mxu3 %v15574_v38 }
 0x8d3   : > { %10112 = vmatpush.bf16.msrb.mxu1 %v15510_v48  ;;  %10150 = vmatpush.bf16.msrb.mxu0 %v15514_v25 }
 0x8d6   : > { %10169 = vmatpush.bf16.msra.mxu2 %v15578_v44  ;;  %10132 = vmatpush.bf16.msrb.mxu3 %v15566_v14 }
 0x8d7   : > { %10113 = vmatpush.bf16.msrb.mxu1 %v15502_v37  ;;  %10151 = vmatpush.bf16.msrb.mxu0 %v15506_v28  ;;  %v10191_v28 = vld [vmem:[#allocation18] sm:$0x3] }
 0x8d8   : > { %9823 = vmatmul.bf16.gmra.mxu1 %v20589_v49  ;;  %9842 = vmatmul.bf16.gmra.mxu3 %v20591_v10  ;;  %v10194_v53 = vperm.slane %v10191_v28, 1 }
 0x8d9   : > { %9861 = vmatmul.bf16.gmra.mxu0 %v20589_v49  ;;  %9880 = vmatmul.bf16.gmra.mxu2 %v20591_v10 }
 0x8da   : > { %10170 = vmatpush.bf16.msra.mxu2 %v15570_v50  ;;  %10133 = vmatpush.bf16.msrb.mxu3 %v15558_v15  ;;  %v10193_v15 = vperm.slane %v10191_v28, 0 }
 0x8db   : > { %10114 = vmatpush.bf16.msrb.mxu1 %v15494_v41  ;;  %10152 = vmatpush.bf16.msrb.mxu0 %v15498_v23 }
 0x8de   : > { %10171 = vmatpush.bf16.msra.mxu2 %v15562_v43 }
 0x8e8   : > { %10115 = vmatmul.bf16.vlgmr.msrb.gmra.mxu1 %v9935_v56  ;;  %10134 = vmatmul.bf16.vlgmr.msrb.gmra.mxu3 %v9938_v30 }
 0x8e9   : > { %10153 = vmatmul.bf16.vlgmr.msrb.gmra.mxu0 %v9935_v56  ;;  %10172 = vmatmul.bf16.vlgmr.msra.gmra.mxu2 %v9938_v30 }
 0x8f8   : > { %10120 = vmatmul.bf16.gmra.mxu1 %v9940_v54  ;;  %10139 = vmatmul.bf16.gmra.mxu3 %v9942_v55 }
 0x8f9   : > { %10158 = vmatmul.bf16.gmra.mxu0 %v9940_v54  ;;  %10177 = vmatmul.bf16.gmra.mxu2 %v9942_v55 }
 0x925   : > { %v9583_v6 = vpop.f32.mrf.mxu1 }
 0x926   : > { %v9621_v63 = vpop.f32.mrf.mxu0 }
 0x92b   : > { %v9602_v62 = vpop.f32.mrf.mxu3 }
 0x92c   : > { %v9603_v18 = vadd.f32 %v9602_v62, %v9583_v6  ;;  %v9640_v7 = vpop.f32.mrf.mxu2 }
 0x92d   : > { %v9641_v59 = vadd.f32 %v9640_v7, %v9621_v63  ;;  %v9585_v0 = vpop.f32.mrf.mxu1 }
 0x92e   : > { %v9623_v22 = vpop.f32.mrf.mxu0 }
 0x933   : > { %v9604_v17 = vpop.f32.mrf.mxu3 }
 0x934   : > { %v9642_v49 = vpop.f32.mrf.mxu2  ;;  %v9605_v11 = vadd.f32 %v9604_v17, %v9585_v0 }
 0x935   : > { %v9643_v9 = vadd.f32 %v9642_v49, %v9623_v22  ;;  %v9588_v51 = vpop.f32.mrf.mxu1 }
 0x936   : > { %v9626_v8 = vpop.f32.mrf.mxu0 }
 0x93b   : > { %v9607_v10 = vpop.f32.mrf.mxu3 }
 0x93c   : > { %v20631_v39 = vadd.f32 %v9607_v10, %v9588_v51  ;;  %v9645_v40 = vpop.f32.mrf.mxu2 }
 0x93d   : > { %v20633_v24 = vadd.f32 %v9645_v40, %v9626_v8  ;;  %v20635_v32 = vpop.f32.mrf.mxu1 }
 0x93e   : > { %v20637_v61 = vpop.f32.mrf.mxu0 }
 0x943   : > { %v20639_v35 = vpop.f32.mrf.mxu3 }
 0x944   : > { %v20641_v27 = vpop.f32.mrf.mxu2 }
 0x945   : > { %v9819_v47 = vpop.f32.mrf.mxu1 }
 0x946   : > { %v9857_v57 = vpop.f32.mrf.mxu0  ;;  %v9820_v14 = vadd.f32 %v9819_v47, %v9603_v18 }
 0x947   : > { %v9858_v4 = vadd.f32 %v9857_v57, %v9641_v59 }
 0x94b   : > { %v9838_v31 = vpop.f32.mrf.mxu3 }
 0x94c   : > { %v9876_v52 = vpop.f32.mrf.mxu2  ;;  %v9839_v16 = vadd.f32 %v9838_v31, %v9820_v14 }
 0x94d   : > { %v9821_v3 = vpop.f32.mrf.mxu1  ;;  %v9877_v19 = vadd.f32 %v9876_v52, %v9858_v4 }
 0x94e   : > { %v9859_v56 = vpop.f32.mrf.mxu0  ;;  %v9822_v13 = vadd.f32 %v9821_v3, %v9605_v11  ;;  %v9610_v3 = vadd.f32 %v20639_v35, %v20635_v32 }
 0x94f   : > { %v9860_v23 = vadd.f32 %v9859_v56, %v9643_v9 }
 0x953   : > { %v9840_v30 = vpop.f32.mrf.mxu3 }
 0x954   : > { %v9878_v48 = vpop.f32.mrf.mxu2  ;;  %v9841_v45 = vadd.f32 %v9840_v30, %v9822_v13  ;;  %v9648_v30 = vadd.f32 %v20641_v27, %v20637_v61  ;;  %v17374_v61 = vld [vmem:[#allocation24 + $0x30] sm:$0xff]  ;;  %v17372_v13 = vld [vmem:[#allocation24 + $0x20] sm:$0xff] }
 0x955   : > { %v9824_v38 = vpop.f32.mrf.mxu1  ;;  %v9879_v33 = vadd.f32 %v9878_v48, %v9860_v23  ;;  %v17367_v23 = vld [vmem:[#allocation23 + $0x8] sm:$0xff] }
 0x956   : > { %v9862_v58 = vpop.f32.mrf.mxu0  ;;  %v9825_v47 = vadd.f32 %v9824_v38, %v20631_v39 }
 0x957   : > { %v9863_v31 = vadd.f32 %v9862_v58, %v20633_v24 }
 0x95b   : > { %v9843_v29 = vpop.f32.mrf.mxu3 }
 0x95c   : > { %v9881_v25 = vpop.f32.mrf.mxu2  ;;  %v9844_v56 = vadd.f32 %v9843_v29, %v9825_v47  ;;  %v17376_v47 = vld [vmem:[#allocation24 + $0x40] sm:$0xff] }
 0x95d   : > { %v9826_v44 = vpop.f32.mrf.mxu1  ;;  %v9882_v48 = vadd.f32 %v9881_v25, %v9863_v31  ;;  %v17407_v31 = vld [vmem:[%s21094_s13 + $0x38] sm:$0xff] }
 0x95e   : > { %v9864_v21 = vpop.f32.mrf.mxu0 }
 0x963   : > { %v9845_v42 = vpop.f32.mrf.mxu3 }
 0x964   : > { %v9883_v60 = vpop.f32.mrf.mxu2 }
 0x965   : > { %v10116_v12 = vpop.f32.mrf.mxu1 }
 0x966   : > { %v10154_v46 = vpop.f32.mrf.mxu0 }
 0x96b   : > { %v10135_v36 = vpop.f32.mrf.mxu3 }
 0x96c   : > { %v10173_v37 = vpop.f32.mrf.mxu2  ;;  %v10136_v2 = vadd.f32 %v10135_v36, %v10116_v12  ;;  %v9827_v12 = vadd.f32 %v9826_v44, %v9610_v3  ;;  %v9865_v36 = vadd.f32 %v9864_v21, %v9648_v30  ;;  %v17423_v3 = vld [vmem:[%s21094_s13 + $0xb8] sm:$0xff]  ;;  %v17406_v30 = vld [vmem:[%s21094_s13 + $0x30] sm:$0xff] }
 0x96d   : > { %v10174_v50 = vadd.f32 %v10173_v37, %v10154_v46  ;;  %v10118_v20 = vpop.f32.mrf.mxu1 }
 0x96e   : > { %v10156_v26 = vpop.f32.mrf.mxu0  ;;  %v10183_v41 = vadd.f32 %v10136_v2, %v9839_v16  ;;  %v9846_v4 = vadd.f32 %v9845_v42, %v9827_v12  ;;  %v9884_v24 = vadd.f32 %v9883_v60, %v9865_v36  ;;  %v17373_v42 = vld [vmem:[#allocation24 + $0x28] sm:$0xff]  ;;  %v17391_v60 = vld [vmem:[#allocation24 + $0xb8] sm:$0xff] }
 0x96f   : > { %v10184_v43 = vadd.f32 %v10174_v50, %v9877_v19  ;;  %v17375_v50 = vld [vmem:[#allocation24 + $0x38] sm:$0xff]  ;;  %v17422_v36 = vld [vmem:[%s21094_s13 + $0xb0] sm:$0xff] }
 0x970   : > { %v10197_v55 = vadd.f32 %v10193_v15, %v10183_v41  ;;  %10429 = vmatpush.bf16.msrb.mxu2 %v17375_v50  ;;  %v17366_v41 = vld [vmem:[#allocation23] sm:$0xff] }
 0x971   : > { %v10198_v63 = vadd.f32 %v10194_v53, %v10184_v43  ;;  %v17390_v43 = vld [vmem:[#allocation24 + $0xb0] sm:$0xff] }
 0x972   : > { %v10205_v0 = vmax.f32 %v10197_v55, 0.0  ;;  %v17386_v55 = vld [vmem:[#allocation24 + $0x90] sm:$0xff] }
 0x973   : > { %v10137_v5 = vpop.f32.mrf.mxu3  ;;  %v10206_v49 = vmax.f32 %v10198_v63, 0.0  ;;  %v17369_v63 = vld [vmem:[#allocation24 + $0x8] sm:$0xff]  ;;  %v17420_v50 = vld [vmem:[%s21094_s13 + $0xa0] sm:$0xff] }
 0x974   : > { %v10138_v34 = vadd.f32 %v10137_v5, %v10118_v20  ;;  %v10175_v1 = vpop.f32.mrf.mxu2  ;;  %10430 = vmatpush.bf16.msrb.mxu2 %v17374_v61  ;;  %v17399_v5 = vld [vmem:[#allocation24 + $0xf8] sm:$0xff]  ;;  %v17403_v61 = vld [vmem:[%s21094_s13 + $0x18] sm:$0xff] }
 0x975   : > { %v10176_v54 = vadd.f32 %v10175_v1, %v10156_v26  ;;  %v10121_v59 = vpop.f32.mrf.mxu1  ;;  %v17387_v1 = vld [vmem:[#allocation24 + $0x98] sm:$0xff] }
 0x976   : > { %v10185_v6 = vadd.f32 %v10138_v34, %v9841_v45  ;;  %v10159_v17 = vpop.f32.mrf.mxu0  ;;  %v17389_v45 = vld [vmem:[#allocation24 + $0xa8] sm:$0xff]  ;;  %v17388_v34 = vld [vmem:[#allocation24 + $0xa0] sm:$0xff] }
 0x977   : > { %v10186_v62 = vadd.f32 %v10176_v54, %v9879_v33  ;;  %v17370_v33 = vld [vmem:[#allocation24 + $0x10] sm:$0xff] }
 0x978   : > { %v10199_v18 = vadd.f32 %v10193_v15, %v10185_v6  ;;  %10431 = vmatpush.bf16.msrb.mxu2 %v17373_v42  ;;  %v17382_v54 = vld [vmem:[#allocation24 + $0x70] sm:$0xff] }
 0x979   : > { %v10200_v7 = vadd.f32 %v10194_v53, %v10186_v62  ;;  %v17398_v6 = vld [vmem:[#allocation24 + $0xf0] sm:$0xff]  ;;  %v17381_v62 = vld [vmem:[#allocation24 + $0x68] sm:$0xff] }
 0x97a   : > { %v10207_v22 = vmax.f32 %v10199_v18, 0.0  ;;  %v17385_v18 = vld [vmem:[#allocation24 + $0x88] sm:$0xff] }
 0x97b   : > { %v10208_v9 = vmax.f32 %v10200_v7, 0.0  ;;  %v10140_v51 = vpop.f32.mrf.mxu3  ;;  %v17397_v7 = vld [vmem:[#allocation24 + $0xe8] sm:$0xff] }
 0x97c   : > { %v10178_v8 = vpop.f32.mrf.mxu2  ;;  %v10213_v10 = vpack.c.bf16 %v10207_v22, %v10205_v0  ;;  %v10141_v57 = vadd.f32 %v10140_v51, %v10121_v59  ;;  %10432 = vmatpush.bf16.msrb.mxu2 %v17372_v13  ;;  %v17368_v59 = vld [vmem:[#allocation24] sm:$0xff]  ;;  %v17378_v51 = vld [vmem:[#allocation24 + $0x50] sm:$0xff] }
 0x97d   : > { %v10214_v40 = vpack.c.bf16 %v10208_v9, %v10206_v49  ;;  %v10179_v52 = vadd.f32 %v10178_v8, %v10159_v17  ;;  %v10123_v14 = vpop.f32.mrf.mxu1  ;;  %v17380_v0 = vld [vmem:[#allocation24 + $0x60] sm:$0xff]  ;;  %v17379_v49 = vld [vmem:[#allocation24 + $0x58] sm:$0xff]  ;;  %v17394_v8 = vld [vmem:[#allocation24 + $0xd0] sm:$0xff] }
 0x97e   : > { %v10187_v46 = vadd.f32 %v10141_v57, %v9844_v56  ;;  %v10161_v39 = vpop.f32.mrf.mxu0  ;;  %v17384_v22 = vld [vmem:[#allocation24 + $0x80] sm:$0xff]  ;;  %v17395_v9 = vld [vmem:[#allocation24 + $0xd8] sm:$0xff]  ;;  %v17431_v56 = vld [vmem:[%s21094_s13 + $0xf8] sm:$0xff] }
 0x97f   : > { %v10188_v37 = vadd.f32 %v10179_v52, %v9882_v48  ;;  %v17396_v17 = vld [vmem:[#allocation24 + $0xe0] sm:$0xff]  ;;  %v17415_v52 = vld [vmem:[%s21094_s13 + $0x78] sm:$0xff]  ;;  %v17400_v13 = vld [vmem:[%s21094_s13] sm:$0xff] }
 0x980   : > { %v10201_v20 = vadd.f32 %v10193_v15, %v10187_v46  ;;  %v17392_v57 = vld [vmem:[#allocation24 + $0xc0] sm:$0xff] }
 0x981   : > { %v10202_v35 = vadd.f32 %v10194_v53, %v10188_v37  ;;  %v17414_v48 = vld [vmem:[%s21094_s13 + $0x70] sm:$0xff] }
 0x982   : > { %v10209_v44 = vmax.f32 %v10201_v20, 0.0  ;;  %v17430_v37 = vld [vmem:[%s21094_s13 + $0xf0] sm:$0xff]  ;;  %v17428_v20 = vld [vmem:[%s21094_s13 + $0xe0] sm:$0xff] }
 0x983   : > { %v10142_v2 = vpop.f32.mrf.mxu3  ;;  %v10210_v11 = vmax.f32 %v10202_v35, 0.0 }
 0x984   : > { %v10143_v38 = vadd.f32 %v10142_v2, %v10123_v14  ;;  %v10180_v28 = vpop.f32.mrf.mxu2  ;;  %v17405_v14 = vld [vmem:[%s21094_s13 + $0x28] sm:$0xff] }
 0x985   : > { %v10181_v58 = vadd.f32 %v10180_v28, %v10161_v39  ;;  %v17413_v2 = vld [vmem:[%s21094_s13 + $0x68] sm:$0xff]  ;;  %v17412_v28 = vld [vmem:[%s21094_s13 + $0x60] sm:$0xff] }
 0x986   : > { %v10189_v32 = vadd.f32 %v10143_v38, %v9846_v4  ;;  %v17421_v4 = vld [vmem:[%s21094_s13 + $0xa8] sm:$0xff]  ;;  %v17404_v38 = vld [vmem:[%s21094_s13 + $0x20] sm:$0xff] }
 0x987   : > { %v10190_v29 = vadd.f32 %v10181_v58, %v9884_v24  ;;  %v17429_v39 = vld [vmem:[%s21094_s13 + $0xe8] sm:$0xff] }
 0x988   : > { %v10203_v27 = vadd.f32 %v10193_v15, %v10189_v32  ;;  %v17383_v15 = vld [vmem:[#allocation24 + $0x78] sm:$0xff] }
 0x989   : > { %v10204_v25 = vadd.f32 %v10194_v53, %v10190_v29  ;;  %v17371_v53 = vld [vmem:[#allocation24 + $0x18] sm:$0xff] }
 0x98a   : > { %v10211_v21 = vmax.f32 %v10203_v27, 0.0  ;;  %10433 = vmatpush.bf16.msrb.mxu2 %v17371_v53  ;;  %v17411_v27 = vld [vmem:[%s21094_s13 + $0x58] sm:$0xff] }
 0x98b   : > { %v10212_v16 = vmax.f32 %v10204_v25, 0.0  ;;  %v17419_v25 = vld [vmem:[%s21094_s13 + $0x98] sm:$0xff] }
 0x98c   : > { %v10215_v26 = vpack.c.bf16 %v10211_v21, %v10209_v44  ;;  %v17427_v44 = vld [vmem:[%s21094_s13 + $0xd8] sm:$0xff] }
 0x98d   : > { %v10216_v19 = vpack.c.bf16 %v10212_v16, %v10210_v11  ;;  %v17402_v11 = vld [vmem:[%s21094_s13 + $0x10] sm:$0xff] }
 0x98e   : > { %10234 = vmatpush.bf16.msra.mxu1 %v10215_v26  ;;  %10273 = vmatpush.bf16.msra.mxu0 %v10215_v26  ;;  %v17410_v16 = vld [vmem:[%s21094_s13 + $0x50] sm:$0xff] }
 0x98f   : > { %10248 = vmatpush.bf16.msra.mxu3 %v10216_v19  ;;  %10434 = vmatpush.bf16.msrb.mxu2 %v17370_v33  ;;  %v17418_v26 = vld [vmem:[%s21094_s13 + $0x90] sm:$0xff] }
 0x990   : > { %v17446_v33 = vld [vmem:[%s21094_s13 + $0x170] sm:$0xff] }
 0x992   : > { %10235 = vmatpush.bf16.msra.mxu1 %v10213_v10  ;;  %10274 = vmatpush.bf16.msra.mxu0 %v10213_v10  ;;  %v17377_v10 = vld [vmem:[#allocation24 + $0x48] sm:$0xff] }
 0x993   : > { %10249 = vmatpush.bf16.msra.mxu3 %v10214_v40  ;;  %10435 = vmatpush.bf16.msrb.mxu2 %v17369_v63  ;;  %v17455_v63 = vld [vmem:[%s21094_s13 + $0x1b8] sm:$0xff] }
 0x995   : > { %15623 = vmatmul.msk.bf16.vlgmr.msra.gmra.mxu1 %vm10224_vm9, %v17366_v41  ;;  %15629 = vmatmul.msk.bf16.vlgmr.msra.gmra.mxu0 %vm10224_vm9, %v17367_v23 }
 0x996   : > { %10287 = vmatpush.bf16.msrb.mxu1 %v10216_v19  ;;  %10586 = vmatpush.bf16.msrb.mxu0 %v17391_v60  ;;  %v17426_v19 = vld [vmem:[%s21094_s13 + $0xd0] sm:$0xff]  ;;  %v17401_v60 = vld [vmem:[%s21094_s13 + $0x8] sm:$0xff] }
 0x997   : > { %15624 = vmatmul.msk.bf16.vlgmr.msra.gmra.mxu3 %vm10224_vm9, %v17366_v41  ;;  %10436 = vmatpush.bf16.msrb.mxu2 %v17368_v59  ;;  %v17438_v59 = vld [vmem:[%s21094_s13 + $0x130] sm:$0xff] }
 0x998   : > { %10443 = vmatpush.bf16.msrb.mxu3 %v17383_v15 }
 0x99a   : > { %10288 = vmatpush.bf16.msrb.mxu1 %v10214_v40  ;;  %10587 = vmatpush.bf16.msrb.mxu0 %v17390_v43  ;;  %v17393_v40 = vld [vmem:[#allocation24 + $0xc8] sm:$0xff] }
 0x99b   : > { %10706 = vmatpush.bf16.msra.mxu2 %v17415_v52  ;;  %v17451_v52 = vld [vmem:[%s21094_s13 + $0x198] sm:$0xff] }
 0x99c   : > { %10444 = vmatpush.bf16.msrb.mxu3 %v17382_v54  ;;  %v17408_v54 = vld [vmem:[%s21094_s13 + $0x40] sm:$0xff] }
 0x99e   : > { %10600 = vmatpush.bf16.msra.mxu1 %v17399_v5  ;;  %10588 = vmatpush.bf16.msrb.mxu0 %v17389_v45  ;;  %v17447_v5 = vld [vmem:[%s21094_s13 + $0x178] sm:$0xff]  ;;  %v17409_v45 = vld [vmem:[%s21094_s13 + $0x48] sm:$0xff] }
 0x99f   : > { %10707 = vmatpush.bf16.msra.mxu2 %v17414_v48  ;;  %v17450_v48 = vld [vmem:[%s21094_s13 + $0x190] sm:$0xff] }
 0x9a0   : > { %10445 = vmatpush.bf16.msrb.mxu3 %v17381_v62  ;;  %v17424_v62 = vld [vmem:[%s21094_s13 + $0xc0] sm:$0xff] }
 0x9a2   : > { %10589 = vmatpush.bf16.msrb.mxu0 %v17388_v34  ;;  %10601 = vmatpush.bf16.msra.mxu1 %v17398_v6  ;;  %v17417_v34 = vld [vmem:[%s21094_s13 + $0x88] sm:$0xff]  ;;  %v17439_v6 = vld [vmem:[%s21094_s13 + $0x138] sm:$0xff] }
 0x9a3   : > { %10708 = vmatpush.bf16.msra.mxu2 %v17413_v2  ;;  %v17432_v2 = vld [vmem:[%s21094_s13 + $0x100] sm:$0xff] }
 0x9a4   : > { %10446 = vmatpush.bf16.msrb.mxu3 %v17380_v0  ;;  %v17454_v0 = vld [vmem:[%s21094_s13 + $0x1b0] sm:$0xff] }
 0x9a5   : > { %15630 = vmatmul.msk.bf16.vlgmr.msrb.gmra.mxu1 %vm10224_vm9, %v17367_v23 }
 0x9a6   : > { %10590 = vmatpush.bf16.msrb.mxu0 %v17387_v1  ;;  %10602 = vmatpush.bf16.msra.mxu1 %v17397_v7  ;;  %v17425_v1 = vld [vmem:[%s21094_s13 + $0xc8] sm:$0xff]  ;;  %v17463_v7 = vld [vmem:[%s21094_s13 + $0x1f8] sm:$0xff] }
 0x9a7   : > { %10709 = vmatpush.bf16.msra.mxu2 %v17412_v28 }
 0x9a8   : > { %10447 = vmatpush.bf16.msrb.mxu3 %v17379_v49  ;;  %v17437_v49 = vld [vmem:[%s21094_s13 + $0x128] sm:$0xff] }
 0x9aa   : > { %10591 = vmatpush.bf16.msrb.mxu0 %v17386_v55  ;;  %10603 = vmatpush.bf16.msra.mxu1 %v17396_v17  ;;  %v17416_v55 = vld [vmem:[%s21094_s13 + $0x80] sm:$0xff]  ;;  %v17462_v17 = vld [vmem:[%s21094_s13 + $0x1f0] sm:$0xff] }
 0x9ab   : > { %10710 = vmatpush.bf16.msra.mxu2 %v17411_v27  ;;  %v17478_v27 = vld [vmem:[%s21094_s13 + $0x270] sm:$0xff] }
 0x9ac   : > { %10448 = vmatpush.bf16.msrb.mxu3 %v17378_v51  ;;  %v17443_v51 = vld [vmem:[%s21094_s13 + $0x158] sm:$0xff] }
 0x9ae   : > { %10592 = vmatpush.bf16.msrb.mxu0 %v17385_v18  ;;  %10604 = vmatpush.bf16.msra.mxu1 %v17395_v9  ;;  %v17445_v18 = vld [vmem:[%s21094_s13 + $0x168] sm:$0xff] }
 0x9af   : > { %10711 = vmatpush.bf16.msra.mxu2 %v17410_v16  ;;  %v17453_v9 = vld [vmem:[%s21094_s13 + $0x1a8] sm:$0xff] }
 0x9b0   : > { %10449 = vmatpush.bf16.msrb.mxu3 %v17377_v10  ;;  %v17436_v10 = vld [vmem:[%s21094_s13 + $0x120] sm:$0xff] }
 0x9b2   : > { %10593 = vmatpush.bf16.msrb.mxu0 %v17384_v22  ;;  %10605 = vmatpush.bf16.msra.mxu1 %v17394_v8  ;;  %v17444_v22 = vld [vmem:[%s21094_s13 + $0x160] sm:$0xff]  ;;  %v17461_v8 = vld [vmem:[%s21094_s13 + $0x1e8] sm:$0xff] }
 0x9b3   : > { %10712 = vmatpush.bf16.msra.mxu2 %v17409_v45 }
 0x9b4   : > { %10450 = vmatpush.bf16.msrb.mxu3 %v17376_v47  ;;  %v17442_v47 = vld [vmem:[%s21094_s13 + $0x150] sm:$0xff] }
 0x9b6   : > { %10606 = vmatpush.bf16.msra.mxu1 %v17393_v40  ;;  %10847 = vmatpush.bf16.msra.mxu0 %v17423_v3  ;;  %v17452_v40 = vld [vmem:[%s21094_s13 + $0x1a0] sm:$0xff]  ;;  %v17441_v3 = vld [vmem:[%s21094_s13 + $0x148] sm:$0xff] }
 0x9b7   : > { %10713 = vmatpush.bf16.msra.mxu2 %v17408_v54  ;;  %v17475_v54 = vld [vmem:[%s21094_s13 + $0x258] sm:$0xff] }
 0x9b8   : > { %10767 = vmatpush.bf16.msra.mxu3 %v17407_v31  ;;  %v17435_v31 = vld [vmem:[%s21094_s13 + $0x118] sm:$0xff] }
 0x9ba   : > { %10607 = vmatpush.bf16.msra.mxu1 %v17392_v57  ;;  %10848 = vmatpush.bf16.msra.mxu0 %v17422_v36  ;;  %v17460_v57 = vld [vmem:[%s21094_s13 + $0x1e0] sm:$0xff]  ;;  %v17433_v36 = vld [vmem:[%s21094_s13 + $0x108] sm:$0xff] }
 0x9bc   : > { %10768 = vmatpush.bf16.msra.mxu3 %v17406_v30  ;;  %v17434_v30 = vld [vmem:[%s21094_s13 + $0x110] sm:$0xff] }
 0x9be   : > { %10928 = vmatpush.bf16.msrb.mxu1 %v17431_v56  ;;  %10849 = vmatpush.bf16.msra.mxu0 %v17421_v4  ;;  %v17459_v56 = vld [vmem:[%s21094_s13 + $0x1d8] sm:$0xff]  ;;  %v17448_v4 = vld [vmem:[%s21094_s13 + $0x180] sm:$0xff] }
 0x9c0   : > { %10769 = vmatpush.bf16.msra.mxu3 %v17405_v14  ;;  %v17457_v14 = vld [vmem:[%s21094_s13 + $0x1c8] sm:$0xff] }
 0x9c2   : > { %10929 = vmatpush.bf16.msrb.mxu1 %v17430_v37  ;;  %10850 = vmatpush.bf16.msra.mxu0 %v17420_v50  ;;  %v17449_v37 = vld [vmem:[%s21094_s13 + $0x188] sm:$0xff] }
 0x9c4   : > { %10770 = vmatpush.bf16.msra.mxu3 %v17404_v38 }
 0x9c6   : > { %10930 = vmatpush.bf16.msrb.mxu1 %v17429_v39  ;;  %10851 = vmatpush.bf16.msra.mxu0 %v17419_v25  ;;  %v17456_v39 = vld [vmem:[%s21094_s13 + $0x1c0] sm:$0xff] }
 0x9c8   : > { %10771 = vmatpush.bf16.msra.mxu3 %v17403_v61 }
 0x9ca   : > { %10931 = vmatpush.bf16.msrb.mxu1 %v17428_v20  ;;  %10852 = vmatpush.bf16.msra.mxu0 %v17418_v26  ;;  %v17495_v26 = vld [vmem:[%s21094_s13 + $0x2f8] sm:$0xff] }
 0x9cc   : > { %10772 = vmatpush.bf16.msra.mxu3 %v17402_v11 }
 0x9ce   : > { %10932 = vmatpush.bf16.msrb.mxu1 %v17427_v44  ;;  %10853 = vmatpush.bf16.msra.mxu0 %v17417_v34  ;;  %v17471_v44 = vld [vmem:[%s21094_s13 + $0x238] sm:$0xff]  ;;  %v17469_v34 = vld [vmem:[%s21094_s13 + $0x228] sm:$0xff] }
 0x9d0   : > { %10773 = vmatpush.bf16.msra.mxu3 %v17401_v60 }
 0x9d2   : > { %10933 = vmatpush.bf16.msrb.mxu1 %v17426_v19  ;;  %10854 = vmatpush.bf16.msra.mxu0 %v17416_v55  ;;  %v17493_v55 = vld [vmem:[%s21094_s13 + $0x2e8] sm:$0xff] }
 0x9d4   : > { %10774 = vmatpush.bf16.msra.mxu3 %v17400_v13  ;;  %v17470_v13 = vld [vmem:[%s21094_s13 + $0x230] sm:$0xff] }
 0x9d6   : > { %10934 = vmatpush.bf16.msrb.mxu1 %v17425_v1  ;;  %v17485_v1 = vld [vmem:[%s21094_s13 + $0x2a8] sm:$0xff] }
 0x9da   : > { %10935 = vmatpush.bf16.msrb.mxu1 %v17424_v62  ;;  %v17468_v62 = vld [vmem:[%s21094_s13 + $0x220] sm:$0xff] }
 0xa12   : > { %v10237_v12 = vpop.f32.mrf.mxu1  ;;  %v10276_v46 = vpop.f32.mrf.mxu0 }
 0xa13   : > { %v10295_v32 = vmax.f32 %v10237_v12, %v10276_v46  ;;  %v17440_v12 = vld [vmem:[%s21094_s13 + $0x140] sm:$0xff]  ;;  %v17458_v46 = vld [vmem:[%s21094_s13 + $0x1d0] sm:$0xff] }
 0xa1a   : > { %v10239_v24 = vpop.f32.mrf.mxu1  ;;  %v10278_v58 = vpop.f32.mrf.mxu0 }
 0xa1b   : > { %v10297_v35 = vmax.f32 %v10239_v24, %v10278_v58  ;;  %v10251_v21 = vpop.f32.mrf.mxu3 }
 0xa1d   : > { %v10299_v29 = vpack.c.bf16 %v10297_v35, %v10295_v32  ;;  %v17479_v35 = vld [vmem:[%s21094_s13 + $0x278] sm:$0xff] }
 0xa1f   : > { %10437 = vmatmul.bf16.vlgmr.msrb.gmra.mxu2 %v10299_v29  ;;  %10594 = vmatmul.bf16.vlgmr.msrb.gmra.mxu0 %v10299_v29 }
 0xa20   : > { %11009 = vmatpush.bf16.msrb.mxu2 %v17439_v6  ;;  %11171 = vmatpush.bf16.msrb.mxu0 %v17455_v63 }
 0xa22   : > { %v10290_v42 = vpop.f32.mrf.mxu1 }
 0xa23   : > { %v10253_v41 = vpop.f32.mrf.mxu3  ;;  %v10296_v15 = vmax.f32 %v10251_v21, %v10290_v42  ;;  %v17487_v21 = vld [vmem:[%s21094_s13 + $0x2b8] sm:$0xff]  ;;  %v17477_v42 = vld [vmem:[%s21094_s13 + $0x268] sm:$0xff] }
 0xa24   : > { %11010 = vmatpush.bf16.msrb.mxu2 %v17438_v59  ;;  %11172 = vmatpush.bf16.msrb.mxu0 %v17454_v0  ;;  %v17492_v59 = vld [vmem:[%s21094_s13 + $0x2e0] sm:$0xff] }
 0xa28   : > { %11011 = vmatpush.bf16.msrb.mxu2 %v17437_v49  ;;  %11173 = vmatpush.bf16.msrb.mxu0 %v17453_v9 }
 0xa2a   : > { %v10292_v23 = vpop.f32.mrf.mxu1 }
 0xa2b   : > { %v10298_v43 = vmax.f32 %v10253_v41, %v10292_v23  ;;  %v17486_v41 = vld [vmem:[%s21094_s13 + $0x2b0] sm:$0xff] }
 0xa2c   : > { %11012 = vmatpush.bf16.msrb.mxu2 %v17436_v10  ;;  %11174 = vmatpush.bf16.msrb.mxu0 %v17452_v40 }
 0xa2d   : > { %v10300_v53 = vpack.c.bf16 %v10298_v43, %v10296_v15  ;;  %v17476_v43 = vld [vmem:[%s21094_s13 + $0x260] sm:$0xff] }
 0xa2f   : > { %10451 = vmatmul.bf16.vlgmr.msrb.gmra.mxu3 %v10300_v53  ;;  %10608 = vmatmul.bf16.vlgmr.msra.gmra.mxu1 %v10300_v53  ;;  %v17494_v53 = vld [vmem:[%s21094_s13 + $0x2f0] sm:$0xff] }
 0xa30   : > { %11090 = vmatpush.bf16.msrb.mxu3 %v17447_v5  ;;  %11252 = vmatpush.bf16.msra.mxu1 %v17463_v7  ;;  %v17474_v7 = vld [vmem:[%s21094_s13 + $0x250] sm:$0xff] }
 0xa31   : > { %11013 = vmatpush.bf16.msrb.mxu2 %v17435_v31  ;;  %11175 = vmatpush.bf16.msrb.mxu0 %v17451_v52  ;;  %v17472_v31 = vld [vmem:[%s21094_s13 + $0x240] sm:$0xff]  ;;  %v17490_v52 = vld [vmem:[%s21094_s13 + $0x2d0] sm:$0xff] }
 0xa34   : > { %11091 = vmatpush.bf16.msrb.mxu3 %v17446_v33  ;;  %11253 = vmatpush.bf16.msra.mxu1 %v17462_v17  ;;  %v17483_v17 = vld [vmem:[%s21094_s13 + $0x298] sm:$0xff] }
 0xa35   : > { %11014 = vmatpush.bf16.msrb.mxu2 %v17434_v30  ;;  %11176 = vmatpush.bf16.msrb.mxu0 %v17450_v48  ;;  %v17465_v30 = vld [vmem:[%s21094_s13 + $0x208] sm:$0xff] }
 0xa36   : > { %v17481_v48 = vld [vmem:[%s21094_s13 + $0x288] sm:$0xff] }
 0xa38   : > { %11092 = vmatpush.bf16.msrb.mxu3 %v17445_v18  ;;  %11254 = vmatpush.bf16.msra.mxu1 %v17461_v8  ;;  %v17484_v18 = vld [vmem:[%s21094_s13 + $0x2a0] sm:$0xff]  ;;  %v17491_v8 = vld [vmem:[%s21094_s13 + $0x2d8] sm:$0xff] }
 0xa39   : > { %11015 = vmatpush.bf16.msrb.mxu2 %v17433_v36  ;;  %11177 = vmatpush.bf16.msrb.mxu0 %v17449_v37  ;;  %v17510_v36 = vld [vmem:[%s21094_s13 + $0x370] sm:$0xff]  ;;  %v17464_v37 = vld [vmem:[%s21094_s13 + $0x200] sm:$0xff] }
 0xa3c   : > { %11093 = vmatpush.bf16.msrb.mxu3 %v17444_v22  ;;  %11255 = vmatpush.bf16.msra.mxu1 %v17460_v57  ;;  %v17467_v22 = vld [vmem:[%s21094_s13 + $0x218] sm:$0xff]  ;;  %v17482_v57 = vld [vmem:[%s21094_s13 + $0x290] sm:$0xff] }
 0xa3d   : > { %11016 = vmatpush.bf16.msrb.mxu2 %v17432_v2  ;;  %11178 = vmatpush.bf16.msrb.mxu0 %v17448_v4  ;;  %v17503_v2 = vld [vmem:[%s21094_s13 + $0x338] sm:$0xff] }
 0xa3e   : > { %v17519_v4 = vld [vmem:[%s21094_s13 + $0x3b8] sm:$0xff] }
 0xa40   : > { %11094 = vmatpush.bf16.msrb.mxu3 %v17443_v51  ;;  %11256 = vmatpush.bf16.msra.mxu1 %v17459_v56  ;;  %v17473_v51 = vld [vmem:[%s21094_s13 + $0x248] sm:$0xff]  ;;  %v17511_v56 = vld [vmem:[%s21094_s13 + $0x378] sm:$0xff] }
 0xa44   : > { %11095 = vmatpush.bf16.msrb.mxu3 %v17442_v47  ;;  %11257 = vmatpush.bf16.msra.mxu1 %v17458_v46  ;;  %v17466_v47 = vld [vmem:[%s21094_s13 + $0x210] sm:$0xff] }
 0xa48   : > { %11096 = vmatpush.bf16.msrb.mxu3 %v17441_v3  ;;  %11258 = vmatpush.bf16.msra.mxu1 %v17457_v14  ;;  %v17480_v14 = vld [vmem:[%s21094_s13 + $0x280] sm:$0xff] }
 0xa4c   : > { %11097 = vmatpush.bf16.msrb.mxu3 %v17440_v12  ;;  %11259 = vmatpush.bf16.msra.mxu1 %v17456_v39  ;;  %v17489_v12 = vld [vmem:[%s21094_s13 + $0x2c8] sm:$0xff]  ;;  %v17488_v39 = vld [vmem:[%s21094_s13 + $0x2c0] sm:$0xff] }
 0xa9c   : > { %v10595_v28 = vpop.f32.mrf.mxu0 }
 0xaa2   : > { %v10438_v24 = vpop.f32.mrf.mxu2 }
 0xaa4   : > { %v10597_v45 = vpop.f32.mrf.mxu0 }
 0xaaa   : > { %v10440_v23 = vpop.f32.mrf.mxu2 }
 0xaac   : > { %v10609_v38 = vpop.f32.mrf.mxu1 }
 0xaad   : > { %v10610_v50 = vadd.f32 %v10609_v38, %v10595_v28  ;;  %v17509_v38 = vld [vmem:[%s21094_s13 + $0x368] sm:$0xff]  ;;  %v17527_v28 = vld [vmem:[%s21094_s13 + $0x3f8] sm:$0xff] }
 0xab2   : > { %v10452_v58 = vpop.f32.mrf.mxu3 }
 0xab3   : > { %v10453_v20 = vadd.f32 %v10452_v58, %v10438_v24  ;;  %v17502_v24 = vld [vmem:[%s21094_s13 + $0x330] sm:$0xff] }
 0xab4   : > { %v10611_v15 = vpop.f32.mrf.mxu1  ;;  %v17518_v58 = vld [vmem:[%s21094_s13 + $0x3b0] sm:$0xff] }
 0xab5   : > { %v10614_v32 = vmax.f32 %v10453_v20, %v10610_v50  ;;  %v10612_v33 = vadd.f32 %v10611_v15, %v10597_v45  ;;  %v17508_v20 = vld [vmem:[%s21094_s13 + $0x360] sm:$0xff]  ;;  %v17522_v15 = vld [vmem:[%s21094_s13 + $0x3d0] sm:$0xff] }
 0xab7   : > { %v10616_v29 = vpack.c.bf16 %v10614_v32, %v10614_v32  ;;  %v17526_v32 = vld [vmem:[%s21094_s13 + $0x3f0] sm:$0xff] }
 0xab9   : > { %v10652_v61 = vunpack.c.l.b16 %v10616_v29  ;;  %10775 = vmatmul.bf16.vlgmr.msra.gmra.mxu3 %v10616_v29  ;;  %v17501_v29 = vld [vmem:[%s21094_s13 + $0x328] sm:$0xff] }
 0xaba   : > { %11417 = vmatpush.bf16.msra.mxu3 %v17479_v35  ;;  %v10454_v60 = vpop.f32.mrf.mxu3 }
 0xabb   : > { %v10653_v25 = vpack.c.b16 %v10652_v61, %v10652_v61  ;;  %v10455_v5 = vadd.f32 %v10454_v60, %v10440_v23  ;;  %v17517_v61 = vld [vmem:[%s21094_s13 + $0x3a8] sm:$0xff]  ;;  %v17523_v60 = vld [vmem:[%s21094_s13 + $0x3d8] sm:$0xff]  ;;  %v17504_v23 = vld [vmem:[%s21094_s13 + $0x340] sm:$0xff] }
 0xabd   : > { %v10655_v11 = vshrl.u32 %v10653_v25, 16  ;;  %v10797_v16 = vrot.slane %v10653_v25, 1  ;;  %v10615_v6 = vmax.f32 %v10455_v5, %v10612_v33  ;;  %v10959_v49 = vrot.slane %v10653_v25, 2  ;;  %v17521_v5 = vld [vmem:[%s21094_s13 + $0x3c8] sm:$0xff]  ;;  %v17520_v33 = vld [vmem:[%s21094_s13 + $0x3c0] sm:$0xff] }
 0xabe   : > { %11418 = vmatpush.bf16.msra.mxu3 %v17478_v27  ;;  %v11121_v9 = vrot.slane %v10653_v25, 3  ;;  %v17507_v27 = vld [vmem:[%s21094_s13 + $0x358] sm:$0xff]  ;;  %v17525_v25 = vld [vmem:[%s21094_s13 + $0x3e8] sm:$0xff] }
 0xabf   : > { %10714 = vmatmul.bf16.vlgmr.msra.gmra.mxu2 %v10655_v11  ;;  %10855 = vmatmul.bf16.vlgmr.msra.gmra.mxu0 %v10797_v16  ;;  %v10878_v19 = vrot.slane %v10655_v11, 1  ;;  %v11040_v63 = vrot.slane %v10655_v11, 2  ;;  %v10617_v0 = vpack.c.bf16 %v10615_v6, %v10615_v6  ;;  %v11202_v40 = vrot.slane %v10655_v11, 3  ;;  %v17506_v11 = vld [vmem:[%s21094_s13 + $0x350] sm:$0xff]  ;;  %v17524_v16 = vld [vmem:[%s21094_s13 + $0x3e0] sm:$0xff] }
 0xac0   : > { %11331 = vmatpush.bf16.msra.mxu2 %v17471_v44  ;;  %11498 = vmatpush.bf16.msra.mxu0 %v17487_v21  ;;  %v17500_v44 = vld [vmem:[%s21094_s13 + $0x320] sm:$0xff] }
 0xac1   : > { %10936 = vmatmul.bf16.vlgmr.msrb.gmra.mxu1 %v10878_v19  ;;  %v11363_v10 = vunpack.c.l.b16 %v10617_v0  ;;  %v17516_v21 = vld [vmem:[%s21094_s13 + $0x3a0] sm:$0xff]  ;;  %v17505_v19 = vld [vmem:[%s21094_s13 + $0x348] sm:$0xff] }
 0xac2   : > { %11419 = vmatpush.bf16.msra.mxu3 %v17477_v42  ;;  %11579 = vmatpush.bf16.msrb.mxu1 %v17495_v26  ;;  %v17499_v42 = vld [vmem:[%s21094_s13 + $0x318] sm:$0xff] }
 0xac3   : > { %v20923_v3 = vpack.c.b16 %v11363_v10, %v11363_v10  ;;  %v17515_v26 = vld [vmem:[%s21094_s13 + $0x398] sm:$0xff] }
 0xac4   : > { %11332 = vmatpush.bf16.msra.mxu2 %v17470_v13  ;;  %11499 = vmatpush.bf16.msra.mxu0 %v17486_v41  ;;  %v17498_v13 = vld [vmem:[%s21094_s13 + $0x310] sm:$0xff] }
 0xac5   : > { %v20938_v46 = vshrl.u32 %v20923_v3, 16  ;;  %v11448_v50 = vrot.slane %v20923_v3, 1  ;;  %v17514_v41 = vld [vmem:[%s21094_s13 + $0x390] sm:$0xff] }
 0xac6   : > { %11420 = vmatpush.bf16.msra.mxu3 %v17476_v43  ;;  %11580 = vmatpush.bf16.msrb.mxu1 %v17494_v53  ;;  %v17497_v43 = vld [vmem:[%s21094_s13 + $0x308] sm:$0xff] }
 0xac7   : > { %v11529_v35 = vrot.slane %v20938_v46, 1  ;;  %v17513_v53 = vld [vmem:[%s21094_s13 + $0x388] sm:$0xff]  ;;  %v11691_v45 = vrot.slane %v20938_v46, 2  ;;  %v11853_v6 = vrot.slane %v20938_v46, 3 }
 0xac8   : > { %11333 = vmatpush.bf16.msra.mxu2 %v17469_v34  ;;  %11500 = vmatpush.bf16.msra.mxu0 %v17485_v1  ;;  %v17496_v34 = vld [vmem:[%s21094_s13 + $0x300] sm:$0xff] }
 0xac9   : > { %11098 = vmatmul.bf16.vlgmr.msrb.gmra.mxu3 %v11040_v63  ;;  %v17512_v1 = vld [vmem:[%s21094_s13 + $0x380] sm:$0xff] }
 0xaca   : > { %11421 = vmatpush.bf16.msra.mxu3 %v17475_v54  ;;  %11581 = vmatpush.bf16.msrb.mxu1 %v17493_v55  ;;  %v11610_v54 = vrot.slane %v20923_v3, 2  ;;  %v11772_v55 = vrot.slane %v20923_v3, 3 }
 0xacc   : > { %11334 = vmatpush.bf16.msra.mxu2 %v17468_v62  ;;  %11501 = vmatpush.bf16.msra.mxu0 %v17484_v18 }
 0xace   : > { %11422 = vmatpush.bf16.msra.mxu3 %v17474_v7  ;;  %11582 = vmatpush.bf16.msrb.mxu1 %v17492_v59 }
 0xacf   : > { %11017 = vmatmul.bf16.vlgmr.msrb.gmra.mxu2 %v10959_v49  ;;  %11179 = vmatmul.bf16.vlgmr.msrb.gmra.mxu0 %v11121_v9 }
 0xad0   : > { %11335 = vmatpush.bf16.msra.mxu2 %v17467_v22  ;;  %11502 = vmatpush.bf16.msra.mxu0 %v17483_v17 }
 0xad1   : > { %11260 = vmatmul.bf16.vlgmr.msra.gmra.mxu1 %v11202_v40 }
 0xad2   : > { %11423 = vmatpush.bf16.msra.mxu3 %v17473_v51  ;;  %11583 = vmatpush.bf16.msrb.mxu1 %v17491_v8 }
 0xad4   : > { %11336 = vmatpush.bf16.msra.mxu2 %v17466_v47  ;;  %11503 = vmatpush.bf16.msra.mxu0 %v17482_v57 }
 0xad6   : > { %11424 = vmatpush.bf16.msra.mxu3 %v17472_v31  ;;  %11584 = vmatpush.bf16.msrb.mxu1 %v17490_v52 }
 0xad8   : > { %11337 = vmatpush.bf16.msra.mxu2 %v17465_v30  ;;  %11504 = vmatpush.bf16.msra.mxu0 %v17481_v48 }
 0xad9   : > { %11425 = vmatmul.bf16.vlgmr.msra.gmra.mxu3 %v20938_v46 }
 0xada   : > { %11741 = vmatpush.bf16.msrb.mxu3 %v17511_v56  ;;  %11585 = vmatpush.bf16.msrb.mxu1 %v17489_v12 }
 0xadc   : > { %11338 = vmatpush.bf16.msra.mxu2 %v17464_v37  ;;  %11505 = vmatpush.bf16.msra.mxu0 %v17480_v14 }
 0xade   : > { %11742 = vmatpush.bf16.msrb.mxu3 %v17510_v36  ;;  %11586 = vmatpush.bf16.msrb.mxu1 %v17488_v39 }
 0xadf   : > { %11339 = vmatmul.bf16.vlgmr.msra.gmra.mxu2 %v10617_v0  ;;  %11506 = vmatmul.bf16.vlgmr.msra.gmra.mxu0 %v11448_v50 }
 0xae0   : > { %11660 = vmatpush.bf16.msrb.mxu2 %v17503_v2  ;;  %11822 = vmatpush.bf16.msrb.mxu0 %v17519_v4 }
 0xae1   : > { %11587 = vmatmul.bf16.vlgmr.msrb.gmra.mxu1 %v11529_v35 }
 0xae2   : > { %11743 = vmatpush.bf16.msrb.mxu3 %v17509_v38  ;;  %11903 = vmatpush.bf16.msra.mxu1 %v17527_v28 }
 0xae4   : > { %11661 = vmatpush.bf16.msrb.mxu2 %v17502_v24  ;;  %11823 = vmatpush.bf16.msrb.mxu0 %v17518_v58 }
 0xae6   : > { %11744 = vmatpush.bf16.msrb.mxu3 %v17508_v20  ;;  %11904 = vmatpush.bf16.msra.mxu1 %v17526_v32 }
 0xae8   : > { %11662 = vmatpush.bf16.msrb.mxu2 %v17501_v29  ;;  %11824 = vmatpush.bf16.msrb.mxu0 %v17517_v61 }
 0xaea   : > { %11745 = vmatpush.bf16.msrb.mxu3 %v17507_v27  ;;  %11905 = vmatpush.bf16.msra.mxu1 %v17525_v25 }
 0xaec   : > { %11663 = vmatpush.bf16.msrb.mxu2 %v17500_v44  ;;  %11825 = vmatpush.bf16.msrb.mxu0 %v17516_v21 }
 0xaee   : > { %11746 = vmatpush.bf16.msrb.mxu3 %v17506_v11  ;;  %11906 = vmatpush.bf16.msra.mxu1 %v17524_v16  ;;  %v11917_v16 = vld [vmem:[#allocation26] sm:$0x1] }
 0xaf0   : > { %11664 = vmatpush.bf16.msrb.mxu2 %v17499_v42  ;;  %11826 = vmatpush.bf16.msrb.mxu0 %v17515_v26 }
 0xaf2   : > { %11747 = vmatpush.bf16.msrb.mxu3 %v17505_v19  ;;  %11907 = vmatpush.bf16.msra.mxu1 %v17523_v60 }
 0xaf4   : > { %11665 = vmatpush.bf16.msrb.mxu2 %v17498_v13  ;;  %11827 = vmatpush.bf16.msrb.mxu0 %v17514_v41 }
 0xaf6   : > { %11748 = vmatpush.bf16.msrb.mxu3 %v17504_v23  ;;  %11908 = vmatpush.bf16.msra.mxu1 %v17522_v15 }
 0xaf8   : > { %11666 = vmatpush.bf16.msrb.mxu2 %v17497_v43  ;;  %11828 = vmatpush.bf16.msrb.mxu0 %v17513_v53 }
 0xaf9   : > { %11749 = vmatmul.bf16.vlgmr.msrb.gmra.mxu3 %v11691_v45 }
 0xafa   : > { %11909 = vmatpush.bf16.msra.mxu1 %v17521_v5 }
 0xafc   : > { %11667 = vmatpush.bf16.msrb.mxu2 %v17496_v34  ;;  %11829 = vmatpush.bf16.msrb.mxu0 %v17512_v1 }
 0xafe   : > { %11910 = vmatpush.bf16.msra.mxu1 %v17520_v33 }
 0xaff   : > { %11668 = vmatmul.bf16.vlgmr.msrb.gmra.mxu2 %v11610_v54  ;;  %11830 = vmatmul.bf16.vlgmr.msrb.gmra.mxu0 %v11772_v55 }
 0xb01   : > { %11911 = vmatmul.bf16.vlgmr.msra.gmra.mxu1 %v11853_v6 }
 0xb3c   : > { %v10776_v63 = vpop.f32.mrf.mxu3  ;;  %v10856_v62 = vpop.f32.mrf.mxu0 }
 0xb3e   : > { %v10937_v18 = vpop.f32.mrf.mxu1 }
 0xb42   : > { %v10715_v7 = vpop.f32.mrf.mxu2 }
 0xb43   : > { %v10777_v57 = vadd.f32 %v10776_v63, %v10715_v7 }
 0xb44   : > { %v10778_v59 = vpop.f32.mrf.mxu3  ;;  %v10858_v0 = vpop.f32.mrf.mxu0 }
 0xb45   : > { %v10860_v56 = vadd.f32 %v10856_v62, %v10777_v57 }
 0xb46   : > { %v10939_v22 = vpop.f32.mrf.mxu1 }
 0xb47   : > { %v10941_v48 = vadd.f32 %v10937_v18, %v10860_v56 }
 0xb4a   : > { %v10717_v17 = vpop.f32.mrf.mxu2 }
 0xb4c   : > { %v11099_v49 = vpop.f32.mrf.mxu3  ;;  %v11180_v9 = vpop.f32.mrf.mxu0 }
 0xb4e   : > { %v11261_v51 = vpop.f32.mrf.mxu1 }
 0xb52   : > { %v11018_v8 = vpop.f32.mrf.mxu2 }
 0xb53   : > { %v11022_v46 = vadd.f32 %v11018_v8, %v10941_v48 }
 0xb54   : > { %v11101_v10 = vpop.f32.mrf.mxu3  ;;  %v11182_v40 = vpop.f32.mrf.mxu0 }
 0xb55   : > { %v11103_v2 = vadd.f32 %v11099_v49, %v11022_v46 }
 0xb56   : > { %v11263_v47 = vpop.f32.mrf.mxu1 }
 0xb57   : > { %v11184_v39 = vadd.f32 %v11180_v9, %v11103_v2 }
 0xb59   : > { %v11265_v38 = vadd.f32 %v11261_v51, %v11184_v39 }
 0xb5a   : > { %v11020_v31 = vpop.f32.mrf.mxu2 }
 0xb5c   : > { %v11426_v52 = vpop.f32.mrf.mxu3  ;;  %v11507_v3 = vpop.f32.mrf.mxu0 }
 0xb5e   : > { %v11588_v30 = vpop.f32.mrf.mxu1 }
 0xb62   : > { %v11340_v12 = vpop.f32.mrf.mxu2 }
 0xb63   : > { %v11344_v28 = vadd.f32 %v11340_v12, %v11265_v38 }
 0xb64   : > { %v11428_v36 = vpop.f32.mrf.mxu3  ;;  %v11509_v37 = vpop.f32.mrf.mxu0 }
 0xb65   : > { %v11430_v24 = vadd.f32 %v11426_v52, %v11344_v28 }
 0xb66   : > { %v11590_v14 = vpop.f32.mrf.mxu1 }
 0xb67   : > { %v11511_v20 = vadd.f32 %v11507_v3, %v11430_v24 }
 0xb69   : > { %v11592_v35 = vadd.f32 %v11588_v30, %v11511_v20 }
 0xb6a   : > { %v11342_v4 = vpop.f32.mrf.mxu2 }
 0xb7c   : > { %v11750_v58 = vpop.f32.mrf.mxu3  ;;  %v11831_v50 = vpop.f32.mrf.mxu0 }
 0xb7e   : > { %v11912_v32 = vpop.f32.mrf.mxu1 }
 0xb82   : > { %v11669_v29 = vpop.f32.mrf.mxu2 }
 0xb83   : > { %v11673_v61 = vadd.f32 %v11669_v29, %v11592_v35 }
 0xb84   : > { %v11752_v27 = vpop.f32.mrf.mxu3  ;;  %v11833_v25 = vpop.f32.mrf.mxu0 }
 0xb85   : > { %v11754_v44 = vadd.f32 %v11750_v58, %v11673_v61 }
 0xb86   : > { %v11914_v21 = vpop.f32.mrf.mxu1 }
 0xb87   : > { %v11835_v11 = vadd.f32 %v11831_v50, %v11754_v44 }
 0xb89   : > { %v11916_v42 = vadd.f32 %v11912_v32, %v11835_v11 }
 0xb8a   : > { %v11671_v26 = vpop.f32.mrf.mxu2 }
 0xb8b   : > { %v11918_v19 = vadd.f32 %v11917_v16, %v11916_v42 }
 0xb8d   : > { %11920 = vst.msk [vmem:[%s691_s21] sm:$0x1] %vm11919_vm10, %v11918_v19 }
 0xb8e   : > { %18136 = shalt.err (!%p18133_p8)
}
 0xb8f   : > { %17584 = dma.vmem_to_hbm [thread:$0]  (%p18339_p5), %s11933_s24, 16, %s11935_s29, %s11922_s30  }
 0xb90 PF: > { %s21249_s23 = sld [smem:[#allocation38_spill]] }
 0xb91   : > { %s21250_s17 = sld [smem:[#allocation36_spill]] }
 0xb96   : > { %p17656_p9 = scmp.ge.s32.totalorder %s21249_s23, 2 }
 0xb97   : > { %s11946_s4 = sand.u32 1, %s21250_s17  }
 0xb98   : > { %p17627_p10 = pnand %p17656_p9, %p18343_p6  ;;  %s11947_s18 = scalar_lea.sflag [#allocation8], %s11946_s4 }
 0xb9a   : > { %p17628_p11 = pneg %p17627_p10 }
 0xb9c   : > { %18182 = dma.done.wait (%p17628_p11), %s11947_s18, 16  }
 0xb9d   : > { %18184 = vsyncadd (%p17628_p11), %s11947_s18, 4294967280  ;;  %s21252_s21 = sld [smem:[#allocation39_spill]]  ;;  %s21255_s18 = smov %s18191_s19 }
 0xb9e   : > { %s21253_s27 = sld [smem:[#allocation37_spill]] }
 0xb9f   : > { %s21254_s20 = sld [smem:[#allocation40_spill]] }
 0xba3   : > { %p32_p12 = scmp.ge.s32.totalorder %s21252_s21, 4  }
 0xba4   : > { %s21256_s19 = smov %s21253_s27 }
 0xba5   :  { %34 = sbr.rel (!%p32_p12) target bundleno = 16 (0x10), region = 199 }
 0xbaa   :  { %11952 = vsyncpa [#allocation7], 1 }
 0xbab   :  { %11954 = vsyncpa [#allocation7 + $0x1], 1 }
 0xbac   :  { %11955 = vsyncpa [#allocation10], 1 }
 0xbad   :  { %11956 = vsyncpa [#allocation13], 1 }
 0xbae   :  { %11957 = vsyncpa [#allocation16], 1 }
 0xbaf   :  { %11958 = vsyncpa [#allocation19], 1 }
 0xbb0   :  { %11959 = vsyncpa [#allocation22], 1 }
 0xbb1   :  { %11960 = vsyncpa [#allocation25], 1 }
 0xbb2   :  { %11961 = vsyncpa [#allocation8], 1 }
 0xbb3   :  { %11963 = vsyncpa [#allocation8 + $0x1], 1 }

</bundles_post_ra>
